<compile_context>
chip_gen: v6e
topology: v6e:2x2x1
jax: 0.10.0
libtpu: 0.0.40
codegen_flags: <defaults>
</compile_context>

<pallas_src>
import math

import jax
import jax.numpy as jnp
import numpy as np
from jax.experimental import pallas as pl
from jax.experimental.pallas import tpu as pltpu


# -----------------------------------------------------------------------------
# Fused kernel: whole stacked bidirectional GRU, single invocation, layer-major.
#
# Ref layout (all full arrays in VMEM):
#   refs[0]              : x_flat     (T*B, D0)   rows ordered (t major, b minor)
#   refs[1 + 4*l + 0]    : W_x[l]     (D_l, 6H)   cols [r_f r_b | z_f z_b | n_f n_b]
#   refs[1 + 4*l + 1]    : W_h[l]     (2H, 6H)    rows [h_f | h_b], same col packing
#   refs[1 + 4*l + 2]    : b_fold[l]  (1, 6H)     b_ih + (b_hh for r/z gates)
#   refs[1 + 4*l + 3]    : b_hn[l]    (1, 2H)     hidden bias of n gates (fwd|bwd)
#   refs[1 + 4*L]        : out        (B, 2H)     last timestep, top layer
#   refs[2 + 4*L]        : gi scratch (T*B, 6H)   batched input-side gate preacts
#   refs[3 + 4*L]        : seq scratch(T*B, 2H)   layer output -> next layer input
# -----------------------------------------------------------------------------
def make_encoder_kernel(T, B, H, num_layers):
    H2, H4 = 2 * H, 4 * H

    def kernel(*refs):
        x_ref = refs[0]
        out_ref = refs[1 + 4 * num_layers]
        gi_ref = refs[2 + 4 * num_layers]
        seq_ref = refs[3 + 4 * num_layers]

        def run_layer(l, in_ref):
            base = 1 + 4 * l
            w_x_ref = refs[base]
            w_h_ref = refs[base + 1]
            b_fold_ref = refs[base + 2]
            b_hn_ref = refs[base + 3]

            # One batched (T*B, D_l) x (D_l, 6H) input-side matmul per layer.
            # Input bias + pre-summable r/z hidden bias folded in once here.
            gi_ref[...] = (
                jnp.dot(in_ref[...], w_x_ref[...],
                        preferred_element_type=jnp.float32,
                        precision=jax.lax.Precision.HIGHEST)
                + b_fold_ref[...])

            write_seq = (l != num_layers - 1)

            def step(t, h):
                row = t * B
                gi_t = gi_ref[pl.ds(row, B), :]                       # (B, 6H)
                # Hidden matmul stays on the recurrence; weight ref indexed at
                # its use site (VMEM-resident, re-load is ~free, no spills).
                gh = jnp.dot(h, w_h_ref[...],
                             preferred_element_type=jnp.float32,
                             precision=jax.lax.Precision.HIGHEST)     # (B, 6H)
                # Both directions fused: one sigmoid over (B,4H), one tanh over
                # (B,2H), single (B,2H) state update (no lane concat).
                rz = jax.nn.sigmoid(gi_t[:, :H4] + gh[:, :H4])
                r = rz[:, :H2]
                z = rz[:, H2:]
                n = jnp.tanh(gi_t[:, H4:] + r * (gh[:, H4:] + b_hn_ref[...]))
                h_new = (1.0 - z) * n + z * h
                if write_seq:
                    seq_ref[pl.ds(row, B), :] = h_new
                return h_new

            h0 = jnp.zeros((B, H2), jnp.float32)
            if T <= 16:
                h = h0
                for t in range(T):
                    h = step(t, h)
            else:
                h = jax.lax.fori_loop(0, T, step, h0, unroll=4)
            return h

        h = run_layer(0, x_ref)
        for l in range(1, num_layers):
            # seq scratch holds layer l-1's full output; its batched matmul is
            # consumed before layer l's recurrence overwrites it (ping-pong).
            h = run_layer(l, seq_ref)

        out_ref[...] = h

    return kernel


# -----------------------------------------------------------------------------
# Parameter construction (deterministic synthetic init, PyTorch-style uniform).
# Raw form per layer/direction (gate order r, z, n; pre-transposed per gate):
#   w_ih: (3, D_l, H)   w_hh: (3, H, H)   b_ih, b_hh: (3, 1, H)
# with D_0 = input_size, D_l = 2H for l > 0.
# -----------------------------------------------------------------------------
def init_params(key, input_size, hidden_size, num_layers):
    H = hidden_size
    bound = 1.0 / math.sqrt(H)
    params = []
    for layer in range(num_layers):
        d_in = input_size if layer == 0 else 2 * H
        layer_p = {}
        for direction in ("fwd", "bwd"):
            key, k1, k2, k3, k4 = jax.random.split(key, 5)
            w_ih = jax.random.uniform(k1, (3, d_in, H), jnp.float32, -bound, bound)
            w_hh = jax.random.uniform(k2, (3, H, H), jnp.float32, -bound, bound)
            b_ih = jax.random.uniform(k3, (3, 1, H), jnp.float32, -bound, bound)
            b_hh = jax.random.uniform(k4, (3, 1, H), jnp.float32, -bound, bound)
            layer_p[direction] = (w_ih, w_hh, b_ih, b_hh)
        params.append(layer_p)
    return params


def _interleave_gate_cols(w_f, w_b):
    """(3, D, H) x2 -> (D, 6H) columns [r_f r_b | z_f z_b | n_f n_b]."""
    parts = []
    for g in range(3):
        parts.append(w_f[g])
        parts.append(w_b[g])
    return jnp.concatenate(parts, axis=1)


def _interleave_bias(b_f, b_b):
    """(3, 1, H) x2 -> (1, 6H) same packing."""
    parts = []
    for g in range(3):
        parts.append(b_f[g])
        parts.append(b_b[g])
    return jnp.concatenate(parts, axis=1)


def pack_layer(layer_p, H):
    """Pack one layer's fwd/bwd params into the fused kernel layout."""
    w_ih_f, w_hh_f, b_ih_f, b_hh_f = layer_p["fwd"]
    w_ih_b, w_hh_b, b_ih_b, b_hh_b = layer_p["bwd"]

    # Shared-input matmul: gate-pair-interleaved columns.
    w_x = _interleave_gate_cols(w_ih_f, w_ih_b)          # (D_l, 6H)

    # Hidden matmul: rows [h_f | h_b]; per gate pair, fwd weights occupy the
    # top row block / fwd column, bwd weights the bottom row block / bwd column.
    w_h = jnp.zeros((2 * H, 6 * H), jnp.float32)
    for g in range(3):
        w_h = w_h.at[:H, 2 * g * H:(2 * g + 1) * H].set(w_hh_f[g])
        w_h = w_h.at[H:, (2 * g + 1) * H:(2 * g + 2) * H].set(w_hh_b[g])

    b_i = _interleave_bias(b_ih_f, b_ih_b)               # (1, 6H)
    b_h = _interleave_bias(b_hh_f, b_hh_b)               # (1, 6H)

    # r/z gates: input and hidden biases pre-summed and folded into the batched
    # input-side matmul. n gates keep b_hh separate (inside the r * (...) term).
    b_fold = b_i.at[:, :4 * H].add(b_h[:, :4 * H])       # (1, 6H)
    b_hn = b_h[:, 4 * H:]                                # (1, 2H)
    return w_x, w_h, b_fold, b_hn


def encoder_rnn_forward(input_tensor, seq_len, params, hidden_size):
    """Forward pass matching EncoderRNN.forward.

    input_tensor: (B, T, input_size) batch-first float32 (T >= seq_len).
    Returns: (1, B, 2*hidden_size) float32 — last-timestep top-layer output.
    """
    B = input_tensor.shape[0]
    H = hidden_size
    num_layers = len(params)
    T = seq_len
    d0 = input_tensor.shape[-1]

    # (B, T, D0) -> (T*B, D0), rows ordered t-major / b-minor.
    x = jnp.transpose(input_tensor[:, :T, :], (1, 0, 2)).reshape(T * B, d0)

    flat_inputs = [x]
    for layer_p in params:
        flat_inputs.extend(pack_layer(layer_p, H))

    # Rough all-resident VMEM budget (weights + activations + scratch).
    # TODO(synk): if this approaches the scoped VMEM limit (v7x: 64 MiB physical,
    # 32 MiB default scoped), stream per-layer weights via a grid axis +
    # pl.Buffered and set pltpu.CompilerParams(vmem_limit_bytes=...).
    vmem_bytes = sum(int(np.prod(a.shape)) * 4 for a in flat_inputs)
    vmem_bytes += (T * B * 6 * H + T * B * 2 * H + B * 2 * H) * 4
    assert vmem_bytes < 16 * 1024 * 1024, f"weights/activations too big: {vmem_bytes}"

    kernel = make_encoder_kernel(T, B, H, num_layers)
    vmem_spec = pl.BlockSpec(memory_space=pltpu.MemorySpace.VMEM)

    out = pl.pallas_call(
        kernel,
        out_shape=jax.ShapeDtypeStruct((B, 2 * H), jnp.float32),
        in_specs=[vmem_spec] * len(flat_inputs),
        out_specs=vmem_spec,
        scratch_shapes=[
            pltpu.VMEM((T * B, 6 * H), jnp.float32),   # batched gate preacts
            pltpu.VMEM((T * B, 2 * H), jnp.float32),   # per-layer output sequence
        ],
    )(*flat_inputs)

    return out[None, :, :]  # (1, B, 2H)


# -----------------------------------------------------------------------------
# Pure-JAX reference (same math, lax.scan) to sanity-check the kernel.
# -----------------------------------------------------------------------------
def gru_direction_ref(x_tbd, w_ih, w_hh, b_ih, b_hh):
    B = x_tbd.shape[1]
    H = w_hh.shape[-1]
    hi = jax.lax.Precision.HIGHEST

    def step(h, x_t):
        gi = [jnp.dot(x_t, w_ih[g], precision=hi) + b_ih[g] for g in range(3)]
        gh = [jnp.dot(h, w_hh[g], precision=hi) + b_hh[g] for g in range(3)]
        r = jax.nn.sigmoid(gi[0] + gh[0])
        z = jax.nn.sigmoid(gi[1] + gh[1])
        n = jnp.tanh(gi[2] + r * gh[2])
        h_new = (1.0 - z) * n + z * h
        return h_new, h_new

    h0 = jnp.zeros((B, H), jnp.float32)
    _, outs = jax.lax.scan(step, h0, x_tbd)
    return outs


def encoder_rnn_forward_ref(input_tensor, seq_len, params):
    x = jnp.transpose(input_tensor[:, :seq_len, :], (1, 0, 2))
    h_in = x
    for layer_p in params:
        out_f = gru_direction_ref(h_in, *layer_p["fwd"])
        out_b = gru_direction_ref(h_in, *layer_p["bwd"])
        h_in = jnp.concatenate([out_f, out_b], axis=-1)
    return h_in[seq_len - 1][None, :, :]


if __name__ == "__main__":
    B, T, INPUT_SIZE, HIDDEN_SIZE, NUM_LAYERS = 2, 8, 16, 32, 2
    SEQ_LEN = T

    key = jax.random.PRNGKey(0)
    key, kx = jax.random.split(key)
    input_tensor = jax.random.normal(kx, (B, T, INPUT_SIZE), jnp.float32)
    params = init_params(key, INPUT_SIZE, HIDDEN_SIZE, NUM_LAYERS)

    out = encoder_rnn_forward(input_tensor, SEQ_LEN, params, HIDDEN_SIZE)
    out = jax.block_until_ready(out)

    assert out.shape == (1, B, 2 * HIDDEN_SIZE), out.shape
    ref = jax.block_until_ready(encoder_rnn_forward_ref(input_tensor, SEQ_LEN, params))
    np.testing.assert_allclose(np.asarray(out), np.asarray(ref), rtol=5e-5, atol=5e-5)

    print("KERNEL_OK")
</pallas_src>

<mosaic_0001>
module attributes {stable_mosaic.version = 11 : i64} {
  func.func @kernel(%arg0: memref<16x16xf32, #tpu.memory_space<vmem>>, %arg1: memref<16x192xf32, #tpu.memory_space<vmem>>, %arg2: memref<64x192xf32, #tpu.memory_space<vmem>>, %arg3: memref<1x192xf32, #tpu.memory_space<vmem>>, %arg4: memref<1x64xf32, #tpu.memory_space<vmem>>, %arg5: memref<64x192xf32, #tpu.memory_space<vmem>>, %arg6: memref<64x192xf32, #tpu.memory_space<vmem>>, %arg7: memref<1x192xf32, #tpu.memory_space<vmem>>, %arg8: memref<1x64xf32, #tpu.memory_space<vmem>>, %arg9: memref<2x64xf32, #tpu.memory_space<vmem>>, %arg10: memref<16x192xf32, #tpu.memory_space<vmem>>, %arg11: memref<16x64xf32, #tpu.memory_space<vmem>>) attributes {dimension_semantics = [], scalar_prefetch = 0 : i64, scratch_operands = 2 : i64, tpu.core_type = #tpu.core_type<tc>} {
    %c0 = arith.constant 0 : index
    %c0_0 = arith.constant 0 : index
    %0 = vector.load %arg0[%c0, %c0_0] : memref<16x16xf32, #tpu.memory_space<vmem>>, vector<16x16xf32>
    %c0_1 = arith.constant 0 : index
    %c0_2 = arith.constant 0 : index
    %1 = vector.load %arg1[%c0_1, %c0_2] : memref<16x192xf32, #tpu.memory_space<vmem>>, vector<16x192xf32>
    %cst = arith.constant dense<0.000000e+00> : vector<16x192xf32>
    %2 = tpu.matmul %0, %1, %cst {dimension_numbers = #tpu.dot_dimension_numbers<[1], [0], [0], [1], [0, 0, 1, 1], [], []>, precision = #tpu.contract_precision<fp32>} : vector<16x16xf32>, vector<16x192xf32>, vector<16x192xf32> -> vector<16x192xf32>
    %c0_3 = arith.constant 0 : index
    %c0_4 = arith.constant 0 : index
    %3 = vector.load %arg3[%c0_3, %c0_4] : memref<1x192xf32, #tpu.memory_space<vmem>>, vector<1x192xf32>
    %4 = vector.broadcast %3 : vector<1x192xf32> to vector<16x192xf32>
    %5 = arith.addf %2, %4 : vector<16x192xf32>
    %c0_5 = arith.constant 0 : index
    %c0_6 = arith.constant 0 : index
    %6 = vector.load %arg10[%c0_5, %c0_6] : memref<16x192xf32, #tpu.memory_space<vmem>>, vector<16x192xf32>
    tpu.vector_store %arg10[%c0_5, %c0_6], %5 {strides = array<i32>} : memref<16x192xf32, #tpu.memory_space<vmem>>, vector<16x192xf32>,
    %cst_7 = arith.constant 0.000000e+00 : f32
    %7 = vector.broadcast %cst_7 : f32 to vector<2x64xf32>
    %c0_8 = arith.constant 0 : index
    %c0_9 = arith.constant 0 : index
    %8 = vector.load %arg10[%c0_8, %c0_9] : memref<16x192xf32, #tpu.memory_space<vmem>>, vector<2x192xf32>
    %c0_10 = arith.constant 0 : index
    %c0_11 = arith.constant 0 : index
    %9 = vector.load %arg2[%c0_10, %c0_11] : memref<64x192xf32, #tpu.memory_space<vmem>>, vector<64x192xf32>
    %cst_12 = arith.constant dense<0.000000e+00> : vector<2x192xf32>
    %10 = tpu.matmul %7, %9, %cst_12 {dimension_numbers = #tpu.dot_dimension_numbers<[1], [0], [0], [1], [0, 0, 1, 1], [], []>, precision = #tpu.contract_precision<fp32>} : vector<2x64xf32>, vector<64x192xf32>, vector<2x192xf32> -> vector<2x192xf32>
    %11 = vector.extract_strided_slice %8 {offsets = [0, 0], sizes = [2, 128], strides = [1, 1]} : vector<2x192xf32> to vector<2x128xf32>
    %12 = vector.extract_strided_slice %10 {offsets = [0, 0], sizes = [2, 128], strides = [1, 1]} : vector<2x192xf32> to vector<2x128xf32>
    %13 = arith.addf %11, %12 : vector<2x128xf32>
    %14 = arith.negf %13 : vector<2x128xf32>
    %15 = math.exp %14 : vector<2x128xf32>
    %cst_13 = arith.constant 1.000000e+00 : f32
    %16 = vector.broadcast %cst_13 : f32 to vector<2x128xf32>
    %17 = arith.addf %16, %15 : vector<2x128xf32>
    %18 = arith.divf %16, %17 : vector<2x128xf32>
    %19 = vector.extract_strided_slice %18 {offsets = [0, 0], sizes = [2, 64], strides = [1, 1]} : vector<2x128xf32> to vector<2x64xf32>
    %20 = vector.extract_strided_slice %18 {offsets = [0, 64], sizes = [2, 64], strides = [1, 1]} : vector<2x128xf32> to vector<2x64xf32>
    %21 = vector.extract_strided_slice %8 {offsets = [0, 128], sizes = [2, 64], strides = [1, 1]} : vector<2x192xf32> to vector<2x64xf32>
    %22 = vector.extract_strided_slice %10 {offsets = [0, 128], sizes = [2, 64], strides = [1, 1]} : vector<2x192xf32> to vector<2x64xf32>
    %c0_14 = arith.constant 0 : index
    %c0_15 = arith.constant 0 : index
    %23 = vector.load %arg4[%c0_14, %c0_15] : memref<1x64xf32, #tpu.memory_space<vmem>>, vector<1x64xf32>
    %24 = vector.broadcast %23 : vector<1x64xf32> to vector<2x64xf32>
    %25 = arith.addf %22, %24 : vector<2x64xf32>
    %26 = arith.mulf %19, %25 : vector<2x64xf32>
    %27 = arith.addf %21, %26 : vector<2x64xf32>
    %28 = math.tanh %27 : vector<2x64xf32>
    %cst_16 = arith.constant 1.000000e+00 : f32
    %29 = vector.broadcast %cst_16 : f32 to vector<2x64xf32>
    %30 = arith.subf %29, %20 : vector<2x64xf32>
    %31 = arith.mulf %30, %28 : vector<2x64xf32>
    %32 = arith.mulf %20, %7 : vector<2x64xf32>
    %33 = arith.addf %31, %32 : vector<2x64xf32>
    %c0_17 = arith.constant 0 : index
    %c0_18 = arith.constant 0 : index
    %34 = vector.load %arg11[%c0_17, %c0_18] : memref<16x64xf32, #tpu.memory_space<vmem>>, vector<2x64xf32>
    tpu.vector_store %arg11[%c0_17, %c0_18], %33 {strides = array<i32>} : memref<16x64xf32, #tpu.memory_space<vmem>>, vector<2x64xf32>,
    %c2 = arith.constant 2 : index
    %c0_19 = arith.constant 0 : index
    %35 = vector.load %arg10[%c2, %c0_19] : memref<16x192xf32, #tpu.memory_space<vmem>>, vector<2x192xf32>
    %c0_20 = arith.constant 0 : index
    %c0_21 = arith.constant 0 : index
    %36 = vector.load %arg2[%c0_20, %c0_21] : memref<64x192xf32, #tpu.memory_space<vmem>>, vector<64x192xf32>
    %cst_22 = arith.constant dense<0.000000e+00> : vector<2x192xf32>
    %37 = tpu.matmul %33, %36, %cst_22 {dimension_numbers = #tpu.dot_dimension_numbers<[1], [0], [0], [1], [0, 0, 1, 1], [], []>, precision = #tpu.contract_precision<fp32>} : vector<2x64xf32>, vector<64x192xf32>, vector<2x192xf32> -> vector<2x192xf32>
    %38 = vector.extract_strided_slice %35 {offsets = [0, 0], sizes = [2, 128], strides = [1, 1]} : vector<2x192xf32> to vector<2x128xf32>
    %39 = vector.extract_strided_slice %37 {offsets = [0, 0], sizes = [2, 128], strides = [1, 1]} : vector<2x192xf32> to vector<2x128xf32>
    %40 = arith.addf %38, %39 : vector<2x128xf32>
    %41 = arith.negf %40 : vector<2x128xf32>
    %42 = math.exp %41 : vector<2x128xf32>
    %cst_23 = arith.constant 1.000000e+00 : f32
    %43 = vector.broadcast %cst_23 : f32 to vector<2x128xf32>
    %44 = arith.addf %43, %42 : vector<2x128xf32>
    %45 = arith.divf %43, %44 : vector<2x128xf32>
    %46 = vector.extract_strided_slice %45 {offsets = [0, 0], sizes = [2, 64], strides = [1, 1]} : vector<2x128xf32> to vector<2x64xf32>
    %47 = vector.extract_strided_slice %45 {offsets = [0, 64], sizes = [2, 64], strides = [1, 1]} : vector<2x128xf32> to vector<2x64xf32>
    %48 = vector.extract_strided_slice %35 {offsets = [0, 128], sizes = [2, 64], strides = [1, 1]} : vector<2x192xf32> to vector<2x64xf32>
    %49 = vector.extract_strided_slice %37 {offsets = [0, 128], sizes = [2, 64], strides = [1, 1]} : vector<2x192xf32> to vector<2x64xf32>
    %c0_24 = arith.constant 0 : index
    %c0_25 = arith.constant 0 : index
    %50 = vector.load %arg4[%c0_24, %c0_25] : memref<1x64xf32, #tpu.memory_space<vmem>>, vector<1x64xf32>
    %51 = vector.broadcast %50 : vector<1x64xf32> to vector<2x64xf32>
    %52 = arith.addf %49, %51 : vector<2x64xf32>
    %53 = arith.mulf %46, %52 : vector<2x64xf32>
    %54 = arith.addf %48, %53 : vector<2x64xf32>
    %55 = math.tanh %54 : vector<2x64xf32>
    %cst_26 = arith.constant 1.000000e+00 : f32
    %56 = vector.broadcast %cst_26 : f32 to vector<2x64xf32>
    %57 = arith.subf %56, %47 : vector<2x64xf32>
    %58 = arith.mulf %57, %55 : vector<2x64xf32>
    %59 = arith.mulf %47, %33 : vector<2x64xf32>
    %60 = arith.addf %58, %59 : vector<2x64xf32>
    %c2_27 = arith.constant 2 : index
    %c0_28 = arith.constant 0 : index
    %61 = vector.load %arg11[%c2_27, %c0_28] : memref<16x64xf32, #tpu.memory_space<vmem>>, vector<2x64xf32>
    tpu.vector_store %arg11[%c2_27, %c0_28], %60 {strides = array<i32>} : memref<16x64xf32, #tpu.memory_space<vmem>>, vector<2x64xf32>,
    %c4 = arith.constant 4 : index
    %c0_29 = arith.constant 0 : index
    %62 = vector.load %arg10[%c4, %c0_29] : memref<16x192xf32, #tpu.memory_space<vmem>>, vector<2x192xf32>
    %c0_30 = arith.constant 0 : index
    %c0_31 = arith.constant 0 : index
    %63 = vector.load %arg2[%c0_30, %c0_31] : memref<64x192xf32, #tpu.memory_space<vmem>>, vector<64x192xf32>
    %cst_32 = arith.constant dense<0.000000e+00> : vector<2x192xf32>
    %64 = tpu.matmul %60, %63, %cst_32 {dimension_numbers = #tpu.dot_dimension_numbers<[1], [0], [0], [1], [0, 0, 1, 1], [], []>, precision = #tpu.contract_precision<fp32>} : vector<2x64xf32>, vector<64x192xf32>, vector<2x192xf32> -> vector<2x192xf32>
    %65 = vector.extract_strided_slice %62 {offsets = [0, 0], sizes = [2, 128], strides = [1, 1]} : vector<2x192xf32> to vector<2x128xf32>
    %66 = vector.extract_strided_slice %64 {offsets = [0, 0], sizes = [2, 128], strides = [1, 1]} : vector<2x192xf32> to vector<2x128xf32>
    %67 = arith.addf %65, %66 : vector<2x128xf32>
    %68 = arith.negf %67 : vector<2x128xf32>
    %69 = math.exp %68 : vector<2x128xf32>
    %cst_33 = arith.constant 1.000000e+00 : f32
    %70 = vector.broadcast %cst_33 : f32 to vector<2x128xf32>
    %71 = arith.addf %70, %69 : vector<2x128xf32>
    %72 = arith.divf %70, %71 : vector<2x128xf32>
    %73 = vector.extract_strided_slice %72 {offsets = [0, 0], sizes = [2, 64], strides = [1, 1]} : vector<2x128xf32> to vector<2x64xf32>
    %74 = vector.extract_strided_slice %72 {offsets = [0, 64], sizes = [2, 64], strides = [1, 1]} : vector<2x128xf32> to vector<2x64xf32>
    %75 = vector.extract_strided_slice %62 {offsets = [0, 128], sizes = [2, 64], strides = [1, 1]} : vector<2x192xf32> to vector<2x64xf32>
    %76 = vector.extract_strided_slice %64 {offsets = [0, 128], sizes = [2, 64], strides = [1, 1]} : vector<2x192xf32> to vector<2x64xf32>
    %c0_34 = arith.constant 0 : index
    %c0_35 = arith.constant 0 : index
    %77 = vector.load %arg4[%c0_34, %c0_35] : memref<1x64xf32, #tpu.memory_space<vmem>>, vector<1x64xf32>
    %78 = vector.broadcast %77 : vector<1x64xf32> to vector<2x64xf32>
    %79 = arith.addf %76, %78 : vector<2x64xf32>
    %80 = arith.mulf %73, %79 : vector<2x64xf32>
    %81 = arith.addf %75, %80 : vector<2x64xf32>
    %82 = math.tanh %81 : vector<2x64xf32>
    %cst_36 = arith.constant 1.000000e+00 : f32
    %83 = vector.broadcast %cst_36 : f32 to vector<2x64xf32>
    %84 = arith.subf %83, %74 : vector<2x64xf32>
    %85 = arith.mulf %84, %82 : vector<2x64xf32>
    %86 = arith.mulf %74, %60 : vector<2x64xf32>
    %87 = arith.addf %85, %86 : vector<2x64xf32>
    %c4_37 = arith.constant 4 : index
    %c0_38 = arith.constant 0 : index
    %88 = vector.load %arg11[%c4_37, %c0_38] : memref<16x64xf32, #tpu.memory_space<vmem>>, vector<2x64xf32>
    tpu.vector_store %arg11[%c4_37, %c0_38], %87 {strides = array<i32>} : memref<16x64xf32, #tpu.memory_space<vmem>>, vector<2x64xf32>,
    %c6 = arith.constant 6 : index
    %c0_39 = arith.constant 0 : index
    %89 = vector.load %arg10[%c6, %c0_39] : memref<16x192xf32, #tpu.memory_space<vmem>>, vector<2x192xf32>
    %c0_40 = arith.constant 0 : index
    %c0_41 = arith.constant 0 : index
    %90 = vector.load %arg2[%c0_40, %c0_41] : memref<64x192xf32, #tpu.memory_space<vmem>>, vector<64x192xf32>
    %cst_42 = arith.constant dense<0.000000e+00> : vector<2x192xf32>
    %91 = tpu.matmul %87, %90, %cst_42 {dimension_numbers = #tpu.dot_dimension_numbers<[1], [0], [0], [1], [0, 0, 1, 1], [], []>, precision = #tpu.contract_precision<fp32>} : vector<2x64xf32>, vector<64x192xf32>, vector<2x192xf32> -> vector<2x192xf32>
    %92 = vector.extract_strided_slice %89 {offsets = [0, 0], sizes = [2, 128], strides = [1, 1]} : vector<2x192xf32> to vector<2x128xf32>
    %93 = vector.extract_strided_slice %91 {offsets = [0, 0], sizes = [2, 128], strides = [1, 1]} : vector<2x192xf32> to vector<2x128xf32>
    %94 = arith.addf %92, %93 : vector<2x128xf32>
    %95 = arith.negf %94 : vector<2x128xf32>
    %96 = math.exp %95 : vector<2x128xf32>
    %cst_43 = arith.constant 1.000000e+00 : f32
    %97 = vector.broadcast %cst_43 : f32 to vector<2x128xf32>
    %98 = arith.addf %97, %96 : vector<2x128xf32>
    %99 = arith.divf %97, %98 : vector<2x128xf32>
    %100 = vector.extract_strided_slice %99 {offsets = [0, 0], sizes = [2, 64], strides = [1, 1]} : vector<2x128xf32> to vector<2x64xf32>
    %101 = vector.extract_strided_slice %99 {offsets = [0, 64], sizes = [2, 64], strides = [1, 1]} : vector<2x128xf32> to vector<2x64xf32>
    %102 = vector.extract_strided_slice %89 {offsets = [0, 128], sizes = [2, 64], strides = [1, 1]} : vector<2x192xf32> to vector<2x64xf32>
    %103 = vector.extract_strided_slice %91 {offsets = [0, 128], sizes = [2, 64], strides = [1, 1]} : vector<2x192xf32> to vector<2x64xf32>
    %c0_44 = arith.constant 0 : index
    %c0_45 = arith.constant 0 : index
    %104 = vector.load %arg4[%c0_44, %c0_45] : memref<1x64xf32, #tpu.memory_space<vmem>>, vector<1x64xf32>
    %105 = vector.broadcast %104 : vector<1x64xf32> to vector<2x64xf32>
    %106 = arith.addf %103, %105 : vector<2x64xf32>
    %107 = arith.mulf %100, %106 : vector<2x64xf32>
    %108 = arith.addf %102, %107 : vector<2x64xf32>
    %109 = math.tanh %108 : vector<2x64xf32>
    %cst_46 = arith.constant 1.000000e+00 : f32
    %110 = vector.broadcast %cst_46 : f32 to vector<2x64xf32>
    %111 = arith.subf %110, %101 : vector<2x64xf32>
    %112 = arith.mulf %111, %109 : vector<2x64xf32>
    %113 = arith.mulf %101, %87 : vector<2x64xf32>
    %114 = arith.addf %112, %113 : vector<2x64xf32>
    %c6_47 = arith.constant 6 : index
    %c0_48 = arith.constant 0 : index
    %115 = vector.load %arg11[%c6_47, %c0_48] : memref<16x64xf32, #tpu.memory_space<vmem>>, vector<2x64xf32>
    tpu.vector_store %arg11[%c6_47, %c0_48], %114 {strides = array<i32>} : memref<16x64xf32, #tpu.memory_space<vmem>>, vector<2x64xf32>,
    %c8 = arith.constant 8 : index
    %c0_49 = arith.constant 0 : index
    %116 = vector.load %arg10[%c8, %c0_49] : memref<16x192xf32, #tpu.memory_space<vmem>>, vector<2x192xf32>
    %c0_50 = arith.constant 0 : index
    %c0_51 = arith.constant 0 : index
    %117 = vector.load %arg2[%c0_50, %c0_51] : memref<64x192xf32, #tpu.memory_space<vmem>>, vector<64x192xf32>
    %cst_52 = arith.constant dense<0.000000e+00> : vector<2x192xf32>
    %118 = tpu.matmul %114, %117, %cst_52 {dimension_numbers = #tpu.dot_dimension_numbers<[1], [0], [0], [1], [0, 0, 1, 1], [], []>, precision = #tpu.contract_precision<fp32>} : vector<2x64xf32>, vector<64x192xf32>, vector<2x192xf32> -> vector<2x192xf32>
    %119 = vector.extract_strided_slice %116 {offsets = [0, 0], sizes = [2, 128], strides = [1, 1]} : vector<2x192xf32> to vector<2x128xf32>
    %120 = vector.extract_strided_slice %118 {offsets = [0, 0], sizes = [2, 128], strides = [1, 1]} : vector<2x192xf32> to vector<2x128xf32>
    %121 = arith.addf %119, %120 : vector<2x128xf32>
    %122 = arith.negf %121 : vector<2x128xf32>
    %123 = math.exp %122 : vector<2x128xf32>
    %cst_53 = arith.constant 1.000000e+00 : f32
    %124 = vector.broadcast %cst_53 : f32 to vector<2x128xf32>
    %125 = arith.addf %124, %123 : vector<2x128xf32>
    %126 = arith.divf %124, %125 : vector<2x128xf32>
    %127 = vector.extract_strided_slice %126 {offsets = [0, 0], sizes = [2, 64], strides = [1, 1]} : vector<2x128xf32> to vector<2x64xf32>
    %128 = vector.extract_strided_slice %126 {offsets = [0, 64], sizes = [2, 64], strides = [1, 1]} : vector<2x128xf32> to vector<2x64xf32>
    %129 = vector.extract_strided_slice %116 {offsets = [0, 128], sizes = [2, 64], strides = [1, 1]} : vector<2x192xf32> to vector<2x64xf32>
    %130 = vector.extract_strided_slice %118 {offsets = [0, 128], sizes = [2, 64], strides = [1, 1]} : vector<2x192xf32> to vector<2x64xf32>
    %c0_54 = arith.constant 0 : index
    %c0_55 = arith.constant 0 : index
    %131 = vector.load %arg4[%c0_54, %c0_55] : memref<1x64xf32, #tpu.memory_space<vmem>>, vector<1x64xf32>
    %132 = vector.broadcast %131 : vector<1x64xf32> to vector<2x64xf32>
    %133 = arith.addf %130, %132 : vector<2x64xf32>
    %134 = arith.mulf %127, %133 : vector<2x64xf32>
    %135 = arith.addf %129, %134 : vector<2x64xf32>
    %136 = math.tanh %135 : vector<2x64xf32>
    %cst_56 = arith.constant 1.000000e+00 : f32
    %137 = vector.broadcast %cst_56 : f32 to vector<2x64xf32>
    %138 = arith.subf %137, %128 : vector<2x64xf32>
    %139 = arith.mulf %138, %136 : vector<2x64xf32>
    %140 = arith.mulf %128, %114 : vector<2x64xf32>
    %141 = arith.addf %139, %140 : vector<2x64xf32>
    %c8_57 = arith.constant 8 : index
    %c0_58 = arith.constant 0 : index
    %142 = vector.load %arg11[%c8_57, %c0_58] : memref<16x64xf32, #tpu.memory_space<vmem>>, vector<2x64xf32>
    tpu.vector_store %arg11[%c8_57, %c0_58], %141 {strides = array<i32>} : memref<16x64xf32, #tpu.memory_space<vmem>>, vector<2x64xf32>,
    %c10 = arith.constant 10 : index
    %c0_59 = arith.constant 0 : index
    %143 = vector.load %arg10[%c10, %c0_59] : memref<16x192xf32, #tpu.memory_space<vmem>>, vector<2x192xf32>
    %c0_60 = arith.constant 0 : index
    %c0_61 = arith.constant 0 : index
    %144 = vector.load %arg2[%c0_60, %c0_61] : memref<64x192xf32, #tpu.memory_space<vmem>>, vector<64x192xf32>
    %cst_62 = arith.constant dense<0.000000e+00> : vector<2x192xf32>
    %145 = tpu.matmul %141, %144, %cst_62 {dimension_numbers = #tpu.dot_dimension_numbers<[1], [0], [0], [1], [0, 0, 1, 1], [], []>, precision = #tpu.contract_precision<fp32>} : vector<2x64xf32>, vector<64x192xf32>, vector<2x192xf32> -> vector<2x192xf32>
    %146 = vector.extract_strided_slice %143 {offsets = [0, 0], sizes = [2, 128], strides = [1, 1]} : vector<2x192xf32> to vector<2x128xf32>
    %147 = vector.extract_strided_slice %145 {offsets = [0, 0], sizes = [2, 128], strides = [1, 1]} : vector<2x192xf32> to vector<2x128xf32>
    %148 = arith.addf %146, %147 : vector<2x128xf32>
    %149 = arith.negf %148 : vector<2x128xf32>
    %150 = math.exp %149 : vector<2x128xf32>
    %cst_63 = arith.constant 1.000000e+00 : f32
    %151 = vector.broadcast %cst_63 : f32 to vector<2x128xf32>
    %152 = arith.addf %151, %150 : vector<2x128xf32>
    %153 = arith.divf %151, %152 : vector<2x128xf32>
    %154 = vector.extract_strided_slice %153 {offsets = [0, 0], sizes = [2, 64], strides = [1, 1]} : vector<2x128xf32> to vector<2x64xf32>
    %155 = vector.extract_strided_slice %153 {offsets = [0, 64], sizes = [2, 64], strides = [1, 1]} : vector<2x128xf32> to vector<2x64xf32>
    %156 = vector.extract_strided_slice %143 {offsets = [0, 128], sizes = [2, 64], strides = [1, 1]} : vector<2x192xf32> to vector<2x64xf32>
    %157 = vector.extract_strided_slice %145 {offsets = [0, 128], sizes = [2, 64], strides = [1, 1]} : vector<2x192xf32> to vector<2x64xf32>
    %c0_64 = arith.constant 0 : index
    %c0_65 = arith.constant 0 : index
    %158 = vector.load %arg4[%c0_64, %c0_65] : memref<1x64xf32, #tpu.memory_space<vmem>>, vector<1x64xf32>
    %159 = vector.broadcast %158 : vector<1x64xf32> to vector<2x64xf32>
    %160 = arith.addf %157, %159 : vector<2x64xf32>
    %161 = arith.mulf %154, %160 : vector<2x64xf32>
    %162 = arith.addf %156, %161 : vector<2x64xf32>
    %163 = math.tanh %162 : vector<2x64xf32>
    %cst_66 = arith.constant 1.000000e+00 : f32
    %164 = vector.broadcast %cst_66 : f32 to vector<2x64xf32>
    %165 = arith.subf %164, %155 : vector<2x64xf32>
    %166 = arith.mulf %165, %163 : vector<2x64xf32>
    %167 = arith.mulf %155, %141 : vector<2x64xf32>
    %168 = arith.addf %166, %167 : vector<2x64xf32>
    %c10_67 = arith.constant 10 : index
    %c0_68 = arith.constant 0 : index
    %169 = vector.load %arg11[%c10_67, %c0_68] : memref<16x64xf32, #tpu.memory_space<vmem>>, vector<2x64xf32>
    tpu.vector_store %arg11[%c10_67, %c0_68], %168 {strides = array<i32>} : memref<16x64xf32, #tpu.memory_space<vmem>>, vector<2x64xf32>,
    %c12 = arith.constant 12 : index
    %c0_69 = arith.constant 0 : index
    %170 = vector.load %arg10[%c12, %c0_69] : memref<16x192xf32, #tpu.memory_space<vmem>>, vector<2x192xf32>
    %c0_70 = arith.constant 0 : index
    %c0_71 = arith.constant 0 : index
    %171 = vector.load %arg2[%c0_70, %c0_71] : memref<64x192xf32, #tpu.memory_space<vmem>>, vector<64x192xf32>
    %cst_72 = arith.constant dense<0.000000e+00> : vector<2x192xf32>
    %172 = tpu.matmul %168, %171, %cst_72 {dimension_numbers = #tpu.dot_dimension_numbers<[1], [0], [0], [1], [0, 0, 1, 1], [], []>, precision = #tpu.contract_precision<fp32>} : vector<2x64xf32>, vector<64x192xf32>, vector<2x192xf32> -> vector<2x192xf32>
    %173 = vector.extract_strided_slice %170 {offsets = [0, 0], sizes = [2, 128], strides = [1, 1]} : vector<2x192xf32> to vector<2x128xf32>
    %174 = vector.extract_strided_slice %172 {offsets = [0, 0], sizes = [2, 128], strides = [1, 1]} : vector<2x192xf32> to vector<2x128xf32>
    %175 = arith.addf %173, %174 : vector<2x128xf32>
    %176 = arith.negf %175 : vector<2x128xf32>
    %177 = math.exp %176 : vector<2x128xf32>
    %cst_73 = arith.constant 1.000000e+00 : f32
    %178 = vector.broadcast %cst_73 : f32 to vector<2x128xf32>
    %179 = arith.addf %178, %177 : vector<2x128xf32>
    %180 = arith.divf %178, %179 : vector<2x128xf32>
    %181 = vector.extract_strided_slice %180 {offsets = [0, 0], sizes = [2, 64], strides = [1, 1]} : vector<2x128xf32> to vector<2x64xf32>
    %182 = vector.extract_strided_slice %180 {offsets = [0, 64], sizes = [2, 64], strides = [1, 1]} : vector<2x128xf32> to vector<2x64xf32>
    %183 = vector.extract_strided_slice %170 {offsets = [0, 128], sizes = [2, 64], strides = [1, 1]} : vector<2x192xf32> to vector<2x64xf32>
    %184 = vector.extract_strided_slice %172 {offsets = [0, 128], sizes = [2, 64], strides = [1, 1]} : vector<2x192xf32> to vector<2x64xf32>
    %c0_74 = arith.constant 0 : index
    %c0_75 = arith.constant 0 : index
    %185 = vector.load %arg4[%c0_74, %c0_75] : memref<1x64xf32, #tpu.memory_space<vmem>>, vector<1x64xf32>
    %186 = vector.broadcast %185 : vector<1x64xf32> to vector<2x64xf32>
    %187 = arith.addf %184, %186 : vector<2x64xf32>
    %188 = arith.mulf %181, %187 : vector<2x64xf32>
    %189 = arith.addf %183, %188 : vector<2x64xf32>
    %190 = math.tanh %189 : vector<2x64xf32>
    %cst_76 = arith.constant 1.000000e+00 : f32
    %191 = vector.broadcast %cst_76 : f32 to vector<2x64xf32>
    %192 = arith.subf %191, %182 : vector<2x64xf32>
    %193 = arith.mulf %192, %190 : vector<2x64xf32>
    %194 = arith.mulf %182, %168 : vector<2x64xf32>
    %195 = arith.addf %193, %194 : vector<2x64xf32>
    %c12_77 = arith.constant 12 : index
    %c0_78 = arith.constant 0 : index
    %196 = vector.load %arg11[%c12_77, %c0_78] : memref<16x64xf32, #tpu.memory_space<vmem>>, vector<2x64xf32>
    tpu.vector_store %arg11[%c12_77, %c0_78], %195 {strides = array<i32>} : memref<16x64xf32, #tpu.memory_space<vmem>>, vector<2x64xf32>,
    %c14 = arith.constant 14 : index
    %c0_79 = arith.constant 0 : index
    %197 = vector.load %arg10[%c14, %c0_79] : memref<16x192xf32, #tpu.memory_space<vmem>>, vector<2x192xf32>
    %c0_80 = arith.constant 0 : index
    %c0_81 = arith.constant 0 : index
    %198 = vector.load %arg2[%c0_80, %c0_81] : memref<64x192xf32, #tpu.memory_space<vmem>>, vector<64x192xf32>
    %cst_82 = arith.constant dense<0.000000e+00> : vector<2x192xf32>
    %199 = tpu.matmul %195, %198, %cst_82 {dimension_numbers = #tpu.dot_dimension_numbers<[1], [0], [0], [1], [0, 0, 1, 1], [], []>, precision = #tpu.contract_precision<fp32>} : vector<2x64xf32>, vector<64x192xf32>, vector<2x192xf32> -> vector<2x192xf32>
    %200 = vector.extract_strided_slice %197 {offsets = [0, 0], sizes = [2, 128], strides = [1, 1]} : vector<2x192xf32> to vector<2x128xf32>
    %201 = vector.extract_strided_slice %199 {offsets = [0, 0], sizes = [2, 128], strides = [1, 1]} : vector<2x192xf32> to vector<2x128xf32>
    %202 = arith.addf %200, %201 : vector<2x128xf32>
    %203 = arith.negf %202 : vector<2x128xf32>
    %204 = math.exp %203 : vector<2x128xf32>
    %cst_83 = arith.constant 1.000000e+00 : f32
    %205 = vector.broadcast %cst_83 : f32 to vector<2x128xf32>
    %206 = arith.addf %205, %204 : vector<2x128xf32>
    %207 = arith.divf %205, %206 : vector<2x128xf32>
    %208 = vector.extract_strided_slice %207 {offsets = [0, 0], sizes = [2, 64], strides = [1, 1]} : vector<2x128xf32> to vector<2x64xf32>
    %209 = vector.extract_strided_slice %207 {offsets = [0, 64], sizes = [2, 64], strides = [1, 1]} : vector<2x128xf32> to vector<2x64xf32>
    %210 = vector.extract_strided_slice %197 {offsets = [0, 128], sizes = [2, 64], strides = [1, 1]} : vector<2x192xf32> to vector<2x64xf32>
    %211 = vector.extract_strided_slice %199 {offsets = [0, 128], sizes = [2, 64], strides = [1, 1]} : vector<2x192xf32> to vector<2x64xf32>
    %c0_84 = arith.constant 0 : index
    %c0_85 = arith.constant 0 : index
    %212 = vector.load %arg4[%c0_84, %c0_85] : memref<1x64xf32, #tpu.memory_space<vmem>>, vector<1x64xf32>
    %213 = vector.broadcast %212 : vector<1x64xf32> to vector<2x64xf32>
    %214 = arith.addf %211, %213 : vector<2x64xf32>
    %215 = arith.mulf %208, %214 : vector<2x64xf32>
    %216 = arith.addf %210, %215 : vector<2x64xf32>
    %217 = math.tanh %216 : vector<2x64xf32>
    %cst_86 = arith.constant 1.000000e+00 : f32
    %218 = vector.broadcast %cst_86 : f32 to vector<2x64xf32>
    %219 = arith.subf %218, %209 : vector<2x64xf32>
    %220 = arith.mulf %219, %217 : vector<2x64xf32>
    %221 = arith.mulf %209, %195 : vector<2x64xf32>
    %222 = arith.addf %220, %221 : vector<2x64xf32>
    %c14_87 = arith.constant 14 : index
    %c0_88 = arith.constant 0 : index
    %223 = vector.load %arg11[%c14_87, %c0_88] : memref<16x64xf32, #tpu.memory_space<vmem>>, vector<2x64xf32>
    tpu.vector_store %arg11[%c14_87, %c0_88], %222 {strides = array<i32>} : memref<16x64xf32, #tpu.memory_space<vmem>>, vector<2x64xf32>,
    %c0_89 = arith.constant 0 : index
    %c0_90 = arith.constant 0 : index
    %224 = vector.load %arg11[%c0_89, %c0_90] : memref<16x64xf32, #tpu.memory_space<vmem>>, vector<16x64xf32>
    %c0_91 = arith.constant 0 : index
    %c0_92 = arith.constant 0 : index
    %225 = vector.load %arg5[%c0_91, %c0_92] : memref<64x192xf32, #tpu.memory_space<vmem>>, vector<64x192xf32>
    %cst_93 = arith.constant dense<0.000000e+00> : vector<16x192xf32>
    %226 = tpu.matmul %224, %225, %cst_93 {dimension_numbers = #tpu.dot_dimension_numbers<[1], [0], [0], [1], [0, 0, 1, 1], [], []>, precision = #tpu.contract_precision<fp32>} : vector<16x64xf32>, vector<64x192xf32>, vector<16x192xf32> -> vector<16x192xf32>
    %c0_94 = arith.constant 0 : index
    %c0_95 = arith.constant 0 : index
    %227 = vector.load %arg7[%c0_94, %c0_95] : memref<1x192xf32, #tpu.memory_space<vmem>>, vector<1x192xf32>
    %228 = vector.broadcast %227 : vector<1x192xf32> to vector<16x192xf32>
    %229 = arith.addf %226, %228 : vector<16x192xf32>
    %c0_96 = arith.constant 0 : index
    %c0_97 = arith.constant 0 : index
    %230 = vector.load %arg10[%c0_96, %c0_97] : memref<16x192xf32, #tpu.memory_space<vmem>>, vector<16x192xf32>
    tpu.vector_store %arg10[%c0_96, %c0_97], %229 {strides = array<i32>} : memref<16x192xf32, #tpu.memory_space<vmem>>, vector<16x192xf32>,
    %cst_98 = arith.constant 0.000000e+00 : f32
    %231 = vector.broadcast %cst_98 : f32 to vector<2x64xf32>
    %c0_99 = arith.constant 0 : index
    %c0_100 = arith.constant 0 : index
    %232 = vector.load %arg10[%c0_99, %c0_100] : memref<16x192xf32, #tpu.memory_space<vmem>>, vector<2x192xf32>
    %c0_101 = arith.constant 0 : index
    %c0_102 = arith.constant 0 : index
    %233 = vector.load %arg6[%c0_101, %c0_102] : memref<64x192xf32, #tpu.memory_space<vmem>>, vector<64x192xf32>
    %cst_103 = arith.constant dense<0.000000e+00> : vector<2x192xf32>
    %234 = tpu.matmul %231, %233, %cst_103 {dimension_numbers = #tpu.dot_dimension_numbers<[1], [0], [0], [1], [0, 0, 1, 1], [], []>, precision = #tpu.contract_precision<fp32>} : vector<2x64xf32>, vector<64x192xf32>, vector<2x192xf32> -> vector<2x192xf32>
    %235 = vector.extract_strided_slice %232 {offsets = [0, 0], sizes = [2, 128], strides = [1, 1]} : vector<2x192xf32> to vector<2x128xf32>
    %236 = vector.extract_strided_slice %234 {offsets = [0, 0], sizes = [2, 128], strides = [1, 1]} : vector<2x192xf32> to vector<2x128xf32>
    %237 = arith.addf %235, %236 : vector<2x128xf32>
    %238 = arith.negf %237 : vector<2x128xf32>
    %239 = math.exp %238 : vector<2x128xf32>
    %cst_104 = arith.constant 1.000000e+00 : f32
    %240 = vector.broadcast %cst_104 : f32 to vector<2x128xf32>
    %241 = arith.addf %240, %239 : vector<2x128xf32>
    %242 = arith.divf %240, %241 : vector<2x128xf32>
    %243 = vector.extract_strided_slice %242 {offsets = [0, 0], sizes = [2, 64], strides = [1, 1]} : vector<2x128xf32> to vector<2x64xf32>
    %244 = vector.extract_strided_slice %242 {offsets = [0, 64], sizes = [2, 64], strides = [1, 1]} : vector<2x128xf32> to vector<2x64xf32>
    %245 = vector.extract_strided_slice %232 {offsets = [0, 128], sizes = [2, 64], strides = [1, 1]} : vector<2x192xf32> to vector<2x64xf32>
    %246 = vector.extract_strided_slice %234 {offsets = [0, 128], sizes = [2, 64], strides = [1, 1]} : vector<2x192xf32> to vector<2x64xf32>
    %c0_105 = arith.constant 0 : index
    %c0_106 = arith.constant 0 : index
    %247 = vector.load %arg8[%c0_105, %c0_106] : memref<1x64xf32, #tpu.memory_space<vmem>>, vector<1x64xf32>
    %248 = vector.broadcast %247 : vector<1x64xf32> to vector<2x64xf32>
    %249 = arith.addf %246, %248 : vector<2x64xf32>
    %250 = arith.mulf %243, %249 : vector<2x64xf32>
    %251 = arith.addf %245, %250 : vector<2x64xf32>
    %252 = math.tanh %251 : vector<2x64xf32>
    %cst_107 = arith.constant 1.000000e+00 : f32
    %253 = vector.broadcast %cst_107 : f32 to vector<2x64xf32>
    %254 = arith.subf %253, %244 : vector<2x64xf32>
    %255 = arith.mulf %254, %252 : vector<2x64xf32>
    %256 = arith.mulf %244, %231 : vector<2x64xf32>
    %257 = arith.addf %255, %256 : vector<2x64xf32>
    %c2_108 = arith.constant 2 : index
    %c0_109 = arith.constant 0 : index
    %258 = vector.load %arg10[%c2_108, %c0_109] : memref<16x192xf32, #tpu.memory_space<vmem>>, vector<2x192xf32>
    %c0_110 = arith.constant 0 : index
    %c0_111 = arith.constant 0 : index
    %259 = vector.load %arg6[%c0_110, %c0_111] : memref<64x192xf32, #tpu.memory_space<vmem>>, vector<64x192xf32>
    %cst_112 = arith.constant dense<0.000000e+00> : vector<2x192xf32>
    %260 = tpu.matmul %257, %259, %cst_112 {dimension_numbers = #tpu.dot_dimension_numbers<[1], [0], [0], [1], [0, 0, 1, 1], [], []>, precision = #tpu.contract_precision<fp32>} : vector<2x64xf32>, vector<64x192xf32>, vector<2x192xf32> -> vector<2x192xf32>
    %261 = vector.extract_strided_slice %258 {offsets = [0, 0], sizes = [2, 128], strides = [1, 1]} : vector<2x192xf32> to vector<2x128xf32>
    %262 = vector.extract_strided_slice %260 {offsets = [0, 0], sizes = [2, 128], strides = [1, 1]} : vector<2x192xf32> to vector<2x128xf32>
    %263 = arith.addf %261, %262 : vector<2x128xf32>
    %264 = arith.negf %263 : vector<2x128xf32>
    %265 = math.exp %264 : vector<2x128xf32>
    %cst_113 = arith.constant 1.000000e+00 : f32
    %266 = vector.broadcast %cst_113 : f32 to vector<2x128xf32>
    %267 = arith.addf %266, %265 : vector<2x128xf32>
    %268 = arith.divf %266, %267 : vector<2x128xf32>
    %269 = vector.extract_strided_slice %268 {offsets = [0, 0], sizes = [2, 64], strides = [1, 1]} : vector<2x128xf32> to vector<2x64xf32>
    %270 = vector.extract_strided_slice %268 {offsets = [0, 64], sizes = [2, 64], strides = [1, 1]} : vector<2x128xf32> to vector<2x64xf32>
    %271 = vector.extract_strided_slice %258 {offsets = [0, 128], sizes = [2, 64], strides = [1, 1]} : vector<2x192xf32> to vector<2x64xf32>
    %272 = vector.extract_strided_slice %260 {offsets = [0, 128], sizes = [2, 64], strides = [1, 1]} : vector<2x192xf32> to vector<2x64xf32>
    %c0_114 = arith.constant 0 : index
    %c0_115 = arith.constant 0 : index
    %273 = vector.load %arg8[%c0_114, %c0_115] : memref<1x64xf32, #tpu.memory_space<vmem>>, vector<1x64xf32>
    %274 = vector.broadcast %273 : vector<1x64xf32> to vector<2x64xf32>
    %275 = arith.addf %272, %274 : vector<2x64xf32>
    %276 = arith.mulf %269, %275 : vector<2x64xf32>
    %277 = arith.addf %271, %276 : vector<2x64xf32>
    %278 = math.tanh %277 : vector<2x64xf32>
    %cst_116 = arith.constant 1.000000e+00 : f32
    %279 = vector.broadcast %cst_116 : f32 to vector<2x64xf32>
    %280 = arith.subf %279, %270 : vector<2x64xf32>
    %281 = arith.mulf %280, %278 : vector<2x64xf32>
    %282 = arith.mulf %270, %257 : vector<2x64xf32>
    %283 = arith.addf %281, %282 : vector<2x64xf32>
    %c4_117 = arith.constant 4 : index
    %c0_118 = arith.constant 0 : index
    %284 = vector.load %arg10[%c4_117, %c0_118] : memref<16x192xf32, #tpu.memory_space<vmem>>, vector<2x192xf32>
    %c0_119 = arith.constant 0 : index
    %c0_120 = arith.constant 0 : index
    %285 = vector.load %arg6[%c0_119, %c0_120] : memref<64x192xf32, #tpu.memory_space<vmem>>, vector<64x192xf32>
    %cst_121 = arith.constant dense<0.000000e+00> : vector<2x192xf32>
    %286 = tpu.matmul %283, %285, %cst_121 {dimension_numbers = #tpu.dot_dimension_numbers<[1], [0], [0], [1], [0, 0, 1, 1], [], []>, precision = #tpu.contract_precision<fp32>} : vector<2x64xf32>, vector<64x192xf32>, vector<2x192xf32> -> vector<2x192xf32>
    %287 = vector.extract_strided_slice %284 {offsets = [0, 0], sizes = [2, 128], strides = [1, 1]} : vector<2x192xf32> to vector<2x128xf32>
    %288 = vector.extract_strided_slice %286 {offsets = [0, 0], sizes = [2, 128], strides = [1, 1]} : vector<2x192xf32> to vector<2x128xf32>
    %289 = arith.addf %287, %288 : vector<2x128xf32>
    %290 = arith.negf %289 : vector<2x128xf32>
    %291 = math.exp %290 : vector<2x128xf32>
    %cst_122 = arith.constant 1.000000e+00 : f32
    %292 = vector.broadcast %cst_122 : f32 to vector<2x128xf32>
    %293 = arith.addf %292, %291 : vector<2x128xf32>
    %294 = arith.divf %292, %293 : vector<2x128xf32>
    %295 = vector.extract_strided_slice %294 {offsets = [0, 0], sizes = [2, 64], strides = [1, 1]} : vector<2x128xf32> to vector<2x64xf32>
    %296 = vector.extract_strided_slice %294 {offsets = [0, 64], sizes = [2, 64], strides = [1, 1]} : vector<2x128xf32> to vector<2x64xf32>
    %297 = vector.extract_strided_slice %284 {offsets = [0, 128], sizes = [2, 64], strides = [1, 1]} : vector<2x192xf32> to vector<2x64xf32>
    %298 = vector.extract_strided_slice %286 {offsets = [0, 128], sizes = [2, 64], strides = [1, 1]} : vector<2x192xf32> to vector<2x64xf32>
    %c0_123 = arith.constant 0 : index
    %c0_124 = arith.constant 0 : index
    %299 = vector.load %arg8[%c0_123, %c0_124] : memref<1x64xf32, #tpu.memory_space<vmem>>, vector<1x64xf32>
    %300 = vector.broadcast %299 : vector<1x64xf32> to vector<2x64xf32>
    %301 = arith.addf %298, %300 : vector<2x64xf32>
    %302 = arith.mulf %295, %301 : vector<2x64xf32>
    %303 = arith.addf %297, %302 : vector<2x64xf32>
    %304 = math.tanh %303 : vector<2x64xf32>
    %cst_125 = arith.constant 1.000000e+00 : f32
    %305 = vector.broadcast %cst_125 : f32 to vector<2x64xf32>
    %306 = arith.subf %305, %296 : vector<2x64xf32>
    %307 = arith.mulf %306, %304 : vector<2x64xf32>
    %308 = arith.mulf %296, %283 : vector<2x64xf32>
    %309 = arith.addf %307, %308 : vector<2x64xf32>
    %c6_126 = arith.constant 6 : index
    %c0_127 = arith.constant 0 : index
    %310 = vector.load %arg10[%c6_126, %c0_127] : memref<16x192xf32, #tpu.memory_space<vmem>>, vector<2x192xf32>
    %c0_128 = arith.constant 0 : index
    %c0_129 = arith.constant 0 : index
    %311 = vector.load %arg6[%c0_128, %c0_129] : memref<64x192xf32, #tpu.memory_space<vmem>>, vector<64x192xf32>
    %cst_130 = arith.constant dense<0.000000e+00> : vector<2x192xf32>
    %312 = tpu.matmul %309, %311, %cst_130 {dimension_numbers = #tpu.dot_dimension_numbers<[1], [0], [0], [1], [0, 0, 1, 1], [], []>, precision = #tpu.contract_precision<fp32>} : vector<2x64xf32>, vector<64x192xf32>, vector<2x192xf32> -> vector<2x192xf32>
    %313 = vector.extract_strided_slice %310 {offsets = [0, 0], sizes = [2, 128], strides = [1, 1]} : vector<2x192xf32> to vector<2x128xf32>
    %314 = vector.extract_strided_slice %312 {offsets = [0, 0], sizes = [2, 128], strides = [1, 1]} : vector<2x192xf32> to vector<2x128xf32>
    %315 = arith.addf %313, %314 : vector<2x128xf32>
    %316 = arith.negf %315 : vector<2x128xf32>
    %317 = math.exp %316 : vector<2x128xf32>
    %cst_131 = arith.constant 1.000000e+00 : f32
    %318 = vector.broadcast %cst_131 : f32 to vector<2x128xf32>
    %319 = arith.addf %318, %317 : vector<2x128xf32>
    %320 = arith.divf %318, %319 : vector<2x128xf32>
    %321 = vector.extract_strided_slice %320 {offsets = [0, 0], sizes = [2, 64], strides = [1, 1]} : vector<2x128xf32> to vector<2x64xf32>
    %322 = vector.extract_strided_slice %320 {offsets = [0, 64], sizes = [2, 64], strides = [1, 1]} : vector<2x128xf32> to vector<2x64xf32>
    %323 = vector.extract_strided_slice %310 {offsets = [0, 128], sizes = [2, 64], strides = [1, 1]} : vector<2x192xf32> to vector<2x64xf32>
    %324 = vector.extract_strided_slice %312 {offsets = [0, 128], sizes = [2, 64], strides = [1, 1]} : vector<2x192xf32> to vector<2x64xf32>
    %c0_132 = arith.constant 0 : index
    %c0_133 = arith.constant 0 : index
    %325 = vector.load %arg8[%c0_132, %c0_133] : memref<1x64xf32, #tpu.memory_space<vmem>>, vector<1x64xf32>
    %326 = vector.broadcast %325 : vector<1x64xf32> to vector<2x64xf32>
    %327 = arith.addf %324, %326 : vector<2x64xf32>
    %328 = arith.mulf %321, %327 : vector<2x64xf32>
    %329 = arith.addf %323, %328 : vector<2x64xf32>
    %330 = math.tanh %329 : vector<2x64xf32>
    %cst_134 = arith.constant 1.000000e+00 : f32
    %331 = vector.broadcast %cst_134 : f32 to vector<2x64xf32>
    %332 = arith.subf %331, %322 : vector<2x64xf32>
    %333 = arith.mulf %332, %330 : vector<2x64xf32>
    %334 = arith.mulf %322, %309 : vector<2x64xf32>
    %335 = arith.addf %333, %334 : vector<2x64xf32>
    %c8_135 = arith.constant 8 : index
    %c0_136 = arith.constant 0 : index
    %336 = vector.load %arg10[%c8_135, %c0_136] : memref<16x192xf32, #tpu.memory_space<vmem>>, vector<2x192xf32>
    %c0_137 = arith.constant 0 : index
    %c0_138 = arith.constant 0 : index
    %337 = vector.load %arg6[%c0_137, %c0_138] : memref<64x192xf32, #tpu.memory_space<vmem>>, vector<64x192xf32>
    %cst_139 = arith.constant dense<0.000000e+00> : vector<2x192xf32>
    %338 = tpu.matmul %335, %337, %cst_139 {dimension_numbers = #tpu.dot_dimension_numbers<[1], [0], [0], [1], [0, 0, 1, 1], [], []>, precision = #tpu.contract_precision<fp32>} : vector<2x64xf32>, vector<64x192xf32>, vector<2x192xf32> -> vector<2x192xf32>
    %339 = vector.extract_strided_slice %336 {offsets = [0, 0], sizes = [2, 128], strides = [1, 1]} : vector<2x192xf32> to vector<2x128xf32>
    %340 = vector.extract_strided_slice %338 {offsets = [0, 0], sizes = [2, 128], strides = [1, 1]} : vector<2x192xf32> to vector<2x128xf32>
    %341 = arith.addf %339, %340 : vector<2x128xf32>
    %342 = arith.negf %341 : vector<2x128xf32>
    %343 = math.exp %342 : vector<2x128xf32>
    %cst_140 = arith.constant 1.000000e+00 : f32
    %344 = vector.broadcast %cst_140 : f32 to vector<2x128xf32>
    %345 = arith.addf %344, %343 : vector<2x128xf32>
    %346 = arith.divf %344, %345 : vector<2x128xf32>
    %347 = vector.extract_strided_slice %346 {offsets = [0, 0], sizes = [2, 64], strides = [1, 1]} : vector<2x128xf32> to vector<2x64xf32>
    %348 = vector.extract_strided_slice %346 {offsets = [0, 64], sizes = [2, 64], strides = [1, 1]} : vector<2x128xf32> to vector<2x64xf32>
    %349 = vector.extract_strided_slice %336 {offsets = [0, 128], sizes = [2, 64], strides = [1, 1]} : vector<2x192xf32> to vector<2x64xf32>
    %350 = vector.extract_strided_slice %338 {offsets = [0, 128], sizes = [2, 64], strides = [1, 1]} : vector<2x192xf32> to vector<2x64xf32>
    %c0_141 = arith.constant 0 : index
    %c0_142 = arith.constant 0 : index
    %351 = vector.load %arg8[%c0_141, %c0_142] : memref<1x64xf32, #tpu.memory_space<vmem>>, vector<1x64xf32>
    %352 = vector.broadcast %351 : vector<1x64xf32> to vector<2x64xf32>
    %353 = arith.addf %350, %352 : vector<2x64xf32>
    %354 = arith.mulf %347, %353 : vector<2x64xf32>
    %355 = arith.addf %349, %354 : vector<2x64xf32>
    %356 = math.tanh %355 : vector<2x64xf32>
    %cst_143 = arith.constant 1.000000e+00 : f32
    %357 = vector.broadcast %cst_143 : f32 to vector<2x64xf32>
    %358 = arith.subf %357, %348 : vector<2x64xf32>
    %359 = arith.mulf %358, %356 : vector<2x64xf32>
    %360 = arith.mulf %348, %335 : vector<2x64xf32>
    %361 = arith.addf %359, %360 : vector<2x64xf32>
    %c10_144 = arith.constant 10 : index
    %c0_145 = arith.constant 0 : index
    %362 = vector.load %arg10[%c10_144, %c0_145] : memref<16x192xf32, #tpu.memory_space<vmem>>, vector<2x192xf32>
    %c0_146 = arith.constant 0 : index
    %c0_147 = arith.constant 0 : index
    %363 = vector.load %arg6[%c0_146, %c0_147] : memref<64x192xf32, #tpu.memory_space<vmem>>, vector<64x192xf32>
    %cst_148 = arith.constant dense<0.000000e+00> : vector<2x192xf32>
    %364 = tpu.matmul %361, %363, %cst_148 {dimension_numbers = #tpu.dot_dimension_numbers<[1], [0], [0], [1], [0, 0, 1, 1], [], []>, precision = #tpu.contract_precision<fp32>} : vector<2x64xf32>, vector<64x192xf32>, vector<2x192xf32> -> vector<2x192xf32>
    %365 = vector.extract_strided_slice %362 {offsets = [0, 0], sizes = [2, 128], strides = [1, 1]} : vector<2x192xf32> to vector<2x128xf32>
    %366 = vector.extract_strided_slice %364 {offsets = [0, 0], sizes = [2, 128], strides = [1, 1]} : vector<2x192xf32> to vector<2x128xf32>
    %367 = arith.addf %365, %366 : vector<2x128xf32>
    %368 = arith.negf %367 : vector<2x128xf32>
    %369 = math.exp %368 : vector<2x128xf32>
    %cst_149 = arith.constant 1.000000e+00 : f32
    %370 = vector.broadcast %cst_149 : f32 to vector<2x128xf32>
    %371 = arith.addf %370, %369 : vector<2x128xf32>
    %372 = arith.divf %370, %371 : vector<2x128xf32>
    %373 = vector.extract_strided_slice %372 {offsets = [0, 0], sizes = [2, 64], strides = [1, 1]} : vector<2x128xf32> to vector<2x64xf32>
    %374 = vector.extract_strided_slice %372 {offsets = [0, 64], sizes = [2, 64], strides = [1, 1]} : vector<2x128xf32> to vector<2x64xf32>
    %375 = vector.extract_strided_slice %362 {offsets = [0, 128], sizes = [2, 64], strides = [1, 1]} : vector<2x192xf32> to vector<2x64xf32>
    %376 = vector.extract_strided_slice %364 {offsets = [0, 128], sizes = [2, 64], strides = [1, 1]} : vector<2x192xf32> to vector<2x64xf32>
    %c0_150 = arith.constant 0 : index
    %c0_151 = arith.constant 0 : index
    %377 = vector.load %arg8[%c0_150, %c0_151] : memref<1x64xf32, #tpu.memory_space<vmem>>, vector<1x64xf32>
    %378 = vector.broadcast %377 : vector<1x64xf32> to vector<2x64xf32>
    %379 = arith.addf %376, %378 : vector<2x64xf32>
    %380 = arith.mulf %373, %379 : vector<2x64xf32>
    %381 = arith.addf %375, %380 : vector<2x64xf32>
    %382 = math.tanh %381 : vector<2x64xf32>
    %cst_152 = arith.constant 1.000000e+00 : f32
    %383 = vector.broadcast %cst_152 : f32 to vector<2x64xf32>
    %384 = arith.subf %383, %374 : vector<2x64xf32>
    %385 = arith.mulf %384, %382 : vector<2x64xf32>
    %386 = arith.mulf %374, %361 : vector<2x64xf32>
    %387 = arith.addf %385, %386 : vector<2x64xf32>
    %c12_153 = arith.constant 12 : index
    %c0_154 = arith.constant 0 : index
    %388 = vector.load %arg10[%c12_153, %c0_154] : memref<16x192xf32, #tpu.memory_space<vmem>>, vector<2x192xf32>
    %c0_155 = arith.constant 0 : index
    %c0_156 = arith.constant 0 : index
    %389 = vector.load %arg6[%c0_155, %c0_156] : memref<64x192xf32, #tpu.memory_space<vmem>>, vector<64x192xf32>
    %cst_157 = arith.constant dense<0.000000e+00> : vector<2x192xf32>
    %390 = tpu.matmul %387, %389, %cst_157 {dimension_numbers = #tpu.dot_dimension_numbers<[1], [0], [0], [1], [0, 0, 1, 1], [], []>, precision = #tpu.contract_precision<fp32>} : vector<2x64xf32>, vector<64x192xf32>, vector<2x192xf32> -> vector<2x192xf32>
    %391 = vector.extract_strided_slice %388 {offsets = [0, 0], sizes = [2, 128], strides = [1, 1]} : vector<2x192xf32> to vector<2x128xf32>
    %392 = vector.extract_strided_slice %390 {offsets = [0, 0], sizes = [2, 128], strides = [1, 1]} : vector<2x192xf32> to vector<2x128xf32>
    %393 = arith.addf %391, %392 : vector<2x128xf32>
    %394 = arith.negf %393 : vector<2x128xf32>
    %395 = math.exp %394 : vector<2x128xf32>
    %cst_158 = arith.constant 1.000000e+00 : f32
    %396 = vector.broadcast %cst_158 : f32 to vector<2x128xf32>
    %397 = arith.addf %396, %395 : vector<2x128xf32>
    %398 = arith.divf %396, %397 : vector<2x128xf32>
    %399 = vector.extract_strided_slice %398 {offsets = [0, 0], sizes = [2, 64], strides = [1, 1]} : vector<2x128xf32> to vector<2x64xf32>
    %400 = vector.extract_strided_slice %398 {offsets = [0, 64], sizes = [2, 64], strides = [1, 1]} : vector<2x128xf32> to vector<2x64xf32>
    %401 = vector.extract_strided_slice %388 {offsets = [0, 128], sizes = [2, 64], strides = [1, 1]} : vector<2x192xf32> to vector<2x64xf32>
    %402 = vector.extract_strided_slice %390 {offsets = [0, 128], sizes = [2, 64], strides = [1, 1]} : vector<2x192xf32> to vector<2x64xf32>
    %c0_159 = arith.constant 0 : index
    %c0_160 = arith.constant 0 : index
    %403 = vector.load %arg8[%c0_159, %c0_160] : memref<1x64xf32, #tpu.memory_space<vmem>>, vector<1x64xf32>
    %404 = vector.broadcast %403 : vector<1x64xf32> to vector<2x64xf32>
    %405 = arith.addf %402, %404 : vector<2x64xf32>
    %406 = arith.mulf %399, %405 : vector<2x64xf32>
    %407 = arith.addf %401, %406 : vector<2x64xf32>
    %408 = math.tanh %407 : vector<2x64xf32>
    %cst_161 = arith.constant 1.000000e+00 : f32
    %409 = vector.broadcast %cst_161 : f32 to vector<2x64xf32>
    %410 = arith.subf %409, %400 : vector<2x64xf32>
    %411 = arith.mulf %410, %408 : vector<2x64xf32>
    %412 = arith.mulf %400, %387 : vector<2x64xf32>
    %413 = arith.addf %411, %412 : vector<2x64xf32>
    %c14_162 = arith.constant 14 : index
    %c0_163 = arith.constant 0 : index
    %414 = vector.load %arg10[%c14_162, %c0_163] : memref<16x192xf32, #tpu.memory_space<vmem>>, vector<2x192xf32>
    %c0_164 = arith.constant 0 : index
    %c0_165 = arith.constant 0 : index
    %415 = vector.load %arg6[%c0_164, %c0_165] : memref<64x192xf32, #tpu.memory_space<vmem>>, vector<64x192xf32>
    %cst_166 = arith.constant dense<0.000000e+00> : vector<2x192xf32>
    %416 = tpu.matmul %413, %415, %cst_166 {dimension_numbers = #tpu.dot_dimension_numbers<[1], [0], [0], [1], [0, 0, 1, 1], [], []>, precision = #tpu.contract_precision<fp32>} : vector<2x64xf32>, vector<64x192xf32>, vector<2x192xf32> -> vector<2x192xf32>
    %417 = vector.extract_strided_slice %414 {offsets = [0, 0], sizes = [2, 128], strides = [1, 1]} : vector<2x192xf32> to vector<2x128xf32>
    %418 = vector.extract_strided_slice %416 {offsets = [0, 0], sizes = [2, 128], strides = [1, 1]} : vector<2x192xf32> to vector<2x128xf32>
    %419 = arith.addf %417, %418 : vector<2x128xf32>
    %420 = arith.negf %419 : vector<2x128xf32>
    %421 = math.exp %420 : vector<2x128xf32>
    %cst_167 = arith.constant 1.000000e+00 : f32
    %422 = vector.broadcast %cst_167 : f32 to vector<2x128xf32>
    %423 = arith.addf %422, %421 : vector<2x128xf32>
    %424 = arith.divf %422, %423 : vector<2x128xf32>
    %425 = vector.extract_strided_slice %424 {offsets = [0, 0], sizes = [2, 64], strides = [1, 1]} : vector<2x128xf32> to vector<2x64xf32>
    %426 = vector.extract_strided_slice %424 {offsets = [0, 64], sizes = [2, 64], strides = [1, 1]} : vector<2x128xf32> to vector<2x64xf32>
    %427 = vector.extract_strided_slice %414 {offsets = [0, 128], sizes = [2, 64], strides = [1, 1]} : vector<2x192xf32> to vector<2x64xf32>
    %428 = vector.extract_strided_slice %416 {offsets = [0, 128], sizes = [2, 64], strides = [1, 1]} : vector<2x192xf32> to vector<2x64xf32>
    %c0_168 = arith.constant 0 : index
    %c0_169 = arith.constant 0 : index
    %429 = vector.load %arg8[%c0_168, %c0_169] : memref<1x64xf32, #tpu.memory_space<vmem>>, vector<1x64xf32>
    %430 = vector.broadcast %429 : vector<1x64xf32> to vector<2x64xf32>
    %431 = arith.addf %428, %430 : vector<2x64xf32>
    %432 = arith.mulf %425, %431 : vector<2x64xf32>
    %433 = arith.addf %427, %432 : vector<2x64xf32>
    %434 = math.tanh %433 : vector<2x64xf32>
    %cst_170 = arith.constant 1.000000e+00 : f32
    %435 = vector.broadcast %cst_170 : f32 to vector<2x64xf32>
    %436 = arith.subf %435, %426 : vector<2x64xf32>
    %437 = arith.mulf %436, %434 : vector<2x64xf32>
    %438 = arith.mulf %426, %413 : vector<2x64xf32>
    %439 = arith.addf %437, %438 : vector<2x64xf32>
    %c0_171 = arith.constant 0 : index
    %c0_172 = arith.constant 0 : index
    %440 = vector.load %arg9[%c0_171, %c0_172] : memref<2x64xf32, #tpu.memory_space<vmem>>, vector<2x64xf32>
    tpu.vector_store %arg9[%c0_171, %c0_172], %439 {strides = array<i32>} : memref<2x64xf32, #tpu.memory_space<vmem>>, vector<2x64xf32>,
    return
  }
}

</mosaic_0001>

<bundles_post_ra>
// kernel: tpu_custom_call.1
= control target key start
LH: loop header
LB: loop body
LE: loop exit
PB: predicated region body
PF: predicated region fallthrough
CT: control target
= control target key end

     0   :  { %14 = vsyncpa [#allocation5], 0  ;;  %s16122_s0 = inlined_call_operand.hbm [shape: f32[16,16], index: 0, kind: input, shape index: {}]   ;;  %s16123_s1 = inlined_call_operand.hbm [shape: f32[16,192], index: 1, kind: input, shape index: {}]   ;;  %s16124_s2 = inlined_call_operand.hbm [shape: f32[64,192], index: 2, kind: input, shape index: {}]   ;;  %s16125_s3 = inlined_call_operand.vmem [shape: f32[1,192], index: 3, kind: input, shape index: {}]   ;;  %s16126_s4 = inlined_call_operand.vmem [shape: f32[1,64], index: 4, kind: input, shape index: {}]   ;;  %s16127_s5 = inlined_call_operand.hbm [shape: f32[64,192], index: 5, kind: input, shape index: {}]   ;;  %s16128_s6 = inlined_call_operand.hbm [shape: f32[64,192], index: 6, kind: input, shape index: {}]   ;;  %s16129_s7 = inlined_call_operand.vmem [shape: f32[1,192], index: 7, kind: input, shape index: {}]   ;;  %s16130_s8 = inlined_call_operand.vmem [shape: f32[1,64], index: 8, kind: input, shape index: {}]   ;;  %s16131_s9 = inlined_call_operand.hbm [shape: f32[2,64], index: 9, kind: output, shape index: {}]  }
   0x1   :  { %15 = vsyncpa [#allocation8], 0 }
   0x2   :  { %16 = vsyncpa [#allocation11], 0 }
   0x3   :  { %17 = vsyncpa [#allocation6], 0  ;;  %s12800_s30 = smov [#allocation7]  }
   0x4   :  { %s35_s10 = sshll.u32 %s12800_s30, 4  ;;  %s36_s10 = int_to_ptr.vmem [resolvable:$true] %s35_s10 }
   0x5   :  { %s12680_s11 = scalar_lea.vmem %s36_s10, 512  ;;  %p12685_p1 = scmp.lt.s32.totalorder %s36_s10, %s36_s10 }
   0x6   :  { %p12681_p0 = scmp.ne.s32.totalorder %s36_s10, %s12680_s11  ;;  %p12686_p2 = scmp.lt.s32.totalorder %s12680_s11, %s12680_s11 }
   0x8   :  { %p12687_p3 = por %p12686_p2, %p12685_p1 }
   0xa   :  { %p12688_p4 = pnand %p12687_p3, %p12681_p0 }
   0xc   :  { %12691 = shalt.err (!%p12688_p4)
}
   0xd   :  { %s12801_s12 = smov 256   ;;  %s12802_s13 = smov 16  }
   0xe   :  { %41 = dma.hbm_to_vmem [thread:$0]  %s16123_s1, 512, %s36_s10, [#allocation8], %s12801_s12, %s12801_s12, %s12802_s13  }
   0xf   :  { %s12803_s16 = smov [#allocation10]   ;;  %s12804_s18 = smov [#allocation4]  }
  0x10   :  { %s63_s17 = sshll.u32 %s12803_s16, 4  ;;  %s23_s19 = sshll.u32 %s12804_s18, 4  ;;  %s64_s17 = int_to_ptr.vmem [resolvable:$true] %s63_s17  ;;  %s24_s19 = int_to_ptr.vmem [resolvable:$true] %s23_s19 }
  0x11   :  { %s12700_s20 = scalar_lea.vmem %s64_s17, 2048  ;;  %p12705_p6 = scmp.lt.s32.totalorder %s64_s17, %s64_s17 }
  0x12   :  { %p12701_p5 = scmp.ne.s32.totalorder %s64_s17, %s12700_s20  ;;  %p12706_p7 = scmp.lt.s32.totalorder %s12700_s20, %s12700_s20 }
  0x14   :  { %p12707_p8 = por %p12706_p7, %p12705_p6 }
  0x16   :  { %p12708_p9 = pnand %p12707_p8, %p12701_p5 }
  0x18   :  { %12711 = shalt.err (!%p12708_p9)
}
  0x19   :  { %69 = dma.hbm_to_vmem [thread:$0]  %s16127_s5, 2048, %s64_s17, [#allocation11], %s12801_s12, %s12801_s12, %s12802_s13  }
  0x1a   :  { %s12720_s1 = scalar_lea.vmem %s24_s19, 256  ;;  %p12725_p11 = scmp.lt.s32.totalorder %s24_s19, %s24_s19 }
  0x1b   :  { %p12721_p10 = scmp.ne.s32.totalorder %s24_s19, %s12720_s1  ;;  %p12726_p12 = scmp.lt.s32.totalorder %s12720_s1, %s12720_s1 }
  0x1d   :  { %p12727_p13 = por %p12726_p12, %p12725_p11 }
  0x1f   :  { %p12728_p0 = pnand %p12727_p13, %p12721_p10 }
  0x21   :  { %12731 = shalt.err (!%p12728_p0)
}
  0x22   :  { %s12805_s23 = smov 128   ;;  %s12806_s24 = smov 8  }
  0x23   :  { %29 = dma.hbm_to_vmem [thread:$0]  %s16122_s0, 256, %s24_s19, [#allocation5], %s12805_s23, %s12805_s23, %s12806_s24  }
  0x24   :  { %s12807_s27 = smov [#allocation9]   ;;  %s12808_s29 = smov [#allocation12]  }
  0x25   :  { %s47_s28 = sshll.u32 %s12807_s27, 4  ;;  %s75_s30 = sshll.u32 %s12808_s29, 4  ;;  %s48_s28 = int_to_ptr.vmem [resolvable:$true] %s47_s28  ;;  %s76_s30 = int_to_ptr.vmem [resolvable:$true] %s75_s30 }
  0x26   :  { %s12740_s5 = scalar_lea.vmem %s48_s28, 2048  ;;  %p12745_p2 = scmp.lt.s32.totalorder %s48_s28, %s48_s28 }
  0x27   :  { %p12741_p1 = scmp.ne.s32.totalorder %s48_s28, %s12740_s5  ;;  %p12746_p3 = scmp.lt.s32.totalorder %s12740_s5, %s12740_s5 }
  0x29   :  { %p12747_p4 = por %p12746_p3, %p12745_p2 }
  0x2b   :  { %p12748_p5 = pnand %p12747_p4, %p12741_p1 }
  0x2d   :  { %12751 = shalt.err (!%p12748_p5)
}
  0x2e   :  { %53 = dma.hbm_to_vmem [thread:$0]  %s16124_s2, 2048, %s48_s28, [#allocation8], %s12801_s12, %s12801_s12, %s12802_s13  }
  0x2f   :  { %s12760_s0 = scalar_lea.vmem %s76_s30, 2048  ;;  %p12765_p7 = scmp.lt.s32.totalorder %s76_s30, %s76_s30 }
  0x30   :  { %p12761_p6 = scmp.ne.s32.totalorder %s76_s30, %s12760_s0  ;;  %p12766_p8 = scmp.lt.s32.totalorder %s12760_s0, %s12760_s0 }
  0x32   :  { %p12767_p9 = por %p12766_p8, %p12765_p7 }
  0x34   :  { %p12768_p10 = pnand %p12767_p9, %p12761_p6 }
  0x36   :  { %12771 = shalt.err (!%p12768_p10)
}
  0x37   :  { %81 = dma.hbm_to_vmem [thread:$0]  %s16128_s6, 2048, %s76_s30, [#allocation11], %s12801_s12, %s12801_s12, %s12802_s13  }
  0x38   :  { %12792 = dma.done.wait [#allocation5], 256  }
  0x39   :  { %12793 = vsyncadd [#allocation5], 4294967040 }
  0x3a   :  { %12794 = dma.done.wait [#allocation8], 2560  }
  0x3b   :  { %12795 = vsyncadd [#allocation8], 4294964736 }
  0x3c   :  { %12796 = dma.done.wait [#allocation11], 4096  }
  0x3d   :  { %12797 = vsyncadd [#allocation11], 4294963200  ;;  %v16132_v0 = vmov 0.0   ;;  %vm119_vm0 = vcmask 130048   ;;  %v106_v1 = vld [vmem:[#allocation7 + $0x18] sm:$0xff]  ;;  %v105_v2 = vld [vmem:[#allocation7 + $0x10] sm:$0xff] }
  0x3e   :  { %194 = vmatprep.mubr.f32.mxu0 %v16132_v0  ;;  %301 = vmatprep.mubr.f32.mxu1 %v16132_v0  ;;  %v104_v3 = vld [vmem:[#allocation7 + $0x8] sm:$0xff]  ;;  %v12891_v4 = vand.u32 4294901760, %v106_v1  ;;  %v12893_v5 = vand.u32 4294901760, %v105_v2  ;;  %v103_v7 = vld [vmem:[#allocation7] sm:$0xff]  ;;  %v101_v8 = vld [vmem:[#allocation4] sm:$0xff]  ;;  %vm667_vm1 = vcmask 523264  }
  0x3f   :  { %v12895_v6 = vand.u32 4294901760, %v104_v3  ;;  %v102_v9 = vld [vmem:[#allocation4 + $0x8] sm:$0xff]  ;;  %v12897_v10 = vand.u32 4294901760, %v103_v7  ;;  %v121_v11 = vsel %vm119_vm0, %v101_v8, 0  ;;  %v687_v39 = vld [vmem:[#allocation9 + $0x70] sm:$0xff]  ;;  %v686_v41 = vld [vmem:[#allocation9 + $0x68] sm:$0xff] }
  0x40   :  { %v124_v12 = vsel %vm119_vm0, %v102_v9, 0  ;;  %155 = vmatprep.subr.mxu0 %v12891_v4  ;;  %v12901_v13 = vsub.f32 %v106_v1, %v12891_v4  ;;  %v12903_v14 = vand.u32 4294901760, %v121_v11  ;;  %v12906_v15 = vsub.f32 %v105_v2, %v12893_v5  ;;  %v688_v29 = vld [vmem:[#allocation9 + $0x78] sm:$0xff]  ;;  %v685_v44 = vld [vmem:[#allocation9 + $0x60] sm:$0xff]  ;;  %v683_v49 = vld [vmem:[#allocation9 + $0x50] sm:$0xff]  ;;  %s12810_s13 = smov 64  }
  0x41   :  { %v12909_v16 = vsub.f32 %v104_v3, %v12895_v6  ;;  %157 = vmatpush1.msra.mxu0 %v12893_v5  ;;  %v12913_v17 = vsub.f32 %v103_v7, %v12897_v10  ;;  %v12915_v18 = vand.u32 4294901760, %v124_v12  ;;  %v12948_v38 = vand.u32 4294901760, %v688_v29  ;;  %v684_v47 = vld [vmem:[#allocation9 + $0x58] sm:$0xff]  ;;  %v682_v51 = vld [vmem:[#allocation9 + $0x48] sm:$0xff]  ;;  %v681_v54 = vld [vmem:[#allocation9 + $0x40] sm:$0xff] }
  0x42   :  { %159 = vmatprep.subr.mxu0 %v12895_v6  ;;  %v247_v19 = vand.u32 4294901760, %v12901_v13  ;;  %v12920_v20 = vsub.f32 %v121_v11, %v12903_v14  ;;  %v253_v21 = vand.u32 4294901760, %v12906_v15  ;;  %v12950_v43 = vand.u32 4294901760, %v687_v39  ;;  %v680_v57 = vld [vmem:[#allocation9 + $0x38] sm:$0xff]  ;;  %v679_v60 = vld [vmem:[#allocation9 + $0x30] sm:$0xff]  ;;  %v678_v63 = vld [vmem:[#allocation9 + $0x28] sm:$0xff] }
  0x43   :  { %v259_v22 = vand.u32 4294901760, %v12909_v16  ;;  %161 = vmatpush1.msra.mxu0 %v12897_v10  ;;  %v265_v23 = vand.u32 4294901760, %v12913_v17  ;;  %v12927_v24 = vsub.f32 %v124_v12, %v12915_v18  ;;  %v12954_v45 = vsub.f32 %v688_v29, %v12948_v38  ;;  %v677_v7 = vld [vmem:[#allocation9 + $0x20] sm:$0xff]  ;;  %v676_v12 = vld [vmem:[#allocation9 + $0x18] sm:$0xff] }
  0x44   :  { %v248_v25 = vsub.f32 %v12901_v13, %v247_v19  ;;  %v197_v26 = vand.u32 4294901760, %v12920_v20  ;;  %v254_v27 = vsub.f32 %v12906_v15, %v253_v21  ;;  %346 = vmatprep.subr.mxu0 %v12901_v13  ;;  %v12958_v46 = vand.u32 4294901760, %v686_v41 }
  0x45   :  { %v260_v28 = vsub.f32 %v12909_v16, %v259_v22  ;;  %v266_v30 = vsub.f32 %v12913_v17, %v265_v23  ;;  %v208_v31 = vand.u32 4294901760, %v12927_v24  ;;  %v12962_v48 = vand.u32 4294901760, %v685_v44 }
  0x46   :  { %v249_v32 = vand.u32 4294901760, %v248_v25  ;;  %v198_v33 = vsub.f32 %v12920_v20, %v197_v26  ;;  %v255_v34 = vand.u32 4294901760, %v254_v27  ;;  %v12966_v50 = vsub.f32 %v687_v39, %v12950_v43  ;;  %v674_v27 = vld [vmem:[#allocation9 + $0x8] sm:$0xff] }
  0x47   :  { %v261_v35 = vand.u32 4294901760, %v260_v28  ;;  %v267_v36 = vand.u32 4294901760, %v266_v30  ;;  %v209_v37 = vsub.f32 %v12927_v24, %v208_v31  ;;  %v12971_v52 = vand.u32 4294901760, %v12954_v45  ;;  %v673_v30 = vld [vmem:[#allocation9] sm:$0xff] }
  0x48   :  { %250 = vmatprep.subr.mxu1 %v249_v32  ;;  %v199_v40 = vand.u32 4294901760, %v198_v33  ;;  %v12973_v53 = vand.u32 4294901760, %v684_v47  ;;  %v12977_v55 = vand.u32 4294901760, %v683_v49  ;;  %v12980_v56 = vsub.f32 %v686_v41, %v12958_v46 }
  0x49   :  { %256 = vmatpush1.msra.mxu1 %v255_v34  ;;  %v210_v42 = vand.u32 4294901760, %v209_v37  ;;  %v12984_v58 = vsub.f32 %v685_v44, %v12962_v48  ;;  %v12986_v59 = vand.u32 4294901760, %v682_v51  ;;  %v12991_v61 = vand.u32 4294901760, %v12966_v50 }
  0x4a   :  { %200 = vmatmul.mubr.f32.vlgmr.msra.gmra.mxu0 %v199_v40  ;;  %262 = vmatprep.subr.mxu1 %v261_v35  ;;  %v12993_v62 = vand.u32 4294901760, %v681_v54  ;;  %v803_v1 = vsub.f32 %v12954_v45, %v12971_v52  ;;  %v13001_v2 = vsub.f32 %v684_v47, %v12973_v53  ;;  %v13003_v3 = vand.u32 4294901760, %v680_v57 }
  0x4b   :  { %268 = vmatpush1.msra.mxu1 %v267_v36  ;;  %349 = vmatpush1.msra.mxu0 %v12906_v15  ;;  %16307 = vst [vmem:[#allocation18_spill] sm:$0xff] %v12991_v61  ;;  %v13009_v8 = vsub.f32 %v683_v49, %v12977_v55  ;;  %v13012_v9 = vand.u32 4294901760, %v12980_v56  ;;  %v13014_v11 = vand.u32 4294901760, %v679_v60  ;;  %v13020_v13 = vand.u32 4294901760, %v12984_v58 }
  0x4c   :  { %205 = vmatprep.mubr.f32.mxu0 %v16132_v0  ;;  %303 = vmatmul.mubr.f32.vlgmr.msra.gmra.mxu1 %v12903_v14  ;;  %v13023_v15 = vsub.f32 %v682_v51, %v12986_v59  ;;  %v13042_v25 = vand.u32 4294901760, %v13001_v2  ;;  %v13082_v35 = vand.u32 4294901760, %v674_v27  ;;  %vm1369_vm2 = vcmask 517120  }
  0x4d   :  { %434 = vmatprep.subr.mxu1 %v12891_v4  ;;  %352 = vmatprep.subr.mxu0 %v12909_v16  ;;  %16308 = vst [vmem:[#allocation19_spill] sm:$0xff] %v13012_v9  ;;  %16309 = vst [vmem:[#allocation20_spill] sm:$0xff] %v13020_v13  ;;  %v13034_v16 = vand.u32 4294901760, %v677_v7  ;;  %v13058_v28 = vsub.f32 %v679_v60, %v13014_v11  ;;  %vm2076_vm3 = vcmask 519170   ;;  %vm3496_vm4 = vcmask 523270  }
  0x4e   :  { %211 = vmatmul.mubr.f32.gmra.mxu0 %v210_v42  ;;  %436 = vmatpush1.msra.mxu1 %v12893_v5  ;;  %16310 = vst [vmem:[#allocation21_spill] sm:$0xff] %v13042_v25  ;;  %v827_v36 = vsub.f32 %v13001_v2, %v13042_v25  ;;  %v13125_v60 = vsub.f32 %v674_v27, %v13082_v35  ;;  %vm2786_vm5 = vcmask 521220  }
  0x4f   :  { %308 = vmatprep.mubr.f32.mxu1 %v16132_v0  ;;  %355 = vmatpush1.msra.mxu0 %v12913_v17  ;;  %v815_v17 = vsub.f32 %v12980_v56, %v13012_v9  ;;  %v13103_v42 = vand.u32 4294901760, %v13058_v28 }
  0x50   :  { %310 = vmatmul.mubr.f32.gmra.mxu1 %v12915_v18  ;;  %388 = vmatprep.mubr.f32.mxu0 %v16132_v0 }
  0x51   :  { %438 = vmatprep.subr.mxu1 %v12895_v6  ;;  %523 = vmatprep.subr.mxu0 %v247_v19  ;;  %v13025_v19 = vand.u32 4294901760, %v678_v63  ;;  %v13098_v40 = vand.u32 4294901760, %v815_v17  ;;  %16315 = vst [vmem:[#allocation26_spill] sm:$0xff] %v13103_v42 }
  0x52   :  { %391 = vmatmul.mubr.f32.vlgmr.msra.gmra.mxu0 %v12920_v20  ;;  %440 = vmatpush1.msra.mxu1 %v12897_v10  ;;  %v675_v20 = vld [vmem:[#allocation9 + $0x10] sm:$0xff] }
  0x53   :  { %473 = vmatprep.mubr.f32.mxu1 %v16132_v0  ;;  %527 = vmatpush1.msra.mxu0 %v253_v21  ;;  %v809_v21 = vsub.f32 %v12966_v50, %v12991_v61  ;;  %v13060_v29 = vand.u32 4294901760, %v675_v20  ;;  %v13070_v32 = vsub.f32 %v678_v63, %v13025_v19  ;;  %v13129_v63 = vand.u32 4294901760, %v827_v36 }
  0x54   :  { %396 = vmatprep.mubr.f32.mxu0 %v16132_v0  ;;  %477 = vmatmul.mubr.f32.vlgmr.msra.gmra.mxu1 %v197_v26  ;;  %v13047_v26 = vand.u32 4294901760, %v676_v12  ;;  %v13161_v36 = vand.u32 4294901760, %v13125_v60 }
  0x55   :  { %612 = vmatprep.subr.mxu1 %v12891_v4  ;;  %531 = vmatprep.subr.mxu0 %v259_v22  ;;  %v13032_v4 = vsub.f32 %v681_v54, %v12993_v62  ;;  %v13039_v22 = vand.u32 4294901760, %v803_v1  ;;  %v13074_v33 = vand.u32 4294901760, %v809_v21  ;;  %v13106_v44 = vsub.f32 %v675_v20, %v13060_v29 }
  0x56   :  { %399 = vmatmul.mubr.f32.gmra.mxu0 %v12927_v24  ;;  %614 = vmatpush1.msra.mxu1 %v12893_v5  ;;  %v13045_v5 = vsub.f32 %v680_v57, %v13003_v3  ;;  %v821_v24 = vsub.f32 %v12984_v58, %v13020_v13  ;;  %v13094_v39 = vsub.f32 %v676_v12, %v13047_v26  ;;  %v13115_v51 = vand.u32 4294901760, %v13070_v32 }
  0x57   :  { %482 = vmatprep.mubr.f32.mxu1 %v16132_v0  ;;  %535 = vmatpush1.msra.mxu0 %v265_v23  ;;  %v13055_v23 = vand.u32 4294901760, %v13009_v8  ;;  %v13077_v34 = vand.u32 4294901760, %v13032_v4  ;;  %v857_v20 = vsub.f32 %v13058_v28, %v13103_v42  ;;  %v13146_v21 = vand.u32 4294901760, %v13106_v44  ;;  %16323 = vst [vmem:[#allocation34_spill] sm:$0xff] %v13161_v36 }
  0x58   :  { %486 = vmatmul.mubr.f32.gmra.mxu1 %v208_v31  ;;  %568 = vmatprep.mubr.f32.mxu0 %v16132_v0  ;;  %v13067_v31 = vand.u32 4294901760, %v13023_v15  ;;  %v13089_v37 = vand.u32 4294901760, %v13045_v5  ;;  %v13110_v47 = vand.u32 4294901760, %v821_v24  ;;  %16317 = vst [vmem:[#allocation28_spill] sm:$0xff] %v13115_v51  ;;  %v863_v17 = vsub.f32 %v13070_v32, %v13115_v51 }
  0x59   :  { %16311 = vst [vmem:[#allocation22_spill] sm:$0xff] %v13055_v23  ;;  %616 = vmatprep.subr.mxu1 %v12895_v6  ;;  %709 = vmatprep.subr.mxu0 %v12948_v38  ;;  %16313 = vst [vmem:[#allocation24_spill] sm:$0xff] %v13077_v34  ;;  %v13080_v6 = vsub.f32 %v677_v7, %v13034_v16  ;;  %v833_v41 = vsub.f32 %v13009_v8, %v13055_v23  ;;  %v13137_v7 = vand.u32 4294901760, %v13094_v39 }
  0x5a   :  { %16312 = vst [vmem:[#allocation23_spill] sm:$0xff] %v13067_v31  ;;  %570 = vmatmul.mubr.f32.vlgmr.msra.gmra.mxu0 %v12903_v14  ;;  %618 = vmatpush1.msra.mxu1 %v12897_v10  ;;  %16314 = vst [vmem:[#allocation25_spill] sm:$0xff] %v13089_v37  ;;  %v13091_v10 = vand.u32 4294901760, %v673_v30  ;;  %v839_v49 = vsub.f32 %v13023_v15, %v13067_v31  ;;  %v845_v54 = vsub.f32 %v13032_v4, %v13077_v34 }
  0x5b   :  { %711 = vmatpush1.msra.mxu0 %v12950_v43  ;;  %651 = vmatprep.mubr.f32.mxu1 %v16132_v0  ;;  %16316 = vst [vmem:[#allocation27_spill] sm:$0xff] %v13110_v47  ;;  %v13122_v57 = vand.u32 4294901760, %v13080_v6  ;;  %16319 = vst [vmem:[#allocation30_spill] sm:$0xff] %v13137_v7  ;;  %v13141_v12 = vand.u32 4294901760, %v833_v41 }
  0x5c   :  { %713 = vmatprep.subr.mxu0 %v12958_v46  ;;  %805 = vmatprep.subr.mxu1 %v13039_v22  ;;  %v13134_v1 = vsub.f32 %v673_v30, %v13091_v10  ;;  %16321 = vst [vmem:[#allocation32_spill] sm:$0xff] %v13146_v21  ;;  %v13150_v27 = vand.u32 4294901760, %v839_v49  ;;  %v13156_v30 = vand.u32 4294901760, %v845_v54  ;;  %v875_v49 = vsub.f32 %v13094_v39, %v13137_v7 }
  0x5d   :  { %715 = vmatpush1.msra.mxu0 %v12962_v48  ;;  %575 = vmatprep.mubr.f32.mxu0 %v16132_v0  ;;  %16318 = vst [vmem:[#allocation29_spill] sm:$0xff] %v13122_v57  ;;  %16320 = vst [vmem:[#allocation31_spill] sm:$0xff] %v13141_v12  ;;  %v869_v24 = vsub.f32 %v13080_v6, %v13122_v57  ;;  %v13174_v54 = vand.u32 4294901760, %v857_v20 }
  0x5e   :  { %653 = vmatmul.mubr.f32.vlgmr.msra.gmra.mxu1 %v12903_v14  ;;  %717 = vmatprep.subr.mxu0 %v12973_v53  ;;  %v851_v14 = vsub.f32 %v13045_v5, %v13089_v37  ;;  %16322 = vst [vmem:[#allocation33_spill] sm:$0xff] %v13150_v27  ;;  %v13190_v20 = vand.u32 4294901760, %v875_v49 }
  0x5f   :  { %811 = vmatpush1.msra.mxu1 %v13074_v33  ;;  %577 = vmatmul.mubr.f32.gmra.mxu0 %v12915_v18 }
  0x60   :  { %719 = vmatpush1.msra.mxu0 %v12977_v55  ;;  %817 = vmatprep.subr.mxu1 %v13098_v40  ;;  %v13165_v41 = vand.u32 4294901760, %v851_v14  ;;  %v13184_v14 = vand.u32 4294901760, %v869_v24 }
  0x61   :  { %721 = vmatprep.subr.mxu0 %v12986_v59  ;;  %823 = vmatpush1.msra.mxu1 %v13110_v47  ;;  %v881_v47 = vsub.f32 %v13106_v44, %v13146_v21 }
  0x62   :  { %658 = vmatprep.mubr.f32.mxu1 %v16132_v0  ;;  %723 = vmatpush1.msra.mxu0 %v12993_v62  ;;  %16324 = vst [vmem:[#allocation35_spill] sm:$0xff] %v13165_v41  ;;  %v13170_v0 = vand.u32 4294901760, %v13134_v1 }
  0x63   :  { %829 = vmatprep.subr.mxu1 %v13129_v63  ;;  %660 = vmatmul.mubr.f32.gmra.mxu1 %v12915_v18  ;;  %v13180_v18 = vand.u32 4294901760, %v863_v17  ;;  %v13196_v17 = vand.u32 4294901760, %v881_v47  ;;  %v16327_v47 = vld [vmem:[#allocation27_spill] sm:$0xff] }
  0x64   :  { %16325 = vst [vmem:[#allocation36_spill] sm:$0xff] %v13170_v0  ;;  %725 = vmatprep.subr.mxu0 %v13003_v3  ;;  %835 = vmatpush1.msra.mxu1 %v13141_v12  ;;  %v887_v12 = vsub.f32 %v13125_v60, %v13161_v36 }
  0x65   :  { %727 = vmatpush1.msra.mxu0 %v13014_v11  ;;  %841 = vmatprep.subr.mxu1 %v13150_v27  ;;  %v893_v27 = vsub.f32 %v13134_v1, %v13170_v0 }
  0x66   :  { %729 = vmatprep.subr.mxu0 %v13025_v19  ;;  %847 = vmatpush1.msra.mxu1 %v13156_v30  ;;  %v13202_v24 = vand.u32 4294901760, %v887_v12  ;;  %v16328_v12 = vld [vmem:[#allocation31_spill] sm:$0xff] }
  0x67   :  { %731 = vmatpush1.msra.mxu0 %v13034_v16  ;;  %853 = vmatprep.subr.mxu1 %v13165_v41  ;;  %v13206_v49 = vand.u32 4294901760, %v893_v27  ;;  %v16326_v41 = vmov 0.0  }
  0x68   :  { %733 = vmatprep.subr.mxu0 %v13047_v26  ;;  %859 = vmatpush1.msra.mxu1 %v13174_v54 }
  0x69   :  { %735 = vmatpush1.msra.mxu0 %v13060_v29  ;;  %865 = vmatprep.subr.mxu1 %v13180_v18 }
  0x6a   :  { %737 = vmatprep.subr.mxu0 %v13082_v35  ;;  %871 = vmatpush1.msra.mxu1 %v13184_v14 }
  0x6b   :  { %739 = vmatpush1.msra.mxu0 %v13091_v10  ;;  %877 = vmatprep.subr.mxu1 %v13190_v20 }
  0x6c   :  { %772 = vmatprep.mubr.f32.mxu0 %v16326_v41  ;;  %883 = vmatpush1.msra.mxu1 %v13196_v17 }
  0x6d   :  { %954 = vmatprep.subr.mxu0 %v12954_v45  ;;  %778 = vmatmul.mubr.f32.vlgmr.msra.gmra.mxu0 %v16326_v41 }
  0x6e   :  { %889 = vmatprep.subr.mxu1 %v13202_v24  ;;  %957 = vmatpush1.msra.mxu0 %v12966_v50 }
  0x6f   :  { %895 = vmatpush1.msra.mxu1 %v13206_v49  ;;  %928 = vmatprep.mubr.f32.mxu1 %v16326_v41 }
  0x70   :  { %960 = vmatprep.subr.mxu0 %v12980_v56  ;;  %930 = vmatmul.mubr.f32.vlgmr.msra.gmra.mxu1 %v16326_v41 }
  0x71   :  { %963 = vmatpush1.msra.mxu0 %v12984_v58  ;;  %1058 = vmatprep.subr.mxu1 %v12948_v38 }
  0x72   :  { %966 = vmatprep.subr.mxu0 %v13001_v2  ;;  %1060 = vmatpush1.msra.mxu1 %v12950_v43 }
  0x73   :  { %969 = vmatpush1.msra.mxu0 %v13009_v8  ;;  %1062 = vmatprep.subr.mxu1 %v12958_v46 }
  0x74   :  { %972 = vmatprep.subr.mxu0 %v13023_v15  ;;  %1064 = vmatpush1.msra.mxu1 %v12962_v48 }
  0x75   :  { %975 = vmatpush1.msra.mxu0 %v13032_v4  ;;  %1066 = vmatprep.subr.mxu1 %v12973_v53 }
  0x76   :  { %978 = vmatprep.subr.mxu0 %v13045_v5  ;;  %1068 = vmatpush1.msra.mxu1 %v12977_v55 }
  0x77   :  { %981 = vmatpush1.msra.mxu0 %v13058_v28  ;;  %1070 = vmatprep.subr.mxu1 %v12986_v59 }
  0x78   :  { %984 = vmatprep.subr.mxu0 %v13070_v32  ;;  %1072 = vmatpush1.msra.mxu1 %v12993_v62 }
  0x79   :  { %987 = vmatpush1.msra.mxu0 %v13080_v6  ;;  %1074 = vmatprep.subr.mxu1 %v13003_v3 }
  0x7a   :  { %990 = vmatprep.subr.mxu0 %v13094_v39  ;;  %1076 = vmatpush1.msra.mxu1 %v13014_v11 }
  0x7b   :  { %993 = vmatpush1.msra.mxu0 %v13106_v44  ;;  %1078 = vmatprep.subr.mxu1 %v13025_v19 }
  0x7c   :  { %996 = vmatprep.subr.mxu0 %v13125_v60  ;;  %1080 = vmatpush1.msra.mxu1 %v13034_v16 }
  0x7d   :  { %999 = vmatpush1.msra.mxu0 %v13134_v1  ;;  %1032 = vmatprep.mubr.f32.mxu0 %v16326_v41 }
  0x7e   :  { %1082 = vmatprep.subr.mxu1 %v13047_v26  ;;  %1035 = vmatmul.mubr.f32.vlgmr.msra.gmra.mxu0 %v16326_v41 }
  0x7f   :  { %1084 = vmatpush1.msra.mxu1 %v13060_v29  ;;  %1150 = vmatprep.subr.mxu0 %v12971_v52 }
  0x80   :  { %1086 = vmatprep.subr.mxu1 %v13082_v35  ;;  %1154 = vmatpush1.msra.mxu0 %v12991_v61 }
  0x81   :  { %1088 = vmatpush1.msra.mxu1 %v13091_v10  ;;  %1121 = vmatprep.mubr.f32.mxu1 %v16326_v41 }
  0x82   :  { %1158 = vmatprep.subr.mxu0 %v13012_v9  ;;  %1125 = vmatmul.mubr.f32.vlgmr.msra.gmra.mxu1 %v16326_v41 }
  0x83   :  { %1162 = vmatpush1.msra.mxu0 %v13020_v13  ;;  %1268 = vmatprep.subr.mxu1 %v12948_v38 }
  0x84   :  { %1166 = vmatprep.subr.mxu0 %v13042_v25  ;;  %1270 = vmatpush1.msra.mxu1 %v12950_v43 }
  0x85   :  { %1170 = vmatpush1.msra.mxu0 %v13055_v23  ;;  %1272 = vmatprep.subr.mxu1 %v12958_v46 }
  0x86   :  { %1174 = vmatprep.subr.mxu0 %v13067_v31  ;;  %1274 = vmatpush1.msra.mxu1 %v12962_v48 }
  0x87   :  { %1178 = vmatpush1.msra.mxu0 %v13077_v34  ;;  %1276 = vmatprep.subr.mxu1 %v12973_v53 }
  0x88   :  { %1182 = vmatprep.subr.mxu0 %v13089_v37  ;;  %1278 = vmatpush1.msra.mxu1 %v12977_v55 }
  0x89   :  { %1186 = vmatpush1.msra.mxu0 %v13103_v42  ;;  %1280 = vmatprep.subr.mxu1 %v12986_v59 }
  0x8a   :  { %1190 = vmatprep.subr.mxu0 %v13115_v51  ;;  %1282 = vmatpush1.msra.mxu1 %v12993_v62 }
  0x8b   :  { %1194 = vmatpush1.msra.mxu0 %v13122_v57  ;;  %1284 = vmatprep.subr.mxu1 %v13003_v3 }
  0x8c   :  { %1198 = vmatprep.subr.mxu0 %v13137_v7  ;;  %1286 = vmatpush1.msra.mxu1 %v13014_v11 }
  0x8d   :  { %1202 = vmatpush1.msra.mxu0 %v13146_v21  ;;  %1288 = vmatprep.subr.mxu1 %v13025_v19 }
  0x8e   :  { %1206 = vmatprep.subr.mxu0 %v13161_v36  ;;  %1290 = vmatpush1.msra.mxu1 %v13034_v16 }
  0x8f   :  { %1210 = vmatpush1.msra.mxu0 %v13170_v0  ;;  %1243 = vmatprep.mubr.f32.mxu0 %v16326_v41 }
  0x90   :  { %1292 = vmatprep.subr.mxu1 %v13047_v26  ;;  %1245 = vmatmul.mubr.f32.vlgmr.msra.gmra.mxu0 %v16326_v41 }
  0x91   :  { %1294 = vmatpush1.msra.mxu1 %v13060_v29  ;;  %1331 = vmatprep.mubr.f32.mxu1 %v16326_v41 }
  0x92   :  { %1296 = vmatprep.subr.mxu1 %v13082_v35  ;;  %1408 = vmatprep.subr.mxu0 %v12948_v38 }
  0x93   :  { %1298 = vmatpush1.msra.mxu1 %v13091_v10  ;;  %1410 = vmatpush1.msra.mxu0 %v12950_v43 }
  0x94   :  { %1333 = vmatmul.mubr.f32.vlgmr.msra.gmra.mxu1 %v16326_v41  ;;  %1504 = vmatprep.subr.mxu1 %v13039_v22  ;;  %v16329_v22 = vld [vmem:[#allocation33_spill] sm:$0xff] }
  0x95   :  { %1510 = vmatpush1.msra.mxu1 %v13074_v33  ;;  %1412 = vmatprep.subr.mxu0 %v12958_v46  ;;  %v16330_v33 = vld [vmem:[#allocation35_spill] sm:$0xff] }
  0x96   :  { %1516 = vmatprep.subr.mxu1 %v13098_v40  ;;  %1414 = vmatpush1.msra.mxu0 %v12962_v48  ;;  %v109_v40 = vlaneseq }
  0x97   :  { %1522 = vmatpush1.msra.mxu1 %v16327_v47  ;;  %1416 = vmatprep.subr.mxu0 %v12973_v53 }
  0x98   :  { %1528 = vmatprep.subr.mxu1 %v13129_v63  ;;  %1418 = vmatpush1.msra.mxu0 %v12977_v55  ;;  %v13323_v63 = vshrl.u32 %v109_v40, 7 }
  0x99   :  { %1534 = vmatpush1.msra.mxu1 %v16328_v12  ;;  %1420 = vmatprep.subr.mxu0 %v12986_v59 }
  0x9a   :  { %1540 = vmatprep.subr.mxu1 %v16329_v22  ;;  %1422 = vmatpush1.msra.mxu0 %v12993_v62  ;;  %16331 = vst [vmem:[#allocation27_spill] sm:$0xff] %v13323_v63  ;;  %v16145_v27 = vsub.s32 0, %v13323_v63 }
  0x9b   :  { %1546 = vmatpush1.msra.mxu1 %v13156_v30  ;;  %1424 = vmatprep.subr.mxu0 %v13003_v3  ;;  %v107_v30 = vld [vmem:[%s16125_s3] sm:$0x3] }
  0x9c   :  { %1552 = vmatprep.subr.mxu1 %v16330_v33  ;;  %1627 = vmatprep.mubr.f32.mxu1 %v16326_v41 }
  0x9d   :  { %1558 = vmatpush1.msra.mxu1 %v13174_v54  ;;  %1426 = vmatpush1.msra.mxu0 %v13014_v11  ;;  %v16151_v54 = vsub.s32 1, %v13323_v63 }
  0x9e   :  { %1564 = vmatprep.subr.mxu1 %v13180_v18  ;;  %1428 = vmatprep.subr.mxu0 %v13025_v19 }
  0x9f   :  { %1570 = vmatpush1.msra.mxu1 %v13184_v14  ;;  %1430 = vmatpush1.msra.mxu0 %v13034_v16  ;;  %v112_v14 = vrot.slane %v107_v30, %v16145_v27 }
  0xa0   :  { %1576 = vmatprep.subr.mxu1 %v13190_v20  ;;  %1432 = vmatprep.subr.mxu0 %v13047_v26 }
  0xa1   :  { %1582 = vmatpush1.msra.mxu1 %v13196_v17  ;;  %1434 = vmatpush1.msra.mxu0 %v13060_v29 }
  0xa2   :  { %1588 = vmatprep.subr.mxu1 %v13202_v24  ;;  %1436 = vmatprep.subr.mxu0 %v13082_v35 }
  0xa3   :  { %1594 = vmatpush1.msra.mxu1 %v13206_v49  ;;  %1438 = vmatpush1.msra.mxu0 %v13091_v10 }
  0xa4   :  { %1757 = vmatprep.subr.mxu1 %v12948_v38  ;;  %1471 = vmatprep.mubr.f32.mxu0 %v16326_v41 }
  0xa5   :  { %1653 = vmatprep.subr.mxu0 %v12954_v45  ;;  %v116_v45 = vrot.slane %v107_v30, %v16151_v54 }
 0x10a   :  { %v201_v18 = vpop.f32.mrf.mxu0 }
 0x10b   :  { %v202_v47 = vadd.f32 %v201_v18, %v112_v14 }
 0x10c   :  { %v203_v20 = vpop.f32.mrf.mxu0  ;;  %v304_v17 = vpop.f32.mrf.mxu1 }
 0x10d   :  { %v204_v33 = vadd.f32 %v203_v20, %v116_v45  ;;  %v305_v36 = vadd.f32 %v304_v17, %v202_v47 }
 0x10e   :  { %v212_v24 = vpop.f32.mrf.mxu0  ;;  %v306_v49 = vpop.f32.mrf.mxu1 }
 0x10f   :  { %v213_v21 = vadd.f32 %v212_v24, %v112_v14  ;;  %v307_v51 = vadd.f32 %v306_v49, %v204_v33 }
 0x110   :  { %v214_v12 = vpop.f32.mrf.mxu0  ;;  %v311_v22 = vpop.f32.mrf.mxu1 }
 0x111   :  { %v215_v27 = vadd.f32 %v214_v12, %v116_v45  ;;  %v312_v63 = vadd.f32 %v311_v22, %v213_v21 }
 0x112   :  { %v392_v40 = vpop.f32.mrf.mxu0  ;;  %v313_v0 = vpop.f32.mrf.mxu1 }
 0x113   :  { %v393_v42 = vadd.f32 %v392_v40, %v305_v36  ;;  %v314_v18 = vadd.f32 %v313_v0, %v215_v27 }
 0x114   :  { %v394_v7 = vpop.f32.mrf.mxu0  ;;  %v478_v57 = vpop.f32.mrf.mxu1 }
 0x115   :  { %v395_v31 = vadd.f32 %v394_v7, %v307_v51  ;;  %v479_v23 = vadd.f32 %v478_v57, %v393_v42 }
 0x116   :  { %v400_v37 = vpop.f32.mrf.mxu0  ;;  %v480_v34 = vpop.f32.mrf.mxu1 }
 0x117   :  { %v401_v25 = vadd.f32 %v400_v37, %v312_v63  ;;  %v481_v9 = vadd.f32 %v480_v34, %v395_v31 }
 0x118   :  { %v402_v30 = vpop.f32.mrf.mxu0  ;;  %v487_v54 = vpop.f32.mrf.mxu1 }
 0x119   :  { %v403_v17 = vadd.f32 %v402_v30, %v314_v18  ;;  %v488_v47 = vadd.f32 %v487_v54, %v401_v25 }
 0x11a   :  { %v571_v13 = vpop.f32.mrf.mxu0  ;;  %v489_v20 = vpop.f32.mrf.mxu1 }
 0x11b   :  { %v572_v61 = vadd.f32 %v571_v13, %v479_v23  ;;  %v490_v12 = vadd.f32 %v489_v20, %v403_v17 }
 0x11c   :  { %v573_v14 = vpop.f32.mrf.mxu0 }
 0x11d   :  { %v574_v24 = vadd.f32 %v573_v14, %v481_v9 }
 0x11e   :  { %v654_v49 = vpop.f32.mrf.mxu1 }
 0x11f   :  { %v655_v36 = vadd.f32 %v654_v49, %v572_v61  ;;  %v578_v45 = vpop.f32.mrf.mxu0 }
 0x120   :  { %v579_v33 = vadd.f32 %v578_v45, %v488_v47  ;;  %v656_v51 = vpop.f32.mrf.mxu1 }
 0x121   :  { %666 = vst [vmem:[#allocation2] sm:$0xff] %v655_v36  ;;  %v657_v7 = vadd.f32 %v656_v51, %v574_v24  ;;  %v580_v42 = vpop.f32.mrf.mxu0 }
 0x122   :  { %v581_v0 = vadd.f32 %v580_v42, %v490_v12 }
 0x123   :  { %668 = vst.msk [vmem:[#allocation2 + $0x8] sm:$0xff] %vm667_vm1, %v657_v7  ;;  %v661_v37 = vpop.f32.mrf.mxu1 }
 0x124   :  { %v662_v31 = vadd.f32 %v661_v37, %v579_v33  ;;  %v13339_v37 = vld [vmem:[%s16126_s4] ss:$0 sm:$0xff] }
 0x125   :  { %v663_v13 = vpop.f32.mrf.mxu1  ;;  %16332 = vst [vmem:[#allocation31_spill] sm:$0xff] %v13339_v37 }
 0x126   :  { %669 = vst [vmem:[#allocation2 + $0x10] sm:$0xff] %v662_v31  ;;  %v664_v23 = vadd.f32 %v663_v13, %v581_v0 }
 0x128   :  { %670 = vst.msk [vmem:[#allocation2 + $0x18] sm:$0xff] %vm667_vm1, %v664_v23  ;;  %v671_v14 = vld [vmem:[#allocation2] sm:$0x3] }
 0x12d   :  { %v779_v9 = vpop.f32.mrf.mxu0 }
 0x12f   :  { %v781_v61 = vpop.f32.mrf.mxu0 }
 0x130   :  { %v931_v25 = vpop.f32.mrf.mxu1 }
 0x131   :  { %v932_v57 = vadd.f32 %v931_v25, %v779_v9  ;;  %v672_v9 = vld [vmem:[#allocation2 + $0x8] sm:$0x3] }
 0x132   :  { %v933_v21 = vpop.f32.mrf.mxu1 }
 0x133   :  { %v934_v49 = vadd.f32 %v933_v21, %v781_v61 }
 0x13e   :  { %v1036_v34 = vpop.f32.mrf.mxu0 }
 0x13f   :  { %v1037_v63 = vadd.f32 %v1036_v34, %v932_v57 }
 0x140   :  { %v1038_v54 = vpop.f32.mrf.mxu0 }
 0x141   :  { %v1039_v45 = vadd.f32 %v1038_v54, %v934_v49 }
 0x142   :  { %v1126_v27 = vpop.f32.mrf.mxu1 }
 0x143   :  { %v1127_v22 = vadd.f32 %v1126_v27, %v1037_v63 }
 0x144   :  { %v1128_v18 = vpop.f32.mrf.mxu1 }
 0x145   :  { %v1129_v51 = vadd.f32 %v1128_v18, %v1039_v45 }
 0x150   :  { %v1246_v40 = vpop.f32.mrf.mxu0 }
 0x151   :  { %v1247_v30 = vadd.f32 %v1246_v40, %v1127_v22 }
 0x152   :  { %v1248_v33 = vpop.f32.mrf.mxu0 }
 0x153   :  { %v1249_v7 = vadd.f32 %v1248_v33, %v1129_v51 }
 0x154   :  { %v1334_v20 = vpop.f32.mrf.mxu1 }
 0x155   :  { %v1335_v17 = vadd.f32 %v1334_v20, %v1247_v30 }
 0x156   :  { %v1336_v42 = vpop.f32.mrf.mxu1 }
 0x157   :  { %v1339_v24 = vadd.f32 %v1335_v17, %v671_v14  ;;  %v1337_v0 = vadd.f32 %v1336_v42, %v1249_v7 }
 0x159   :  { %v12538_v47 = vmul.f32 -1.442695, %v1339_v24  ;;  %v1353_v31 = vadd.f32 %v13339_v37, %v1337_v0 }
 0x15b   :  { %12575 = vpow2.f32 %v12538_v47 }
 0x168   :  { %v12576_v36 = vpop.eup %12575 }
 0x169   :  { %v1343_v12 = vadd.f32 1.0, %v12576_v36 }
 0x16b   :  { %12577 = vrcp.f32 %v1343_v12 }
 0x178   :  { %v12578_v13 = vpop.eup %12577 }
 0x179   :  { %v1354_v23 = vmul.f32 %v12578_v13, %v1353_v31  ;;  %v1357_v34 = vsub.f32 1.0, %v12578_v13  ;;  %v1363_v21 = vmul.f32 0.0, %v12578_v13 }
 0x17b   :  { %v1355_v61 = vadd.f32 %v1354_v23, %v672_v9 }
 0x17d   :  { %12579 = vtanh.f32 %v1355_v61 }
 0x18a   :  { %v12580_v25 = vpop.eup %12579 }
 0x18b   :  { %1359 = vrot.lane.b32.xlu0 %v12580_v25, %s12810_s13  ;;  %v1372_v25 = vld [vmem:[#allocation2 + $0x8] sm:$0xc] }
 0x1fd   :  { %v1360_v57 = vpop.permute.xlu0 %1359 }
 0x1fe   :  { %v1362_v63 = vmul.f32 %v1360_v57, %v1357_v34  ;;  %v2095_v57 = vld [vmem:[#allocation9 + $0x78] sm:$0xff] }
 0x200   :  { %v13343_v27 = vadd.f32 %v1363_v21, %v1362_v63  ;;  %v2094_v21 = vld [vmem:[#allocation9 + $0x70] sm:$0xff]  ;;  %v2093_v63 = vld [vmem:[#allocation9 + $0x68] sm:$0xff] }
 0x202   :  { %1366 = vrot.lane.b32.xlu0 %v13343_v27, %s12810_s13  ;;  %v2068_v31 = vrot.slane %v13343_v27, 6  ;;  %v2092_v27 = vld [vmem:[#allocation9 + $0x60] sm:$0xff] }
 0x274   :  { %v1367_v54 = vpop.permute.xlu0 %1366 }
 0x275   :  { %1370 = vst.msk [vmem:[#allocation3] sm:$0x3] %vm1369_vm2, %v1367_v54  ;;  %v1389_v22 = vsel %vm667_vm1, %v1367_v54, 0  ;;  %v13431_v54 = vand.u32 4294901760, %v2095_v57 }
 0x276   :  { %v13349_v40 = vand.u32 4294901760, %v1389_v22 }
 0x278   :  { %v1473_v30 = vsub.f32 %v1389_v22, %v13349_v40  ;;  %1629 = vmatmul.mubr.f32.vlgmr.msra.gmra.mxu1 %v13349_v40  ;;  %v13433_v22 = vand.u32 4294901760, %v2094_v21 }
 0x279   :  { %1759 = vmatpush1.msra.mxu1 %v12950_v43  ;;  %1820 = vmatprep.mubr.f32.mxu1 %v16326_v41 }
 0x27a   :  { %v1474_v18 = vand.u32 4294901760, %v1473_v30  ;;  %1761 = vmatprep.subr.mxu1 %v12958_v46 }
 0x27b   :  { %1763 = vmatpush1.msra.mxu1 %v12962_v48 }
 0x27c   :  { %v1475_v20 = vsub.f32 %v1473_v30, %v1474_v18  ;;  %1765 = vmatprep.subr.mxu1 %v12973_v53 }
 0x27d   :  { %1767 = vmatpush1.msra.mxu1 %v12977_v55 }
 0x27e   :  { %1769 = vmatprep.subr.mxu1 %v12986_v59  ;;  %v1476_v17 = vand.u32 4294901760, %v1475_v20  ;;  %v13437_v20 = vand.u32 4294901760, %v2092_v27 }
 0x27f   :  { %1771 = vmatpush1.msra.mxu1 %v12993_v62 }
 0x280   :  { %1773 = vmatprep.subr.mxu1 %v13003_v3  ;;  %1477 = vmatmul.mubr.f32.vlgmr.msra.gmra.mxu0 %v1476_v17 }
 0x281   :  { %1656 = vmatpush1.msra.mxu0 %v12966_v50  ;;  %1775 = vmatpush1.msra.mxu1 %v13014_v11  ;;  %v16337_v50 = vld [vmem:[#allocation22_spill] sm:$0xff] }
 0x282   :  { %1659 = vmatprep.subr.mxu0 %v12980_v56  ;;  %1777 = vmatprep.subr.mxu1 %v13025_v19  ;;  %v16341_v56 = vld [vmem:[#allocation26_spill] sm:$0xff] }
 0x283   :  { %1662 = vmatpush1.msra.mxu0 %v12984_v58  ;;  %1779 = vmatpush1.msra.mxu1 %v13034_v16  ;;  %v16342_v58 = vld [vmem:[#allocation28_spill] sm:$0xff] }
 0x284   :  { %1665 = vmatprep.subr.mxu0 %v13001_v2  ;;  %1781 = vmatprep.subr.mxu1 %v13047_v26  ;;  %v16345_v2 = vld [vmem:[#allocation32_spill] sm:$0xff] }
 0x285   :  { %1668 = vmatpush1.msra.mxu0 %v13009_v8  ;;  %1783 = vmatpush1.msra.mxu1 %v13060_v29  ;;  %v16347_v8 = vld [vmem:[#allocation36_spill] sm:$0xff] }
 0x286   :  { %1671 = vmatprep.subr.mxu0 %v13023_v15  ;;  %1785 = vmatprep.subr.mxu1 %v13082_v35 }
 0x287   :  { %1674 = vmatpush1.msra.mxu0 %v13032_v4  ;;  %1787 = vmatpush1.msra.mxu1 %v13091_v10 }
 0x288   :  { %1677 = vmatprep.subr.mxu0 %v13045_v5  ;;  %1824 = vmatmul.mubr.f32.vlgmr.msra.gmra.mxu1 %v1474_v18  ;;  %v2090_v18 = vld [vmem:[#allocation9 + $0x50] sm:$0xff] }
 0x289   :  { %1967 = vmatprep.subr.mxu1 %v12948_v38  ;;  %1680 = vmatpush1.msra.mxu0 %v13058_v28  ;;  %v16333_v38 = vld [vmem:[#allocation18_spill] sm:$0xff] }
 0x28a   :  { %1969 = vmatpush1.msra.mxu1 %v12950_v43  ;;  %1683 = vmatprep.subr.mxu0 %v13070_v32  ;;  %v16334_v43 = vld [vmem:[#allocation19_spill] sm:$0xff] }
 0x28b   :  { %1971 = vmatprep.subr.mxu1 %v12958_v46  ;;  %1686 = vmatpush1.msra.mxu0 %v13080_v6  ;;  %v16335_v46 = vld [vmem:[#allocation20_spill] sm:$0xff] }
 0x28c   :  { %1973 = vmatpush1.msra.mxu1 %v12962_v48  ;;  %1689 = vmatprep.subr.mxu0 %v13094_v39  ;;  %v16336_v48 = vld [vmem:[#allocation21_spill] sm:$0xff] }
 0x28d   :  { %1975 = vmatprep.subr.mxu1 %v12973_v53  ;;  %1692 = vmatpush1.msra.mxu0 %v13106_v44  ;;  %v16339_v53 = vld [vmem:[#allocation24_spill] sm:$0xff] }
 0x28e   :  { %1977 = vmatpush1.msra.mxu1 %v12977_v55  ;;  %1695 = vmatprep.subr.mxu0 %v13125_v60  ;;  %v16340_v55 = vld [vmem:[#allocation25_spill] sm:$0xff] }
 0x28f   :  { %1979 = vmatprep.subr.mxu1 %v12986_v59  ;;  %1698 = vmatpush1.msra.mxu0 %v13134_v1  ;;  %v16343_v59 = vld [vmem:[#allocation29_spill] sm:$0xff]  ;;  %v1371_v1 = vld [vmem:[#allocation2] sm:$0xc] }
 0x290   :  { %1731 = vmatprep.mubr.f32.mxu0 %v16326_v41  ;;  %1981 = vmatpush1.msra.mxu1 %v12993_v62  ;;  %v16344_v62 = vld [vmem:[#allocation30_spill] sm:$0xff] }
 0x291   :  { %1734 = vmatmul.mubr.f32.vlgmr.msra.gmra.mxu0 %v1473_v30  ;;  %1849 = vmatprep.subr.mxu0 %v12971_v52  ;;  %v16338_v52 = vld [vmem:[#allocation23_spill] sm:$0xff]  ;;  %v2091_v30 = vld [vmem:[#allocation9 + $0x58] sm:$0xff] }
 0x292   :  { %1983 = vmatprep.subr.mxu1 %v13003_v3  ;;  %1853 = vmatpush1.msra.mxu0 %v16333_v38  ;;  %v16346_v3 = vld [vmem:[#allocation34_spill] sm:$0xff]  ;;  %v13439_v17 = vand.u32 4294901760, %v2091_v30  ;;  %v13441_v38 = vand.u32 4294901760, %v2090_v18 }
 0x293   :  { %1985 = vmatpush1.msra.mxu1 %v13014_v11  ;;  %1857 = vmatprep.subr.mxu0 %v16334_v43  ;;  %v2089_v43 = vld [vmem:[#allocation9 + $0x48] sm:$0xff] }
 0x294   :  { %1987 = vmatprep.subr.mxu1 %v13025_v19  ;;  %1861 = vmatpush1.msra.mxu0 %v16335_v46  ;;  %v2088_v46 = vld [vmem:[#allocation9 + $0x40] sm:$0xff] }
 0x295   :  { %1989 = vmatpush1.msra.mxu1 %v13034_v16  ;;  %1865 = vmatprep.subr.mxu0 %v16336_v48  ;;  %v13444_v48 = vsub.f32 %v2095_v57, %v13431_v54 }
 0x296   :  { %1991 = vmatprep.subr.mxu1 %v13047_v26  ;;  %1869 = vmatpush1.msra.mxu0 %v16337_v50  ;;  %v13447_v50 = vsub.f32 %v2094_v21, %v13433_v22 }
 0x297   :  { %1993 = vmatpush1.msra.mxu1 %v13060_v29  ;;  %1873 = vmatprep.subr.mxu0 %v16338_v52  ;;  %16348 = vst [vmem:[#allocation33_spill] sm:$0xff] %v13444_v48 }
 0x298   :  { %1995 = vmatprep.subr.mxu1 %v13082_v35  ;;  %1877 = vmatpush1.msra.mxu0 %v16339_v53  ;;  %v13452_v53 = vand.u32 4294901760, %v2089_v43 }
 0x299   :  { %1997 = vmatpush1.msra.mxu1 %v13091_v10  ;;  %2030 = vmatprep.mubr.f32.mxu1 %v16326_v41 }
 0x29a   :  { %1881 = vmatprep.subr.mxu0 %v16340_v55  ;;  %2032 = vmatmul.mubr.f32.vlgmr.msra.gmra.mxu1 %v13349_v40  ;;  %v13456_v55 = vsub.f32 %v2092_v27, %v13437_v20 }
 0x29b   :  { %1885 = vmatpush1.msra.mxu0 %v16341_v56  ;;  %1942 = vmatprep.mubr.f32.mxu0 %v16326_v41  ;;  %v13459_v56 = vsub.f32 %v2091_v30, %v13439_v17 }
 0x29c   :  { %1889 = vmatprep.subr.mxu0 %v16342_v58  ;;  %2337 = vmatprep.mubr.f32.mxu1 %v16326_v41  ;;  %v13462_v58 = vsub.f32 %v2090_v18, %v13441_v38 }
 0x29d   :  { %1893 = vmatpush1.msra.mxu0 %v16343_v59  ;;  %v13464_v59 = vand.u32 4294901760, %v2088_v46 }
 0x29e   :  { %1897 = vmatprep.subr.mxu0 %v16344_v62  ;;  %v13468_v62 = vand.u32 4294901760, %v13444_v48 }
 0x29f   :  { %1901 = vmatpush1.msra.mxu0 %v16345_v2  ;;  %v13471_v2 = vand.u32 4294901760, %v13447_v50 }
 0x2a0   :  { %1905 = vmatprep.subr.mxu0 %v16346_v3 }
 0x2a1   :  { %1909 = vmatpush1.msra.mxu0 %v16347_v8  ;;  %v13477_v8 = vsub.f32 %v2089_v43, %v13452_v53 }
 0x2a2   :  { %1944 = vmatmul.mubr.f32.vlgmr.msra.gmra.mxu0 %v13349_v40  ;;  %v13435_v40 = vand.u32 4294901760, %v2093_v63  ;;  %2118 = vmatprep.subr.mxu0 %v13431_v54 }
 0x2a3   :  { %2181 = vmatprep.mubr.f32.mxu0 %v16326_v41  ;;  %2120 = vmatpush1.msra.mxu0 %v13433_v22 }
 0x2a4   :  { %v13450_v52 = vsub.f32 %v2093_v63, %v13435_v40  ;;  %2122 = vmatprep.subr.mxu0 %v13435_v40 }
 0x2a5   :  { %2124 = vmatpush1.msra.mxu0 %v13437_v20 }
 0x2a6   :  { %v13474_v3 = vand.u32 4294901760, %v13450_v52  ;;  %2126 = vmatprep.subr.mxu0 %v13439_v17 }
 0x2a7   :  { %2128 = vmatpush1.msra.mxu0 %v13441_v38 }
 0x2a8   :  { %2130 = vmatprep.subr.mxu0 %v13452_v53 }
 0x2a9   :  { %2132 = vmatpush1.msra.mxu0 %v13464_v59 }
 0x338   :  { %v1630_v15 = vpop.f32.mrf.mxu1 }
 0x33a   :  { %v1632_v5 = vpop.f32.mrf.mxu1 }
 0x340   :  { %v1478_v11 = vpop.f32.mrf.mxu0 }
 0x341   :  { %v1631_v16 = vadd.f32 %v1630_v15, %v1478_v11  ;;  %v13481_v15 = vand.u32 4294901760, %v13456_v55 }
 0x342   :  { %v1480_v19 = vpop.f32.mrf.mxu0 }
 0x343   :  { %v1633_v47 = vadd.f32 %v1632_v5, %v1480_v19  ;;  %v13484_v19 = vand.u32 4294901760, %v13459_v56  ;;  %v2212_v5 = vsub.f32 %v13444_v48, %v13468_v62 }
 0x348   :  { %v1825_v28 = vpop.f32.mrf.mxu1 }
 0x34a   :  { %v1827_v6 = vpop.f32.mrf.mxu1 }
 0x351   :  { %v1735_v4 = vpop.f32.mrf.mxu0 }
 0x352   :  { %v1736_v26 = vadd.f32 %v1735_v4, %v1631_v16  ;;  %v13487_v4 = vand.u32 4294901760, %v13462_v58  ;;  %v13490_v16 = vsub.f32 %v2088_v46, %v13464_v59 }
 0x353   :  { %v1737_v29 = vpop.f32.mrf.mxu0 }
 0x354   :  { %v1826_v32 = vadd.f32 %v1825_v28, %v1736_v26  ;;  %v1738_v49 = vadd.f32 %v1737_v29, %v1633_v47  ;;  %v2218_v26 = vsub.f32 %v13447_v50, %v13471_v2  ;;  %v2224_v28 = vsub.f32 %v13450_v52, %v13474_v3 }
 0x355   :  { %v13501_v29 = vand.u32 4294901760, %v13477_v8 }
 0x356   :  { %v1828_v33 = vadd.f32 %v1827_v6, %v1738_v49  ;;  %v2236_v6 = vsub.f32 %v13459_v56, %v13484_v19  ;;  %v2084_v49 = vld [vmem:[#allocation9 + $0x20] sm:$0xff] }
 0x357   :  { %v2248_v47 = vsub.f32 %v13477_v8, %v13501_v29 }
 0x35a   :  { %v2033_v39 = vpop.f32.mrf.mxu1 }
 0x35c   :  { %v2035_v7 = vpop.f32.mrf.mxu1 }
 0x362   :  { %v1945_v35 = vpop.f32.mrf.mxu0 }
 0x363   :  { %v1946_v10 = vadd.f32 %v1945_v35, %v1826_v32  ;;  %v2230_v32 = vsub.f32 %v13456_v55, %v13481_v15  ;;  %v2242_v35 = vsub.f32 %v13462_v58, %v13487_v4 }
 0x364   :  { %v1947_v45 = vpop.f32.mrf.mxu0 }
 0x365   :  { %v2034_v44 = vadd.f32 %v2033_v39, %v1946_v10  ;;  %v1948_v51 = vadd.f32 %v1947_v45, %v1828_v33  ;;  %v13511_v10 = vand.u32 4294901760, %v13490_v16  ;;  %v2087_v39 = vld [vmem:[#allocation9 + $0x38] sm:$0xff]  ;;  %v2082_v45 = vld [vmem:[#allocation9 + $0x10] sm:$0xff] }
 0x367   :  { %v2039_v60 = vrot.slane %v2034_v44, 6  ;;  %v2036_v42 = vadd.f32 %v2035_v7, %v1948_v51  ;;  %16349 = vst [vmem:[#allocation35_spill] sm:$0xff] %v13511_v10  ;;  %v2086_v44 = vld [vmem:[#allocation9 + $0x30] sm:$0xff]  ;;  %v2254_v33 = vsub.f32 %v13490_v16, %v13511_v10  ;;  %v13529_v51 = vand.u32 4294901760, %v2236_v6 }
 0x368   :  { %v13531_v7 = vand.u32 4294901760, %v2087_v39 }
 0x369   :  { %v2041_v14 = vadd.f32 %v2039_v60, %v1371_v1  ;;  %v2055_v0 = vadd.f32 %v13339_v37, %v2036_v42  ;;  %v2085_v60 = vld [vmem:[#allocation9 + $0x28] sm:$0xff]  ;;  %v13514_v1 = vand.u32 4294901760, %v2212_v5  ;;  %16354 = vst [vmem:[#allocation22_spill] sm:$0xff] %v13529_v51  ;;  %v13533_v42 = vand.u32 4294901760, %v2086_v44 }
 0x36a   :  { %v13550_v57 = vsub.f32 %v2087_v39, %v13531_v7  ;;  %2134 = vmatprep.subr.mxu0 %v13531_v7  ;;  %v13560_v27 = vand.u32 4294901760, %v2254_v33 }
 0x36b   :  { %v12540_v24 = vmul.f32 -1.442695, %v2041_v14  ;;  %v2057_v13 = vrot.slane %v2055_v0, 6  ;;  %16350 = vst [vmem:[#allocation18_spill] sm:$0xff] %v13514_v1  ;;  %v13516_v14 = vand.u32 4294901760, %v2218_v26  ;;  %2214 = vmatprep.subr.mxu1 %v13514_v1  ;;  %v13535_v0 = vand.u32 4294901760, %v2085_v60  ;;  %2136 = vmatpush1.msra.mxu0 %v13533_v42 }
 0x36c   :  { %v13553_v21 = vsub.f32 %v2086_v44, %v13533_v42  ;;  %16357 = vst [vmem:[#allocation25_spill] sm:$0xff] %v13560_v27  ;;  %v13574_v46 = vand.u32 4294901760, %v13550_v57 }
 0x36d   :  { %12581 = vpow2.f32 %v12540_v24  ;;  %16351 = vst [vmem:[#allocation19_spill] sm:$0xff] %v13516_v14  ;;  %v13518_v24 = vand.u32 4294901760, %v2224_v28  ;;  %2220 = vmatpush1.msra.mxu1 %v13516_v14  ;;  %v13556_v63 = vsub.f32 %v2085_v60, %v13535_v0  ;;  %2138 = vmatprep.subr.mxu0 %v13535_v0 }
 0x36e   :  { %16358 = vst [vmem:[#allocation26_spill] sm:$0xff] %v13574_v46  ;;  %v2260_v6 = vsub.f32 %v13550_v57, %v13574_v46 }
 0x36f   :  { %16352 = vst [vmem:[#allocation20_spill] sm:$0xff] %v13518_v24  ;;  %2226 = vmatprep.subr.mxu1 %v13518_v24  ;;  %v13580_v5 = vand.u32 4294901760, %v13556_v63 }
 0x371   :  { %16360 = vst [vmem:[#allocation29_spill] sm:$0xff] %v13580_v5  ;;  %v2272_v39 = vsub.f32 %v13556_v63, %v13580_v5 }
 0x37a   :  { %v12582_v36 = vpop.eup %12581 }
 0x37b   :  { %v2045_v12 = vadd.f32 1.0, %v12582_v36  ;;  %v2083_v36 = vld [vmem:[#allocation9 + $0x18] sm:$0xff] }
 0x37d   :  { %12583 = vrcp.f32 %v2045_v12  ;;  %v13523_v12 = vand.u32 4294901760, %v2230_v32 }
 0x37f   :  { %16353 = vst [vmem:[#allocation21_spill] sm:$0xff] %v13523_v12  ;;  %2232 = vmatpush1.msra.mxu1 %v13523_v12 }
 0x380   :  { %2238 = vmatprep.subr.mxu1 %v13529_v51 }
 0x38a   :  { %v13425_v23 = vpop.eup %12583 }
 0x38b   :  { %v2059_v9 = vmul.f32 %v13425_v23, %v2057_v13  ;;  %v13429_v61 = vmul.f32 %v13425_v23, %v2068_v31  ;;  %v13538_v31 = vand.u32 4294901760, %v2242_v35  ;;  %v13540_v13 = vand.u32 4294901760, %v2084_v49 }
 0x38d   :  { %v2060_v34 = vadd.f32 %v2059_v9, %v1372_v25  ;;  %16355 = vst [vmem:[#allocation23_spill] sm:$0xff] %v13538_v31  ;;  %v13542_v9 = vand.u32 4294901760, %v2083_v36  ;;  %v13544_v25 = vand.u32 4294901760, %v2082_v45  ;;  %v13563_v30 = vsub.f32 %v2084_v49, %v13540_v13  ;;  %2244 = vmatpush1.msra.mxu1 %v13538_v31  ;;  %2140 = vmatpush1.msra.mxu0 %v13540_v13 }
 0x38e   :  { %v13610_v49 = vand.u32 4294901760, %v2260_v6  ;;  %v2081_v6 = vld [vmem:[#allocation9 + $0x8] sm:$0xff] }
 0x38f   :  { %12585 = vtanh.f32 %v2060_v34  ;;  %v13547_v34 = vand.u32 4294901760, %v2248_v47  ;;  %v13566_v18 = vsub.f32 %v2083_v36, %v13542_v9  ;;  %v13569_v43 = vsub.f32 %v2082_v45, %v13544_v25  ;;  %2142 = vmatprep.subr.mxu0 %v13542_v9 }
 0x390   :  { %v13585_v26 = vand.u32 4294901760, %v13563_v30  ;;  %2144 = vmatpush1.msra.mxu0 %v13544_v25  ;;  %16364 = vst [vmem:[#allocation36_spill] sm:$0xff] %v13610_v49  ;;  %v13614_v45 = vand.u32 4294901760, %v2272_v39  ;;  %v2080_v39 = vld [vmem:[#allocation9] sm:$0xff] }
 0x391   :  { %16356 = vst [vmem:[#allocation24_spill] sm:$0xff] %v13547_v34  ;;  %v13588_v28 = vand.u32 4294901760, %v13566_v18  ;;  %v13591_v32 = vand.u32 4294901760, %v13569_v43  ;;  %2250 = vmatprep.subr.mxu1 %v13547_v34 }
 0x392   :  { %16361 = vst [vmem:[#allocation30_spill] sm:$0xff] %v13585_v26  ;;  %2256 = vmatpush1.msra.mxu1 %v13560_v27  ;;  %v2278_v44 = vsub.f32 %v13563_v30, %v13585_v26  ;;  %16366 = vst [vmem:[#allocation38_spill] sm:$0xff] %v13614_v45 }
 0x393   :  { %16362 = vst [vmem:[#allocation32_spill] sm:$0xff] %v13588_v28  ;;  %16363 = vst [vmem:[#allocation34_spill] sm:$0xff] %v13591_v32  ;;  %v2284_v60 = vsub.f32 %v13566_v18, %v13588_v28  ;;  %v2290_v47 = vsub.f32 %v13569_v43, %v13591_v32  ;;  %2262 = vmatprep.subr.mxu1 %v13610_v49 }
 0x394   :  { %v13616_v33 = vand.u32 4294901760, %v2278_v44  ;;  %v13630_v44 = vand.u32 4294901760, %v2080_v39 }
 0x395   :  { %v13619_v37 = vand.u32 4294901760, %v2284_v60  ;;  %v13622_v27 = vand.u32 4294901760, %v2290_v47 }
 0x396   :  { %16367 = vst [vmem:[#allocation39_spill] sm:$0xff] %v13616_v33  ;;  %v13637_v47 = vsub.f32 %v2080_v39, %v13630_v44 }
 0x397   :  { %16368 = vst [vmem:[#allocation40_spill] sm:$0xff] %v13619_v37  ;;  %16369 = vst [vmem:[#allocation41_spill] sm:$0xff] %v13622_v27 }
 0x39c   :  { %v12586_v11 = vpop.eup %12585 }
 0x39d   :  { %2064 = vrot.lane.b32.xlu1 %v12586_v11, %s12810_s13  ;;  %v13577_v11 = vand.u32 4294901760, %v13553_v21 }
 0x39f   :  { %16359 = vst [vmem:[#allocation28_spill] sm:$0xff] %v13577_v11  ;;  %v2266_v35 = vsub.f32 %v13553_v21, %v13577_v11 }
 0x3a1   :  { %v13612_v36 = vand.u32 4294901760, %v2266_v35  ;;  %v13628_v35 = vand.u32 4294901760, %v2081_v6 }
 0x3a3   :  { %16365 = vst [vmem:[#allocation37_spill] sm:$0xff] %v13612_v36  ;;  %2268 = vmatpush1.msra.mxu1 %v13612_v36  ;;  %v13633_v60 = vsub.f32 %v2081_v6, %v13628_v35  ;;  %2146 = vmatprep.subr.mxu0 %v13628_v35 }
 0x3a4   :  { %2274 = vmatprep.subr.mxu1 %v13614_v45  ;;  %2148 = vmatpush1.msra.mxu0 %v13630_v44 }
 0x3a5   :  { %2280 = vmatpush1.msra.mxu1 %v13616_v33  ;;  %2363 = vmatprep.subr.mxu0 %v13444_v48  ;;  %v2062_v48 = vsub.f32 1.0, %v13425_v23 }
 0x3a6   :  { %2286 = vmatprep.subr.mxu1 %v13619_v37  ;;  %v13641_v37 = vand.u32 4294901760, %v13633_v60 }
 0x3a7   :  { %2292 = vmatpush1.msra.mxu1 %v13622_v27  ;;  %v13645_v27 = vand.u32 4294901760, %v13637_v47 }
 0x3a8   :  { %16370 = vst [vmem:[#allocation42_spill] sm:$0xff] %v13641_v37  ;;  %v2296_v33 = vsub.f32 %v13633_v60, %v13641_v37 }
 0x3a9   :  { %16371 = vst [vmem:[#allocation43_spill] sm:$0xff] %v13645_v27  ;;  %v2302_v6 = vsub.f32 %v13637_v47, %v13645_v27 }
 0x3aa   :  { %v13651_v45 = vand.u32 4294901760, %v2296_v33 }
 0x3ab   :  { %v13653_v39 = vand.u32 4294901760, %v2302_v6 }
 0x3ac   :  { %16372 = vst [vmem:[#allocation44_spill] sm:$0xff] %v13651_v45  ;;  %2298 = vmatprep.subr.mxu1 %v13651_v45 }
 0x3ad   :  { %16373 = vst [vmem:[#allocation45_spill] sm:$0xff] %v13653_v39  ;;  %2304 = vmatpush1.msra.mxu1 %v13653_v39 }
 0x3ae   :  { %2467 = vmatprep.subr.mxu1 %v13431_v54 }
 0x40f   :  { %v2065_v36 = vpop.permute.xlu1 %2064 }
 0x410   :  { %v2067_v49 = vmul.f32 %v2065_v36, %v2062_v48  ;;  %v16377_v36 = vld [vmem:[#allocation24_spill] sm:$0xff] }
 0x412   :  { %v13660_v34 = vadd.f32 %v13429_v61, %v2067_v49  ;;  %v16376_v49 = vld [vmem:[#allocation23_spill] sm:$0xff] }
 0x414   :  { %16374 = vst [vmem:[#allocation46_spill] sm:$0xff] %v13660_v34  ;;  %v2096_v31 = vrot.slane %v13660_v34, 2 }
 0x416   :  { %2097 = vrot.lane.b32.xlu1 %v2096_v31, %s12810_s13  ;;  %v16375_v31 = vld [vmem:[#allocation43_spill] sm:$0xff] }
 0x488   :  { %v2098_v33 = vpop.permute.xlu1 %2097 }
 0x489   :  { %v2099_v6 = vsel %vm667_vm1, %v2098_v33, 0  ;;  %v16379_v33 = vld [vmem:[#allocation36_spill] sm:$0xff] }
 0x48a   :  { %v13665_v27 = vand.u32 4294901760, %v2099_v6 }
 0x48c   :  { %v2183_v39 = vsub.f32 %v2099_v6, %v13665_v27  ;;  %2339 = vmatmul.mubr.f32.vlgmr.msra.gmra.mxu1 %v13665_v27  ;;  %v16380_v6 = vld [vmem:[#allocation37_spill] sm:$0xff] }
 0x48d   :  { %2469 = vmatpush1.msra.mxu1 %v13433_v22  ;;  %2530 = vmatprep.mubr.f32.mxu1 %v16326_v41 }
 0x48e   :  { %v2184_v23 = vand.u32 4294901760, %v2183_v39  ;;  %2471 = vmatprep.subr.mxu1 %v13435_v40 }
 0x48f   :  { %2473 = vmatpush1.msra.mxu1 %v13437_v20 }
 0x490   :  { %v2185_v61 = vsub.f32 %v2183_v39, %v2184_v23  ;;  %2475 = vmatprep.subr.mxu1 %v13439_v17 }
 0x491   :  { %2477 = vmatpush1.msra.mxu1 %v13441_v38 }
 0x492   :  { %v2186_v48 = vand.u32 4294901760, %v2185_v61  ;;  %2479 = vmatprep.subr.mxu1 %v13452_v53  ;;  %v16382_v61 = vld [vmem:[#allocation39_spill] sm:$0xff] }
 0x493   :  { %2481 = vmatpush1.msra.mxu1 %v13464_v59 }
 0x494   :  { %2483 = vmatprep.subr.mxu1 %v13531_v7  ;;  %2187 = vmatmul.mubr.f32.vlgmr.msra.gmra.mxu0 %v2186_v48  ;;  %v16384_v48 = vld [vmem:[#allocation41_spill] sm:$0xff] }
 0x495   :  { %2366 = vmatpush1.msra.mxu0 %v13447_v50  ;;  %2485 = vmatpush1.msra.mxu1 %v13533_v42 }
 0x496   :  { %2369 = vmatprep.subr.mxu0 %v13450_v52  ;;  %2487 = vmatprep.subr.mxu1 %v13535_v0 }
 0x497   :  { %2372 = vmatpush1.msra.mxu0 %v13456_v55  ;;  %2489 = vmatpush1.msra.mxu1 %v13540_v13 }
 0x498   :  { %2375 = vmatprep.subr.mxu0 %v13459_v56  ;;  %2491 = vmatprep.subr.mxu1 %v13542_v9 }
 0x499   :  { %2378 = vmatpush1.msra.mxu0 %v13462_v58  ;;  %2493 = vmatpush1.msra.mxu1 %v13544_v25 }
 0x49a   :  { %2381 = vmatprep.subr.mxu0 %v13477_v8  ;;  %2495 = vmatprep.subr.mxu1 %v13628_v35 }
 0x49b   :  { %2384 = vmatpush1.msra.mxu0 %v13490_v16  ;;  %2497 = vmatpush1.msra.mxu1 %v13630_v44 }
 0x49c   :  { %2387 = vmatprep.subr.mxu0 %v13550_v57  ;;  %2534 = vmatmul.mubr.f32.vlgmr.msra.gmra.mxu1 %v2184_v23  ;;  %v16381_v23 = vld [vmem:[#allocation38_spill] sm:$0xff] }
 0x49d   :  { %2677 = vmatprep.subr.mxu1 %v13431_v54  ;;  %2390 = vmatpush1.msra.mxu0 %v13553_v21 }
 0x49e   :  { %2679 = vmatpush1.msra.mxu1 %v13433_v22  ;;  %2393 = vmatprep.subr.mxu0 %v13556_v63 }
 0x49f   :  { %2681 = vmatprep.subr.mxu1 %v13435_v40  ;;  %2396 = vmatpush1.msra.mxu0 %v13563_v30 }
 0x4a0   :  { %2683 = vmatpush1.msra.mxu1 %v13437_v20  ;;  %2399 = vmatprep.subr.mxu0 %v13566_v18 }
 0x4a1   :  { %2685 = vmatprep.subr.mxu1 %v13439_v17  ;;  %2402 = vmatpush1.msra.mxu0 %v13569_v43 }
 0x4a2   :  { %2687 = vmatpush1.msra.mxu1 %v13441_v38  ;;  %2405 = vmatprep.subr.mxu0 %v13633_v60 }
 0x4a3   :  { %2689 = vmatprep.subr.mxu1 %v13452_v53  ;;  %2408 = vmatpush1.msra.mxu0 %v13637_v47 }
 0x4a4   :  { %2441 = vmatprep.mubr.f32.mxu0 %v16326_v41  ;;  %2691 = vmatpush1.msra.mxu1 %v13464_v59 }
 0x4a5   :  { %2444 = vmatmul.mubr.f32.vlgmr.msra.gmra.mxu0 %v2183_v39  ;;  %2559 = vmatprep.subr.mxu0 %v13468_v62  ;;  %v16378_v39 = vld [vmem:[#allocation25_spill] sm:$0xff] }
 0x4a6   :  { %2693 = vmatprep.subr.mxu1 %v13531_v7  ;;  %2563 = vmatpush1.msra.mxu0 %v13471_v2 }
 0x4a7   :  { %2695 = vmatpush1.msra.mxu1 %v13533_v42  ;;  %2567 = vmatprep.subr.mxu0 %v13474_v3 }
 0x4a8   :  { %2697 = vmatprep.subr.mxu1 %v13535_v0  ;;  %2571 = vmatpush1.msra.mxu0 %v13481_v15 }
 0x4a9   :  { %2699 = vmatpush1.msra.mxu1 %v13540_v13  ;;  %2575 = vmatprep.subr.mxu0 %v13484_v19 }
 0x4aa   :  { %2701 = vmatprep.subr.mxu1 %v13542_v9  ;;  %2579 = vmatpush1.msra.mxu0 %v13487_v4 }
 0x4ab   :  { %2703 = vmatpush1.msra.mxu1 %v13544_v25  ;;  %2583 = vmatprep.subr.mxu0 %v13501_v29 }
 0x4ac   :  { %2705 = vmatprep.subr.mxu1 %v13628_v35  ;;  %2587 = vmatpush1.msra.mxu0 %v13511_v10 }
 0x4ad   :  { %2707 = vmatpush1.msra.mxu1 %v13630_v44  ;;  %2740 = vmatprep.mubr.f32.mxu1 %v16326_v41 }
 0x4ae   :  { %2591 = vmatprep.subr.mxu0 %v13574_v46  ;;  %2742 = vmatmul.mubr.f32.vlgmr.msra.gmra.mxu1 %v13665_v27 }
 0x4af   :  { %2595 = vmatpush1.msra.mxu0 %v13577_v11  ;;  %2652 = vmatprep.mubr.f32.mxu0 %v16326_v41 }
 0x4b0   :  { %2599 = vmatprep.subr.mxu0 %v13580_v5  ;;  %2924 = vmatprep.subr.mxu1 %v13514_v1 }
 0x4b1   :  { %2603 = vmatpush1.msra.mxu0 %v13585_v26  ;;  %2930 = vmatpush1.msra.mxu1 %v13516_v14  ;;  %v2078_v14 = vld [vmem:[#allocation2] sm:$0x30] }
 0x4b2   :  { %2607 = vmatprep.subr.mxu0 %v13588_v28  ;;  %2936 = vmatprep.subr.mxu1 %v13518_v24 }
 0x4b3   :  { %2611 = vmatpush1.msra.mxu0 %v13591_v32  ;;  %2942 = vmatpush1.msra.mxu1 %v13523_v12 }
 0x4b4   :  { %2615 = vmatprep.subr.mxu0 %v13641_v37  ;;  %2948 = vmatprep.subr.mxu1 %v13529_v51 }
 0x4b5   :  { %2619 = vmatpush1.msra.mxu0 %v16375_v31  ;;  %2954 = vmatpush1.msra.mxu1 %v16376_v49 }
 0x4b6   :  { %2654 = vmatmul.mubr.f32.vlgmr.msra.gmra.mxu0 %v13665_v27  ;;  %2960 = vmatprep.subr.mxu1 %v16377_v36  ;;  %v16383_v27 = vld [vmem:[#allocation40_spill] sm:$0xff] }
 0x4b7   :  { %2966 = vmatpush1.msra.mxu1 %v16378_v39  ;;  %2828 = vmatprep.subr.mxu0 %v13431_v54 }
 0x4b8   :  { %2972 = vmatprep.subr.mxu1 %v16379_v33  ;;  %2830 = vmatpush1.msra.mxu0 %v13433_v22 }
 0x4b9   :  { %2978 = vmatpush1.msra.mxu1 %v16380_v6  ;;  %2832 = vmatprep.subr.mxu0 %v13435_v40  ;;  %v16385_v6 = vld [vmem:[#allocation45_spill] sm:$0xff] }
 0x4ba   :  { %2984 = vmatprep.subr.mxu1 %v16381_v23  ;;  %2834 = vmatpush1.msra.mxu0 %v13437_v20 }
 0x4bb   :  { %2990 = vmatpush1.msra.mxu1 %v16382_v61  ;;  %2836 = vmatprep.subr.mxu0 %v13439_v17 }
 0x4bc   :  { %2996 = vmatprep.subr.mxu1 %v16383_v27  ;;  %2838 = vmatpush1.msra.mxu0 %v13441_v38 }
 0x4bd   :  { %3002 = vmatpush1.msra.mxu1 %v16384_v48  ;;  %2840 = vmatprep.subr.mxu0 %v13452_v53 }
 0x4be   :  { %3008 = vmatprep.subr.mxu1 %v13651_v45  ;;  %2842 = vmatpush1.msra.mxu0 %v13464_v59 }
 0x4bf   :  { %3014 = vmatpush1.msra.mxu1 %v16385_v6  ;;  %2844 = vmatprep.subr.mxu0 %v13531_v7  ;;  %v16386_v6 = vld [vmem:[#allocation33_spill] sm:$0xff] }
 0x4c0   :  { %3047 = vmatprep.mubr.f32.mxu1 %v16326_v41  ;;  %3177 = vmatprep.subr.mxu1 %v13431_v54 }
 0x4c1   :  { %2846 = vmatpush1.msra.mxu0 %v13533_v42  ;;  %2891 = vmatprep.mubr.f32.mxu0 %v16326_v41 }
 0x4c2   :  { %2848 = vmatprep.subr.mxu0 %v13535_v0 }
 0x4c3   :  { %2850 = vmatpush1.msra.mxu0 %v13540_v13 }
 0x4c4   :  { %2852 = vmatprep.subr.mxu0 %v13542_v9 }
 0x4c5   :  { %2854 = vmatpush1.msra.mxu0 %v13544_v25 }
 0x4c6   :  { %2856 = vmatprep.subr.mxu0 %v13628_v35 }
 0x4c7   :  { %2858 = vmatpush1.msra.mxu0 %v13630_v44 }
 0x4c8   :  { %3073 = vmatprep.subr.mxu0 %v16386_v6 }
 0x54c   :  { %v2340_v48 = vpop.f32.mrf.mxu1 }
 0x54e   :  { %v2342_v33 = vpop.f32.mrf.mxu1 }
 0x554   :  { %v2188_v45 = vpop.f32.mrf.mxu0 }
 0x555   :  { %v2341_v23 = vadd.f32 %v2340_v48, %v2188_v45 }
 0x556   :  { %v2190_v27 = vpop.f32.mrf.mxu0 }
 0x557   :  { %v2343_v6 = vadd.f32 %v2342_v33, %v2190_v27 }
 0x55c   :  { %v2535_v36 = vpop.f32.mrf.mxu1 }
 0x55e   :  { %v2537_v51 = vpop.f32.mrf.mxu1 }
 0x565   :  { %v2445_v61 = vpop.f32.mrf.mxu0 }
 0x566   :  { %v2446_v39 = vadd.f32 %v2445_v61, %v2341_v23 }
 0x567   :  { %v2447_v49 = vpop.f32.mrf.mxu0 }
 0x568   :  { %v2536_v31 = vadd.f32 %v2535_v36, %v2446_v39  ;;  %v2448_v5 = vadd.f32 %v2447_v49, %v2343_v6  ;;  %v16387_v39 = vld [vmem:[#allocation31_spill] sm:$0xff] }
 0x56a   :  { %v2538_v48 = vadd.f32 %v2537_v51, %v2448_v5 }
 0x56e   :  { %v2743_v32 = vpop.f32.mrf.mxu1 }
 0x570   :  { %v2745_v61 = vpop.f32.mrf.mxu1 }
 0x576   :  { %v2655_v37 = vpop.f32.mrf.mxu0 }
 0x577   :  { %v2656_v12 = vadd.f32 %v2655_v37, %v2536_v31 }
 0x578   :  { %v2657_v46 = vpop.f32.mrf.mxu0 }
 0x579   :  { %v2744_v24 = vadd.f32 %v2743_v32, %v2656_v12  ;;  %v2658_v23 = vadd.f32 %v2657_v46, %v2538_v48 }
 0x57b   :  { %v2749_v28 = vrot.slane %v2744_v24, 4  ;;  %v2746_v36 = vadd.f32 %v2745_v61, %v2658_v23  ;;  %v2079_v24 = vld [vmem:[#allocation2 + $0x8] sm:$0x30]  ;;  %v16390_v61 = vld [vmem:[#allocation26_spill] sm:$0xff] }
 0x57c   :  { %v16389_v23 = vld [vmem:[#allocation35_spill] sm:$0xff] }
 0x57d   :  { %v2751_v26 = vadd.f32 %v2749_v28, %v2078_v14  ;;  %v2765_v10 = vadd.f32 %v16387_v39, %v2746_v36  ;;  %v16391_v36 = vld [vmem:[#allocation28_spill] sm:$0xff]  ;;  %v16392_v39 = vld [vmem:[#allocation29_spill] sm:$0xff] }
 0x57f   :  { %v12542_v1 = vmul.f32 -1.442695, %v2751_v26  ;;  %v2767_v37 = vrot.slane %v2765_v10, 4  ;;  %v2778_v26 = vrot.slane %v13660_v34, 6 }
 0x581   :  { %12587 = vpow2.f32 %v12542_v1 }
 0x58e   :  { %v12588_v11 = vpop.eup %12587 }
 0x58f   :  { %v2755_v45 = vadd.f32 1.0, %v12588_v11 }
 0x591   :  { %12589 = vrcp.f32 %v2755_v45 }
 0x59e   :  { %v12590_v31 = vpop.eup %12589 }
 0x59f   :  { %v2769_v12 = vmul.f32 %v12590_v31, %v2767_v37  ;;  %v2772_v1 = vsub.f32 1.0, %v12590_v31  ;;  %v2780_v51 = vmul.f32 %v12590_v31, %v2778_v26  ;;  %v16393_v37 = vld [vmem:[#allocation18_spill] sm:$0xff] }
 0x5a0   :  { %v16394_v31 = vld [vmem:[#allocation30_spill] sm:$0xff] }
 0x5a1   :  { %v2770_v32 = vadd.f32 %v2769_v12, %v2079_v24  ;;  %v16395_v12 = vld [vmem:[#allocation19_spill] sm:$0xff]  ;;  %v16396_v24 = vld [vmem:[#allocation32_spill] sm:$0xff]  ;;  %v16400_v26 = vld [vmem:[#allocation42_spill] sm:$0xff] }
 0x5a3   :  { %12591 = vtanh.f32 %v2770_v32  ;;  %v16397_v32 = vld [vmem:[#allocation20_spill] sm:$0xff] }
 0x5b0   :  { %v12592_v14 = vpop.eup %12591 }
 0x5b1   :  { %2774 = vrot.lane.b32.xlu0 %v12592_v14, %s12810_s13  ;;  %v16398_v14 = vld [vmem:[#allocation34_spill] sm:$0xff] }
 0x623   :  { %v2775_v11 = vpop.permute.xlu0 %2774 }
 0x624   :  { %v2777_v5 = vmul.f32 %v2775_v11, %v2772_v1  ;;  %v16399_v1 = vld [vmem:[#allocation21_spill] sm:$0xff]  ;;  %v16401_v11 = vld [vmem:[#allocation22_spill] sm:$0xff] }
 0x626   :  { %v13776_v46 = vadd.f32 %v2780_v51, %v2777_v5  ;;  %v16402_v51 = vld [vmem:[#allocation43_spill] sm:$0xff] }
 0x627   :  { %v16403_v5 = vld [vmem:[#allocation23_spill] sm:$0xff] }
 0x628   :  { %16388 = vst [vmem:[#allocation31_spill] sm:$0xff] %v13776_v46  ;;  %v2806_v28 = vrot.slane %v13776_v46, 4 }
 0x62a   :  { %2807 = vrot.lane.b32.xlu1 %v2806_v28, %s12810_s13  ;;  %v16404_v28 = vld [vmem:[#allocation24_spill] sm:$0xff] }
 0x69c   :  { %v2808_v10 = vpop.permute.xlu1 %2807 }
 0x69d   :  { %v2809_v49 = vsel %vm667_vm1, %v2808_v10, 0  ;;  %v16405_v10 = vld [vmem:[#allocation25_spill] sm:$0xff] }
 0x69e   :  { %v13781_v33 = vand.u32 4294901760, %v2809_v49 }
 0x6a0   :  { %v2893_v6 = vsub.f32 %v2809_v49, %v13781_v33  ;;  %3049 = vmatmul.mubr.f32.vlgmr.msra.gmra.mxu1 %v13781_v33  ;;  %v16406_v49 = vld [vmem:[#allocation36_spill] sm:$0xff] }
 0x6a1   :  { %3179 = vmatpush1.msra.mxu1 %v13433_v22  ;;  %3240 = vmatprep.mubr.f32.mxu1 %v16326_v41 }
 0x6a2   :  { %v2894_v27 = vand.u32 4294901760, %v2893_v6  ;;  %3181 = vmatprep.subr.mxu1 %v13435_v40 }
 0x6a3   :  { %3183 = vmatpush1.msra.mxu1 %v13437_v20 }
 0x6a4   :  { %v2895_v45 = vsub.f32 %v2893_v6, %v2894_v27  ;;  %3185 = vmatprep.subr.mxu1 %v13439_v17 }
 0x6a5   :  { %3187 = vmatpush1.msra.mxu1 %v13441_v38 }
 0x6a6   :  { %v2896_v48 = vand.u32 4294901760, %v2895_v45  ;;  %3189 = vmatprep.subr.mxu1 %v13452_v53  ;;  %v16409_v45 = vld [vmem:[#allocation39_spill] sm:$0xff] }
 0x6a7   :  { %3191 = vmatpush1.msra.mxu1 %v13464_v59 }
 0x6a8   :  { %3193 = vmatprep.subr.mxu1 %v13531_v7  ;;  %2897 = vmatmul.mubr.f32.vlgmr.msra.gmra.mxu0 %v2896_v48  ;;  %v16411_v48 = vld [vmem:[#allocation41_spill] sm:$0xff] }
 0x6a9   :  { %3076 = vmatpush1.msra.mxu0 %v13447_v50  ;;  %3195 = vmatpush1.msra.mxu1 %v13533_v42 }
 0x6aa   :  { %3079 = vmatprep.subr.mxu0 %v13450_v52  ;;  %3197 = vmatprep.subr.mxu1 %v13535_v0 }
 0x6ab   :  { %3082 = vmatpush1.msra.mxu0 %v13456_v55  ;;  %3199 = vmatpush1.msra.mxu1 %v13540_v13 }
 0x6ac   :  { %3085 = vmatprep.subr.mxu0 %v13459_v56  ;;  %3201 = vmatprep.subr.mxu1 %v13542_v9 }
 0x6ad   :  { %3088 = vmatpush1.msra.mxu0 %v13462_v58  ;;  %3203 = vmatpush1.msra.mxu1 %v13544_v25 }
 0x6ae   :  { %3091 = vmatprep.subr.mxu0 %v13477_v8  ;;  %3205 = vmatprep.subr.mxu1 %v13628_v35 }
 0x6af   :  { %3094 = vmatpush1.msra.mxu0 %v13490_v16  ;;  %3207 = vmatpush1.msra.mxu1 %v13630_v44 }
 0x6b0   :  { %3097 = vmatprep.subr.mxu0 %v13550_v57  ;;  %3244 = vmatmul.mubr.f32.vlgmr.msra.gmra.mxu1 %v2894_v27  ;;  %v16408_v27 = vld [vmem:[#allocation38_spill] sm:$0xff] }
 0x6b1   :  { %3387 = vmatprep.subr.mxu1 %v13431_v54  ;;  %3100 = vmatpush1.msra.mxu0 %v13553_v21 }
 0x6b2   :  { %3389 = vmatpush1.msra.mxu1 %v13433_v22  ;;  %3103 = vmatprep.subr.mxu0 %v13556_v63 }
 0x6b3   :  { %3391 = vmatprep.subr.mxu1 %v13435_v40  ;;  %3106 = vmatpush1.msra.mxu0 %v13563_v30 }
 0x6b4   :  { %3393 = vmatpush1.msra.mxu1 %v13437_v20  ;;  %3109 = vmatprep.subr.mxu0 %v13566_v18 }
 0x6b5   :  { %3395 = vmatprep.subr.mxu1 %v13439_v17  ;;  %3112 = vmatpush1.msra.mxu0 %v13569_v43 }
 0x6b6   :  { %3397 = vmatpush1.msra.mxu1 %v13441_v38  ;;  %3115 = vmatprep.subr.mxu0 %v13633_v60 }
 0x6b7   :  { %3399 = vmatprep.subr.mxu1 %v13452_v53  ;;  %3118 = vmatpush1.msra.mxu0 %v13637_v47 }
 0x6b8   :  { %3151 = vmatprep.mubr.f32.mxu0 %v16326_v41  ;;  %3401 = vmatpush1.msra.mxu1 %v13464_v59 }
 0x6b9   :  { %3154 = vmatmul.mubr.f32.vlgmr.msra.gmra.mxu0 %v2893_v6  ;;  %3269 = vmatprep.subr.mxu0 %v13468_v62  ;;  %v16407_v6 = vld [vmem:[#allocation37_spill] sm:$0xff] }
 0x6ba   :  { %3403 = vmatprep.subr.mxu1 %v13531_v7  ;;  %3273 = vmatpush1.msra.mxu0 %v13471_v2 }
 0x6bb   :  { %3405 = vmatpush1.msra.mxu1 %v13533_v42  ;;  %3277 = vmatprep.subr.mxu0 %v13474_v3 }
 0x6bc   :  { %3407 = vmatprep.subr.mxu1 %v13535_v0  ;;  %3281 = vmatpush1.msra.mxu0 %v13481_v15 }
 0x6bd   :  { %3409 = vmatpush1.msra.mxu1 %v13540_v13  ;;  %3285 = vmatprep.subr.mxu0 %v13484_v19 }
 0x6be   :  { %3411 = vmatprep.subr.mxu1 %v13542_v9  ;;  %3289 = vmatpush1.msra.mxu0 %v13487_v4 }
 0x6bf   :  { %3413 = vmatpush1.msra.mxu1 %v13544_v25  ;;  %3293 = vmatprep.subr.mxu0 %v13501_v29 }
 0x6c0   :  { %3415 = vmatprep.subr.mxu1 %v13628_v35  ;;  %3297 = vmatpush1.msra.mxu0 %v16389_v23 }
 0x6c1   :  { %3417 = vmatpush1.msra.mxu1 %v13630_v44  ;;  %3450 = vmatprep.mubr.f32.mxu1 %v16326_v41 }
 0x6c2   :  { %3301 = vmatprep.subr.mxu0 %v16390_v61  ;;  %3452 = vmatmul.mubr.f32.vlgmr.msra.gmra.mxu1 %v13781_v33 }
 0x6c3   :  { %3305 = vmatpush1.msra.mxu0 %v16391_v36  ;;  %3362 = vmatprep.mubr.f32.mxu0 %v16326_v41 }
 0x6c4   :  { %3309 = vmatprep.subr.mxu0 %v16392_v39  ;;  %3634 = vmatprep.subr.mxu1 %v16393_v37  ;;  %v16412_v37 = vld [vmem:[#allocation44_spill] sm:$0xff] }
 0x6c5   :  { %3313 = vmatpush1.msra.mxu0 %v16394_v31  ;;  %3640 = vmatpush1.msra.mxu1 %v16395_v12  ;;  %v16413_v12 = vld [vmem:[#allocation45_spill] sm:$0xff] }
 0x6c6   :  { %3317 = vmatprep.subr.mxu0 %v16396_v24  ;;  %3646 = vmatprep.subr.mxu1 %v16397_v32  ;;  %v16414_v32 = vld [vmem:[#allocation33_spill] sm:$0xff] }
 0x6c7   :  { %3321 = vmatpush1.msra.mxu0 %v16398_v14  ;;  %3652 = vmatpush1.msra.mxu1 %v16399_v1  ;;  %v2788_v14 = vld [vmem:[#allocation2] sm:$0xc0] }
 0x6c8   :  { %3325 = vmatprep.subr.mxu0 %v16400_v26  ;;  %3658 = vmatprep.subr.mxu1 %v16401_v11 }
 0x6c9   :  { %3329 = vmatpush1.msra.mxu0 %v16402_v51  ;;  %3664 = vmatpush1.msra.mxu1 %v16403_v5 }
 0x6ca   :  { %3364 = vmatmul.mubr.f32.vlgmr.msra.gmra.mxu0 %v13781_v33  ;;  %3670 = vmatprep.subr.mxu1 %v16404_v28  ;;  %v16410_v33 = vld [vmem:[#allocation40_spill] sm:$0xff] }
 0x6cb   :  { %3676 = vmatpush1.msra.mxu1 %v16405_v10  ;;  %3538 = vmatprep.subr.mxu0 %v13431_v54 }
 0x6cc   :  { %3682 = vmatprep.subr.mxu1 %v16406_v49  ;;  %3540 = vmatpush1.msra.mxu0 %v13433_v22 }
 0x6cd   :  { %3688 = vmatpush1.msra.mxu1 %v16407_v6  ;;  %3542 = vmatprep.subr.mxu0 %v13435_v40 }
 0x6ce   :  { %3694 = vmatprep.subr.mxu1 %v16408_v27  ;;  %3544 = vmatpush1.msra.mxu0 %v13437_v20 }
 0x6cf   :  { %3700 = vmatpush1.msra.mxu1 %v16409_v45  ;;  %3546 = vmatprep.subr.mxu0 %v13439_v17 }
 0x6d0   :  { %3706 = vmatprep.subr.mxu1 %v16410_v33  ;;  %3548 = vmatpush1.msra.mxu0 %v13441_v38 }
 0x6d1   :  { %3712 = vmatpush1.msra.mxu1 %v16411_v48  ;;  %3550 = vmatprep.subr.mxu0 %v13452_v53 }
 0x6d2   :  { %3718 = vmatprep.subr.mxu1 %v16412_v37  ;;  %3552 = vmatpush1.msra.mxu0 %v13464_v59 }
 0x6d3   :  { %3724 = vmatpush1.msra.mxu1 %v16413_v12  ;;  %3554 = vmatprep.subr.mxu0 %v13531_v7 }
 0x6d4   :  { %3757 = vmatprep.mubr.f32.mxu1 %v16326_v41  ;;  %3887 = vmatprep.subr.mxu1 %v13431_v54 }
 0x6d5   :  { %3556 = vmatpush1.msra.mxu0 %v13533_v42  ;;  %3601 = vmatprep.mubr.f32.mxu0 %v16326_v41 }
 0x6d6   :  { %3558 = vmatprep.subr.mxu0 %v13535_v0 }
 0x6d7   :  { %3560 = vmatpush1.msra.mxu0 %v13540_v13 }
 0x6d8   :  { %3562 = vmatprep.subr.mxu0 %v13542_v9 }
 0x6d9   :  { %3564 = vmatpush1.msra.mxu0 %v13544_v25 }
 0x6da   :  { %3566 = vmatprep.subr.mxu0 %v13628_v35 }
 0x6db   :  { %3568 = vmatpush1.msra.mxu0 %v13630_v44 }
 0x6dc   :  { %3783 = vmatprep.subr.mxu0 %v16414_v32 }
 0x760   :  { %v3050_v11 = vpop.f32.mrf.mxu1 }
 0x762   :  { %v3052_v49 = vpop.f32.mrf.mxu1 }
 0x768   :  { %v2898_v1 = vpop.f32.mrf.mxu0 }
 0x769   :  { %v3051_v10 = vadd.f32 %v3050_v11, %v2898_v1 }
 0x76a   :  { %v2900_v5 = vpop.f32.mrf.mxu0 }
 0x76b   :  { %v3053_v32 = vadd.f32 %v3052_v49, %v2900_v5 }
 0x770   :  { %v3245_v27 = vpop.f32.mrf.mxu1 }
 0x772   :  { %v3247_v48 = vpop.f32.mrf.mxu1 }
 0x779   :  { %v3155_v28 = vpop.f32.mrf.mxu0 }
 0x77a   :  { %v3156_v6 = vadd.f32 %v3155_v28, %v3051_v10 }
 0x77b   :  { %v3157_v45 = vpop.f32.mrf.mxu0 }
 0x77c   :  { %v3246_v33 = vadd.f32 %v3245_v27, %v3156_v6  ;;  %v3158_v39 = vadd.f32 %v3157_v45, %v3053_v32  ;;  %v13892_v27 = vld [vmem:[%s16126_s4] ss:$0 sm:$0xff] }
 0x77d   :  { %16415 = vst [vmem:[#allocation35_spill] sm:$0xff] %v13892_v27 }
 0x77e   :  { %v3248_v11 = vadd.f32 %v3247_v48, %v3158_v39 }
 0x782   :  { %v3453_v34 = vpop.f32.mrf.mxu1 }
 0x784   :  { %v3455_v10 = vpop.f32.mrf.mxu1 }
 0x78a   :  { %v3365_v37 = vpop.f32.mrf.mxu0 }
 0x78b   :  { %v3366_v12 = vadd.f32 %v3365_v37, %v3246_v33 }
 0x78c   :  { %v3367_v61 = vpop.f32.mrf.mxu0 }
 0x78d   :  { %v3454_v51 = vadd.f32 %v3453_v34, %v3366_v12  ;;  %v3368_v28 = vadd.f32 %v3367_v61, %v3248_v11  ;;  %v3488_v61 = vrot.slane %v13776_v46, 6 }
 0x78f   :  { %v3459_v26 = vrot.slane %v3454_v51, 2  ;;  %v3456_v6 = vadd.f32 %v3455_v10, %v3368_v28 }
 0x791   :  { %v3461_v24 = vadd.f32 %v3459_v26, %v2788_v14  ;;  %v3475_v34 = vadd.f32 %v13892_v27, %v3456_v6  ;;  %v2789_v26 = vld [vmem:[#allocation2 + $0x8] sm:$0xc0] }
 0x793   :  { %v12544_v31 = vmul.f32 -1.442695, %v3461_v24  ;;  %v3477_v14 = vrot.slane %v3475_v34, 2  ;;  %v4217_v34 = vld [vmem:[#allocation9 + $0x78] sm:$0xff] }
 0x795   :  { %12593 = vpow2.f32 %v12544_v31 }
 0x7a2   :  { %v12594_v36 = vpop.eup %12593 }
 0x7a3   :  { %v3465_v1 = vadd.f32 1.0, %v12594_v36 }
 0x7a5   :  { %12595 = vrcp.f32 %v3465_v1 }
 0x7b2   :  { %v12596_v24 = vpop.eup %12595 }
 0x7b3   :  { %v3479_v31 = vmul.f32 %v12596_v24, %v3477_v14  ;;  %v3482_v36 = vsub.f32 1.0, %v12596_v24  ;;  %v3490_v49 = vmul.f32 %v12596_v24, %v3488_v61  ;;  %v4216_v14 = vld [vmem:[#allocation9 + $0x70] sm:$0xff]  ;;  %v4215_v24 = vld [vmem:[#allocation9 + $0x68] sm:$0xff] }
 0x7b4   :  { %v4212_v61 = vld [vmem:[#allocation9 + $0x50] sm:$0xff] }
 0x7b5   :  { %v3480_v51 = vadd.f32 %v3479_v31, %v2789_v26  ;;  %v13982_v31 = vand.u32 4294901760, %v4217_v34  ;;  %v13984_v26 = vand.u32 4294901760, %v4216_v14 }
 0x7b7   :  { %12597 = vtanh.f32 %v3480_v51  ;;  %v13986_v51 = vand.u32 4294901760, %v4215_v24 }
 0x7c4   :  { %v12598_v5 = vpop.eup %12597 }
 0x7c5   :  { %3484 = vrot.lane.b32.xlu0 %v12598_v5, %s12810_s13  ;;  %v4214_v5 = vld [vmem:[#allocation9 + $0x60] sm:$0xff] }
 0x837   :  { %v3485_v39 = vpop.permute.xlu0 %3484 }
 0x838   :  { %v3487_v45 = vmul.f32 %v3485_v39, %v3482_v36  ;;  %v4213_v36 = vld [vmem:[#allocation9 + $0x58] sm:$0xff]  ;;  %v13988_v39 = vand.u32 4294901760, %v4214_v5 }
 0x83a   :  { %v13897_v33 = vadd.f32 %v3490_v49, %v3487_v45  ;;  %v13990_v49 = vand.u32 4294901760, %v4213_v36  ;;  %v13992_v45 = vand.u32 4294901760, %v4212_v61 }
 0x83c   :  { %16416 = vst [vmem:[#allocation18_spill] sm:$0xff] %v13897_v33  ;;  %v16205_v48 = vrot.slane %v13897_v33, 6 }
 0x83e   :  { %3517 = vrot.lane.b32.xlu1 %v16205_v48, %s12810_s13 }
 0x8b0   :  { %v3518_v37 = vpop.permute.xlu1 %3517 }
 0x8b1   :  { %v3519_v12 = vsel %vm667_vm1, %v3518_v37, 0  ;;  %v4211_v37 = vld [vmem:[#allocation9 + $0x48] sm:$0xff] }
 0x8b2   :  { %v13904_v32 = vand.u32 4294901760, %v3519_v12 }
 0x8b4   :  { %v3603_v1 = vsub.f32 %v3519_v12, %v13904_v32  ;;  %3759 = vmatmul.mubr.f32.vlgmr.msra.gmra.mxu1 %v13904_v32  ;;  %v4210_v12 = vld [vmem:[#allocation9 + $0x40] sm:$0xff] }
 0x8b5   :  { %3889 = vmatpush1.msra.mxu1 %v13433_v22  ;;  %3950 = vmatprep.mubr.f32.mxu1 %v16326_v41 }
 0x8b6   :  { %v3604_v11 = vand.u32 4294901760, %v3603_v1  ;;  %3891 = vmatprep.subr.mxu1 %v13435_v40 }
 0x8b7   :  { %3893 = vmatpush1.msra.mxu1 %v13437_v20 }
 0x8b8   :  { %v3605_v28 = vsub.f32 %v3603_v1, %v3604_v11  ;;  %3895 = vmatprep.subr.mxu1 %v13439_v17 }
 0x8b9   :  { %3897 = vmatpush1.msra.mxu1 %v13441_v38 }
 0x8ba   :  { %v3606_v10 = vand.u32 4294901760, %v3605_v28  ;;  %3899 = vmatprep.subr.mxu1 %v13452_v53  ;;  %v14003_v28 = vand.u32 4294901760, %v4211_v37 }
 0x8bb   :  { %3901 = vmatpush1.msra.mxu1 %v13464_v59 }
 0x8bc   :  { %3903 = vmatprep.subr.mxu1 %v13531_v7  ;;  %3607 = vmatmul.mubr.f32.vlgmr.msra.gmra.mxu0 %v3606_v10  ;;  %v14007_v10 = vsub.f32 %v4214_v5, %v13988_v39 }
 0x8bd   :  { %3786 = vmatpush1.msra.mxu0 %v13447_v50  ;;  %3905 = vmatpush1.msra.mxu1 %v13533_v42  ;;  %v16423_v50 = vld [vmem:[#allocation42_spill] sm:$0xff] }
 0x8be   :  { %3789 = vmatprep.subr.mxu0 %v13450_v52  ;;  %3907 = vmatprep.subr.mxu1 %v13535_v0  ;;  %v16424_v52 = vld [vmem:[#allocation43_spill] sm:$0xff] }
 0x8bf   :  { %3792 = vmatpush1.msra.mxu0 %v13456_v55  ;;  %3909 = vmatpush1.msra.mxu1 %v13540_v13 }
 0x8c0   :  { %3795 = vmatprep.subr.mxu0 %v13459_v56  ;;  %3911 = vmatprep.subr.mxu1 %v13542_v9 }
 0x8c1   :  { %3798 = vmatpush1.msra.mxu0 %v13462_v58  ;;  %3913 = vmatpush1.msra.mxu1 %v13544_v25 }
 0x8c2   :  { %3801 = vmatprep.subr.mxu0 %v13477_v8  ;;  %3915 = vmatprep.subr.mxu1 %v13628_v35 }
 0x8c3   :  { %3804 = vmatpush1.msra.mxu0 %v13490_v16  ;;  %3917 = vmatpush1.msra.mxu1 %v13630_v44 }
 0x8c4   :  { %3807 = vmatprep.subr.mxu0 %v13550_v57  ;;  %3954 = vmatmul.mubr.f32.vlgmr.msra.gmra.mxu1 %v3604_v11  ;;  %v14001_v11 = vsub.f32 %v4215_v24, %v13986_v51 }
 0x8c5   :  { %4097 = vmatprep.subr.mxu1 %v13431_v54  ;;  %3810 = vmatpush1.msra.mxu0 %v13553_v21  ;;  %v16417_v54 = vld [vmem:[#allocation26_spill] sm:$0xff] }
 0x8c6   :  { %4099 = vmatpush1.msra.mxu1 %v13433_v22  ;;  %3813 = vmatprep.subr.mxu0 %v13556_v63  ;;  %v16418_v22 = vld [vmem:[#allocation28_spill] sm:$0xff] }
 0x8c7   :  { %4101 = vmatprep.subr.mxu1 %v13435_v40  ;;  %3816 = vmatpush1.msra.mxu0 %v13563_v30  ;;  %v16419_v40 = vld [vmem:[#allocation29_spill] sm:$0xff] }
 0x8c8   :  { %4103 = vmatpush1.msra.mxu1 %v13437_v20  ;;  %3819 = vmatprep.subr.mxu0 %v13566_v18  ;;  %v16420_v20 = vld [vmem:[#allocation30_spill] sm:$0xff] }
 0x8c9   :  { %4105 = vmatprep.subr.mxu1 %v13439_v17  ;;  %3822 = vmatpush1.msra.mxu0 %v13569_v43  ;;  %v16421_v17 = vld [vmem:[#allocation32_spill] sm:$0xff] }
 0x8ca   :  { %4107 = vmatpush1.msra.mxu1 %v13441_v38  ;;  %3825 = vmatprep.subr.mxu0 %v13633_v60  ;;  %v16422_v38 = vld [vmem:[#allocation34_spill] sm:$0xff] }
 0x8cb   :  { %4109 = vmatprep.subr.mxu1 %v13452_v53  ;;  %3828 = vmatpush1.msra.mxu0 %v13637_v47 }
 0x8cc   :  { %3861 = vmatprep.mubr.f32.mxu0 %v16326_v41  ;;  %4111 = vmatpush1.msra.mxu1 %v13464_v59 }
 0x8cd   :  { %3864 = vmatmul.mubr.f32.vlgmr.msra.gmra.mxu0 %v3603_v1  ;;  %3979 = vmatprep.subr.mxu0 %v13468_v62  ;;  %v13998_v1 = vsub.f32 %v4216_v14, %v13984_v26 }
 0x8ce   :  { %4113 = vmatprep.subr.mxu1 %v13531_v7  ;;  %3983 = vmatpush1.msra.mxu0 %v13471_v2 }
 0x8cf   :  { %4115 = vmatpush1.msra.mxu1 %v13533_v42  ;;  %3987 = vmatprep.subr.mxu0 %v13474_v3  ;;  %v3498_v42 = vld [vmem:[#allocation2 + $0x10] sm:$0x3] }
 0x8d0   :  { %4117 = vmatprep.subr.mxu1 %v13535_v0  ;;  %3991 = vmatpush1.msra.mxu0 %v13481_v15 }
 0x8d1   :  { %4119 = vmatpush1.msra.mxu1 %v13540_v13  ;;  %3995 = vmatprep.subr.mxu0 %v13484_v19 }
 0x8d2   :  { %4121 = vmatprep.subr.mxu1 %v13542_v9  ;;  %3999 = vmatpush1.msra.mxu0 %v13487_v4 }
 0x8d3   :  { %4123 = vmatpush1.msra.mxu1 %v13544_v25  ;;  %4003 = vmatprep.subr.mxu0 %v13501_v29 }
 0x8d4   :  { %4125 = vmatprep.subr.mxu1 %v13628_v35  ;;  %4007 = vmatpush1.msra.mxu0 %v16389_v23  ;;  %v3499_v23 = vld [vmem:[#allocation2 + $0x18] sm:$0x3] }
 0x8d5   :  { %4127 = vmatpush1.msra.mxu1 %v13630_v44  ;;  %4160 = vmatprep.mubr.f32.mxu1 %v16326_v41 }
 0x8d6   :  { %4011 = vmatprep.subr.mxu0 %v16417_v54  ;;  %4162 = vmatmul.mubr.f32.vlgmr.msra.gmra.mxu1 %v13904_v32  ;;  %v14010_v54 = vsub.f32 %v4213_v36, %v13990_v49 }
 0x8d7   :  { %4015 = vmatpush1.msra.mxu0 %v16418_v22  ;;  %4072 = vmatprep.mubr.f32.mxu0 %v16326_v41  ;;  %v14013_v22 = vsub.f32 %v4212_v61, %v13992_v45 }
 0x8d8   :  { %4019 = vmatprep.subr.mxu0 %v16419_v40  ;;  %4456 = vmatprep.mubr.f32.mxu1 %v16326_v41  ;;  %v14015_v40 = vand.u32 4294901760, %v4210_v12 }
 0x8d9   :  { %4023 = vmatpush1.msra.mxu0 %v16420_v20 }
 0x8da   :  { %4027 = vmatprep.subr.mxu0 %v16421_v17  ;;  %v14022_v17 = vand.u32 4294901760, %v13998_v1 }
 0x8db   :  { %4031 = vmatpush1.msra.mxu0 %v16422_v38  ;;  %v14025_v38 = vand.u32 4294901760, %v14001_v11 }
 0x8dc   :  { %4035 = vmatprep.subr.mxu0 %v16423_v50  ;;  %v14028_v50 = vsub.f32 %v4211_v37, %v14003_v28 }
 0x8dd   :  { %4039 = vmatpush1.msra.mxu0 %v16424_v52  ;;  %v14032_v52 = vand.u32 4294901760, %v14007_v10 }
 0x8de   :  { %4074 = vmatmul.mubr.f32.vlgmr.msra.gmra.mxu0 %v13904_v32  ;;  %v13995_v32 = vsub.f32 %v4217_v34, %v13982_v31  ;;  %4237 = vmatprep.subr.mxu0 %v13982_v31 }
 0x8df   :  { %4300 = vmatprep.mubr.f32.mxu0 %v16326_v41  ;;  %4239 = vmatpush1.msra.mxu0 %v13984_v26 }
 0x8e0   :  { %16425 = vst [vmem:[#allocation19_spill] sm:$0xff] %v13995_v32  ;;  %v14019_v20 = vand.u32 4294901760, %v13995_v32  ;;  %4241 = vmatprep.subr.mxu0 %v13986_v51 }
 0x8e1   :  { %4243 = vmatpush1.msra.mxu0 %v13988_v39 }
 0x8e2   :  { %4245 = vmatprep.subr.mxu0 %v13990_v49 }
 0x8e3   :  { %4247 = vmatpush1.msra.mxu0 %v13992_v45 }
 0x8e4   :  { %4249 = vmatprep.subr.mxu0 %v14003_v28 }
 0x8e5   :  { %4251 = vmatpush1.msra.mxu0 %v14015_v40 }
 0x974   :  { %v3760_v55 = vpop.f32.mrf.mxu1 }
 0x976   :  { %v3762_v62 = vpop.f32.mrf.mxu1 }
 0x97c   :  { %v3608_v53 = vpop.f32.mrf.mxu0 }
 0x97d   :  { %v3761_v59 = vadd.f32 %v3760_v55, %v3608_v53  ;;  %v14035_v53 = vand.u32 4294901760, %v14010_v54  ;;  %v14038_v55 = vand.u32 4294901760, %v14013_v22 }
 0x97e   :  { %v3610_v56 = vpop.f32.mrf.mxu0 }
 0x97f   :  { %v3763_v9 = vadd.f32 %v3762_v62, %v3610_v56  ;;  %v14041_v56 = vsub.f32 %v4210_v12, %v14015_v40  ;;  %v4343_v62 = vsub.f32 %v14001_v11, %v14025_v38 }
 0x984   :  { %v3955_v3 = vpop.f32.mrf.mxu1 }
 0x986   :  { %v3957_v19 = vpop.f32.mrf.mxu1 }
 0x98d   :  { %v3865_v58 = vpop.f32.mrf.mxu0 }
 0x98e   :  { %v3866_v2 = vadd.f32 %v3865_v58, %v3761_v59  ;;  %v4331_v58 = vsub.f32 %v13995_v32, %v14019_v20  ;;  %v4337_v59 = vsub.f32 %v13998_v1, %v14022_v17 }
 0x98f   :  { %v3867_v8 = vpop.f32.mrf.mxu0 }
 0x990   :  { %v3956_v15 = vadd.f32 %v3955_v3, %v3866_v2  ;;  %v3868_v57 = vadd.f32 %v3867_v8, %v3763_v9  ;;  %v14051_v2 = vand.u32 4294901760, %v14028_v50  ;;  %v4349_v8 = vsub.f32 %v14007_v10, %v14032_v52 }
 0x992   :  { %v3958_v30 = vadd.f32 %v3957_v19, %v3868_v57  ;;  %v4361_v19 = vsub.f32 %v14013_v22, %v14038_v55  ;;  %v4367_v9 = vsub.f32 %v14028_v50, %v14051_v2  ;;  %v4205_v57 = vld [vmem:[#allocation9 + $0x18] sm:$0xff] }
 0x994   :  { %v14098_v14 = vand.u32 4294901760, %v4367_v9 }
 0x996   :  { %v4163_v29 = vpop.f32.mrf.mxu1  ;;  %16429 = vst [vmem:[#allocation23_spill] sm:$0xff] %v14098_v14 }
 0x998   :  { %v4165_v43 = vpop.f32.mrf.mxu1 }
 0x99e   :  { %v4075_v4 = vpop.f32.mrf.mxu0 }
 0x99f   :  { %v4076_v16 = vadd.f32 %v4075_v4, %v3956_v15  ;;  %v4355_v15 = vsub.f32 %v14010_v54, %v14035_v53  ;;  %v14061_v4 = vand.u32 4294901760, %v14041_v56 }
 0x9a0   :  { %v4077_v63 = vpop.f32.mrf.mxu0 }
 0x9a1   :  { %v4164_v7 = vadd.f32 %v4163_v29, %v4076_v16  ;;  %v4078_v18 = vadd.f32 %v4077_v63, %v3958_v30  ;;  %16426 = vst [vmem:[#allocation20_spill] sm:$0xff] %v14061_v4  ;;  %v4209_v16 = vld [vmem:[#allocation9 + $0x38] sm:$0xff]  ;;  %v4208_v29 = vld [vmem:[#allocation9 + $0x30] sm:$0xff]  ;;  %v14074_v63 = vand.u32 4294901760, %v4349_v8  ;;  %v4373_v30 = vsub.f32 %v14041_v56, %v14061_v4 }
 0x9a3   :  { %v4168_v0 = vadd.f32 %v4164_v7, %v3498_v42  ;;  %v4166_v35 = vadd.f32 %v4165_v43, %v4078_v18  ;;  %v4207_v7 = vld [vmem:[#allocation9 + $0x28] sm:$0xff]  ;;  %v14065_v42 = vand.u32 4294901760, %v4331_v58  ;;  %v14080_v18 = vand.u32 4294901760, %v4355_v15 }
 0x9a4   :  { %v14082_v43 = vand.u32 4294901760, %v4209_v16  ;;  %v14111_v61 = vand.u32 4294901760, %v4373_v30 }
 0x9a5   :  { %v12546_v13 = vmul.f32 -1.442695, %v4168_v0  ;;  %v4182_v44 = vadd.f32 %v13892_v27, %v4166_v35  ;;  %v14067_v0 = vand.u32 4294901760, %v4337_v59  ;;  %4333 = vmatprep.subr.mxu1 %v14065_v42  ;;  %16427 = vst [vmem:[#allocation21_spill] sm:$0xff] %v14080_v18  ;;  %v14084_v35 = vand.u32 4294901760, %v4208_v29 }
 0x9a6   :  { %v14101_v24 = vsub.f32 %v4209_v16, %v14082_v43  ;;  %4253 = vmatprep.subr.mxu0 %v14082_v43  ;;  %16430 = vst [vmem:[#allocation24_spill] sm:$0xff] %v14111_v61 }
 0x9a7   :  { %12599 = vpow2.f32 %v12546_v13  ;;  %v14069_v13 = vand.u32 4294901760, %v4343_v62  ;;  %4339 = vmatpush1.msra.mxu1 %v14067_v0  ;;  %v14104_v5 = vsub.f32 %v4208_v29, %v14084_v35  ;;  %4255 = vmatpush1.msra.mxu0 %v14084_v35 }
 0x9a8   :  { %v14125_v59 = vand.u32 4294901760, %v14101_v24 }
 0x9a9   :  { %4345 = vmatprep.subr.mxu1 %v14069_v13  ;;  %v14128_v62 = vand.u32 4294901760, %v14104_v5 }
 0x9aa   :  { %4351 = vmatpush1.msra.mxu1 %v14074_v63  ;;  %16431 = vst [vmem:[#allocation25_spill] sm:$0xff] %v14125_v59  ;;  %v4379_v16 = vsub.f32 %v14101_v24, %v14125_v59 }
 0x9ab   :  { %4357 = vmatprep.subr.mxu1 %v14080_v18  ;;  %16432 = vst [vmem:[#allocation36_spill] sm:$0xff] %v14128_v62  ;;  %v4385_v29 = vsub.f32 %v14104_v5, %v14128_v62 }
 0x9ad   :  { %v14163_v30 = vand.u32 4294901760, %v4385_v29 }
 0x9af   :  { %16438 = vst [vmem:[#allocation44_spill] sm:$0xff] %v14163_v30 }
 0x9b4   :  { %v12600_v25 = vpop.eup %12599 }
 0x9b5   :  { %v4172_v21 = vadd.f32 1.0, %v12600_v25  ;;  %v4206_v25 = vld [vmem:[#allocation9 + $0x20] sm:$0xff] }
 0x9b7   :  { %12601 = vrcp.f32 %v4172_v21  ;;  %v4204_v21 = vld [vmem:[#allocation9 + $0x10] sm:$0xff] }
 0x9b8   :  { %v14095_v34 = vand.u32 4294901760, %v4204_v21 }
 0x9ba   :  { %v14120_v58 = vsub.f32 %v4204_v21, %v14095_v34  ;;  %v14161_v21 = vand.u32 4294901760, %v4379_v16  ;;  %v4203_v16 = vld [vmem:[#allocation9 + $0x8] sm:$0xff] }
 0x9bb   :  { %v14179_v29 = vand.u32 4294901760, %v4203_v16 }
 0x9bc   :  { %16437 = vst [vmem:[#allocation41_spill] sm:$0xff] %v14161_v21 }
 0x9c4   :  { %v13979_v60 = vpop.eup %12601 }
 0x9c5   :  { %v4183_v47 = vmul.f32 %v13979_v60, %v4182_v44  ;;  %v14086_v44 = vand.u32 4294901760, %v4207_v7 }
 0x9c7   :  { %v4184_v6 = vadd.f32 %v4183_v47, %v3499_v23  ;;  %v14089_v47 = vand.u32 4294901760, %v4361_v19  ;;  %v14091_v23 = vand.u32 4294901760, %v4206_v25  ;;  %v14107_v36 = vsub.f32 %v4207_v7, %v14086_v44  ;;  %4257 = vmatprep.subr.mxu0 %v14086_v44 }
 0x9c8   :  { %v14142_v19 = vand.u32 4294901760, %v14120_v58 }
 0x9c9   :  { %12603 = vtanh.f32 %v4184_v6  ;;  %16428 = vst [vmem:[#allocation22_spill] sm:$0xff] %v14089_v47  ;;  %v14093_v6 = vand.u32 4294901760, %v4205_v57  ;;  %v14114_v37 = vsub.f32 %v4206_v25, %v14091_v23  ;;  %4363 = vmatpush1.msra.mxu1 %v14089_v47  ;;  %4259 = vmatpush1.msra.mxu0 %v14091_v23 }
 0x9ca   :  { %16436 = vst [vmem:[#allocation40_spill] sm:$0xff] %v14142_v19  ;;  %4369 = vmatprep.subr.mxu1 %v14098_v14 }
 0x9cb   :  { %v14117_v12 = vsub.f32 %v4205_v57, %v14093_v6  ;;  %v14136_v8 = vand.u32 4294901760, %v14114_v37  ;;  %4261 = vmatprep.subr.mxu0 %v14093_v6  ;;  %4375 = vmatpush1.msra.mxu1 %v14111_v61  ;;  %v4409_v57 = vsub.f32 %v14120_v58, %v14142_v19 }
 0x9cc   :  { %4263 = vmatpush1.msra.mxu0 %v14095_v34  ;;  %4381 = vmatprep.subr.mxu1 %v14161_v21  ;;  %v16447_v21 = vrot.slane %v13897_v33, 6 }
 0x9cd   :  { %16434 = vst [vmem:[#allocation38_spill] sm:$0xff] %v14136_v8  ;;  %v14139_v15 = vand.u32 4294901760, %v14117_v12  ;;  %v4397_v9 = vsub.f32 %v14114_v37, %v14136_v8  ;;  %4387 = vmatpush1.msra.mxu1 %v14163_v30  ;;  %v14173_v61 = vand.u32 4294901760, %v4409_v57  ;;  %4265 = vmatprep.subr.mxu0 %v14179_v29 }
 0x9ce   :  { %v4193_v14 = vmul.f32 %v13979_v60, %v16447_v21 }
 0x9cf   :  { %16435 = vst [vmem:[#allocation39_spill] sm:$0xff] %v14139_v15  ;;  %v4403_v25 = vsub.f32 %v14117_v12, %v14139_v15  ;;  %v14167_v46 = vand.u32 4294901760, %v4397_v9  ;;  %16442 = vst [vmem:[#allocation28_spill] sm:$0xff] %v14173_v61 }
 0x9d1   :  { %16440 = vst [vmem:[#allocation33_spill] sm:$0xff] %v14167_v46  ;;  %v14170_v27 = vand.u32 4294901760, %v4403_v25  ;;  %v14184_v25 = vsub.f32 %v4203_v16, %v14179_v29 }
 0x9d3   :  { %16441 = vst [vmem:[#allocation26_spill] sm:$0xff] %v14170_v27 }
 0x9d6   :  { %v12604_v3 = vpop.eup %12603 }
 0x9d7   :  { %4188 = vrot.lane.b32.xlu0 %v12604_v3, %s12810_s13  ;;  %v14131_v3 = vand.u32 4294901760, %v14107_v36 }
 0x9d9   :  { %16433 = vst [vmem:[#allocation37_spill] sm:$0xff] %v14131_v3  ;;  %v4391_v7 = vsub.f32 %v14107_v36, %v14131_v3 }
 0x9db   :  { %v14165_v48 = vand.u32 4294901760, %v4391_v7  ;;  %v4202_v7 = vld [vmem:[#allocation9] sm:$0xff] }
 0x9dc   :  { %v14181_v9 = vand.u32 4294901760, %v4202_v7 }
 0x9dd   :  { %16439 = vst [vmem:[#allocation45_spill] sm:$0xff] %v14165_v48  ;;  %4393 = vmatprep.subr.mxu1 %v14165_v48 }
 0x9de   :  { %4399 = vmatpush1.msra.mxu1 %v14167_v46  ;;  %v14188_v57 = vsub.f32 %v4202_v7, %v14181_v9  ;;  %4267 = vmatpush1.msra.mxu0 %v14181_v9 }
 0x9df   :  { %4405 = vmatprep.subr.mxu1 %v14170_v27  ;;  %v14192_v27 = vand.u32 4294901760, %v14184_v25  ;;  %4482 = vmatprep.subr.mxu0 %v13995_v32  ;;  %v4186_v32 = vsub.f32 1.0, %v13979_v60 }
 0x9e0   :  { %4411 = vmatpush1.msra.mxu1 %v14173_v61  ;;  %v14196_v61 = vand.u32 4294901760, %v14188_v57 }
 0x9e1   :  { %16443 = vst [vmem:[#allocation29_spill] sm:$0xff] %v14192_v27  ;;  %v4415_v46 = vsub.f32 %v14184_v25, %v14192_v27 }
 0x9e2   :  { %16444 = vst [vmem:[#allocation30_spill] sm:$0xff] %v14196_v61  ;;  %v4421_v16 = vsub.f32 %v14188_v57, %v14196_v61 }
 0x9e3   :  { %v14202_v48 = vand.u32 4294901760, %v4415_v46 }
 0x9e4   :  { %v14204_v7 = vand.u32 4294901760, %v4421_v16  ;;  %v16454_v21 = vld [vmem:[#allocation45_spill] sm:$0xff] }
 0x9e5   :  { %16445 = vst [vmem:[#allocation32_spill] sm:$0xff] %v14202_v48  ;;  %4417 = vmatprep.subr.mxu1 %v14202_v48 }
 0x9e6   :  { %16446 = vst [vmem:[#allocation34_spill] sm:$0xff] %v14204_v7  ;;  %4423 = vmatpush1.msra.mxu1 %v14204_v7 }
 0x9e7   :  { %4586 = vmatprep.subr.mxu1 %v13982_v31 }
 0xa49   :  { %v4189_v30 = vpop.permute.xlu0 %4188 }
 0xa4a   :  { %v4191_v47 = vmul.f32 %v4189_v30, %v4186_v32  ;;  %v16455_v30 = vld [vmem:[#allocation33_spill] sm:$0xff] }
 0xa4c   :  { %v14213_v18 = vadd.f32 %v4193_v14, %v4191_v47  ;;  %v16449_v14 = vld [vmem:[#allocation22_spill] sm:$0xff] }
 0xa4e   :  { %4196 = vrot.lane.b32.xlu1 %v14213_v18, %s12810_s13 }
 0xac0   :  { %v4197_v46 = vpop.permute.xlu1 %4196 }
 0xac1   :  { %4199 = vst.msk [vmem:[#allocation3 + $0x8] sm:$0x3] %vm1369_vm2, %v4197_v46  ;;  %v4218_v16 = vsel %vm667_vm1, %v4197_v46, 0  ;;  %v16457_v46 = vld [vmem:[#allocation28_spill] sm:$0xff] }
 0xac2   :  { %v14219_v7 = vand.u32 4294901760, %v4218_v16 }
 0xac4   :  { %v4302_v48 = vsub.f32 %v4218_v16, %v14219_v7  ;;  %4458 = vmatmul.mubr.f32.vlgmr.msra.gmra.mxu1 %v14219_v7  ;;  %v16458_v16 = vld [vmem:[#allocation32_spill] sm:$0xff] }
 0xac5   :  { %4588 = vmatpush1.msra.mxu1 %v13984_v26  ;;  %4649 = vmatprep.mubr.f32.mxu1 %v16326_v41 }
 0xac6   :  { %v4303_v60 = vand.u32 4294901760, %v4302_v48  ;;  %4590 = vmatprep.subr.mxu1 %v13986_v51 }
 0xac7   :  { %4592 = vmatpush1.msra.mxu1 %v13988_v39 }
 0xac8   :  { %v4304_v32 = vsub.f32 %v4302_v48, %v4303_v60  ;;  %4594 = vmatprep.subr.mxu1 %v13990_v49 }
 0xac9   :  { %4596 = vmatpush1.msra.mxu1 %v13992_v45 }
 0xaca   :  { %4598 = vmatprep.subr.mxu1 %v14003_v28  ;;  %v4305_v47 = vand.u32 4294901760, %v4304_v32  ;;  %v16460_v32 = vld [vmem:[#allocation19_spill] sm:$0xff] }
 0xacb   :  { %4600 = vmatpush1.msra.mxu1 %v14015_v40 }
 0xacc   :  { %4602 = vmatprep.subr.mxu1 %v14082_v43  ;;  %4306 = vmatmul.mubr.f32.vlgmr.msra.gmra.mxu0 %v4305_v47 }
 0xacd   :  { %4485 = vmatpush1.msra.mxu0 %v13998_v1  ;;  %4604 = vmatpush1.msra.mxu1 %v14084_v35 }
 0xace   :  { %4488 = vmatprep.subr.mxu0 %v14001_v11  ;;  %4606 = vmatprep.subr.mxu1 %v14086_v44 }
 0xacf   :  { %4491 = vmatpush1.msra.mxu0 %v14007_v10  ;;  %4608 = vmatpush1.msra.mxu1 %v14091_v23 }
 0xad0   :  { %4494 = vmatprep.subr.mxu0 %v14010_v54  ;;  %4610 = vmatprep.subr.mxu1 %v14093_v6 }
 0xad1   :  { %4497 = vmatpush1.msra.mxu0 %v14013_v22  ;;  %4612 = vmatpush1.msra.mxu1 %v14095_v34 }
 0xad2   :  { %4500 = vmatprep.subr.mxu0 %v14028_v50  ;;  %4614 = vmatprep.subr.mxu1 %v14179_v29 }
 0xad3   :  { %4503 = vmatpush1.msra.mxu0 %v14041_v56  ;;  %4616 = vmatpush1.msra.mxu1 %v14181_v9 }
 0xad4   :  { %4506 = vmatprep.subr.mxu0 %v14101_v24  ;;  %4653 = vmatmul.mubr.f32.vlgmr.msra.gmra.mxu1 %v4303_v60  ;;  %v16459_v60 = vld [vmem:[#allocation34_spill] sm:$0xff] }
 0xad5   :  { %4796 = vmatprep.subr.mxu1 %v13982_v31  ;;  %4509 = vmatpush1.msra.mxu0 %v14104_v5 }
 0xad6   :  { %4798 = vmatpush1.msra.mxu1 %v13984_v26  ;;  %4512 = vmatprep.subr.mxu0 %v14107_v36 }
 0xad7   :  { %4800 = vmatprep.subr.mxu1 %v13986_v51  ;;  %4515 = vmatpush1.msra.mxu0 %v14114_v37 }
 0xad8   :  { %4802 = vmatpush1.msra.mxu1 %v13988_v39  ;;  %4518 = vmatprep.subr.mxu0 %v14117_v12 }
 0xad9   :  { %4804 = vmatprep.subr.mxu1 %v13990_v49  ;;  %4521 = vmatpush1.msra.mxu0 %v14120_v58 }
 0xada   :  { %4806 = vmatpush1.msra.mxu1 %v13992_v45  ;;  %4524 = vmatprep.subr.mxu0 %v14184_v25 }
 0xadb   :  { %4808 = vmatprep.subr.mxu1 %v14003_v28  ;;  %4527 = vmatpush1.msra.mxu0 %v14188_v57 }
 0xadc   :  { %4560 = vmatprep.mubr.f32.mxu0 %v16326_v41  ;;  %4810 = vmatpush1.msra.mxu1 %v14015_v40 }
 0xadd   :  { %4563 = vmatmul.mubr.f32.vlgmr.msra.gmra.mxu0 %v4302_v48  ;;  %4678 = vmatprep.subr.mxu0 %v14019_v20  ;;  %v16448_v48 = vld [vmem:[#allocation21_spill] sm:$0xff] }
 0xade   :  { %4812 = vmatprep.subr.mxu1 %v14082_v43  ;;  %4682 = vmatpush1.msra.mxu0 %v14022_v17 }
 0xadf   :  { %4814 = vmatpush1.msra.mxu1 %v14084_v35  ;;  %4686 = vmatprep.subr.mxu0 %v14025_v38 }
 0xae0   :  { %4816 = vmatprep.subr.mxu1 %v14086_v44  ;;  %4690 = vmatpush1.msra.mxu0 %v14032_v52 }
 0xae1   :  { %4818 = vmatpush1.msra.mxu1 %v14091_v23  ;;  %4694 = vmatprep.subr.mxu0 %v14035_v53 }
 0xae2   :  { %4820 = vmatprep.subr.mxu1 %v14093_v6  ;;  %4698 = vmatpush1.msra.mxu0 %v14038_v55 }
 0xae3   :  { %4822 = vmatpush1.msra.mxu1 %v14095_v34  ;;  %4702 = vmatprep.subr.mxu0 %v14051_v2 }
 0xae4   :  { %4824 = vmatprep.subr.mxu1 %v14179_v29  ;;  %4706 = vmatpush1.msra.mxu0 %v14061_v4 }
 0xae5   :  { %4826 = vmatpush1.msra.mxu1 %v14181_v9  ;;  %4859 = vmatprep.mubr.f32.mxu1 %v16326_v41 }
 0xae6   :  { %4710 = vmatprep.subr.mxu0 %v14125_v59  ;;  %4861 = vmatmul.mubr.f32.vlgmr.msra.gmra.mxu1 %v14219_v7 }
 0xae7   :  { %4714 = vmatpush1.msra.mxu0 %v14128_v62  ;;  %4771 = vmatprep.mubr.f32.mxu0 %v16326_v41 }
 0xae8   :  { %4718 = vmatprep.subr.mxu0 %v14131_v3  ;;  %5042 = vmatprep.subr.mxu1 %v14065_v42  ;;  %v16450_v42 = vld [vmem:[#allocation23_spill] sm:$0xff] }
 0xae9   :  { %4722 = vmatpush1.msra.mxu0 %v14136_v8  ;;  %5048 = vmatpush1.msra.mxu1 %v14067_v0  ;;  %v16451_v0 = vld [vmem:[#allocation24_spill] sm:$0xff] }
 0xaea   :  { %4726 = vmatprep.subr.mxu0 %v14139_v15  ;;  %5054 = vmatprep.subr.mxu1 %v14069_v13  ;;  %v16452_v13 = vld [vmem:[#allocation41_spill] sm:$0xff] }
 0xaeb   :  { %4730 = vmatpush1.msra.mxu0 %v14142_v19  ;;  %5060 = vmatpush1.msra.mxu1 %v14074_v63  ;;  %v16453_v63 = vld [vmem:[#allocation44_spill] sm:$0xff] }
 0xaec   :  { %4734 = vmatprep.subr.mxu0 %v14192_v27  ;;  %5066 = vmatprep.subr.mxu1 %v16448_v48  ;;  %v4200_v19 = vld [vmem:[#allocation2 + $0x10] sm:$0xc] }
 0xaed   :  { %4738 = vmatpush1.msra.mxu0 %v14196_v61  ;;  %5072 = vmatpush1.msra.mxu1 %v16449_v14 }
 0xaee   :  { %4773 = vmatmul.mubr.f32.vlgmr.msra.gmra.mxu0 %v14219_v7  ;;  %5078 = vmatprep.subr.mxu1 %v16450_v42  ;;  %v16456_v7 = vld [vmem:[#allocation26_spill] sm:$0xff] }
 0xaef   :  { %5084 = vmatpush1.msra.mxu1 %v16451_v0  ;;  %4946 = vmatprep.subr.mxu0 %v13982_v31 }
 0xaf0   :  { %5090 = vmatprep.subr.mxu1 %v16452_v13  ;;  %4948 = vmatpush1.msra.mxu0 %v13984_v26 }
 0xaf1   :  { %5096 = vmatpush1.msra.mxu1 %v16453_v63  ;;  %4950 = vmatprep.subr.mxu0 %v13986_v51 }
 0xaf2   :  { %5102 = vmatprep.subr.mxu1 %v16454_v21  ;;  %4952 = vmatpush1.msra.mxu0 %v13988_v39 }
 0xaf3   :  { %5108 = vmatpush1.msra.mxu1 %v16455_v30  ;;  %4954 = vmatprep.subr.mxu0 %v13990_v49 }
 0xaf4   :  { %5114 = vmatprep.subr.mxu1 %v16456_v7  ;;  %4956 = vmatpush1.msra.mxu0 %v13992_v45 }
 0xaf5   :  { %5120 = vmatpush1.msra.mxu1 %v16457_v46  ;;  %4958 = vmatprep.subr.mxu0 %v14003_v28 }
 0xaf6   :  { %5126 = vmatprep.subr.mxu1 %v16458_v16  ;;  %4960 = vmatpush1.msra.mxu0 %v14015_v40 }
 0xaf7   :  { %5132 = vmatpush1.msra.mxu1 %v16459_v60  ;;  %4962 = vmatprep.subr.mxu0 %v14082_v43 }
 0xaf8   :  { %5165 = vmatprep.mubr.f32.mxu1 %v16326_v41  ;;  %5295 = vmatprep.subr.mxu1 %v13982_v31 }
 0xaf9   :  { %4964 = vmatpush1.msra.mxu0 %v14084_v35  ;;  %5009 = vmatprep.mubr.f32.mxu0 %v16326_v41 }
 0xafa   :  { %4966 = vmatprep.subr.mxu0 %v14086_v44 }
 0xafb   :  { %4968 = vmatpush1.msra.mxu0 %v14091_v23 }
 0xafc   :  { %4970 = vmatprep.subr.mxu0 %v14093_v6 }
 0xafd   :  { %4972 = vmatpush1.msra.mxu0 %v14095_v34 }
 0xafe   :  { %4974 = vmatprep.subr.mxu0 %v14179_v29 }
 0xaff   :  { %4976 = vmatpush1.msra.mxu0 %v14181_v9 }
 0xb00   :  { %5191 = vmatprep.subr.mxu0 %v16460_v32 }
 0xb84   :  { %v4459_v48 = vpop.f32.mrf.mxu1 }
 0xb86   :  { %v4461_v13 = vpop.f32.mrf.mxu1 }
 0xb8c   :  { %v4307_v47 = vpop.f32.mrf.mxu0 }
 0xb8d   :  { %v4460_v0 = vadd.f32 %v4459_v48, %v4307_v47 }
 0xb8e   :  { %v4309_v14 = vpop.f32.mrf.mxu0 }
 0xb8f   :  { %v4462_v32 = vadd.f32 %v4461_v13, %v4309_v14 }
 0xb94   :  { %v4654_v21 = vpop.f32.mrf.mxu1 }
 0xb96   :  { %v4656_v46 = vpop.f32.mrf.mxu1 }
 0xb9d   :  { %v4564_v42 = vpop.f32.mrf.mxu0 }
 0xb9e   :  { %v4565_v63 = vadd.f32 %v4564_v42, %v4460_v0 }
 0xb9f   :  { %v4566_v30 = vpop.f32.mrf.mxu0 }
 0xba0   :  { %v4655_v7 = vadd.f32 %v4654_v21, %v4565_v63  ;;  %v4567_v3 = vadd.f32 %v4566_v30, %v4462_v32  ;;  %v16461_v21 = vld [vmem:[#allocation35_spill] sm:$0xff] }
 0xba2   :  { %v4657_v48 = vadd.f32 %v4656_v46, %v4567_v3 }
 0xba6   :  { %v4862_v33 = vpop.f32.mrf.mxu1 }
 0xba8   :  { %v4864_v0 = vpop.f32.mrf.mxu1 }
 0xbae   :  { %v4774_v16 = vpop.f32.mrf.mxu0 }
 0xbaf   :  { %v4775_v60 = vadd.f32 %v4774_v16, %v4655_v7  ;;  %v4897_v7 = vrot.slane %v14213_v18, 6 }
 0xbb0   :  { %v4776_v59 = vpop.f32.mrf.mxu0 }
 0xbb1   :  { %v4863_v61 = vadd.f32 %v4862_v33, %v4775_v60  ;;  %v4777_v42 = vadd.f32 %v4776_v59, %v4657_v48 }
 0xbb3   :  { %v4868_v27 = vrot.slane %v4863_v61, 6  ;;  %v4865_v63 = vadd.f32 %v4864_v0, %v4777_v42 }
 0xbb5   :  { %v4870_v15 = vadd.f32 %v4868_v27, %v4200_v19  ;;  %v4884_v4 = vadd.f32 %v16461_v21, %v4865_v63  ;;  %v4907_v21 = vld [vmem:[#allocation2 + $0x18] sm:$0x30] }
 0xbb7   :  { %v12548_v8 = vmul.f32 -1.442695, %v4870_v15  ;;  %v4886_v33 = vrot.slane %v4884_v4, 6  ;;  %v4201_v15 = vld [vmem:[#allocation2 + $0x18] sm:$0xc] }
 0xbb9   :  { %12605 = vpow2.f32 %v12548_v8 }
 0xbc6   :  { %v12606_v62 = vpop.eup %12605 }
 0xbc7   :  { %v4874_v47 = vadd.f32 1.0, %v12606_v62 }
 0xbc9   :  { %12607 = vrcp.f32 %v4874_v47 }
 0xbd6   :  { %v12608_v61 = vpop.eup %12607 }
 0xbd7   :  { %v4888_v16 = vmul.f32 %v12608_v61, %v4886_v33  ;;  %v4899_v27 = vmul.f32 %v12608_v61, %v4897_v7  ;;  %v4891_v62 = vsub.f32 1.0, %v12608_v61  ;;  %v5632_v61 = vld [vmem:[#allocation9 + $0x78] sm:$0xff] }
 0xbd9   :  { %v4889_v8 = vadd.f32 %v4888_v16, %v4201_v15  ;;  %v5631_v16 = vld [vmem:[#allocation9 + $0x70] sm:$0xff]  ;;  %v14419_v15 = vand.u32 4294901760, %v5632_v61 }
 0xbdb   :  { %12609 = vtanh.f32 %v4889_v8  ;;  %v14421_v8 = vand.u32 4294901760, %v5631_v16 }
 0xbe8   :  { %v12610_v19 = vpop.eup %12609 }
 0xbe9   :  { %4893 = vrot.lane.b32.xlu0 %v12610_v19, %s12810_s13 }
 0xc5b   :  { %v4894_v3 = vpop.permute.xlu0 %4893 }
 0xc5c   :  { %v4896_v14 = vmul.f32 %v4894_v3, %v4891_v62  ;;  %v5629_v62 = vld [vmem:[#allocation9 + $0x60] sm:$0xff]  ;;  %v5628_v3 = vld [vmem:[#allocation9 + $0x58] sm:$0xff] }
 0xc5e   :  { %v14330_v59 = vadd.f32 %v4899_v27, %v4896_v14  ;;  %v5630_v27 = vld [vmem:[#allocation9 + $0x68] sm:$0xff]  ;;  %v5627_v14 = vld [vmem:[#allocation9 + $0x50] sm:$0xff] }
 0xc5f   :  { %v14423_v19 = vand.u32 4294901760, %v5630_v27 }
 0xc60   :  { %v4924_v13 = vrot.slane %v14330_v59, 2 }
 0xc62   :  { %4925 = vrot.lane.b32.xlu1 %v4924_v13, %s12810_s13  ;;  %v14425_v13 = vand.u32 4294901760, %v5629_v62 }
 0xcd4   :  { %v4926_v18 = vpop.permute.xlu1 %4925 }
 0xcd5   :  { %v4927_v4 = vsel %vm667_vm1, %v4926_v18, 0  ;;  %v14427_v18 = vand.u32 4294901760, %v5628_v3 }
 0xcd6   :  { %v14335_v30 = vand.u32 4294901760, %v4927_v4 }
 0xcd8   :  { %v5011_v46 = vsub.f32 %v4927_v4, %v14335_v30  ;;  %5167 = vmatmul.mubr.f32.vlgmr.msra.gmra.mxu1 %v14335_v30  ;;  %v14429_v4 = vand.u32 4294901760, %v5627_v14 }
 0xcd9   :  { %5297 = vmatpush1.msra.mxu1 %v13984_v26  ;;  %5358 = vmatprep.mubr.f32.mxu1 %v16326_v41 }
 0xcda   :  { %v5012_v60 = vand.u32 4294901760, %v5011_v46  ;;  %5299 = vmatprep.subr.mxu1 %v13986_v51 }
 0xcdb   :  { %5301 = vmatpush1.msra.mxu1 %v13988_v39 }
 0xcdc   :  { %v5013_v32 = vsub.f32 %v5011_v46, %v5012_v60  ;;  %5303 = vmatprep.subr.mxu1 %v13990_v49 }
 0xcdd   :  { %5305 = vmatpush1.msra.mxu1 %v13992_v45 }
 0xcde   :  { %v5014_v47 = vand.u32 4294901760, %v5013_v32  ;;  %5307 = vmatprep.subr.mxu1 %v14003_v28  ;;  %v14435_v32 = vsub.f32 %v5631_v16, %v14421_v8 }
 0xcdf   :  { %5309 = vmatpush1.msra.mxu1 %v14015_v40 }
 0xce0   :  { %5311 = vmatprep.subr.mxu1 %v14082_v43  ;;  %5015 = vmatmul.mubr.f32.vlgmr.msra.gmra.mxu0 %v5014_v47  ;;  %v14438_v47 = vsub.f32 %v5630_v27, %v14423_v19 }
 0xce1   :  { %5194 = vmatpush1.msra.mxu0 %v13998_v1  ;;  %5313 = vmatpush1.msra.mxu1 %v14084_v35  ;;  %v16468_v1 = vld [vmem:[#allocation40_spill] sm:$0xff] }
 0xce2   :  { %5197 = vmatprep.subr.mxu0 %v14001_v11  ;;  %5315 = vmatprep.subr.mxu1 %v14086_v44  ;;  %v16469_v11 = vld [vmem:[#allocation29_spill] sm:$0xff] }
 0xce3   :  { %5200 = vmatpush1.msra.mxu0 %v14007_v10  ;;  %5317 = vmatpush1.msra.mxu1 %v14091_v23 }
 0xce4   :  { %5203 = vmatprep.subr.mxu0 %v14010_v54  ;;  %5319 = vmatprep.subr.mxu1 %v14093_v6 }
 0xce5   :  { %5206 = vmatpush1.msra.mxu0 %v14013_v22  ;;  %5321 = vmatpush1.msra.mxu1 %v14095_v34 }
 0xce6   :  { %5209 = vmatprep.subr.mxu0 %v14028_v50  ;;  %5323 = vmatprep.subr.mxu1 %v14179_v29 }
 0xce7   :  { %5212 = vmatpush1.msra.mxu0 %v14041_v56  ;;  %5325 = vmatpush1.msra.mxu1 %v14181_v9 }
 0xce8   :  { %5215 = vmatprep.subr.mxu0 %v14101_v24  ;;  %5362 = vmatmul.mubr.f32.vlgmr.msra.gmra.mxu1 %v5012_v60  ;;  %v14432_v60 = vsub.f32 %v5632_v61, %v14419_v15 }
 0xce9   :  { %5505 = vmatprep.subr.mxu1 %v13982_v31  ;;  %5218 = vmatpush1.msra.mxu0 %v14104_v5  ;;  %v16462_v31 = vld [vmem:[#allocation20_spill] sm:$0xff] }
 0xcea   :  { %5507 = vmatpush1.msra.mxu1 %v13984_v26  ;;  %5221 = vmatprep.subr.mxu0 %v14107_v36  ;;  %v16463_v26 = vld [vmem:[#allocation25_spill] sm:$0xff] }
 0xceb   :  { %5509 = vmatprep.subr.mxu1 %v13986_v51  ;;  %5224 = vmatpush1.msra.mxu0 %v14114_v37  ;;  %v16464_v51 = vld [vmem:[#allocation36_spill] sm:$0xff] }
 0xcec   :  { %5511 = vmatpush1.msra.mxu1 %v13988_v39  ;;  %5227 = vmatprep.subr.mxu0 %v14117_v12  ;;  %v16465_v39 = vld [vmem:[#allocation37_spill] sm:$0xff] }
 0xced   :  { %5513 = vmatprep.subr.mxu1 %v13990_v49  ;;  %5230 = vmatpush1.msra.mxu0 %v14120_v58  ;;  %v16466_v49 = vld [vmem:[#allocation38_spill] sm:$0xff] }
 0xcee   :  { %5515 = vmatpush1.msra.mxu1 %v13992_v45  ;;  %5233 = vmatprep.subr.mxu0 %v14184_v25  ;;  %v16467_v45 = vld [vmem:[#allocation39_spill] sm:$0xff] }
 0xcef   :  { %5517 = vmatprep.subr.mxu1 %v14003_v28  ;;  %5236 = vmatpush1.msra.mxu0 %v14188_v57  ;;  %v16470_v28 = vld [vmem:[#allocation30_spill] sm:$0xff]  ;;  %v14412_v57 = vld [vmem:[%s16126_s4] ss:$0 sm:$0xff] }
 0xcf0   :  { %5269 = vmatprep.mubr.f32.mxu0 %v16326_v41  ;;  %5519 = vmatpush1.msra.mxu1 %v14015_v40 }
 0xcf1   :  { %5272 = vmatmul.mubr.f32.vlgmr.msra.gmra.mxu0 %v5011_v46  ;;  %5387 = vmatprep.subr.mxu0 %v14019_v20  ;;  %v5625_v46 = vld [vmem:[#allocation9 + $0x40] sm:$0xff] }
 0xcf2   :  { %5521 = vmatprep.subr.mxu1 %v14082_v43  ;;  %5391 = vmatpush1.msra.mxu0 %v14022_v17 }
 0xcf3   :  { %5523 = vmatpush1.msra.mxu1 %v14084_v35  ;;  %5395 = vmatprep.subr.mxu0 %v14025_v38 }
 0xcf4   :  { %5525 = vmatprep.subr.mxu1 %v14086_v44  ;;  %5399 = vmatpush1.msra.mxu0 %v14032_v52 }
 0xcf5   :  { %5527 = vmatpush1.msra.mxu1 %v14091_v23  ;;  %5403 = vmatprep.subr.mxu0 %v14035_v53  ;;  %v4906_v23 = vld [vmem:[#allocation2 + $0x10] sm:$0x30] }
 0xcf6   :  { %5529 = vmatprep.subr.mxu1 %v14093_v6  ;;  %5407 = vmatpush1.msra.mxu0 %v14038_v55 }
 0xcf7   :  { %5531 = vmatpush1.msra.mxu1 %v14095_v34  ;;  %5411 = vmatprep.subr.mxu0 %v14051_v2 }
 0xcf8   :  { %5533 = vmatprep.subr.mxu1 %v14179_v29  ;;  %5415 = vmatpush1.msra.mxu0 %v16462_v31 }
 0xcf9   :  { %5535 = vmatpush1.msra.mxu1 %v14181_v9  ;;  %5568 = vmatprep.mubr.f32.mxu1 %v16326_v41 }
 0xcfa   :  { %5419 = vmatprep.subr.mxu0 %v16463_v26  ;;  %5570 = vmatmul.mubr.f32.vlgmr.msra.gmra.mxu1 %v14335_v30  ;;  %v14444_v26 = vsub.f32 %v5629_v62, %v14425_v13 }
 0xcfb   :  { %5423 = vmatpush1.msra.mxu0 %v16464_v51  ;;  %5480 = vmatprep.mubr.f32.mxu0 %v16326_v41  ;;  %v14447_v51 = vsub.f32 %v5628_v3, %v14427_v18 }
 0xcfc   :  { %5427 = vmatprep.subr.mxu0 %v16465_v39  ;;  %5874 = vmatprep.mubr.f32.mxu1 %v16326_v41  ;;  %v14450_v39 = vsub.f32 %v5627_v14, %v14429_v4 }
 0xcfd   :  { %5431 = vmatpush1.msra.mxu0 %v16466_v49  ;;  %v14452_v49 = vand.u32 4294901760, %v5625_v46 }
 0xcfe   :  { %5435 = vmatprep.subr.mxu0 %v16467_v45  ;;  %v5748_v45 = vand.u32 4294901760, %v14432_v60 }
 0xcff   :  { %5439 = vmatpush1.msra.mxu0 %v16468_v1  ;;  %v5754_v1 = vand.u32 4294901760, %v14435_v32 }
 0xd00   :  { %5443 = vmatprep.subr.mxu0 %v16469_v11  ;;  %v5760_v11 = vand.u32 4294901760, %v14438_v47 }
 0xd01   :  { %5447 = vmatpush1.msra.mxu0 %v16470_v28 }
 0xd02   :  { %5482 = vmatmul.mubr.f32.vlgmr.msra.gmra.mxu0 %v14335_v30  ;;  %v5626_v30 = vld [vmem:[#allocation9 + $0x48] sm:$0xff]  ;;  %5655 = vmatprep.subr.mxu0 %v14419_v15 }
 0xd03   :  { %5718 = vmatprep.mubr.f32.mxu0 %v16326_v41  ;;  %v14440_v31 = vand.u32 4294901760, %v5626_v30  ;;  %5657 = vmatpush1.msra.mxu0 %v14421_v8 }
 0xd04   :  { %5659 = vmatprep.subr.mxu0 %v14423_v19 }
 0xd05   :  { %v14459_v28 = vsub.f32 %v5626_v30, %v14440_v31  ;;  %5661 = vmatpush1.msra.mxu0 %v14425_v13 }
 0xd06   :  { %5663 = vmatprep.subr.mxu0 %v14427_v18 }
 0xd07   :  { %5665 = vmatpush1.msra.mxu0 %v14429_v4 }
 0xd08   :  { %5667 = vmatprep.subr.mxu0 %v14440_v31 }
 0xd09   :  { %5669 = vmatpush1.msra.mxu0 %v14452_v49 }
 0xd98   :  { %v5168_v54 = vpop.f32.mrf.mxu1 }
 0xd9a   :  { %v5170_v17 = vpop.f32.mrf.mxu1 }
 0xda0   :  { %v5016_v10 = vpop.f32.mrf.mxu0 }
 0xda1   :  { %v5169_v20 = vadd.f32 %v5168_v54, %v5016_v10  ;;  %v5766_v10 = vand.u32 4294901760, %v14444_v26  ;;  %v5772_v54 = vand.u32 4294901760, %v14447_v51 }
 0xda2   :  { %v5018_v22 = vpop.f32.mrf.mxu0 }
 0xda3   :  { %v5171_v24 = vadd.f32 %v5170_v17, %v5018_v22  ;;  %v5778_v22 = vand.u32 4294901760, %v14450_v39  ;;  %v5755_v17 = vsub.f32 %v14435_v32, %v5754_v1 }
 0xda8   :  { %v5363_v50 = vpop.f32.mrf.mxu1 }
 0xdaa   :  { %v5365_v55 = vpop.f32.mrf.mxu1 }
 0xdb1   :  { %v5273_v40 = vpop.f32.mrf.mxu0 }
 0xdb2   :  { %v5274_v38 = vadd.f32 %v5273_v40, %v5169_v20  ;;  %v14466_v40 = vsub.f32 %v5625_v46, %v14452_v49  ;;  %v5749_v20 = vsub.f32 %v14432_v60, %v5748_v45 }
 0xdb3   :  { %v5275_v52 = vpop.f32.mrf.mxu0 }
 0xdb4   :  { %v5364_v53 = vadd.f32 %v5363_v50, %v5274_v38  ;;  %v5276_v5 = vadd.f32 %v5275_v52, %v5171_v24  ;;  %v5761_v38 = vsub.f32 %v14438_v47, %v5760_v11  ;;  %v5784_v50 = vand.u32 4294901760, %v14459_v28  ;;  %v5621_v24 = vld [vmem:[#allocation9 + $0x20] sm:$0xff] }
 0xdb5   :  { %v5767_v52 = vsub.f32 %v14444_v26, %v5766_v10 }
 0xdb6   :  { %v5366_v58 = vadd.f32 %v5365_v55, %v5276_v5  ;;  %v5779_v55 = vsub.f32 %v14450_v39, %v5778_v22  ;;  %v5620_v5 = vld [vmem:[#allocation9 + $0x18] sm:$0xff] }
 0xdba   :  { %v5571_v43 = vpop.f32.mrf.mxu1 }
 0xdbc   :  { %v5573_v9 = vpop.f32.mrf.mxu1 }
 0xdc2   :  { %v5483_v56 = vpop.f32.mrf.mxu0 }
 0xdc3   :  { %v5484_v2 = vadd.f32 %v5483_v56, %v5364_v53  ;;  %v5773_v53 = vsub.f32 %v14447_v51, %v5772_v54  ;;  %v5790_v56 = vand.u32 4294901760, %v14466_v40 }
 0xdc4   :  { %v5485_v37 = vpop.f32.mrf.mxu0 }
 0xdc5   :  { %v5572_v35 = vadd.f32 %v5571_v43, %v5484_v2  ;;  %v5486_v29 = vadd.f32 %v5485_v37, %v5366_v58  ;;  %v5624_v2 = vld [vmem:[#allocation9 + $0x38] sm:$0xff]  ;;  %v5623_v43 = vld [vmem:[#allocation9 + $0x30] sm:$0xff]  ;;  %v5768_v37 = vand.u32 4294901760, %v5767_v52  ;;  %v5774_v58 = vand.u32 4294901760, %v5773_v53 }
 0xdc7   :  { %v5577_v44 = vrot.slane %v5572_v35, 4  ;;  %v5574_v25 = vadd.f32 %v5573_v9, %v5486_v29  ;;  %v5622_v35 = vld [vmem:[#allocation9 + $0x28] sm:$0xff]  ;;  %v14499_v29 = vand.u32 4294901760, %v5624_v2  ;;  %v14501_v9 = vand.u32 4294901760, %v5623_v43 }
 0xdc9   :  { %v5579_v6 = vadd.f32 %v5577_v44, %v4906_v23  ;;  %v5593_v48 = vadd.f32 %v14412_v57, %v5574_v25  ;;  %v5750_v44 = vand.u32 4294901760, %v5749_v20  ;;  %v5756_v23 = vand.u32 4294901760, %v5755_v17  ;;  %5671 = vmatprep.subr.mxu0 %v14499_v29 }
 0xdca   :  { %v14503_v25 = vand.u32 4294901760, %v5622_v35  ;;  %v14515_v61 = vsub.f32 %v5623_v43, %v14501_v9  ;;  %5673 = vmatpush1.msra.mxu0 %v14501_v9 }
 0xdcb   :  { %v12550_v34 = vmul.f32 -1.442695, %v5579_v6  ;;  %v5595_v42 = vrot.slane %v5593_v48, 4  ;;  %v5762_v6 = vand.u32 4294901760, %v5761_v38  ;;  %5751 = vmatprep.subr.mxu1 %v5750_v44  ;;  %v5780_v48 = vand.u32 4294901760, %v5779_v55 }
 0xdcc   :  { %5757 = vmatpush1.msra.mxu1 %v5756_v23  ;;  %v14518_v16 = vsub.f32 %v5622_v35, %v14503_v25  ;;  %v5802_v46 = vand.u32 4294901760, %v14515_v61  ;;  %5675 = vmatprep.subr.mxu0 %v14503_v25 }
 0xdcd   :  { %12611 = vpow2.f32 %v12550_v34  ;;  %v5785_v34 = vsub.f32 %v14459_v28, %v5784_v50  ;;  %5763 = vmatprep.subr.mxu1 %v5762_v6 }
 0xdce   :  { %5769 = vmatpush1.msra.mxu1 %v5768_v37  ;;  %v5808_v20 = vand.u32 4294901760, %v14518_v16  ;;  %v5803_v55 = vsub.f32 %v14515_v61, %v5802_v46  ;;  %v5618_v37 = vld [vmem:[#allocation9 + $0x8] sm:$0xff] }
 0xdcf   :  { %5775 = vmatprep.subr.mxu1 %v5774_v58  ;;  %v5617_v58 = vld [vmem:[#allocation9] sm:$0xff] }
 0xdd0   :  { %5781 = vmatpush1.msra.mxu1 %v5780_v48  ;;  %v5804_v6 = vand.u32 4294901760, %v5803_v55  ;;  %v14561_v48 = vand.u32 4294901760, %v5617_v58 }
 0xdda   :  { %v12612_v36 = vpop.eup %12611 }
 0xddb   :  { %v5583_v12 = vadd.f32 1.0, %v12612_v36  ;;  %v5619_v36 = vld [vmem:[#allocation9 + $0x10] sm:$0xff] }
 0xddd   :  { %12613 = vrcp.f32 %v5583_v12  ;;  %v5791_v12 = vsub.f32 %v14466_v40, %v5790_v56 }
 0xddf   :  { %v5792_v27 = vand.u32 4294901760, %v5791_v12  ;;  %v14559_v12 = vand.u32 4294901760, %v5618_v37 }
 0xdea   :  { %v14415_v0 = vpop.eup %12613 }
 0xdeb   :  { %v5597_v63 = vmul.f32 %v14415_v0, %v5595_v42  ;;  %v14505_v42 = vand.u32 4294901760, %v5621_v24 }
 0xded   :  { %v5598_v7 = vadd.f32 %v5597_v63, %v4907_v21  ;;  %v14507_v63 = vand.u32 4294901760, %v5620_v5  ;;  %v14509_v21 = vand.u32 4294901760, %v5619_v36  ;;  %v14522_v62 = vsub.f32 %v5621_v24, %v14505_v42  ;;  %5677 = vmatpush1.msra.mxu0 %v14505_v42 }
 0xdef   :  { %12615 = vtanh.f32 %v5598_v7  ;;  %v5786_v7 = vand.u32 4294901760, %v5785_v34  ;;  %v14525_v3 = vsub.f32 %v5620_v5, %v14507_v63  ;;  %v14528_v14 = vsub.f32 %v5619_v36, %v14509_v21  ;;  %5679 = vmatprep.subr.mxu0 %v14507_v63 }
 0xdf0   :  { %v5814_v17 = vand.u32 4294901760, %v14522_v62  ;;  %5681 = vmatpush1.msra.mxu0 %v14509_v21 }
 0xdf1   :  { %v5820_v38 = vand.u32 4294901760, %v14525_v3  ;;  %v5826_v52 = vand.u32 4294901760, %v14528_v14  ;;  %5787 = vmatprep.subr.mxu1 %v5786_v7  ;;  %v14564_v7 = vsub.f32 %v5618_v37, %v14559_v12  ;;  %5683 = vmatprep.subr.mxu0 %v14559_v12 }
 0xdf2   :  { %5793 = vmatpush1.msra.mxu1 %v5792_v27  ;;  %v5815_v43 = vsub.f32 %v14522_v62, %v5814_v17  ;;  %v14568_v27 = vsub.f32 %v5617_v58, %v14561_v48  ;;  %5685 = vmatpush1.msra.mxu0 %v14561_v48  ;;  %v16471_v58 = vld [vmem:[#allocation46_spill] sm:$0xff] }
 0xdf3   :  { %v5821_v35 = vsub.f32 %v14525_v3, %v5820_v38  ;;  %v5827_v44 = vsub.f32 %v14528_v14, %v5826_v52  ;;  %5900 = vmatprep.subr.mxu0 %v14432_v60 }
 0xdf4   :  { %v5816_v24 = vand.u32 4294901760, %v5815_v43  ;;  %v5838_v55 = vand.u32 4294901760, %v14568_v27 }
 0xdf5   :  { %v5822_v5 = vand.u32 4294901760, %v5821_v35  ;;  %v5828_v36 = vand.u32 4294901760, %v5827_v44 }
 0xdf6   :  { %v5839_v43 = vsub.f32 %v14568_v27, %v5838_v55 }
 0xdf8   :  { %v5840_v44 = vand.u32 4294901760, %v5839_v43 }
 0xdfc   :  { %v12616_v33 = vpop.eup %12615 }
 0xdfd   :  { %5602 = vrot.lane.b32.xlu0 %v12616_v33, %s12810_s13  ;;  %v14512_v33 = vsub.f32 %v5624_v2, %v14499_v29  ;;  %v5809_v2 = vsub.f32 %v14518_v16, %v5808_v20 }
 0xdff   :  { %v5796_v30 = vand.u32 4294901760, %v14512_v33  ;;  %v5810_v34 = vand.u32 4294901760, %v5809_v2 }
 0xe01   :  { %v5797_v53 = vsub.f32 %v14512_v33, %v5796_v30 }
 0xe03   :  { %v5798_v23 = vand.u32 4294901760, %v5797_v53  ;;  %v5832_v53 = vand.u32 4294901760, %v14564_v7 }
 0xe05   :  { %5799 = vmatprep.subr.mxu1 %v5798_v23  ;;  %v5833_v2 = vsub.f32 %v14564_v7, %v5832_v53  ;;  %v5600_v23 = vsub.f32 1.0, %v14415_v0 }
 0xe06   :  { %5805 = vmatpush1.msra.mxu1 %v5804_v6  ;;  %v5606_v6 = vrot.slane %v14330_v59, 6 }
 0xe07   :  { %5811 = vmatprep.subr.mxu1 %v5810_v34  ;;  %v5834_v35 = vand.u32 4294901760, %v5833_v2  ;;  %v16472_v2 = vld [vmem:[#allocation18_spill] sm:$0xff] }
 0xe08   :  { %5817 = vmatpush1.msra.mxu1 %v5816_v24  ;;  %v5608_v24 = vmul.f32 %v14415_v0, %v5606_v6 }
 0xe09   :  { %5823 = vmatprep.subr.mxu1 %v5822_v5 }
 0xe0a   :  { %5829 = vmatpush1.msra.mxu1 %v5828_v36 }
 0xe0b   :  { %5835 = vmatprep.subr.mxu1 %v5834_v35 }
 0xe0c   :  { %5841 = vmatpush1.msra.mxu1 %v5840_v44 }
 0xe0d   :  { %6004 = vmatprep.subr.mxu1 %v14419_v15 }
 0xe6f   :  { %v5603_v34 = vpop.permute.xlu0 %5602 }
 0xe70   :  { %v5605_v5 = vmul.f32 %v5603_v34, %v5600_v23 }
 0xe72   :  { %v14584_v36 = vadd.f32 %v5608_v24, %v5605_v5 }
 0xe74   :  { %v5633_v37 = vrot.slane %v14584_v36, 4 }
 0xe76   :  { %5634 = vrot.lane.b32.xlu1 %v5633_v37, %s12810_s13 }
 0xe7a   :  { %2073 = vrot.lane.b32.xlu1 %v16471_v58, %s12810_s13 }
 0xe7e   :  { %3493 = vrot.lane.b32.xlu1 %v16472_v2, %s12810_s13 }
 0xe82   :  { %5611 = vrot.lane.b32.xlu1 %v14584_v36, %s12810_s13 }
 0xee8   :  { %v5635_v43 = vpop.permute.xlu1 %5634 }
 0xee9   :  { %v5636_v35 = vsel %vm667_vm1, %v5635_v43, 0 }
 0xeea   :  { %v14595_v0 = vand.u32 4294901760, %v5636_v35 }
 0xeec   :  { %v5720_v44 = vsub.f32 %v5636_v35, %v14595_v0  ;;  %5876 = vmatmul.mubr.f32.vlgmr.msra.gmra.mxu1 %v14595_v0  ;;  %v2074_v23 = vpop.permute.xlu1 %2073  ;;  %v6335_v35 = vld [vmem:[#allocation10 + $0x48] sm:$0xff] }
 0xeed   :  { %6006 = vmatpush1.msra.mxu1 %v14421_v8  ;;  %2077 = vst.msk [vmem:[#allocation3] sm:$0xc] %vm2076_vm3, %v2074_v23  ;;  %6067 = vmatprep.mubr.f32.mxu1 %v16326_v41  ;;  %v6334_v23 = vld [vmem:[#allocation10 + $0x40] sm:$0xff] }
 0xeee   :  { %v5721_v6 = vand.u32 4294901760, %v5720_v44  ;;  %6008 = vmatprep.subr.mxu1 %v14423_v19 }
 0xeef   :  { %6010 = vmatpush1.msra.mxu1 %v14425_v13 }
 0xef0   :  { %v5722_v34 = vsub.f32 %v5720_v44, %v5721_v6  ;;  %6012 = vmatprep.subr.mxu1 %v14427_v18  ;;  %v3494_v24 = vpop.permute.xlu1 %3493 }
 0xef1   :  { %6014 = vmatpush1.msra.mxu1 %v14429_v4  ;;  %3497 = vst.msk [vmem:[#allocation3] sm:$0xc0] %vm3496_vm4, %v3494_v24 }
 0xef2   :  { %v5723_v5 = vand.u32 4294901760, %v5722_v34  ;;  %6016 = vmatprep.subr.mxu1 %v14440_v31 }
 0xef3   :  { %6018 = vmatpush1.msra.mxu1 %v14452_v49 }
 0xef4   :  { %6020 = vmatprep.subr.mxu1 %v14499_v29  ;;  %5724 = vmatmul.mubr.f32.vlgmr.msra.gmra.mxu0 %v5723_v5  ;;  %v5612_v37 = vpop.permute.xlu1 %5611 }
 0xef5   :  { %5903 = vmatpush1.msra.mxu0 %v14435_v32  ;;  %6022 = vmatpush1.msra.mxu1 %v14501_v9  ;;  %5614 = vst.msk [vmem:[#allocation3 + $0x8] sm:$0x30] %vm2786_vm5, %v5612_v37 }
 0xef6   :  { %5906 = vmatprep.subr.mxu0 %v14438_v47  ;;  %6024 = vmatprep.subr.mxu1 %v14503_v25 }
 0xef7   :  { %5909 = vmatpush1.msra.mxu0 %v14444_v26  ;;  %6026 = vmatpush1.msra.mxu1 %v14505_v42 }
 0xef8   :  { %5912 = vmatprep.subr.mxu0 %v14447_v51  ;;  %6028 = vmatprep.subr.mxu1 %v14507_v63 }
 0xef9   :  { %5915 = vmatpush1.msra.mxu0 %v14450_v39  ;;  %6030 = vmatpush1.msra.mxu1 %v14509_v21 }
 0xefa   :  { %5918 = vmatprep.subr.mxu0 %v14459_v28  ;;  %6032 = vmatprep.subr.mxu1 %v14559_v12 }
 0xefb   :  { %5921 = vmatpush1.msra.mxu0 %v14466_v40  ;;  %6034 = vmatpush1.msra.mxu1 %v14561_v48 }
 0xefc   :  { %5924 = vmatprep.subr.mxu0 %v14512_v33  ;;  %6071 = vmatmul.mubr.f32.vlgmr.msra.gmra.mxu1 %v5721_v6  ;;  %v5616_v6 = vld [vmem:[#allocation2 + $0x18] sm:$0xc0] }
 0xefd   :  { %6214 = vmatprep.subr.mxu1 %v14419_v15  ;;  %5927 = vmatpush1.msra.mxu0 %v14515_v61  ;;  %v6341_v15 = vld [vmem:[#allocation10 + $0x78] sm:$0xff] }
 0xefe   :  { %6216 = vmatpush1.msra.mxu1 %v14421_v8  ;;  %5930 = vmatprep.subr.mxu0 %v14518_v16  ;;  %v14688_v8 = vand.u32 4294901760, %v6341_v15 }
 0xeff   :  { %6218 = vmatprep.subr.mxu1 %v14423_v19  ;;  %5933 = vmatpush1.msra.mxu0 %v14522_v62 }
 0xf00   :  { %6220 = vmatpush1.msra.mxu1 %v14425_v13  ;;  %5936 = vmatprep.subr.mxu0 %v14525_v3  ;;  %v14691_v19 = vsub.f32 %v6341_v15, %v14688_v8 }
 0xf01   :  { %6222 = vmatprep.subr.mxu1 %v14427_v18  ;;  %5939 = vmatpush1.msra.mxu0 %v14528_v14  ;;  %v6340_v14 = vld [vmem:[#allocation10 + $0x70] sm:$0xff] }
 0xf02   :  { %6224 = vmatpush1.msra.mxu1 %v14429_v4  ;;  %5942 = vmatprep.subr.mxu0 %v14564_v7  ;;  %v6481_v13 = vand.u32 4294901760, %v14691_v19  ;;  %v6315_v7 = vrot.slane %v14584_v36, 6 }
 0xf03   :  { %6226 = vmatprep.subr.mxu1 %v14440_v31  ;;  %5945 = vmatpush1.msra.mxu0 %v14568_v27 }
 0xf04   :  { %5978 = vmatprep.mubr.f32.mxu0 %v16326_v41  ;;  %6228 = vmatpush1.msra.mxu1 %v14452_v49  ;;  %v6482_v18 = vsub.f32 %v14691_v19, %v6481_v13 }
 0xf05   :  { %5981 = vmatmul.mubr.f32.vlgmr.msra.gmra.mxu0 %v5720_v44  ;;  %6096 = vmatprep.subr.mxu0 %v5748_v45 }
 0xf06   :  { %6230 = vmatprep.subr.mxu1 %v14499_v29  ;;  %6100 = vmatpush1.msra.mxu0 %v5754_v1  ;;  %v6483_v4 = vand.u32 4294901760, %v6482_v18 }
 0xf07   :  { %6232 = vmatpush1.msra.mxu1 %v14501_v9  ;;  %6104 = vmatprep.subr.mxu0 %v5760_v11 }
 0xf08   :  { %6234 = vmatprep.subr.mxu1 %v14503_v25  ;;  %6108 = vmatpush1.msra.mxu0 %v5766_v10 }
 0xf09   :  { %6236 = vmatpush1.msra.mxu1 %v14505_v42  ;;  %6112 = vmatprep.subr.mxu0 %v5772_v54 }
 0xf0a   :  { %6238 = vmatprep.subr.mxu1 %v14507_v63  ;;  %6116 = vmatpush1.msra.mxu0 %v5778_v22 }
 0xf0b   :  { %6240 = vmatpush1.msra.mxu1 %v14509_v21  ;;  %6120 = vmatprep.subr.mxu0 %v5784_v50  ;;  %v5615_v50 = vld [vmem:[#allocation2 + $0x10] sm:$0xc0] }
 0xf0c   :  { %6242 = vmatprep.subr.mxu1 %v14559_v12  ;;  %6124 = vmatpush1.msra.mxu0 %v5790_v56  ;;  %v6337_v12 = vld [vmem:[#allocation10 + $0x58] sm:$0xff] }
 0xf0d   :  { %6244 = vmatpush1.msra.mxu1 %v14561_v48  ;;  %6277 = vmatprep.mubr.f32.mxu1 %v16326_v41  ;;  %v14713_v27 = vand.u32 4294901760, %v6337_v12 }
 0xf0e   :  { %6128 = vmatprep.subr.mxu0 %v5796_v30  ;;  %6279 = vmatmul.mubr.f32.vlgmr.msra.gmra.mxu1 %v14595_v0  ;;  %v14699_v30 = vand.u32 4294901760, %v6340_v14 }
 0xf0f   :  { %6132 = vmatpush1.msra.mxu0 %v5802_v46  ;;  %6189 = vmatprep.mubr.f32.mxu0 %v16326_v41  ;;  %v6339_v46 = vld [vmem:[#allocation10 + $0x68] sm:$0xff]  ;;  %v14736_v5 = vsub.f32 %v6337_v12, %v14713_v27 }
 0xf10   :  { %6136 = vmatprep.subr.mxu0 %v5808_v20  ;;  %6607 = vmatprep.mubr.f32.mxu1 %v16326_v41  ;;  %v14701_v20 = vand.u32 4294901760, %v6339_v46 }
 0xf11   :  { %6140 = vmatpush1.msra.mxu0 %v5814_v17  ;;  %6484 = vmatprep.subr.mxu1 %v6483_v4  ;;  %v6338_v17 = vld [vmem:[#allocation10 + $0x60] sm:$0xff]  ;;  %v14745_v4 = vand.u32 4294901760, %v6335_v35 }
 0xf12   :  { %6144 = vmatprep.subr.mxu0 %v5820_v38  ;;  %v14704_v38 = vsub.f32 %v6340_v14, %v14699_v30 }
 0xf13   :  { %6148 = vmatpush1.msra.mxu0 %v5826_v52  ;;  %v14706_v52 = vand.u32 4294901760, %v6338_v17 }
 0xf14   :  { %6152 = vmatprep.subr.mxu0 %v5832_v53  ;;  %v6336_v53 = vld [vmem:[#allocation10 + $0x50] sm:$0xff]  ;;  %v6487_v58 = vand.u32 4294901760, %v14704_v38 }
 0xf15   :  { %6156 = vmatpush1.msra.mxu0 %v5838_v55  ;;  %v14720_v2 = vsub.f32 %v6338_v17, %v14706_v52  ;;  %v14722_v43 = vand.u32 4294901760, %v6336_v53 }
 0xf16   :  { %6191 = vmatmul.mubr.f32.vlgmr.msra.gmra.mxu0 %v14595_v0  ;;  %6377 = vmatprep.subr.mxu0 %v14688_v8  ;;  %v6488_v34 = vsub.f32 %v14704_v38, %v6487_v58 }
 0xf17   :  { %6440 = vmatprep.mubr.f32.mxu0 %v16326_v41  ;;  %6379 = vmatpush1.msra.mxu0 %v14699_v30  ;;  %v6499_v24 = vand.u32 4294901760, %v14720_v2  ;;  %v14739_v37 = vsub.f32 %v6336_v53, %v14722_v43  ;;  %v6326_v53 = vld [vmem:[#allocation10] sm:$0xff] }
 0xf18   :  { %6381 = vmatprep.subr.mxu0 %v14701_v20 }
 0xf19   :  { %6383 = vmatpush1.msra.mxu0 %v14706_v52 }
 0xf1a   :  { %6385 = vmatprep.subr.mxu0 %v14713_v27 }
 0xf1b   :  { %6387 = vmatpush1.msra.mxu0 %v14722_v43 }
 0xf1c   :  { %6389 = vmatprep.subr.mxu0 %v14745_v4 }
 0xfac   :  { %v5877_v32 = vpop.f32.mrf.mxu1 }
 0xfae   :  { %v5879_v51 = vpop.f32.mrf.mxu1 }
 0xfb4   :  { %v5725_v60 = vpop.f32.mrf.mxu0 }
 0xfb5   :  { %v5878_v26 = vadd.f32 %v5877_v32, %v5725_v60  ;;  %v14747_v60 = vand.u32 4294901760, %v6334_v23  ;;  %v6333_v32 = vld [vmem:[#allocation10 + $0x38] sm:$0xff] }
 0xfb6   :  { %v5727_v47 = vpop.f32.mrf.mxu0 }
 0xfb7   :  { %v5880_v9 = vadd.f32 %v5879_v51, %v5727_v47  ;;  %v6489_v47 = vand.u32 4294901760, %v6488_v34  ;;  %v6511_v51 = vand.u32 4294901760, %v14739_v37  ;;  %6391 = vmatpush1.msra.mxu0 %v14747_v60 }
 0xfb9   :  { %6490 = vmatpush1.msra.mxu1 %v6489_v47 }
 0xfbc   :  { %v6072_v49 = vpop.f32.mrf.mxu1 }
 0xfbe   :  { %v6074_v11 = vpop.f32.mrf.mxu1 }
 0xfc5   :  { %v5982_v31 = vpop.f32.mrf.mxu0 }
 0xfc6   :  { %v5983_v39 = vadd.f32 %v5982_v31, %v5878_v26  ;;  %v6500_v31 = vsub.f32 %v14720_v2, %v6499_v24  ;;  %v6505_v26 = vand.u32 4294901760, %v14736_v5 }
 0xfc7   :  { %v5984_v45 = vpop.f32.mrf.mxu0 }
 0xfc8   :  { %v6073_v1 = vadd.f32 %v6072_v49, %v5983_v39  ;;  %v5985_v25 = vadd.f32 %v5984_v45, %v5880_v9  ;;  %v6332_v39 = vld [vmem:[#allocation10 + $0x30] sm:$0xff]  ;;  %v6331_v49 = vld [vmem:[#allocation10 + $0x28] sm:$0xff] }
 0xfc9   :  { %v14774_v9 = vand.u32 4294901760, %v6331_v49 }
 0xfca   :  { %v6075_v33 = vadd.f32 %v6074_v11, %v5985_v25  ;;  %v14758_v11 = vsub.f32 %v6334_v23, %v14747_v60  ;;  %v6329_v25 = vld [vmem:[#allocation10 + $0x18] sm:$0xff] }
 0xfcb   :  { %v14792_v14 = vsub.f32 %v6331_v49, %v14774_v9  ;;  %v14799_v12 = vand.u32 4294901760, %v6329_v25  ;;  %v14826_v49 = vand.u32 4294901760, %v6326_v53 }
 0xfce   :  { %v6280_v54 = vpop.f32.mrf.mxu1 }
 0xfd0   :  { %v6282_v16 = vpop.f32.mrf.mxu1 }
 0xfd6   :  { %v6192_v28 = vpop.f32.mrf.mxu0 }
 0xfd7   :  { %v6193_v10 = vadd.f32 %v6192_v28, %v6073_v1  ;;  %v14755_v1 = vsub.f32 %v6335_v35, %v14745_v4  ;;  %v6330_v28 = vld [vmem:[#allocation10 + $0x20] sm:$0xff] }
 0xfd8   :  { %v6194_v63 = vpop.f32.mrf.mxu0 }
 0xfd9   :  { %v6281_v22 = vadd.f32 %v6280_v54, %v6193_v10  ;;  %v6195_v61 = vadd.f32 %v6194_v63, %v6075_v33  ;;  %v6501_v10 = vand.u32 4294901760, %v6500_v31  ;;  %v6506_v54 = vsub.f32 %v14736_v5, %v6505_v26 }
 0xfdb   :  { %v6286_v40 = vrot.slane %v6281_v22, 2  ;;  %v6283_v62 = vadd.f32 %v6282_v16, %v6195_v61  ;;  %v6512_v22 = vsub.f32 %v14739_v37, %v6511_v51  ;;  %v6507_v63 = vand.u32 4294901760, %v6506_v54 }
 0xfdc   :  { %v14779_v61 = vand.u32 4294901760, %v6330_v28 }
 0xfdd   :  { %v6288_v56 = vadd.f32 %v6286_v40, %v5615_v50  ;;  %v6302_v3 = vadd.f32 %v14412_v57, %v6283_v62  ;;  %v14711_v57 = vsub.f32 %v6339_v46, %v14701_v20  ;;  %v14767_v40 = vand.u32 4294901760, %v6333_v32 }
 0xfde   :  { %v6517_v50 = vand.u32 4294901760, %v14755_v1  ;;  %v14797_v17 = vsub.f32 %v6330_v28, %v14779_v61 }
 0xfdf   :  { %v12552_v29 = vmul.f32 -1.442695, %v6288_v56  ;;  %v6304_v48 = vrot.slane %v6302_v3, 2  ;;  %v6493_v44 = vand.u32 4294901760, %v14711_v57  ;;  %v6523_v56 = vand.u32 4294901760, %v14758_v11  ;;  %6393 = vmatprep.subr.mxu0 %v14767_v40 }
 0xfe0   :  { %v14777_v33 = vsub.f32 %v6333_v32, %v14767_v40  ;;  %v6518_v16 = vsub.f32 %v14755_v1, %v6517_v50 }
 0xfe1   :  { %12617 = vpow2.f32 %v12552_v29  ;;  %v6494_v18 = vsub.f32 %v14711_v57, %v6493_v44  ;;  %v14772_v29 = vand.u32 4294901760, %v6332_v39  ;;  %v6524_v62 = vsub.f32 %v14758_v11, %v6523_v56 }
 0xfe2   :  { %v6529_v46 = vand.u32 4294901760, %v14777_v33  ;;  %v6519_v35 = vand.u32 4294901760, %v6518_v16 }
 0xfe3   :  { %v6495_v45 = vand.u32 4294901760, %v6494_v18  ;;  %v14789_v3 = vsub.f32 %v6332_v39, %v14772_v29  ;;  %6395 = vmatpush1.msra.mxu0 %v14772_v29  ;;  %v14812_v18 = vsub.f32 %v6329_v25, %v14799_v12 }
 0xfe4   :  { %6397 = vmatprep.subr.mxu0 %v14774_v9  ;;  %v6530_v34 = vsub.f32 %v14777_v33, %v6529_v46 }
 0xfe5   :  { %6496 = vmatprep.subr.mxu1 %v6495_v45  ;;  %v6535_v23 = vand.u32 4294901760, %v14789_v3  ;;  %6399 = vmatpush1.msra.mxu0 %v14779_v61 }
 0xfe6   :  { %6502 = vmatpush1.msra.mxu1 %v6501_v10  ;;  %6401 = vmatprep.subr.mxu0 %v14799_v12  ;;  %v6531_v45 = vand.u32 4294901760, %v6530_v34  ;;  %v6553_v10 = vand.u32 4294901760, %v14812_v18 }
 0xfe7   :  { %6508 = vmatprep.subr.mxu1 %v6507_v63  ;;  %v6536_v47 = vsub.f32 %v14789_v3, %v6535_v23  ;;  %v14838_v63 = vsub.f32 %v6326_v53, %v14826_v49 }
 0xfe8   :  { %v6554_v16 = vsub.f32 %v14812_v18, %v6553_v10 }
 0xfe9   :  { %v16231_v53 = vand.u32 4294901760, %v14838_v63 }
 0xfee   :  { %v12618_v42 = vpop.eup %12617 }
 0xfef   :  { %v6292_v21 = vadd.f32 1.0, %v12618_v42  ;;  %v6328_v42 = vld [vmem:[#allocation10 + $0x10] sm:$0xff] }
 0xff1   :  { %12619 = vrcp.f32 %v6292_v21  ;;  %v6513_v21 = vand.u32 4294901760, %v6512_v22  ;;  %v6537_v22 = vand.u32 4294901760, %v6536_v47 }
 0xff3   :  { %6514 = vmatpush1.msra.mxu1 %v6513_v21 }
 0xff4   :  { %6520 = vmatprep.subr.mxu1 %v6519_v35 }
 0xffe   :  { %v14716_v55 = vpop.eup %12619 }
 0xfff   :  { %v6306_v36 = vmul.f32 %v14716_v55, %v6304_v48  ;;  %v14727_v0 = vmul.f32 %v14716_v55, %v6315_v7  ;;  %v14801_v48 = vand.u32 4294901760, %v6328_v42  ;;  %v6327_v7 = vld [vmem:[#allocation10 + $0x8] sm:$0xff] }
0x1000   :  { %v14824_v39 = vand.u32 4294901760, %v6327_v7 }
0x1001   :  { %v6307_v15 = vadd.f32 %v6306_v36, %v5616_v6  ;;  %v6525_v36 = vand.u32 4294901760, %v6524_v62  ;;  %v6541_v6 = vand.u32 4294901760, %v14792_v14  ;;  %v14815_v32 = vsub.f32 %v6328_v42, %v14801_v48  ;;  %6403 = vmatpush1.msra.mxu0 %v14801_v48 }
0x1002   :  { %v14835_v42 = vsub.f32 %v6327_v7, %v14824_v39  ;;  %6405 = vmatprep.subr.mxu0 %v14824_v39 }
0x1003   :  { %12621 = vtanh.f32 %v6307_v15  ;;  %v6547_v15 = vand.u32 4294901760, %v14797_v17  ;;  %v6542_v31 = vsub.f32 %v14792_v14, %v6541_v6  ;;  %6526 = vmatpush1.msra.mxu1 %v6525_v36  ;;  %v6559_v54 = vand.u32 4294901760, %v14815_v32  ;;  %6407 = vmatpush1.msra.mxu0 %v14826_v49 }
0x1004   :  { %6532 = vmatprep.subr.mxu1 %v6531_v45  ;;  %v16232_v7 = vand.u32 4294901760, %v14835_v42  ;;  %6640 = vmatprep.subr.mxu0 %v14691_v19  ;;  %v6555_v36 = vand.u32 4294901760, %v6554_v16  ;;  %v7076_v19 = vld [vmem:[#allocation12 + $0x70] sm:$0xff] }
0x1005   :  { %v6548_v28 = vsub.f32 %v14797_v17, %v6547_v15  ;;  %v6543_v25 = vand.u32 4294901760, %v6542_v31  ;;  %v6560_v62 = vsub.f32 %v14815_v32, %v6559_v54  ;;  %6538 = vmatpush1.msra.mxu1 %v6537_v22  ;;  %v6572_v31 = vsub.f32 %v14838_v63, %v16231_v53  ;;  %v16473_v22 = vld [vmem:[#allocation31_spill] sm:$0xff] }
0x1006   :  { %v6566_v47 = vsub.f32 %v14835_v42, %v16232_v7 }
0x1007   :  { %v6549_v21 = vand.u32 4294901760, %v6548_v28  ;;  %6544 = vmatprep.subr.mxu1 %v6543_v25  ;;  %v6561_v34 = vand.u32 4294901760, %v6560_v62  ;;  %v6573_v28 = vand.u32 4294901760, %v6572_v31  ;;  %v6309_v25 = vsub.f32 1.0, %v14716_v55 }
0x1008   :  { %v6567_v45 = vand.u32 4294901760, %v6566_v47 }
0x1009   :  { %6550 = vmatpush1.msra.mxu1 %v6549_v21 }
0x100a   :  { %6556 = vmatprep.subr.mxu1 %v6555_v36 }
0x100b   :  { %6562 = vmatpush1.msra.mxu1 %v6561_v34 }
0x100c   :  { %6568 = vmatprep.subr.mxu1 %v6567_v45 }
0x100d   :  { %6574 = vmatpush1.msra.mxu1 %v6573_v28 }
0x100e   :  { %6752 = vmatprep.subr.mxu1 %v14688_v8 }
0x1010   :  { %v12622_v35 = vpop.eup %12621 }
0x1011   :  { %6311 = vrot.lane.b32.xlu0 %v12622_v35, %s12810_s13 }
0x1015   :  { %2783 = vrot.lane.b32.xlu0 %v16473_v22, %s12810_s13 }
0x1019   :  { %4902 = vrot.lane.b32.xlu0 %v14330_v59, %s12810_s13 }
0x1083   :  { %v6312_v21 = vpop.permute.xlu0 %6311 }
0x1084   :  { %v6314_v16 = vmul.f32 %v6312_v21, %v6309_v25 }
0x1086   :  { %v6318_v62 = vadd.f32 %v14727_v0, %v6314_v16  ;;  %v7077_v16 = vld [vmem:[#allocation12 + $0x78] sm:$0xff] }
0x1087   :  { %v2784_v35 = vpop.permute.xlu0 %2783 }
0x1088   :  { %2787 = vst.msk [vmem:[#allocation3] sm:$0x30] %vm2786_vm5, %v2784_v35  ;;  %6320 = vrot.lane.b32.xlu0 %v6318_v62, %s12810_s13  ;;  %v14923_v35 = vand.u32 4294901760, %v7077_v16 }
0x108b   :  { %v4903_v36 = vpop.permute.xlu0 %4902 }
0x108c   :  { %4905 = vst.msk [vmem:[#allocation3 + $0x8] sm:$0xc] %vm2076_vm3, %v4903_v36  ;;  %v7075_v36 = vld [vmem:[#allocation12 + $0x68] sm:$0xff] }
0x108f   :  { %v6324_v34 = vld [vmem:[#allocation3] sm:$0xff] }
0x1090   :  { %v6355_v47 = vsel %vm667_vm1, %v6324_v34, 0  ;;  %v7074_v34 = vld [vmem:[#allocation12 + $0x60] sm:$0xff] }
0x1091   :  { %v14869_v31 = vand.u32 4294901760, %v6355_v47 }
0x1093   :  { %v14872_v59 = vsub.f32 %v6355_v47, %v14869_v31  ;;  %6609 = vmatmul.mubr.f32.vlgmr.msra.gmra.mxu1 %v14869_v31 }
0x1094   :  { %6754 = vmatpush1.msra.mxu1 %v14699_v30  ;;  %6614 = vmatprep.mubr.f32.mxu1 %v16326_v41 }
0x1095   :  { %v6443_v55 = vand.u32 4294901760, %v14872_v59  ;;  %6756 = vmatprep.subr.mxu1 %v14701_v20 }
0x1096   :  { %6758 = vmatpush1.msra.mxu1 %v14706_v52 }
0x1097   :  { %v6444_v0 = vsub.f32 %v14872_v59, %v6443_v55  ;;  %6760 = vmatprep.subr.mxu1 %v14713_v27 }
0x1098   :  { %6762 = vmatpush1.msra.mxu1 %v14722_v43 }
0x1099   :  { %v6445_v45 = vand.u32 4294901760, %v6444_v0  ;;  %6764 = vmatprep.subr.mxu1 %v14745_v4  ;;  %v14928_v0 = vand.u32 4294901760, %v7076_v19 }
0x109a   :  { %6766 = vmatpush1.msra.mxu1 %v14747_v60 }
0x109b   :  { %6446 = vmatmul.mubr.f32.vlgmr.msra.gmra.mxu0 %v6445_v45  ;;  %6768 = vmatprep.subr.mxu1 %v14767_v40  ;;  %v7073_v45 = vld [vmem:[#allocation12 + $0x58] sm:$0xff] }
0x109c   :  { %6643 = vmatpush1.msra.mxu0 %v14704_v38  ;;  %6770 = vmatpush1.msra.mxu1 %v14772_v29 }
0x109d   :  { %6646 = vmatprep.subr.mxu0 %v14711_v57  ;;  %6772 = vmatprep.subr.mxu1 %v14774_v9 }
0x109e   :  { %6649 = vmatpush1.msra.mxu0 %v14720_v2  ;;  %6774 = vmatpush1.msra.mxu1 %v14779_v61 }
0x109f   :  { %6652 = vmatprep.subr.mxu0 %v14736_v5  ;;  %6776 = vmatprep.subr.mxu1 %v14799_v12 }
0x10a0   :  { %6655 = vmatpush1.msra.mxu0 %v14739_v37  ;;  %6778 = vmatpush1.msra.mxu1 %v14801_v48 }
0x10a1   :  { %6658 = vmatprep.subr.mxu0 %v14755_v1  ;;  %6780 = vmatprep.subr.mxu1 %v14824_v39 }
0x10a2   :  { %6661 = vmatpush1.msra.mxu0 %v14758_v11  ;;  %6782 = vmatpush1.msra.mxu1 %v14826_v49 }
0x10a3   :  { %6664 = vmatprep.subr.mxu0 %v14777_v33  ;;  %6978 = vmatprep.subr.mxu1 %v14688_v8 }
0x10a4   :  { %6667 = vmatpush1.msra.mxu0 %v14789_v3  ;;  %6451 = vmatprep.mubr.f32.mxu0 %v16326_v41 }
0x10a5   :  { %6670 = vmatprep.subr.mxu0 %v14792_v14 }
0x10a6   :  { %6673 = vmatpush1.msra.mxu0 %v14797_v17 }
0x10a7   :  { %6676 = vmatprep.subr.mxu0 %v14812_v18  ;;  %v16494_v18 = vand.u32 4294901760, %v14835_v42 }
0x10a8   :  { %6679 = vmatpush1.msra.mxu0 %v14815_v32 }
0x10a9   :  { %6682 = vmatprep.subr.mxu0 %v14835_v42 }
0x10aa   :  { %6685 = vmatpush1.msra.mxu0 %v14838_v63 }
0x10ab   :  { %6853 = vmatprep.subr.mxu0 %v6481_v13 }
0x10fa   :  { %v6321_v8 = vpop.permute.xlu0 %6320 }
0x10fb   :  { %6323 = vst.msk [vmem:[#allocation3 + $0x8] sm:$0xc0] %vm3496_vm4, %v6321_v8  ;;  %v14931_v8 = vand.u32 4294901760, %v7075_v36 }
0x1102   :  { %v6325_v28 = vld [vmem:[#allocation3 + $0x8] sm:$0xff] }
0x1103   :  { %v6358_v22 = vsel %vm667_vm1, %v6325_v28, 0  ;;  %v14937_v28 = vsub.f32 %v7077_v16, %v14923_v35 }
0x1104   :  { %v14914_v25 = vand.u32 4294901760, %v6358_v22 }
0x1105   :  { %16474 = vst [vmem:[#allocation42_spill] sm:$0xff] %v14937_v28 }
0x1106   :  { %6616 = vmatmul.mubr.f32.gmra.mxu1 %v14914_v25  ;;  %v14918_v21 = vsub.f32 %v6358_v22, %v14914_v25  ;;  %v7071_v22 = vld [vmem:[#allocation12 + $0x48] sm:$0xff] }
0x1107   :  { %6815 = vmatprep.mubr.f32.mxu1 %v16326_v41 }
0x1108   :  { %v6454_v62 = vand.u32 4294901760, %v14918_v21 }
0x110a   :  { %6819 = vmatmul.mubr.f32.vlgmr.msra.gmra.mxu1 %v6443_v55  ;;  %v6455_v13 = vsub.f32 %v14918_v21, %v6454_v62  ;;  %v14933_v55 = vand.u32 4294901760, %v7074_v34 }
0x110b   :  { %6980 = vmatpush1.msra.mxu1 %v14699_v30  ;;  %6824 = vmatprep.mubr.f32.mxu1 %v16326_v41  ;;  %v14940_v30 = vand.u32 4294901760, %v7073_v45 }
0x110c   :  { %6982 = vmatprep.subr.mxu1 %v14701_v20  ;;  %v6456_v47 = vand.u32 4294901760, %v6455_v13  ;;  %v7072_v20 = vld [vmem:[#allocation12 + $0x50] sm:$0xff]  ;;  %v14952_v16 = vsub.f32 %v7074_v34, %v14933_v55  ;;  %v14967_v13 = vand.u32 4294901760, %v7071_v22 }
0x110d   :  { %6984 = vmatpush1.msra.mxu1 %v14706_v52  ;;  %v14945_v52 = vsub.f32 %v7076_v19, %v14928_v0  ;;  %v7070_v19 = vld [vmem:[#allocation12 + $0x40] sm:$0xff] }
0x110e   :  { %6986 = vmatprep.subr.mxu1 %v14713_v27  ;;  %6457 = vmatmul.mubr.f32.gmra.mxu0 %v6456_v47  ;;  %v14949_v27 = vsub.f32 %v7075_v36, %v14931_v8  ;;  %v7069_v36 = vld [vmem:[#allocation12 + $0x38] sm:$0xff] }
0x110f   :  { %6828 = vmatmul.mubr.f32.gmra.mxu1 %v6454_v62  ;;  %6718 = vmatprep.mubr.f32.mxu0 %v16326_v41  ;;  %v14959_v62 = vand.u32 4294901760, %v7072_v20  ;;  %v14993_v2 = vand.u32 4294901760, %v7069_v36  ;;  %v7065_v47 = vld [vmem:[#allocation12 + $0x18] sm:$0xff] }
0x1110   :  { %6988 = vmatpush1.msra.mxu1 %v14722_v43  ;;  %7041 = vmatprep.mubr.f32.mxu1 %v16326_v41  ;;  %v14957_v43 = vand.u32 4294901760, %v14937_v28  ;;  %v14979_v38 = vand.u32 4294901760, %v14949_v27  ;;  %v15035_v53 = vand.u32 4294901760, %v7065_v47 }
0x1111   :  { %6990 = vmatprep.subr.mxu1 %v14745_v4  ;;  %v14965_v4 = vsub.f32 %v7073_v45, %v14940_v30 }
0x1112   :  { %6992 = vmatpush1.msra.mxu1 %v14747_v60  ;;  %6721 = vmatmul.mubr.f32.vlgmr.msra.gmra.mxu0 %v14872_v59  ;;  %16475 = vst [vmem:[#allocation43_spill] sm:$0xff] %v14957_v43  ;;  %v14973_v60 = vand.u32 4294901760, %v14945_v52  ;;  %v7068_v59 = vld [vmem:[#allocation12 + $0x30] sm:$0xff]  ;;  %16477 = vst [vmem:[#allocation22_spill] sm:$0xff] %v14979_v38  ;;  %v7189_v57 = vsub.f32 %v14937_v28, %v14957_v43 }
0x1113   :  { %6994 = vmatprep.subr.mxu1 %v14767_v40  ;;  %6857 = vmatpush1.msra.mxu0 %v6487_v58  ;;  %v14982_v58 = vand.u32 4294901760, %v14952_v16  ;;  %v14984_v40 = vand.u32 4294901760, %v7070_v19  ;;  %v15004_v34 = vand.u32 4294901760, %v7068_v59 }
0x1114   :  { %6996 = vmatpush1.msra.mxu1 %v14772_v29  ;;  %6861 = vmatprep.subr.mxu0 %v6493_v44  ;;  %16476 = vst [vmem:[#allocation21_spill] sm:$0xff] %v14973_v60  ;;  %v7067_v29 = vld [vmem:[#allocation12 + $0x28] sm:$0xff]  ;;  %v14991_v44 = vsub.f32 %v7072_v20, %v14959_v62  ;;  %v7195_v45 = vsub.f32 %v14945_v52, %v14973_v60  ;;  %v15027_v37 = vand.u32 4294901760, %v7189_v57 }
0x1115   :  { %6998 = vmatprep.subr.mxu1 %v14774_v9  ;;  %6865 = vmatpush1.msra.mxu0 %v6499_v24  ;;  %16478 = vst [vmem:[#allocation23_spill] sm:$0xff] %v14982_v58  ;;  %v7066_v24 = vld [vmem:[#allocation12 + $0x20] sm:$0xff]  ;;  %v14999_v9 = vand.u32 4294901760, %v14965_v4  ;;  %v15010_v5 = vand.u32 4294901760, %v7067_v29  ;;  %v7207_v20 = vsub.f32 %v14952_v16, %v14982_v58 }
0x1116   :  { %7000 = vmatpush1.msra.mxu1 %v14779_v61  ;;  %6726 = vmatprep.mubr.f32.mxu0 %v16326_v41  ;;  %v15002_v61 = vsub.f32 %v7071_v22, %v14967_v13  ;;  %v7063_v22 = vld [vmem:[#allocation12 + $0x8] sm:$0xff]  ;;  %16480 = vst [vmem:[#allocation41_spill] sm:$0xff] %v15027_v37  ;;  %v15053_v11 = vand.u32 4294901760, %v7195_v45 }
0x1117   :  { %6869 = vmatprep.subr.mxu0 %v6505_v26  ;;  %7002 = vmatprep.subr.mxu1 %v14799_v12  ;;  %16479 = vst [vmem:[#allocation24_spill] sm:$0xff] %v14999_v9  ;;  %v7064_v26 = vld [vmem:[#allocation12 + $0x10] sm:$0xff]  ;;  %v7201_v12 = vsub.f32 %v14949_v27, %v14979_v38  ;;  %v7213_v1 = vsub.f32 %v14965_v4, %v14999_v9  ;;  %v15058_v57 = vand.u32 4294901760, %v7063_v22  ;;  %v15065_v7 = vand.u32 4294901760, %v7207_v20 }
0x1118   :  { %6729 = vmatmul.mubr.f32.gmra.mxu0 %v14918_v21  ;;  %7004 = vmatpush1.msra.mxu1 %v14801_v48  ;;  %v15020_v21 = vsub.f32 %v7070_v19, %v14984_v40  ;;  %v15022_v48 = vand.u32 4294901760, %v7066_v24  ;;  %v15048_v19 = vand.u32 4294901760, %v7064_v26  ;;  %16483 = vst [vmem:[#allocation33_spill] sm:$0xff] %v15053_v11 }
0x1119   :  { %6873 = vmatpush1.msra.mxu0 %v6511_v51  ;;  %7006 = vmatprep.subr.mxu1 %v14824_v39  ;;  %v15030_v51 = vand.u32 4294901760, %v14991_v44  ;;  %v15033_v39 = vsub.f32 %v7069_v36, %v14993_v2  ;;  %v7062_v36 = vld [vmem:[#allocation12] sm:$0xff]  ;;  %16485 = vst [vmem:[#allocation28_spill] sm:$0xff] %v15065_v7  ;;  %v15089_v14 = vand.u32 4294901760, %v7213_v1 }
0x111a   :  { %6877 = vmatprep.subr.mxu0 %v6517_v50  ;;  %7008 = vmatpush1.msra.mxu1 %v14826_v49  ;;  %v15043_v50 = vand.u32 4294901760, %v15002_v61  ;;  %v15046_v49 = vsub.f32 %v7068_v59, %v15004_v34  ;;  %v15063_v59 = vand.u32 4294901760, %v7201_v12  ;;  %v15068_v33 = vand.u32 4294901760, %v15020_v21 }
0x111b   :  { %16481 = vst [vmem:[#allocation44_spill] sm:$0xff] %v15030_v51  ;;  %6881 = vmatpush1.msra.mxu0 %v6523_v56  ;;  %7043 = vmatmul.mubr.f32.vlgmr.msra.gmra.mxu1 %v14869_v31  ;;  %v15056_v56 = vsub.f32 %v7067_v29, %v15010_v5  ;;  %v7219_v3 = vsub.f32 %v14991_v44, %v15030_v51  ;;  %v15084_v45 = vand.u32 4294901760, %v7062_v36  ;;  %16488 = vst [vmem:[#allocation19_spill] sm:$0xff] %v15089_v14 }
0x111c   :  { %16482 = vst [vmem:[#allocation45_spill] sm:$0xff] %v15043_v50  ;;  %6885 = vmatprep.subr.mxu0 %v6529_v46  ;;  %7048 = vmatprep.mubr.f32.mxu1 %v16326_v41  ;;  %16484 = vst [vmem:[#allocation26_spill] sm:$0xff] %v15063_v59  ;;  %v15071_v46 = vsub.f32 %v7066_v24, %v15022_v48  ;;  %v15082_v29 = vsub.f32 %v7065_v47, %v15035_v53  ;;  %v15094_v24 = vand.u32 4294901760, %v15046_v49 }
0x111d   :  { %6889 = vmatpush1.msra.mxu0 %v6535_v23  ;;  %6946 = vmatprep.mubr.f32.mxu0 %v16326_v41  ;;  %16486 = vst [vmem:[#allocation32_spill] sm:$0xff] %v15068_v33  ;;  %v15079_v23 = vand.u32 4294901760, %v15033_v39  ;;  %v15097_v12 = vsub.f32 %v7064_v26, %v15048_v19  ;;  %v15103_v17 = vand.u32 4294901760, %v15056_v56  ;;  %v7231_v47 = vsub.f32 %v15020_v21, %v15068_v33 }
0x111e   :  { %6893 = vmatprep.subr.mxu0 %v6541_v6  ;;  %7191 = vmatprep.subr.mxu1 %v15027_v37  ;;  %v7225_v6 = vsub.f32 %v15002_v61, %v15043_v50  ;;  %16489 = vst [vmem:[#allocation35_spill] sm:$0xff] %v15094_v24  ;;  %v15114_v26 = vand.u32 4294901760, %v15071_v46  ;;  %v15124_v32 = vand.u32 4294901760, %v15082_v29  ;;  %v7243_v1 = vsub.f32 %v15046_v49, %v15094_v24 }
0x111f   :  { %16487 = vst [vmem:[#allocation34_spill] sm:$0xff] %v15079_v23  ;;  %6897 = vmatpush1.msra.mxu0 %v6547_v15  ;;  %7050 = vmatmul.mubr.f32.gmra.mxu1 %v14914_v25  ;;  %16490 = vst [vmem:[#allocation20_spill] sm:$0xff] %v15097_v12  ;;  %v15106_v15 = vsub.f32 %v7063_v22, %v15058_v57  ;;  %v7237_v20 = vsub.f32 %v15033_v39, %v15079_v23  ;;  %v16498_v22 = vand.u32 4294901760, %v14838_v63 }
0x1120   :  { %6901 = vmatprep.subr.mxu0 %v6553_v10  ;;  %7197 = vmatpush1.msra.mxu1 %v15053_v11  ;;  %16491 = vst [vmem:[#allocation25_spill] sm:$0xff] %v15103_v17  ;;  %16493 = vst [vmem:[#allocation37_spill] sm:$0xff] %v15114_v26  ;;  %v15119_v10 = vand.u32 4294901760, %v7219_v3  ;;  %v15132_v42 = vand.u32 4294901760, %v7225_v6  ;;  %v15137_v3 = vand.u32 4294901760, %v15097_v12  ;;  %v15148_v6 = vand.u32 4294901760, %v7231_v47 }
0x1121   :  { %16492 = vst [vmem:[#allocation36_spill] sm:$0xff] %v15106_v15  ;;  %6905 = vmatpush1.msra.mxu0 %v6559_v54  ;;  %7203 = vmatprep.subr.mxu1 %v15063_v59  ;;  %16496 = vst [vmem:[#allocation39_spill] sm:$0xff] %v15124_v32  ;;  %v15127_v54 = vsub.f32 %v7062_v36, %v15084_v45  ;;  %v7249_v36 = vsub.f32 %v15056_v56, %v15103_v17  ;;  %v15144_v63 = vand.u32 4294901760, %v15106_v15 }
0x1122   :  { %6909 = vmatprep.subr.mxu0 %v16494_v18  ;;  %7209 = vmatpush1.msra.mxu1 %v15065_v7  ;;  %16495 = vst [vmem:[#allocation38_spill] sm:$0xff] %v15119_v10  ;;  %16499 = vst [vmem:[#allocation29_spill] sm:$0xff] %v15132_v42  ;;  %v7255_v18 = vsub.f32 %v15071_v46, %v15114_v26  ;;  %v15163_v47 = vand.u32 4294901760, %v7243_v1  ;;  %v7267_v7 = vsub.f32 %v15097_v12, %v15137_v3 }
0x1123   :  { %16497 = vst [vmem:[#allocation40_spill] sm:$0xff] %v15127_v54  ;;  %6913 = vmatpush1.msra.mxu0 %v16498_v22  ;;  %7215 = vmatprep.subr.mxu1 %v15089_v14  ;;  %16500 = vst [vmem:[#allocation30_spill] sm:$0xff] %v15137_v3  ;;  %v7261_v22 = vsub.f32 %v15082_v29, %v15124_v32  ;;  %v15159_v14 = vand.u32 4294901760, %v15127_v54 }
0x1124   :  { %6948 = vmatmul.mubr.f32.vlgmr.msra.gmra.mxu0 %v14869_v31  ;;  %7095 = vmatprep.subr.mxu0 %v14923_v35  ;;  %16501 = vst [vmem:[#allocation46_spill] sm:$0xff] %v15144_v63  ;;  %16502 = vst [vmem:[#allocation18_spill] sm:$0xff] %v15148_v6  ;;  %v15154_v31 = vand.u32 4294901760, %v7237_v20  ;;  %v15169_v20 = vand.u32 4294901760, %v7249_v36  ;;  %v15175_v59 = vand.u32 4294901760, %v7255_v18  ;;  %v15185_v36 = vand.u32 4294901760, %v7267_v7 }
0x1125   :  { %7097 = vmatpush1.msra.mxu0 %v14928_v0  ;;  %6953 = vmatprep.mubr.f32.mxu0 %v16326_v41  ;;  %16504 = vst [vmem:[#allocation47_spill] sm:$0xff] %v15159_v14  ;;  %16505 = vst [vmem:[#allocation48_spill] sm:$0xff] %v15163_v47  ;;  %v15179_v1 = vand.u32 4294901760, %v7261_v22  ;;  %v16512_v7 = vld [vmem:[#allocation26_spill] sm:$0xff] }
0x1126   :  { %7099 = vmatprep.subr.mxu0 %v14931_v8  ;;  %7221 = vmatpush1.msra.mxu1 %v15119_v10  ;;  %16503 = vst [vmem:[#allocation31_spill] sm:$0xff] %v15154_v31  ;;  %16506 = vst [vmem:[#allocation49_spill] sm:$0xff] %v15169_v20  ;;  %v7273_v10 = vsub.f32 %v15106_v15, %v15144_v63 }
0x1127   :  { %7101 = vmatpush1.msra.mxu0 %v14933_v55  ;;  %7227 = vmatprep.subr.mxu1 %v15132_v42  ;;  %16507 = vst [vmem:[#allocation50_spill] sm:$0xff] %v15175_v59  ;;  %16508 = vst [vmem:[#allocation51_spill] sm:$0xff] %v15179_v1 }
0x1128   :  { %6955 = vmatmul.mubr.f32.gmra.mxu0 %v14914_v25  ;;  %7103 = vmatprep.subr.mxu0 %v14940_v30  ;;  %v7279_v25 = vsub.f32 %v15127_v54, %v15159_v14  ;;  %16509 = vst [vmem:[#allocation52_spill] sm:$0xff] %v15185_v36  ;;  %v15189_v18 = vand.u32 4294901760, %v7273_v10  ;;  %v16513_v10 = vld [vmem:[#allocation28_spill] sm:$0xff] }
0x1129   :  { %7105 = vmatpush1.msra.mxu0 %v14959_v62  ;;  %7233 = vmatpush1.msra.mxu1 %v15148_v6 }
0x112a   :  { %7107 = vmatprep.subr.mxu0 %v14967_v13  ;;  %7239 = vmatprep.subr.mxu1 %v15154_v31  ;;  %16510 = vst [vmem:[#allocation53_spill] sm:$0xff] %v15189_v18  ;;  %v15195_v22 = vand.u32 4294901760, %v7279_v25  ;;  %v16514_v25 = vld [vmem:[#allocation19_spill] sm:$0xff] }
0x112b   :  { %7109 = vmatpush1.msra.mxu0 %v14984_v40  ;;  %7245 = vmatpush1.msra.mxu1 %v15163_v47 }
0x112c   :  { %7111 = vmatprep.subr.mxu0 %v14993_v2  ;;  %7251 = vmatprep.subr.mxu1 %v15169_v20  ;;  %16511 = vst [vmem:[#allocation54_spill] sm:$0xff] %v15195_v22 }
0x112d   :  { %7113 = vmatpush1.msra.mxu0 %v15004_v34  ;;  %7257 = vmatpush1.msra.mxu1 %v15175_v59 }
0x112e   :  { %7115 = vmatprep.subr.mxu0 %v15010_v5  ;;  %7263 = vmatprep.subr.mxu1 %v15179_v1 }
0x112f   :  { %7117 = vmatpush1.msra.mxu0 %v15022_v48  ;;  %7269 = vmatpush1.msra.mxu1 %v15185_v36 }
0x1130   :  { %7119 = vmatprep.subr.mxu0 %v15035_v53  ;;  %7275 = vmatprep.subr.mxu1 %v15189_v18 }
0x1131   :  { %7121 = vmatpush1.msra.mxu0 %v15048_v19  ;;  %7158 = vmatprep.mubr.f32.mxu0 %v16326_v41 }
0x1132   :  { %7123 = vmatprep.subr.mxu0 %v15058_v57  ;;  %7281 = vmatpush1.msra.mxu1 %v15195_v22 }
0x1133   :  { %7125 = vmatpush1.msra.mxu0 %v15084_v45  ;;  %7314 = vmatprep.mubr.f32.mxu1 %v16326_v41 }
0x1134   :  { %7164 = vmatmul.mubr.f32.vlgmr.msra.gmra.mxu0 %v16326_v41  ;;  %7316 = vmatmul.mubr.f32.vlgmr.msra.gmra.mxu1 %v16326_v41 }
0x1135   :  { %7340 = vmatprep.subr.mxu0 %v14937_v28  ;;  %7444 = vmatprep.subr.mxu1 %v14923_v35 }
0x1136   :  { %7343 = vmatpush1.msra.mxu0 %v14945_v52  ;;  %7446 = vmatpush1.msra.mxu1 %v14928_v0 }
0x1137   :  { %7346 = vmatprep.subr.mxu0 %v14949_v27  ;;  %7448 = vmatprep.subr.mxu1 %v14931_v8 }
0x1138   :  { %7349 = vmatpush1.msra.mxu0 %v14952_v16  ;;  %7450 = vmatpush1.msra.mxu1 %v14933_v55 }
0x1139   :  { %7352 = vmatprep.subr.mxu0 %v14965_v4  ;;  %7452 = vmatprep.subr.mxu1 %v14940_v30 }
0x113a   :  { %7355 = vmatpush1.msra.mxu0 %v14991_v44  ;;  %7454 = vmatpush1.msra.mxu1 %v14959_v62 }
0x113b   :  { %7358 = vmatprep.subr.mxu0 %v15002_v61  ;;  %7456 = vmatprep.subr.mxu1 %v14967_v13 }
0x113c   :  { %7361 = vmatpush1.msra.mxu0 %v15020_v21  ;;  %7458 = vmatpush1.msra.mxu1 %v14984_v40 }
0x113d   :  { %7364 = vmatprep.subr.mxu0 %v15033_v39  ;;  %7460 = vmatprep.subr.mxu1 %v14993_v2 }
0x113e   :  { %7367 = vmatpush1.msra.mxu0 %v15046_v49  ;;  %7462 = vmatpush1.msra.mxu1 %v15004_v34 }
0x113f   :  { %7370 = vmatprep.subr.mxu0 %v15056_v56  ;;  %7464 = vmatprep.subr.mxu1 %v15010_v5 }
0x1140   :  { %7373 = vmatpush1.msra.mxu0 %v15071_v46  ;;  %7466 = vmatpush1.msra.mxu1 %v15022_v48 }
0x1141   :  { %7376 = vmatprep.subr.mxu0 %v15082_v29  ;;  %7468 = vmatprep.subr.mxu1 %v15035_v53 }
0x1142   :  { %7379 = vmatpush1.msra.mxu0 %v15097_v12  ;;  %7470 = vmatpush1.msra.mxu1 %v15048_v19 }
0x1143   :  { %7382 = vmatprep.subr.mxu0 %v15106_v15  ;;  %7418 = vmatprep.mubr.f32.mxu0 %v16326_v41 }
0x1144   :  { %7385 = vmatpush1.msra.mxu0 %v15127_v54  ;;  %7472 = vmatprep.subr.mxu1 %v15058_v57 }
0x1145   :  { %7421 = vmatmul.mubr.f32.vlgmr.msra.gmra.mxu0 %v16326_v41  ;;  %7474 = vmatpush1.msra.mxu1 %v15084_v45 }
0x1146   :  { %7536 = vmatprep.subr.mxu0 %v14957_v43  ;;  %7507 = vmatprep.mubr.f32.mxu1 %v16326_v41 }
0x1147   :  { %7540 = vmatpush1.msra.mxu0 %v14973_v60  ;;  %7654 = vmatprep.subr.mxu1 %v14923_v35 }
0x1148   :  { %7511 = vmatmul.mubr.f32.vlgmr.msra.gmra.mxu1 %v16326_v41  ;;  %7544 = vmatprep.subr.mxu0 %v14979_v38 }
0x1149   :  { %7656 = vmatpush1.msra.mxu1 %v14928_v0  ;;  %7548 = vmatpush1.msra.mxu0 %v14982_v58 }
0x114a   :  { %7658 = vmatprep.subr.mxu1 %v14931_v8  ;;  %7552 = vmatprep.subr.mxu0 %v14999_v9 }
0x114b   :  { %7660 = vmatpush1.msra.mxu1 %v14933_v55  ;;  %7556 = vmatpush1.msra.mxu0 %v15030_v51 }
0x114c   :  { %7662 = vmatprep.subr.mxu1 %v14940_v30  ;;  %7560 = vmatprep.subr.mxu0 %v15043_v50 }
0x114d   :  { %7664 = vmatpush1.msra.mxu1 %v14959_v62  ;;  %7564 = vmatpush1.msra.mxu0 %v15068_v33 }
0x114e   :  { %7666 = vmatprep.subr.mxu1 %v14967_v13  ;;  %7568 = vmatprep.subr.mxu0 %v15079_v23 }
0x114f   :  { %7668 = vmatpush1.msra.mxu1 %v14984_v40  ;;  %7572 = vmatpush1.msra.mxu0 %v15094_v24 }
0x1150   :  { %7670 = vmatprep.subr.mxu1 %v14993_v2  ;;  %7576 = vmatprep.subr.mxu0 %v15103_v17 }
0x1151   :  { %7672 = vmatpush1.msra.mxu1 %v15004_v34  ;;  %7580 = vmatpush1.msra.mxu0 %v15114_v26 }
0x1152   :  { %7674 = vmatprep.subr.mxu1 %v15010_v5  ;;  %7584 = vmatprep.subr.mxu0 %v15124_v32 }
0x1153   :  { %7676 = vmatpush1.msra.mxu1 %v15022_v48  ;;  %7588 = vmatpush1.msra.mxu0 %v15137_v3 }
0x1154   :  { %7678 = vmatprep.subr.mxu1 %v15035_v53  ;;  %7592 = vmatprep.subr.mxu0 %v15144_v63 }
0x1155   :  { %7680 = vmatpush1.msra.mxu1 %v15048_v19  ;;  %7596 = vmatpush1.msra.mxu0 %v15159_v14  ;;  %v16515_v14 = vld [vmem:[#allocation38_spill] sm:$0xff] }
0x1156   :  { %7629 = vmatprep.mubr.f32.mxu0 %v16326_v41  ;;  %7682 = vmatprep.subr.mxu1 %v15058_v57 }
0x1157   :  { %7631 = vmatmul.mubr.f32.vlgmr.msra.gmra.mxu0 %v16326_v41  ;;  %7684 = vmatpush1.msra.mxu1 %v15084_v45 }
0x1158   :  { %7717 = vmatprep.mubr.f32.mxu1 %v16326_v41  ;;  %7871 = vmatprep.subr.mxu1 %v15027_v37 }
0x1159   :  { %7719 = vmatmul.mubr.f32.vlgmr.msra.gmra.mxu1 %v16326_v41  ;;  %7775 = vmatprep.subr.mxu0 %v14923_v35 }
0x115a   :  { %7877 = vmatpush1.msra.mxu1 %v15053_v11  ;;  %7777 = vmatpush1.msra.mxu0 %v14928_v0 }
0x115b   :  { %7883 = vmatprep.subr.mxu1 %v16512_v7  ;;  %7779 = vmatprep.subr.mxu0 %v14931_v8 }
0x115c   :  { %7889 = vmatpush1.msra.mxu1 %v16513_v10  ;;  %7781 = vmatpush1.msra.mxu0 %v14933_v55 }
0x115d   :  { %7895 = vmatprep.subr.mxu1 %v16514_v25  ;;  %7783 = vmatprep.subr.mxu0 %v14940_v30 }
0x115e   :  { %7901 = vmatpush1.msra.mxu1 %v16515_v14  ;;  %7785 = vmatpush1.msra.mxu0 %v14959_v62  ;;  %v16516_v14 = vld [vmem:[#allocation27_spill] sm:$0xff] }
0x115f   :  { %7907 = vmatprep.subr.mxu1 %v15132_v42  ;;  %7787 = vmatprep.subr.mxu0 %v14967_v13  ;;  %v16517_v25 = vsub.s32 0, %v16516_v14 }
0x1160   :  { %7913 = vmatpush1.msra.mxu1 %v15148_v6  ;;  %7789 = vmatpush1.msra.mxu0 %v14984_v40 }
0x1161   :  { %7919 = vmatprep.subr.mxu1 %v15154_v31  ;;  %7791 = vmatprep.subr.mxu0 %v14993_v2 }
0x1162   :  { %7925 = vmatpush1.msra.mxu1 %v15163_v47  ;;  %7994 = vmatprep.mubr.f32.mxu1 %v16326_v41 }
0x1163   :  { %7931 = vmatprep.subr.mxu1 %v15169_v20  ;;  %7793 = vmatpush1.msra.mxu0 %v15004_v34 }
0x1164   :  { %7937 = vmatpush1.msra.mxu1 %v15175_v59  ;;  %7795 = vmatprep.subr.mxu0 %v15010_v5  ;;  %v6447_v59 = vpop.f32.mrf.mxu0 }
0x1165   :  { %7943 = vmatprep.subr.mxu1 %v15179_v1  ;;  %7797 = vmatpush1.msra.mxu0 %v15022_v48  ;;  %v6610_v1 = vpop.f32.mrf.mxu1 }
0x1166   :  { %7949 = vmatpush1.msra.mxu1 %v15185_v36  ;;  %7799 = vmatprep.subr.mxu0 %v15035_v53  ;;  %v6449_v47 = vpop.f32.mrf.mxu0 }
0x1167   :  { %7955 = vmatprep.subr.mxu1 %v15189_v18  ;;  %7801 = vmatpush1.msra.mxu0 %v15048_v19  ;;  %v6612_v36 = vpop.f32.mrf.mxu1 }
0x1168   :  { %7961 = vmatpush1.msra.mxu1 %v15195_v22  ;;  %7803 = vmatprep.subr.mxu0 %v15058_v57  ;;  %v6342_v22 = vld [vmem:[%s16129_s7] sm:$0x3] }
0x1169   :  { %8124 = vmatprep.subr.mxu1 %v14923_v35  ;;  %7805 = vmatpush1.msra.mxu0 %v15084_v45  ;;  %v6347_v63 = vrot.slane %v6342_v22, %v16517_v25 }
0x116a   :  { %7838 = vmatprep.mubr.f32.mxu0 %v16326_v41  ;;  %8020 = vmatprep.subr.mxu0 %v14937_v28  ;;  %v16518_v28 = vsub.s32 1, %v16516_v14 }
0x116b   :  { %v6448_v32 = vadd.f32 %v6447_v59, %v6347_v63 }
0x116c   :  { %v6351_v7 = vrot.slane %v6342_v22, %v16518_v28 }
0x116d   :  { %v6611_v24 = vadd.f32 %v6610_v1, %v6448_v32 }
0x116e   :  { %v6450_v37 = vadd.f32 %v6449_v47, %v6351_v7 }
0x1170   :  { %v6613_v9 = vadd.f32 %v6612_v36, %v6450_v37 }
0x11c6   :  { %v6617_v20 = vpop.f32.mrf.mxu1 }
0x11c8   :  { %v6619_v18 = vpop.f32.mrf.mxu1 }
0x11ca   :  { %v6820_v6 = vpop.f32.mrf.mxu1 }
0x11cc   :  { %v6822_v10 = vpop.f32.mrf.mxu1 }
0x11ce   :  { %v6458_v31 = vpop.f32.mrf.mxu0 }
0x11cf   :  { %v6829_v11 = vpop.f32.mrf.mxu1  ;;  %v6459_v17 = vadd.f32 %v6458_v31, %v6347_v63 }
0x11d0   :  { %v6460_v42 = vpop.f32.mrf.mxu0 }
0x11d1   :  { %v6831_v23 = vpop.f32.mrf.mxu1  ;;  %v6461_v50 = vadd.f32 %v6460_v42, %v6351_v7  ;;  %v6618_v60 = vadd.f32 %v6617_v20, %v6459_v17 }
0x11d2   :  { %v6722_v3 = vpop.f32.mrf.mxu0 }
0x11d3   :  { %v6723_v51 = vadd.f32 %v6722_v3, %v6611_v24  ;;  %v6620_v54 = vadd.f32 %v6619_v18, %v6461_v50 }
0x11d4   :  { %v6724_v26 = vpop.f32.mrf.mxu0 }
0x11d5   :  { %v6725_v38 = vadd.f32 %v6724_v26, %v6613_v9  ;;  %v6821_v15 = vadd.f32 %v6820_v6, %v6723_v51 }
0x11d7   :  { %v6823_v12 = vadd.f32 %v6822_v10, %v6725_v38 }
0x11d8   :  { %v6730_v33 = vpop.f32.mrf.mxu0 }
0x11d9   :  { %v6731_v43 = vadd.f32 %v6730_v33, %v6618_v60 }
0x11da   :  { %v6732_v25 = vpop.f32.mrf.mxu0 }
0x11db   :  { %v7044_v58 = vpop.f32.mrf.mxu1  ;;  %v6733_v59 = vadd.f32 %v6732_v25, %v6620_v54  ;;  %v6830_v31 = vadd.f32 %v6829_v11, %v6731_v43 }
0x11dd   :  { %v7046_v14 = vpop.f32.mrf.mxu1  ;;  %v6832_v9 = vadd.f32 %v6831_v23, %v6733_v59 }
0x11df   :  { %v7051_v1 = vpop.f32.mrf.mxu1 }
0x11e1   :  { %v7053_v50 = vpop.f32.mrf.mxu1 }
0x11e4   :  { %v6949_v28 = vpop.f32.mrf.mxu0 }
0x11e5   :  { %v6950_v22 = vadd.f32 %v6949_v28, %v6821_v15 }
0x11e6   :  { %v6951_v47 = vpop.f32.mrf.mxu0 }
0x11e7   :  { %v7045_v63 = vadd.f32 %v7044_v58, %v6950_v22  ;;  %v6952_v32 = vadd.f32 %v6951_v47, %v6823_v12 }
0x11e8   :  { %v6956_v42 = vpop.f32.mrf.mxu0 }
0x11e9   :  { %7056 = vst [vmem:[#allocation2] sm:$0xff] %v7045_v63  ;;  %v7047_v37 = vadd.f32 %v7046_v14, %v6952_v32  ;;  %v6957_v24 = vadd.f32 %v6956_v42, %v6830_v31 }
0x11ea   :  { %v6958_v17 = vpop.f32.mrf.mxu0 }
0x11eb   :  { %7057 = vst.msk [vmem:[#allocation2 + $0x8] sm:$0xff] %vm667_vm1, %v7047_v37  ;;  %v7052_v60 = vadd.f32 %v7051_v1, %v6957_v24  ;;  %v6959_v51 = vadd.f32 %v6958_v17, %v6832_v9  ;;  %v15329_v37 = vld [vmem:[%s16130_s8] ss:$0 sm:$0xff] }
0x11ed   :  { %7058 = vst [vmem:[#allocation2 + $0x10] sm:$0xff] %v7052_v60  ;;  %v7054_v33 = vadd.f32 %v7053_v50, %v6959_v51 }
0x11ef   :  { %7059 = vst.msk [vmem:[#allocation2 + $0x18] sm:$0xff] %vm667_vm1, %v7054_v33 }
0x11f0   :  { %v7060_v10 = vld [vmem:[#allocation2] sm:$0x3] }
0x11f2   :  { %v7061_v60 = vld [vmem:[#allocation2 + $0x8] sm:$0x3] }
0x11f4   :  { %v7165_v38 = vpop.f32.mrf.mxu0  ;;  %v7317_v58 = vpop.f32.mrf.mxu1 }
0x11f5   :  { %v7318_v11 = vadd.f32 %v7317_v58, %v7165_v38 }
0x11f6   :  { %v7167_v12 = vpop.f32.mrf.mxu0  ;;  %v7319_v15 = vpop.f32.mrf.mxu1 }
0x11f7   :  { %v7320_v28 = vadd.f32 %v7319_v15, %v7167_v12 }
0x1205   :  { %v7422_v43 = vpop.f32.mrf.mxu0 }
0x1206   :  { %v7423_v26 = vadd.f32 %v7422_v43, %v7318_v11 }
0x1207   :  { %v7424_v3 = vpop.f32.mrf.mxu0 }
0x1208   :  { %v7512_v54 = vpop.f32.mrf.mxu1  ;;  %v7425_v22 = vadd.f32 %v7424_v3, %v7320_v28  ;;  %v16526_v28 = vld [vmem:[#allocation24_spill] sm:$0xff] }
0x1209   :  { %v7513_v23 = vadd.f32 %v7512_v54, %v7423_v26 }
0x120a   :  { %v7514_v6 = vpop.f32.mrf.mxu1 }
0x120b   :  { %v7515_v32 = vadd.f32 %v7514_v6, %v7425_v22  ;;  %v16528_v22 = vld [vmem:[#allocation45_spill] sm:$0xff] }
0x1217   :  { %v7632_v20 = vpop.f32.mrf.mxu0 }
0x1218   :  { %v7633_v36 = vadd.f32 %v7632_v20, %v7513_v23  ;;  %v16519_v20 = vld [vmem:[#allocation20_spill] sm:$0xff] }
0x1219   :  { %v7720_v18 = vpop.f32.mrf.mxu1  ;;  %v7634_v63 = vpop.f32.mrf.mxu0 }
0x121a   :  { %v7721_v7 = vadd.f32 %v7720_v18, %v7633_v36  ;;  %v7635_v31 = vadd.f32 %v7634_v63, %v7515_v32  ;;  %v16520_v36 = vld [vmem:[#allocation36_spill] sm:$0xff]  ;;  %v16530_v63 = vld [vmem:[#allocation34_spill] sm:$0xff]  ;;  %v16531_v32 = vld [vmem:[#allocation35_spill] sm:$0xff] }
0x121b   :  { %v7722_v1 = vpop.f32.mrf.mxu1  ;;  %v16521_v18 = vld [vmem:[#allocation40_spill] sm:$0xff] }
0x121c   :  { %v7725_v25 = vadd.f32 %v7721_v7, %v7060_v10  ;;  %v7723_v42 = vadd.f32 %v7722_v1, %v7635_v31  ;;  %v16522_v7 = vld [vmem:[#allocation43_spill] sm:$0xff]  ;;  %v16523_v10 = vld [vmem:[#allocation21_spill] sm:$0xff] }
0x121d   :  { %v16532_v31 = vld [vmem:[#allocation25_spill] sm:$0xff] }
0x121e   :  { %v12554_v14 = vmul.f32 -1.442695, %v7725_v25  ;;  %v7739_v24 = vadd.f32 %v15329_v37, %v7723_v42  ;;  %v16524_v25 = vld [vmem:[#allocation22_spill] sm:$0xff]  ;;  %v16533_v1 = vld [vmem:[#allocation41_spill] sm:$0xff] }
0x121f   :  { %v16534_v42 = vld [vmem:[#allocation37_spill] sm:$0xff] }
0x1220   :  { %12623 = vpow2.f32 %v12554_v14  ;;  %v16525_v14 = vld [vmem:[#allocation23_spill] sm:$0xff] }
0x122d   :  { %v12624_v59 = vpop.eup %12623 }
0x122e   :  { %v7729_v47 = vadd.f32 1.0, %v12624_v59  ;;  %v16527_v59 = vld [vmem:[#allocation44_spill] sm:$0xff] }
0x1230   :  { %12625 = vrcp.f32 %v7729_v47  ;;  %v16529_v47 = vld [vmem:[#allocation32_spill] sm:$0xff] }
0x123d   :  { %v12626_v9 = vpop.eup %12625 }
0x123e   :  { %v7740_v17 = vmul.f32 %v12626_v9, %v7739_v24  ;;  %v7743_v33 = vsub.f32 1.0, %v12626_v9  ;;  %v7749_v58 = vmul.f32 0.0, %v12626_v9  ;;  %v16535_v24 = vld [vmem:[#allocation33_spill] sm:$0xff]  ;;  %v16536_v9 = vld [vmem:[#allocation39_spill] sm:$0xff] }
0x1240   :  { %v7741_v51 = vadd.f32 %v7740_v17, %v7061_v60  ;;  %v16537_v17 = vld [vmem:[#allocation26_spill] sm:$0xff] }
0x1241   :  { %v16538_v60 = vld [vmem:[#allocation30_spill] sm:$0xff] }
0x1242   :  { %12627 = vtanh.f32 %v7741_v51  ;;  %v16539_v51 = vld [vmem:[#allocation28_spill] sm:$0xff] }
0x124f   :  { %v12628_v50 = vpop.eup %12627 }
0x1250   :  { %7745 = vrot.lane.b32.xlu1 %v12628_v50, %s12810_s13  ;;  %v16540_v50 = vld [vmem:[#allocation46_spill] sm:$0xff] }
0x12c2   :  { %v7746_v38 = vpop.permute.xlu1 %7745 }
0x12c3   :  { %v7748_v12 = vmul.f32 %v7746_v38, %v7743_v33  ;;  %v16541_v33 = vld [vmem:[#allocation19_spill] sm:$0xff] }
0x12c4   :  { %v16542_v38 = vld [vmem:[#allocation47_spill] sm:$0xff] }
0x12c5   :  { %v15333_v43 = vadd.f32 %v7749_v58, %v7748_v12  ;;  %v16543_v58 = vld [vmem:[#allocation38_spill] sm:$0xff]  ;;  %v16544_v12 = vld [vmem:[#allocation29_spill] sm:$0xff] }
0x12c7   :  { %7754 = vrot.lane.b32.xlu0 %v15333_v43, %s12810_s13 }
0x1339   :  { %v7755_v11 = vpop.permute.xlu0 %7754 }
0x133a   :  { %v7756_v15 = vsel %vm667_vm1, %v7755_v11, 0  ;;  %v16545_v11 = vld [vmem:[#allocation18_spill] sm:$0xff] }
0x133b   :  { %v15338_v26 = vand.u32 4294901760, %v7756_v15 }
0x133d   :  { %v7840_v54 = vsub.f32 %v7756_v15, %v15338_v26  ;;  %7996 = vmatmul.mubr.f32.vlgmr.msra.gmra.mxu1 %v15338_v26  ;;  %v16546_v15 = vld [vmem:[#allocation31_spill] sm:$0xff] }
0x133e   :  { %8126 = vmatpush1.msra.mxu1 %v14928_v0  ;;  %8187 = vmatprep.mubr.f32.mxu1 %v16326_v41 }
0x133f   :  { %v7841_v3 = vand.u32 4294901760, %v7840_v54  ;;  %8128 = vmatprep.subr.mxu1 %v14931_v8 }
0x1340   :  { %8130 = vmatpush1.msra.mxu1 %v14933_v55 }
0x1341   :  { %v7842_v23 = vsub.f32 %v7840_v54, %v7841_v3  ;;  %8132 = vmatprep.subr.mxu1 %v14940_v30 }
0x1342   :  { %8134 = vmatpush1.msra.mxu1 %v14959_v62 }
0x1343   :  { %v7843_v6 = vand.u32 4294901760, %v7842_v23  ;;  %8136 = vmatprep.subr.mxu1 %v14967_v13  ;;  %v16549_v23 = vld [vmem:[#allocation50_spill] sm:$0xff] }
0x1344   :  { %8138 = vmatpush1.msra.mxu1 %v14984_v40 }
0x1345   :  { %8140 = vmatprep.subr.mxu1 %v14993_v2  ;;  %7844 = vmatmul.mubr.f32.vlgmr.msra.gmra.mxu0 %v7843_v6  ;;  %v16551_v6 = vld [vmem:[#allocation52_spill] sm:$0xff] }
0x1346   :  { %8023 = vmatpush1.msra.mxu0 %v14945_v52  ;;  %8142 = vmatpush1.msra.mxu1 %v15004_v34 }
0x1347   :  { %8026 = vmatprep.subr.mxu0 %v14949_v27  ;;  %8144 = vmatprep.subr.mxu1 %v15010_v5 }
0x1348   :  { %8029 = vmatpush1.msra.mxu0 %v14952_v16  ;;  %8146 = vmatpush1.msra.mxu1 %v15022_v48 }
0x1349   :  { %8032 = vmatprep.subr.mxu0 %v14965_v4  ;;  %8148 = vmatprep.subr.mxu1 %v15035_v53 }
0x134a   :  { %8035 = vmatpush1.msra.mxu0 %v14991_v44  ;;  %8150 = vmatpush1.msra.mxu1 %v15048_v19 }
0x134b   :  { %8038 = vmatprep.subr.mxu0 %v15002_v61  ;;  %8152 = vmatprep.subr.mxu1 %v15058_v57 }
0x134c   :  { %8041 = vmatpush1.msra.mxu0 %v15020_v21  ;;  %8154 = vmatpush1.msra.mxu1 %v15084_v45 }
0x134d   :  { %8044 = vmatprep.subr.mxu0 %v15033_v39  ;;  %8191 = vmatmul.mubr.f32.vlgmr.msra.gmra.mxu1 %v7841_v3  ;;  %v16548_v3 = vld [vmem:[#allocation49_spill] sm:$0xff] }
0x134e   :  { %8334 = vmatprep.subr.mxu1 %v14923_v35  ;;  %8047 = vmatpush1.msra.mxu0 %v15046_v49 }
0x134f   :  { %8336 = vmatpush1.msra.mxu1 %v14928_v0  ;;  %8050 = vmatprep.subr.mxu0 %v15056_v56 }
0x1350   :  { %8338 = vmatprep.subr.mxu1 %v14931_v8  ;;  %8053 = vmatpush1.msra.mxu0 %v15071_v46 }
0x1351   :  { %8340 = vmatpush1.msra.mxu1 %v14933_v55  ;;  %8056 = vmatprep.subr.mxu0 %v15082_v29 }
0x1352   :  { %8342 = vmatprep.subr.mxu1 %v14940_v30  ;;  %8059 = vmatpush1.msra.mxu0 %v16519_v20 }
0x1353   :  { %8344 = vmatpush1.msra.mxu1 %v14959_v62  ;;  %8062 = vmatprep.subr.mxu0 %v16520_v36 }
0x1354   :  { %8346 = vmatprep.subr.mxu1 %v14967_v13  ;;  %8065 = vmatpush1.msra.mxu0 %v16521_v18 }
0x1355   :  { %8098 = vmatprep.mubr.f32.mxu0 %v16326_v41  ;;  %8348 = vmatpush1.msra.mxu1 %v14984_v40 }
0x1356   :  { %8101 = vmatmul.mubr.f32.vlgmr.msra.gmra.mxu0 %v7840_v54  ;;  %8216 = vmatprep.subr.mxu0 %v16522_v7  ;;  %v16547_v54 = vld [vmem:[#allocation48_spill] sm:$0xff] }
0x1357   :  { %8350 = vmatprep.subr.mxu1 %v14993_v2  ;;  %8220 = vmatpush1.msra.mxu0 %v16523_v10 }
0x1358   :  { %8352 = vmatpush1.msra.mxu1 %v15004_v34  ;;  %8224 = vmatprep.subr.mxu0 %v16524_v25 }
0x1359   :  { %8354 = vmatprep.subr.mxu1 %v15010_v5  ;;  %8228 = vmatpush1.msra.mxu0 %v16525_v14 }
0x135a   :  { %8356 = vmatpush1.msra.mxu1 %v15022_v48  ;;  %8232 = vmatprep.subr.mxu0 %v16526_v28 }
0x135b   :  { %8358 = vmatprep.subr.mxu1 %v15035_v53  ;;  %8236 = vmatpush1.msra.mxu0 %v16527_v59 }
0x135c   :  { %8360 = vmatpush1.msra.mxu1 %v15048_v19  ;;  %8240 = vmatprep.subr.mxu0 %v16528_v22 }
0x135d   :  { %8362 = vmatprep.subr.mxu1 %v15058_v57  ;;  %8244 = vmatpush1.msra.mxu0 %v16529_v47 }
0x135e   :  { %8364 = vmatpush1.msra.mxu1 %v15084_v45  ;;  %8397 = vmatprep.mubr.f32.mxu1 %v16326_v41 }
0x135f   :  { %8248 = vmatprep.subr.mxu0 %v16530_v63  ;;  %8399 = vmatmul.mubr.f32.vlgmr.msra.gmra.mxu1 %v15338_v26 }
0x1360   :  { %8252 = vmatpush1.msra.mxu0 %v16531_v32  ;;  %8309 = vmatprep.mubr.f32.mxu0 %v16326_v41 }
0x1361   :  { %8256 = vmatprep.subr.mxu0 %v16532_v31  ;;  %8553 = vmatprep.subr.mxu1 %v16533_v1 }
0x1362   :  { %8260 = vmatpush1.msra.mxu0 %v16534_v42  ;;  %8559 = vmatpush1.msra.mxu1 %v16535_v24  ;;  %v7751_v42 = vld [vmem:[#allocation2] sm:$0xc] }
0x1363   :  { %8264 = vmatprep.subr.mxu0 %v16536_v9  ;;  %8565 = vmatprep.subr.mxu1 %v16537_v17 }
0x1364   :  { %8268 = vmatpush1.msra.mxu0 %v16538_v60  ;;  %8571 = vmatpush1.msra.mxu1 %v16539_v51 }
0x1365   :  { %8272 = vmatprep.subr.mxu0 %v16540_v50  ;;  %8577 = vmatprep.subr.mxu1 %v16541_v33 }
0x1366   :  { %8276 = vmatpush1.msra.mxu0 %v16542_v38  ;;  %8583 = vmatpush1.msra.mxu1 %v16543_v58 }
0x1367   :  { %8311 = vmatmul.mubr.f32.vlgmr.msra.gmra.mxu0 %v15338_v26  ;;  %8589 = vmatprep.subr.mxu1 %v16544_v12  ;;  %v16550_v26 = vld [vmem:[#allocation51_spill] sm:$0xff] }
0x1368   :  { %8595 = vmatpush1.msra.mxu1 %v16545_v11  ;;  %8457 = vmatprep.subr.mxu0 %v14923_v35 }
0x1369   :  { %8601 = vmatprep.subr.mxu1 %v16546_v15  ;;  %8459 = vmatpush1.msra.mxu0 %v14928_v0  ;;  %v16552_v15 = vld [vmem:[#allocation53_spill] sm:$0xff] }
0x136a   :  { %8607 = vmatpush1.msra.mxu1 %v16547_v54  ;;  %8461 = vmatprep.subr.mxu0 %v14931_v8  ;;  %v16553_v54 = vld [vmem:[#allocation54_spill] sm:$0xff] }
0x136b   :  { %8613 = vmatprep.subr.mxu1 %v16548_v3  ;;  %8463 = vmatpush1.msra.mxu0 %v14933_v55 }
0x136c   :  { %8619 = vmatpush1.msra.mxu1 %v16549_v23  ;;  %8465 = vmatprep.subr.mxu0 %v14940_v30 }
0x136d   :  { %8625 = vmatprep.subr.mxu1 %v16550_v26  ;;  %8467 = vmatpush1.msra.mxu0 %v14959_v62 }
0x136e   :  { %8631 = vmatpush1.msra.mxu1 %v16551_v6  ;;  %8469 = vmatprep.subr.mxu0 %v14967_v13 }
0x136f   :  { %8637 = vmatprep.subr.mxu1 %v16552_v15  ;;  %8471 = vmatpush1.msra.mxu0 %v14984_v40 }
0x1370   :  { %8643 = vmatpush1.msra.mxu1 %v16553_v54  ;;  %8473 = vmatprep.subr.mxu0 %v14993_v2  ;;  %v16554_v54 = vld [vmem:[#allocation42_spill] sm:$0xff] }
0x1371   :  { %8676 = vmatprep.mubr.f32.mxu1 %v16326_v41  ;;  %8806 = vmatprep.subr.mxu1 %v14923_v35 }
0x1372   :  { %8475 = vmatpush1.msra.mxu0 %v15004_v34  ;;  %8520 = vmatprep.mubr.f32.mxu0 %v16326_v41 }
0x1373   :  { %8477 = vmatprep.subr.mxu0 %v15010_v5 }
0x1374   :  { %8479 = vmatpush1.msra.mxu0 %v15022_v48 }
0x1375   :  { %8481 = vmatprep.subr.mxu0 %v15035_v53 }
0x1376   :  { %8483 = vmatpush1.msra.mxu0 %v15048_v19 }
0x1377   :  { %8485 = vmatprep.subr.mxu0 %v15058_v57 }
0x1378   :  { %8487 = vmatpush1.msra.mxu0 %v15084_v45 }
0x1379   :  { %8702 = vmatprep.subr.mxu0 %v16554_v54 }
0x13fd   :  { %v7997_v6 = vpop.f32.mrf.mxu1 }
0x13ff   :  { %v7999_v11 = vpop.f32.mrf.mxu1 }
0x1405   :  { %v7845_v15 = vpop.f32.mrf.mxu0 }
0x1406   :  { %v7998_v3 = vadd.f32 %v7997_v6, %v7845_v15 }
0x1407   :  { %v7847_v26 = vpop.f32.mrf.mxu0 }
0x1408   :  { %v8000_v54 = vadd.f32 %v7999_v11, %v7847_v26 }
0x140d   :  { %v8192_v58 = vpop.f32.mrf.mxu1 }
0x140f   :  { %v8194_v50 = vpop.f32.mrf.mxu1 }
0x1416   :  { %v8102_v23 = vpop.f32.mrf.mxu0 }
0x1417   :  { %v8103_v12 = vadd.f32 %v8102_v23, %v7998_v3 }
0x1418   :  { %v8104_v38 = vpop.f32.mrf.mxu0 }
0x1419   :  { %v8193_v33 = vadd.f32 %v8192_v58, %v8103_v12  ;;  %v8105_v32 = vadd.f32 %v8104_v38, %v8000_v54 }
0x141b   :  { %v8195_v6 = vadd.f32 %v8194_v50, %v8105_v32 }
0x141f   :  { %v8400_v17 = vpop.f32.mrf.mxu1 }
0x1421   :  { %v8402_v23 = vpop.f32.mrf.mxu1 }
0x1427   :  { %v8312_v51 = vpop.f32.mrf.mxu0 }
0x1428   :  { %v8313_v60 = vadd.f32 %v8312_v51, %v8193_v33  ;;  %v8428_v51 = vrot.slane %v15333_v43, 6 }
0x1429   :  { %v8314_v47 = vpop.f32.mrf.mxu0 }
0x142a   :  { %v8401_v9 = vadd.f32 %v8400_v17, %v8313_v60  ;;  %v8315_v3 = vadd.f32 %v8314_v47, %v8195_v6 }
0x142c   :  { %v8406_v24 = vrot.slane %v8401_v9, 6  ;;  %v8403_v58 = vadd.f32 %v8402_v23, %v8315_v3  ;;  %v16555_v3 = vld [vmem:[#allocation32_spill] sm:$0xff]  ;;  %v16556_v23 = vld [vmem:[#allocation34_spill] sm:$0xff] }
0x142e   :  { %v8408_v1 = vadd.f32 %v8406_v24, %v7751_v42  ;;  %v8415_v12 = vadd.f32 %v15329_v37, %v8403_v58  ;;  %v16557_v58 = vld [vmem:[#allocation35_spill] sm:$0xff] }
0x1430   :  { %v12556_v31 = vmul.f32 -1.442695, %v8408_v1  ;;  %v8417_v17 = vrot.slane %v8415_v12, 6  ;;  %v7752_v1 = vld [vmem:[#allocation2 + $0x8] sm:$0xc]  ;;  %v16558_v12 = vld [vmem:[#allocation25_spill] sm:$0xff] }
0x1432   :  { %12629 = vpow2.f32 %v12556_v31 }
0x143f   :  { %v12630_v63 = vpop.eup %12629 }
0x1440   :  { %v8412_v15 = vadd.f32 1.0, %v12630_v63 }
0x1442   :  { %12631 = vrcp.f32 %v8412_v15 }
0x144f   :  { %v12632_v9 = vpop.eup %12631 }
0x1450   :  { %v8419_v60 = vmul.f32 %v12632_v9, %v8417_v17  ;;  %v8430_v42 = vmul.f32 %v12632_v9, %v8428_v51  ;;  %v8422_v63 = vsub.f32 1.0, %v12632_v9  ;;  %v16559_v51 = vld [vmem:[#allocation41_spill] sm:$0xff] }
0x1451   :  { %v16560_v17 = vld [vmem:[#allocation37_spill] sm:$0xff] }
0x1452   :  { %v8420_v31 = vadd.f32 %v8419_v60, %v7752_v1  ;;  %v16561_v9 = vld [vmem:[#allocation33_spill] sm:$0xff]  ;;  %v16562_v60 = vld [vmem:[#allocation39_spill] sm:$0xff]  ;;  %v16564_v1 = vld [vmem:[#allocation30_spill] sm:$0xff] }
0x1454   :  { %12633 = vtanh.f32 %v8420_v31  ;;  %v16565_v31 = vld [vmem:[#allocation28_spill] sm:$0xff] }
0x1461   :  { %v12634_v24 = vpop.eup %12633 }
0x1462   :  { %8424 = vrot.lane.b32.xlu1 %v12634_v24, %s12810_s13  ;;  %v16566_v24 = vld [vmem:[#allocation46_spill] sm:$0xff] }
0x14d4   :  { %v8425_v32 = vpop.permute.xlu1 %8424 }
0x14d5   :  { %v8427_v50 = vmul.f32 %v8425_v32, %v8422_v63  ;;  %v16567_v63 = vld [vmem:[#allocation19_spill] sm:$0xff] }
0x14d6   :  { %v16568_v32 = vld [vmem:[#allocation47_spill] sm:$0xff] }
0x14d7   :  { %v15449_v47 = vadd.f32 %v8430_v42, %v8427_v50  ;;  %v16563_v42 = vld [vmem:[#allocation26_spill] sm:$0xff] }
0x14d8   :  { %v16569_v50 = vld [vmem:[#allocation38_spill] sm:$0xff] }
0x14d9   :  { %v8435_v33 = vrot.slane %v15449_v47, 2 }
0x14db   :  { %8436 = vrot.lane.b32.xlu0 %v8435_v33, %s12810_s13  ;;  %v16570_v33 = vld [vmem:[#allocation29_spill] sm:$0xff] }
0x154d   :  { %v8437_v43 = vpop.permute.xlu0 %8436 }
0x154e   :  { %v8438_v38 = vsel %vm667_vm1, %v8437_v43, 0  ;;  %v16571_v43 = vld [vmem:[#allocation18_spill] sm:$0xff] }
0x154f   :  { %v15454_v11 = vand.u32 4294901760, %v8438_v38 }
0x1551   :  { %v8522_v54 = vsub.f32 %v8438_v38, %v15454_v11  ;;  %8678 = vmatmul.mubr.f32.vlgmr.msra.gmra.mxu1 %v15454_v11  ;;  %v16572_v38 = vld [vmem:[#allocation31_spill] sm:$0xff] }
0x1552   :  { %8808 = vmatpush1.msra.mxu1 %v14928_v0  ;;  %8869 = vmatprep.mubr.f32.mxu1 %v16326_v41 }
0x1553   :  { %v8523_v26 = vand.u32 4294901760, %v8522_v54  ;;  %8810 = vmatprep.subr.mxu1 %v14931_v8 }
0x1554   :  { %8812 = vmatpush1.msra.mxu1 %v14933_v55 }
0x1555   :  { %v8524_v15 = vsub.f32 %v8522_v54, %v8523_v26  ;;  %8814 = vmatprep.subr.mxu1 %v14940_v30 }
0x1556   :  { %8816 = vmatpush1.msra.mxu1 %v14959_v62 }
0x1557   :  { %v8525_v6 = vand.u32 4294901760, %v8524_v15  ;;  %8818 = vmatprep.subr.mxu1 %v14967_v13  ;;  %v16575_v15 = vld [vmem:[#allocation50_spill] sm:$0xff] }
0x1558   :  { %8820 = vmatpush1.msra.mxu1 %v14984_v40 }
0x1559   :  { %8822 = vmatprep.subr.mxu1 %v14993_v2  ;;  %8526 = vmatmul.mubr.f32.vlgmr.msra.gmra.mxu0 %v8525_v6  ;;  %v16577_v6 = vld [vmem:[#allocation52_spill] sm:$0xff] }
0x155a   :  { %8705 = vmatpush1.msra.mxu0 %v14945_v52  ;;  %8824 = vmatpush1.msra.mxu1 %v15004_v34 }
0x155b   :  { %8708 = vmatprep.subr.mxu0 %v14949_v27  ;;  %8826 = vmatprep.subr.mxu1 %v15010_v5 }
0x155c   :  { %8711 = vmatpush1.msra.mxu0 %v14952_v16  ;;  %8828 = vmatpush1.msra.mxu1 %v15022_v48 }
0x155d   :  { %8714 = vmatprep.subr.mxu0 %v14965_v4  ;;  %8830 = vmatprep.subr.mxu1 %v15035_v53 }
0x155e   :  { %8717 = vmatpush1.msra.mxu0 %v14991_v44  ;;  %8832 = vmatpush1.msra.mxu1 %v15048_v19 }
0x155f   :  { %8720 = vmatprep.subr.mxu0 %v15002_v61  ;;  %8834 = vmatprep.subr.mxu1 %v15058_v57 }
0x1560   :  { %8723 = vmatpush1.msra.mxu0 %v15020_v21  ;;  %8836 = vmatpush1.msra.mxu1 %v15084_v45 }
0x1561   :  { %8726 = vmatprep.subr.mxu0 %v15033_v39  ;;  %8873 = vmatmul.mubr.f32.vlgmr.msra.gmra.mxu1 %v8523_v26  ;;  %v16574_v26 = vld [vmem:[#allocation49_spill] sm:$0xff] }
0x1562   :  { %9016 = vmatprep.subr.mxu1 %v14923_v35  ;;  %8729 = vmatpush1.msra.mxu0 %v15046_v49 }
0x1563   :  { %9018 = vmatpush1.msra.mxu1 %v14928_v0  ;;  %8732 = vmatprep.subr.mxu0 %v15056_v56 }
0x1564   :  { %9020 = vmatprep.subr.mxu1 %v14931_v8  ;;  %8735 = vmatpush1.msra.mxu0 %v15071_v46 }
0x1565   :  { %9022 = vmatpush1.msra.mxu1 %v14933_v55  ;;  %8738 = vmatprep.subr.mxu0 %v15082_v29 }
0x1566   :  { %9024 = vmatprep.subr.mxu1 %v14940_v30  ;;  %8741 = vmatpush1.msra.mxu0 %v16519_v20 }
0x1567   :  { %9026 = vmatpush1.msra.mxu1 %v14959_v62  ;;  %8744 = vmatprep.subr.mxu0 %v16520_v36 }
0x1568   :  { %9028 = vmatprep.subr.mxu1 %v14967_v13  ;;  %8747 = vmatpush1.msra.mxu0 %v16521_v18 }
0x1569   :  { %8780 = vmatprep.mubr.f32.mxu0 %v16326_v41  ;;  %9030 = vmatpush1.msra.mxu1 %v14984_v40 }
0x156a   :  { %8783 = vmatmul.mubr.f32.vlgmr.msra.gmra.mxu0 %v8522_v54  ;;  %8898 = vmatprep.subr.mxu0 %v16522_v7  ;;  %v16573_v54 = vld [vmem:[#allocation48_spill] sm:$0xff] }
0x156b   :  { %9032 = vmatprep.subr.mxu1 %v14993_v2  ;;  %8902 = vmatpush1.msra.mxu0 %v16523_v10 }
0x156c   :  { %9034 = vmatpush1.msra.mxu1 %v15004_v34  ;;  %8906 = vmatprep.subr.mxu0 %v16524_v25 }
0x156d   :  { %9036 = vmatprep.subr.mxu1 %v15010_v5  ;;  %8910 = vmatpush1.msra.mxu0 %v16525_v14 }
0x156e   :  { %9038 = vmatpush1.msra.mxu1 %v15022_v48  ;;  %8914 = vmatprep.subr.mxu0 %v16526_v28 }
0x156f   :  { %9040 = vmatprep.subr.mxu1 %v15035_v53  ;;  %8918 = vmatpush1.msra.mxu0 %v16527_v59 }
0x1570   :  { %9042 = vmatpush1.msra.mxu1 %v15048_v19  ;;  %8922 = vmatprep.subr.mxu0 %v16528_v22 }
0x1571   :  { %9044 = vmatprep.subr.mxu1 %v15058_v57  ;;  %8926 = vmatpush1.msra.mxu0 %v16555_v3 }
0x1572   :  { %9046 = vmatpush1.msra.mxu1 %v15084_v45  ;;  %9079 = vmatprep.mubr.f32.mxu1 %v16326_v41 }
0x1573   :  { %8930 = vmatprep.subr.mxu0 %v16556_v23  ;;  %9081 = vmatmul.mubr.f32.vlgmr.msra.gmra.mxu1 %v15454_v11 }
0x1574   :  { %8934 = vmatpush1.msra.mxu0 %v16557_v58  ;;  %8991 = vmatprep.mubr.f32.mxu0 %v16326_v41 }
0x1575   :  { %8938 = vmatprep.subr.mxu0 %v16558_v12  ;;  %9235 = vmatprep.subr.mxu1 %v16559_v51 }
0x1576   :  { %8942 = vmatpush1.msra.mxu0 %v16560_v17  ;;  %9241 = vmatpush1.msra.mxu1 %v16561_v9  ;;  %v8432_v17 = vld [vmem:[#allocation2] sm:$0x30] }
0x1577   :  { %8946 = vmatprep.subr.mxu0 %v16562_v60  ;;  %9247 = vmatprep.subr.mxu1 %v16563_v42 }
0x1578   :  { %8950 = vmatpush1.msra.mxu0 %v16564_v1  ;;  %9253 = vmatpush1.msra.mxu1 %v16565_v31 }
0x1579   :  { %8954 = vmatprep.subr.mxu0 %v16566_v24  ;;  %9259 = vmatprep.subr.mxu1 %v16567_v63 }
0x157a   :  { %8958 = vmatpush1.msra.mxu0 %v16568_v32  ;;  %9265 = vmatpush1.msra.mxu1 %v16569_v50 }
0x157b   :  { %8993 = vmatmul.mubr.f32.vlgmr.msra.gmra.mxu0 %v15454_v11  ;;  %9271 = vmatprep.subr.mxu1 %v16570_v33  ;;  %v16576_v11 = vld [vmem:[#allocation51_spill] sm:$0xff] }
0x157c   :  { %9277 = vmatpush1.msra.mxu1 %v16571_v43  ;;  %9139 = vmatprep.subr.mxu0 %v14923_v35 }
0x157d   :  { %9283 = vmatprep.subr.mxu1 %v16572_v38  ;;  %9141 = vmatpush1.msra.mxu0 %v14928_v0  ;;  %v16578_v38 = vld [vmem:[#allocation53_spill] sm:$0xff] }
0x157e   :  { %9289 = vmatpush1.msra.mxu1 %v16573_v54  ;;  %9143 = vmatprep.subr.mxu0 %v14931_v8  ;;  %v16579_v54 = vld [vmem:[#allocation54_spill] sm:$0xff] }
0x157f   :  { %9295 = vmatprep.subr.mxu1 %v16574_v26  ;;  %9145 = vmatpush1.msra.mxu0 %v14933_v55 }
0x1580   :  { %9301 = vmatpush1.msra.mxu1 %v16575_v15  ;;  %9147 = vmatprep.subr.mxu0 %v14940_v30 }
0x1581   :  { %9307 = vmatprep.subr.mxu1 %v16576_v11  ;;  %9149 = vmatpush1.msra.mxu0 %v14959_v62 }
0x1582   :  { %9313 = vmatpush1.msra.mxu1 %v16577_v6  ;;  %9151 = vmatprep.subr.mxu0 %v14967_v13 }
0x1583   :  { %9319 = vmatprep.subr.mxu1 %v16578_v38  ;;  %9153 = vmatpush1.msra.mxu0 %v14984_v40 }
0x1584   :  { %9325 = vmatpush1.msra.mxu1 %v16579_v54  ;;  %9155 = vmatprep.subr.mxu0 %v14993_v2  ;;  %v16580_v54 = vld [vmem:[#allocation42_spill] sm:$0xff] }
0x1585   :  { %9358 = vmatprep.mubr.f32.mxu1 %v16326_v41  ;;  %9488 = vmatprep.subr.mxu1 %v14923_v35 }
0x1586   :  { %9157 = vmatpush1.msra.mxu0 %v15004_v34  ;;  %9202 = vmatprep.mubr.f32.mxu0 %v16326_v41 }
0x1587   :  { %9159 = vmatprep.subr.mxu0 %v15010_v5 }
0x1588   :  { %9161 = vmatpush1.msra.mxu0 %v15022_v48 }
0x1589   :  { %9163 = vmatprep.subr.mxu0 %v15035_v53 }
0x158a   :  { %9165 = vmatpush1.msra.mxu0 %v15048_v19 }
0x158b   :  { %9167 = vmatprep.subr.mxu0 %v15058_v57 }
0x158c   :  { %9169 = vmatpush1.msra.mxu0 %v15084_v45 }
0x158d   :  { %9384 = vmatprep.subr.mxu0 %v16580_v54 }
0x1611   :  { %v8679_v6 = vpop.f32.mrf.mxu1 }
0x1613   :  { %v8681_v43 = vpop.f32.mrf.mxu1 }
0x1619   :  { %v8527_v38 = vpop.f32.mrf.mxu0 }
0x161a   :  { %v8680_v26 = vadd.f32 %v8679_v6, %v8527_v38 }
0x161b   :  { %v8529_v11 = vpop.f32.mrf.mxu0 }
0x161c   :  { %v8682_v54 = vadd.f32 %v8681_v43, %v8529_v11 }
0x1621   :  { %v8874_v50 = vpop.f32.mrf.mxu1 }
0x1623   :  { %v8876_v24 = vpop.f32.mrf.mxu1 }
0x162a   :  { %v8784_v15 = vpop.f32.mrf.mxu0 }
0x162b   :  { %v8785_v33 = vadd.f32 %v8784_v15, %v8680_v26 }
0x162c   :  { %v8786_v32 = vpop.f32.mrf.mxu0 }
0x162d   :  { %v8875_v63 = vadd.f32 %v8874_v50, %v8785_v33  ;;  %v8787_v58 = vadd.f32 %v8786_v32, %v8682_v54 }
0x162f   :  { %v8877_v6 = vadd.f32 %v8876_v24, %v8787_v58 }
0x1633   :  { %v9082_v42 = vpop.f32.mrf.mxu1 }
0x1635   :  { %v9084_v15 = vpop.f32.mrf.mxu1 }
0x163b   :  { %v8994_v31 = vpop.f32.mrf.mxu0 }
0x163c   :  { %v8995_v1 = vadd.f32 %v8994_v31, %v8875_v63  ;;  %v9110_v31 = vrot.slane %v15449_v47, 6 }
0x163d   :  { %v8996_v3 = vpop.f32.mrf.mxu0 }
0x163e   :  { %v9083_v60 = vadd.f32 %v9082_v42, %v8995_v1  ;;  %v8997_v26 = vadd.f32 %v8996_v3, %v8877_v6 }
0x1640   :  { %v9088_v9 = vrot.slane %v9083_v60, 4  ;;  %v9085_v50 = vadd.f32 %v9084_v15, %v8997_v26  ;;  %v16581_v26 = vld [vmem:[#allocation32_spill] sm:$0xff]  ;;  %v16582_v15 = vld [vmem:[#allocation34_spill] sm:$0xff] }
0x1642   :  { %v9090_v51 = vadd.f32 %v9088_v9, %v8432_v17  ;;  %v9097_v33 = vadd.f32 %v15329_v37, %v9085_v50  ;;  %v16583_v50 = vld [vmem:[#allocation35_spill] sm:$0xff] }
0x1644   :  { %v12557_v12 = vmul.f32 -1.442695, %v9090_v51  ;;  %v9099_v42 = vrot.slane %v9097_v33, 4  ;;  %v8433_v51 = vld [vmem:[#allocation2 + $0x8] sm:$0x30]  ;;  %v16584_v33 = vld [vmem:[#allocation25_spill] sm:$0xff] }
0x1646   :  { %12635 = vpow2.f32 %v12557_v12 }
0x1653   :  { %v12636_v23 = vpop.eup %12635 }
0x1654   :  { %v9094_v38 = vadd.f32 1.0, %v12636_v23 }
0x1656   :  { %12637 = vrcp.f32 %v9094_v38 }
0x1663   :  { %v12638_v60 = vpop.eup %12637 }
0x1664   :  { %v9101_v1 = vmul.f32 %v12638_v60, %v9099_v42  ;;  %v9112_v17 = vmul.f32 %v12638_v60, %v9110_v31  ;;  %v9104_v23 = vsub.f32 1.0, %v12638_v60  ;;  %v16585_v31 = vld [vmem:[#allocation41_spill] sm:$0xff] }
0x1665   :  { %v16586_v42 = vld [vmem:[#allocation37_spill] sm:$0xff] }
0x1666   :  { %v9102_v12 = vadd.f32 %v9101_v1, %v8433_v51  ;;  %v16587_v60 = vld [vmem:[#allocation33_spill] sm:$0xff]  ;;  %v16588_v1 = vld [vmem:[#allocation39_spill] sm:$0xff]  ;;  %v16590_v51 = vld [vmem:[#allocation30_spill] sm:$0xff] }
0x1668   :  { %12639 = vtanh.f32 %v9102_v12  ;;  %v16591_v12 = vld [vmem:[#allocation28_spill] sm:$0xff] }
0x1675   :  { %v12640_v9 = vpop.eup %12639 }
0x1676   :  { %9106 = vrot.lane.b32.xlu1 %v12640_v9, %s12810_s13  ;;  %v16592_v9 = vld [vmem:[#allocation46_spill] sm:$0xff] }
0x16e8   :  { %v9107_v58 = vpop.permute.xlu1 %9106 }
0x16e9   :  { %v9109_v24 = vmul.f32 %v9107_v58, %v9104_v23  ;;  %v16593_v23 = vld [vmem:[#allocation19_spill] sm:$0xff] }
0x16ea   :  { %v16594_v58 = vld [vmem:[#allocation47_spill] sm:$0xff] }
0x16eb   :  { %v15565_v3 = vadd.f32 %v9112_v17, %v9109_v24  ;;  %v16589_v17 = vld [vmem:[#allocation26_spill] sm:$0xff] }
0x16ec   :  { %v16595_v24 = vld [vmem:[#allocation38_spill] sm:$0xff] }
0x16ed   :  { %v9117_v63 = vrot.slane %v15565_v3, 4 }
0x16ef   :  { %9118 = vrot.lane.b32.xlu0 %v9117_v63, %s12810_s13  ;;  %v16596_v63 = vld [vmem:[#allocation29_spill] sm:$0xff] }
0x1761   :  { %v9119_v47 = vpop.permute.xlu0 %9118 }
0x1762   :  { %v9120_v32 = vsel %vm667_vm1, %v9119_v47, 0  ;;  %v16597_v47 = vld [vmem:[#allocation18_spill] sm:$0xff] }
0x1763   :  { %v15570_v43 = vand.u32 4294901760, %v9120_v32 }
0x1765   :  { %v9204_v54 = vsub.f32 %v9120_v32, %v15570_v43  ;;  %9360 = vmatmul.mubr.f32.vlgmr.msra.gmra.mxu1 %v15570_v43  ;;  %v16598_v32 = vld [vmem:[#allocation31_spill] sm:$0xff] }
0x1766   :  { %9490 = vmatpush1.msra.mxu1 %v14928_v0  ;;  %9551 = vmatprep.mubr.f32.mxu1 %v16326_v41 }
0x1767   :  { %v9205_v11 = vand.u32 4294901760, %v9204_v54  ;;  %9492 = vmatprep.subr.mxu1 %v14931_v8 }
0x1768   :  { %9494 = vmatpush1.msra.mxu1 %v14933_v55 }
0x1769   :  { %v9206_v38 = vsub.f32 %v9204_v54, %v9205_v11  ;;  %9496 = vmatprep.subr.mxu1 %v14940_v30 }
0x176a   :  { %9498 = vmatpush1.msra.mxu1 %v14959_v62 }
0x176b   :  { %v9207_v6 = vand.u32 4294901760, %v9206_v38  ;;  %9500 = vmatprep.subr.mxu1 %v14967_v13  ;;  %v16601_v38 = vld [vmem:[#allocation50_spill] sm:$0xff] }
0x176c   :  { %9502 = vmatpush1.msra.mxu1 %v14984_v40 }
0x176d   :  { %9504 = vmatprep.subr.mxu1 %v14993_v2  ;;  %9208 = vmatmul.mubr.f32.vlgmr.msra.gmra.mxu0 %v9207_v6  ;;  %v16603_v6 = vld [vmem:[#allocation52_spill] sm:$0xff] }
0x176e   :  { %9387 = vmatpush1.msra.mxu0 %v14945_v52  ;;  %9506 = vmatpush1.msra.mxu1 %v15004_v34 }
0x176f   :  { %9390 = vmatprep.subr.mxu0 %v14949_v27  ;;  %9508 = vmatprep.subr.mxu1 %v15010_v5 }
0x1770   :  { %9393 = vmatpush1.msra.mxu0 %v14952_v16  ;;  %9510 = vmatpush1.msra.mxu1 %v15022_v48 }
0x1771   :  { %9396 = vmatprep.subr.mxu0 %v14965_v4  ;;  %9512 = vmatprep.subr.mxu1 %v15035_v53 }
0x1772   :  { %9399 = vmatpush1.msra.mxu0 %v14991_v44  ;;  %9514 = vmatpush1.msra.mxu1 %v15048_v19 }
0x1773   :  { %9402 = vmatprep.subr.mxu0 %v15002_v61  ;;  %9516 = vmatprep.subr.mxu1 %v15058_v57 }
0x1774   :  { %9405 = vmatpush1.msra.mxu0 %v15020_v21  ;;  %9518 = vmatpush1.msra.mxu1 %v15084_v45 }
0x1775   :  { %9408 = vmatprep.subr.mxu0 %v15033_v39  ;;  %9555 = vmatmul.mubr.f32.vlgmr.msra.gmra.mxu1 %v9205_v11  ;;  %v16600_v11 = vld [vmem:[#allocation49_spill] sm:$0xff] }
0x1776   :  { %9698 = vmatprep.subr.mxu1 %v14923_v35  ;;  %9411 = vmatpush1.msra.mxu0 %v15046_v49 }
0x1777   :  { %9700 = vmatpush1.msra.mxu1 %v14928_v0  ;;  %9414 = vmatprep.subr.mxu0 %v15056_v56 }
0x1778   :  { %9702 = vmatprep.subr.mxu1 %v14931_v8  ;;  %9417 = vmatpush1.msra.mxu0 %v15071_v46 }
0x1779   :  { %9704 = vmatpush1.msra.mxu1 %v14933_v55  ;;  %9420 = vmatprep.subr.mxu0 %v15082_v29 }
0x177a   :  { %9706 = vmatprep.subr.mxu1 %v14940_v30  ;;  %9423 = vmatpush1.msra.mxu0 %v16519_v20 }
0x177b   :  { %9708 = vmatpush1.msra.mxu1 %v14959_v62  ;;  %9426 = vmatprep.subr.mxu0 %v16520_v36 }
0x177c   :  { %9710 = vmatprep.subr.mxu1 %v14967_v13  ;;  %9429 = vmatpush1.msra.mxu0 %v16521_v18 }
0x177d   :  { %9462 = vmatprep.mubr.f32.mxu0 %v16326_v41  ;;  %9712 = vmatpush1.msra.mxu1 %v14984_v40 }
0x177e   :  { %9465 = vmatmul.mubr.f32.vlgmr.msra.gmra.mxu0 %v9204_v54  ;;  %9580 = vmatprep.subr.mxu0 %v16522_v7  ;;  %v16599_v54 = vld [vmem:[#allocation48_spill] sm:$0xff] }
0x177f   :  { %9714 = vmatprep.subr.mxu1 %v14993_v2  ;;  %9584 = vmatpush1.msra.mxu0 %v16523_v10 }
0x1780   :  { %9716 = vmatpush1.msra.mxu1 %v15004_v34  ;;  %9588 = vmatprep.subr.mxu0 %v16524_v25 }
0x1781   :  { %9718 = vmatprep.subr.mxu1 %v15010_v5  ;;  %9592 = vmatpush1.msra.mxu0 %v16525_v14 }
0x1782   :  { %9720 = vmatpush1.msra.mxu1 %v15022_v48  ;;  %9596 = vmatprep.subr.mxu0 %v16526_v28 }
0x1783   :  { %9722 = vmatprep.subr.mxu1 %v15035_v53  ;;  %9600 = vmatpush1.msra.mxu0 %v16527_v59 }
0x1784   :  { %9724 = vmatpush1.msra.mxu1 %v15048_v19  ;;  %9604 = vmatprep.subr.mxu0 %v16528_v22 }
0x1785   :  { %9726 = vmatprep.subr.mxu1 %v15058_v57  ;;  %9608 = vmatpush1.msra.mxu0 %v16581_v26 }
0x1786   :  { %9728 = vmatpush1.msra.mxu1 %v15084_v45  ;;  %9761 = vmatprep.mubr.f32.mxu1 %v16326_v41 }
0x1787   :  { %9612 = vmatprep.subr.mxu0 %v16582_v15  ;;  %9763 = vmatmul.mubr.f32.vlgmr.msra.gmra.mxu1 %v15570_v43 }
0x1788   :  { %9616 = vmatpush1.msra.mxu0 %v16583_v50  ;;  %9673 = vmatprep.mubr.f32.mxu0 %v16326_v41 }
0x1789   :  { %9620 = vmatprep.subr.mxu0 %v16584_v33  ;;  %9917 = vmatprep.subr.mxu1 %v16585_v31 }
0x178a   :  { %9624 = vmatpush1.msra.mxu0 %v16586_v42  ;;  %9923 = vmatpush1.msra.mxu1 %v16587_v60  ;;  %v9114_v42 = vld [vmem:[#allocation2] sm:$0xc0] }
0x178b   :  { %9628 = vmatprep.subr.mxu0 %v16588_v1  ;;  %9929 = vmatprep.subr.mxu1 %v16589_v17 }
0x178c   :  { %9632 = vmatpush1.msra.mxu0 %v16590_v51  ;;  %9935 = vmatpush1.msra.mxu1 %v16591_v12 }
0x178d   :  { %9636 = vmatprep.subr.mxu0 %v16592_v9  ;;  %9941 = vmatprep.subr.mxu1 %v16593_v23 }
0x178e   :  { %9640 = vmatpush1.msra.mxu0 %v16594_v58  ;;  %9947 = vmatpush1.msra.mxu1 %v16595_v24 }
0x178f   :  { %9675 = vmatmul.mubr.f32.vlgmr.msra.gmra.mxu0 %v15570_v43  ;;  %9953 = vmatprep.subr.mxu1 %v16596_v63  ;;  %v16602_v43 = vld [vmem:[#allocation51_spill] sm:$0xff] }
0x1790   :  { %9959 = vmatpush1.msra.mxu1 %v16597_v47  ;;  %9821 = vmatprep.subr.mxu0 %v14923_v35 }
0x1791   :  { %9965 = vmatprep.subr.mxu1 %v16598_v32  ;;  %9823 = vmatpush1.msra.mxu0 %v14928_v0  ;;  %v16604_v32 = vld [vmem:[#allocation53_spill] sm:$0xff] }
0x1792   :  { %9971 = vmatpush1.msra.mxu1 %v16599_v54  ;;  %9825 = vmatprep.subr.mxu0 %v14931_v8  ;;  %v16605_v54 = vld [vmem:[#allocation54_spill] sm:$0xff] }
0x1793   :  { %9977 = vmatprep.subr.mxu1 %v16600_v11  ;;  %9827 = vmatpush1.msra.mxu0 %v14933_v55 }
0x1794   :  { %9983 = vmatpush1.msra.mxu1 %v16601_v38  ;;  %9829 = vmatprep.subr.mxu0 %v14940_v30 }
0x1795   :  { %9989 = vmatprep.subr.mxu1 %v16602_v43  ;;  %9831 = vmatpush1.msra.mxu0 %v14959_v62 }
0x1796   :  { %9995 = vmatpush1.msra.mxu1 %v16603_v6  ;;  %9833 = vmatprep.subr.mxu0 %v14967_v13 }
0x1797   :  { %10001 = vmatprep.subr.mxu1 %v16604_v32  ;;  %9835 = vmatpush1.msra.mxu0 %v14984_v40 }
0x1798   :  { %10007 = vmatpush1.msra.mxu1 %v16605_v54  ;;  %9837 = vmatprep.subr.mxu0 %v14993_v2  ;;  %v16606_v54 = vld [vmem:[#allocation42_spill] sm:$0xff] }
0x1799   :  { %10040 = vmatprep.mubr.f32.mxu1 %v16326_v41  ;;  %10170 = vmatprep.subr.mxu1 %v14923_v35 }
0x179a   :  { %9839 = vmatpush1.msra.mxu0 %v15004_v34  ;;  %9884 = vmatprep.mubr.f32.mxu0 %v16326_v41 }
0x179b   :  { %9841 = vmatprep.subr.mxu0 %v15010_v5 }
0x179c   :  { %9843 = vmatpush1.msra.mxu0 %v15022_v48 }
0x179d   :  { %9845 = vmatprep.subr.mxu0 %v15035_v53 }
0x179e   :  { %9847 = vmatpush1.msra.mxu0 %v15048_v19 }
0x179f   :  { %9849 = vmatprep.subr.mxu0 %v15058_v57 }
0x17a0   :  { %9851 = vmatpush1.msra.mxu0 %v15084_v45 }
0x17a1   :  { %10066 = vmatprep.subr.mxu0 %v16606_v54 }
0x1825   :  { %v9361_v6 = vpop.f32.mrf.mxu1 }
0x1827   :  { %v9363_v47 = vpop.f32.mrf.mxu1 }
0x182d   :  { %v9209_v32 = vpop.f32.mrf.mxu0 }
0x182e   :  { %v9362_v11 = vadd.f32 %v9361_v6, %v9209_v32 }
0x182f   :  { %v9211_v43 = vpop.f32.mrf.mxu0 }
0x1830   :  { %v9364_v54 = vadd.f32 %v9363_v47, %v9211_v43 }
0x1835   :  { %v9556_v24 = vpop.f32.mrf.mxu1 }
0x1837   :  { %v9558_v9 = vpop.f32.mrf.mxu1 }
0x183e   :  { %v9466_v38 = vpop.f32.mrf.mxu0 }
0x183f   :  { %v9467_v63 = vadd.f32 %v9466_v38, %v9362_v11 }
0x1840   :  { %v9468_v58 = vpop.f32.mrf.mxu0 }
0x1841   :  { %v9557_v23 = vadd.f32 %v9556_v24, %v9467_v63  ;;  %v9469_v50 = vadd.f32 %v9468_v58, %v9364_v54 }
0x1843   :  { %v9559_v6 = vadd.f32 %v9558_v9, %v9469_v50 }
0x1847   :  { %v9764_v17 = vpop.f32.mrf.mxu1 }
0x1849   :  { %v9766_v38 = vpop.f32.mrf.mxu1 }
0x184f   :  { %v9676_v12 = vpop.f32.mrf.mxu0 }
0x1850   :  { %v9677_v51 = vadd.f32 %v9676_v12, %v9557_v23  ;;  %v9792_v12 = vrot.slane %v15565_v3, 6 }
0x1851   :  { %v9678_v26 = vpop.f32.mrf.mxu0 }
0x1852   :  { %v9765_v1 = vadd.f32 %v9764_v17, %v9677_v51  ;;  %v9679_v11 = vadd.f32 %v9678_v26, %v9559_v6  ;;  %v16607_v6 = vld [vmem:[#allocation32_spill] sm:$0xff] }
0x1854   :  { %v9770_v60 = vrot.slane %v9765_v1, 2  ;;  %v9767_v24 = vadd.f32 %v9766_v38, %v9679_v11  ;;  %v16608_v11 = vld [vmem:[#allocation34_spill] sm:$0xff]  ;;  %v16609_v38 = vld [vmem:[#allocation35_spill] sm:$0xff] }
0x1856   :  { %v9772_v31 = vadd.f32 %v9770_v60, %v9114_v42  ;;  %v9779_v63 = vadd.f32 %v15329_v37, %v9767_v24  ;;  %v16610_v24 = vld [vmem:[#allocation25_spill] sm:$0xff] }
0x1858   :  { %v12558_v33 = vmul.f32 -1.442695, %v9772_v31  ;;  %v9781_v17 = vrot.slane %v9779_v63, 2  ;;  %v9115_v31 = vld [vmem:[#allocation2 + $0x8] sm:$0xc0]  ;;  %v16611_v63 = vld [vmem:[#allocation41_spill] sm:$0xff] }
0x185a   :  { %12641 = vpow2.f32 %v12558_v33 }
0x1867   :  { %v12642_v15 = vpop.eup %12641 }
0x1868   :  { %v9776_v32 = vadd.f32 1.0, %v12642_v15 }
0x186a   :  { %12643 = vrcp.f32 %v9776_v32 }
0x1877   :  { %v12644_v1 = vpop.eup %12643 }
0x1878   :  { %v9783_v51 = vmul.f32 %v12644_v1, %v9781_v17  ;;  %v9794_v42 = vmul.f32 %v12644_v1, %v9792_v12  ;;  %v9786_v15 = vsub.f32 1.0, %v12644_v1  ;;  %v16612_v12 = vld [vmem:[#allocation37_spill] sm:$0xff]  ;;  %v16614_v1 = vld [vmem:[#allocation39_spill] sm:$0xff] }
0x1879   :  { %v16613_v17 = vld [vmem:[#allocation33_spill] sm:$0xff] }
0x187a   :  { %v9784_v33 = vadd.f32 %v9783_v51, %v9115_v31  ;;  %v16615_v51 = vld [vmem:[#allocation26_spill] sm:$0xff]  ;;  %v16617_v31 = vld [vmem:[#allocation28_spill] sm:$0xff] }
0x187c   :  { %12645 = vtanh.f32 %v9784_v33  ;;  %v16618_v33 = vld [vmem:[#allocation46_spill] sm:$0xff] }
0x1889   :  { %v12646_v60 = vpop.eup %12645 }
0x188a   :  { %9788 = vrot.lane.b32.xlu1 %v12646_v60, %s12810_s13  ;;  %v16619_v60 = vld [vmem:[#allocation19_spill] sm:$0xff] }
0x18fc   :  { %v9789_v50 = vpop.permute.xlu1 %9788 }
0x18fd   :  { %v9791_v9 = vmul.f32 %v9789_v50, %v9786_v15  ;;  %v16620_v15 = vld [vmem:[#allocation47_spill] sm:$0xff]  ;;  %v16621_v50 = vld [vmem:[#allocation38_spill] sm:$0xff] }
0x18ff   :  { %v15681_v26 = vadd.f32 %v9794_v42, %v9791_v9  ;;  %v16616_v42 = vld [vmem:[#allocation30_spill] sm:$0xff]  ;;  %v16622_v9 = vld [vmem:[#allocation29_spill] sm:$0xff] }
0x1901   :  { %v16305_v23 = vrot.slane %v15681_v26, 6 }
0x1903   :  { %9800 = vrot.lane.b32.xlu0 %v16305_v23, %s12810_s13  ;;  %v16630_v23 = vld [vmem:[#allocation53_spill] sm:$0xff] }
0x1975   :  { %v9801_v37 = vpop.permute.xlu0 %9800 }
0x1976   :  { %v9802_v3 = vsel %vm667_vm1, %v9801_v37, 0  ;;  %v16623_v37 = vld [vmem:[#allocation18_spill] sm:$0xff] }
0x1977   :  { %v15688_v58 = vand.u32 4294901760, %v9802_v3 }
0x1979   :  { %v9886_v47 = vsub.f32 %v9802_v3, %v15688_v58  ;;  %10042 = vmatmul.mubr.f32.vlgmr.msra.gmra.mxu1 %v15688_v58  ;;  %v16624_v3 = vld [vmem:[#allocation31_spill] sm:$0xff] }
0x197a   :  { %10172 = vmatpush1.msra.mxu1 %v14928_v0  ;;  %10233 = vmatprep.mubr.f32.mxu1 %v16326_v41 }
0x197b   :  { %v9887_v54 = vand.u32 4294901760, %v9886_v47  ;;  %10174 = vmatprep.subr.mxu1 %v14931_v8 }
0x197c   :  { %10176 = vmatpush1.msra.mxu1 %v14933_v55 }
0x197d   :  { %v9888_v43 = vsub.f32 %v9886_v47, %v9887_v54  ;;  %10178 = vmatprep.subr.mxu1 %v14940_v30 }
0x197e   :  { %10180 = vmatpush1.msra.mxu1 %v14959_v62 }
0x197f   :  { %v9889_v32 = vand.u32 4294901760, %v9888_v43  ;;  %10182 = vmatprep.subr.mxu1 %v14967_v13  ;;  %v16627_v43 = vld [vmem:[#allocation50_spill] sm:$0xff] }
0x1980   :  { %10184 = vmatpush1.msra.mxu1 %v14984_v40 }
0x1981   :  { %10186 = vmatprep.subr.mxu1 %v14993_v2  ;;  %9890 = vmatmul.mubr.f32.vlgmr.msra.gmra.mxu0 %v9889_v32  ;;  %v16629_v32 = vld [vmem:[#allocation52_spill] sm:$0xff] }
0x1982   :  { %10069 = vmatpush1.msra.mxu0 %v14945_v52  ;;  %10188 = vmatpush1.msra.mxu1 %v15004_v34 }
0x1983   :  { %10072 = vmatprep.subr.mxu0 %v14949_v27  ;;  %10190 = vmatprep.subr.mxu1 %v15010_v5 }
0x1984   :  { %10075 = vmatpush1.msra.mxu0 %v14952_v16  ;;  %10192 = vmatpush1.msra.mxu1 %v15022_v48 }
0x1985   :  { %10078 = vmatprep.subr.mxu0 %v14965_v4  ;;  %10194 = vmatprep.subr.mxu1 %v15035_v53 }
0x1986   :  { %10081 = vmatpush1.msra.mxu0 %v14991_v44  ;;  %10196 = vmatpush1.msra.mxu1 %v15048_v19 }
0x1987   :  { %10084 = vmatprep.subr.mxu0 %v15002_v61  ;;  %10198 = vmatprep.subr.mxu1 %v15058_v57 }
0x1988   :  { %10087 = vmatpush1.msra.mxu0 %v15020_v21  ;;  %10200 = vmatpush1.msra.mxu1 %v15084_v45 }
0x1989   :  { %10090 = vmatprep.subr.mxu0 %v15033_v39  ;;  %10237 = vmatmul.mubr.f32.vlgmr.msra.gmra.mxu1 %v9887_v54  ;;  %v16626_v54 = vld [vmem:[#allocation49_spill] sm:$0xff] }
0x198a   :  { %10380 = vmatprep.subr.mxu1 %v14923_v35  ;;  %10093 = vmatpush1.msra.mxu0 %v15046_v49 }
0x198b   :  { %10382 = vmatpush1.msra.mxu1 %v14928_v0  ;;  %10096 = vmatprep.subr.mxu0 %v15056_v56 }
0x198c   :  { %10384 = vmatprep.subr.mxu1 %v14931_v8  ;;  %10099 = vmatpush1.msra.mxu0 %v15071_v46 }
0x198d   :  { %10386 = vmatpush1.msra.mxu1 %v14933_v55  ;;  %10102 = vmatprep.subr.mxu0 %v15082_v29 }
0x198e   :  { %10388 = vmatprep.subr.mxu1 %v14940_v30  ;;  %10105 = vmatpush1.msra.mxu0 %v16519_v20 }
0x198f   :  { %10390 = vmatpush1.msra.mxu1 %v14959_v62  ;;  %10108 = vmatprep.subr.mxu0 %v16520_v36 }
0x1990   :  { %10392 = vmatprep.subr.mxu1 %v14967_v13  ;;  %10111 = vmatpush1.msra.mxu0 %v16521_v18 }
0x1991   :  { %10144 = vmatprep.mubr.f32.mxu0 %v16326_v41  ;;  %10394 = vmatpush1.msra.mxu1 %v14984_v40 }
0x1992   :  { %10147 = vmatmul.mubr.f32.vlgmr.msra.gmra.mxu0 %v9886_v47  ;;  %10262 = vmatprep.subr.mxu0 %v16522_v7  ;;  %v16625_v47 = vld [vmem:[#allocation48_spill] sm:$0xff] }
0x1993   :  { %10396 = vmatprep.subr.mxu1 %v14993_v2  ;;  %10266 = vmatpush1.msra.mxu0 %v16523_v10 }
0x1994   :  { %10398 = vmatpush1.msra.mxu1 %v15004_v34  ;;  %10270 = vmatprep.subr.mxu0 %v16524_v25 }
0x1995   :  { %10400 = vmatprep.subr.mxu1 %v15010_v5  ;;  %10274 = vmatpush1.msra.mxu0 %v16525_v14 }
0x1996   :  { %10402 = vmatpush1.msra.mxu1 %v15022_v48  ;;  %10278 = vmatprep.subr.mxu0 %v16526_v28 }
0x1997   :  { %10404 = vmatprep.subr.mxu1 %v15035_v53  ;;  %10282 = vmatpush1.msra.mxu0 %v16527_v59 }
0x1998   :  { %10406 = vmatpush1.msra.mxu1 %v15048_v19  ;;  %10286 = vmatprep.subr.mxu0 %v16528_v22 }
0x1999   :  { %10408 = vmatprep.subr.mxu1 %v15058_v57  ;;  %10290 = vmatpush1.msra.mxu0 %v16607_v6 }
0x199a   :  { %10410 = vmatpush1.msra.mxu1 %v15084_v45  ;;  %10443 = vmatprep.mubr.f32.mxu1 %v16326_v41 }
0x199b   :  { %10294 = vmatprep.subr.mxu0 %v16608_v11  ;;  %10445 = vmatmul.mubr.f32.vlgmr.msra.gmra.mxu1 %v15688_v58 }
0x199c   :  { %10298 = vmatpush1.msra.mxu0 %v16609_v38  ;;  %10355 = vmatprep.mubr.f32.mxu0 %v16326_v41 }
0x199d   :  { %10302 = vmatprep.subr.mxu0 %v16610_v24  ;;  %10591 = vmatprep.subr.mxu1 %v16611_v63 }
0x199e   :  { %10306 = vmatpush1.msra.mxu0 %v16612_v12  ;;  %10597 = vmatpush1.msra.mxu1 %v16613_v17 }
0x199f   :  { %10310 = vmatprep.subr.mxu0 %v16614_v1  ;;  %10603 = vmatprep.subr.mxu1 %v16615_v51  ;;  %v9796_v1 = vld [vmem:[#allocation2 + $0x10] sm:$0x3] }
0x19a0   :  { %10314 = vmatpush1.msra.mxu0 %v16616_v42  ;;  %10609 = vmatpush1.msra.mxu1 %v16617_v31 }
0x19a1   :  { %10318 = vmatprep.subr.mxu0 %v16618_v33  ;;  %10615 = vmatprep.subr.mxu1 %v16619_v60 }
0x19a2   :  { %10322 = vmatpush1.msra.mxu0 %v16620_v15  ;;  %10621 = vmatpush1.msra.mxu1 %v16621_v50 }
0x19a3   :  { %10357 = vmatmul.mubr.f32.vlgmr.msra.gmra.mxu0 %v15688_v58  ;;  %10627 = vmatprep.subr.mxu1 %v16622_v9  ;;  %v16628_v58 = vld [vmem:[#allocation51_spill] sm:$0xff] }
0x19a4   :  { %10633 = vmatpush1.msra.mxu1 %v16623_v37  ;;  %10495 = vmatprep.subr.mxu0 %v14923_v35 }
0x19a5   :  { %10639 = vmatprep.subr.mxu1 %v16624_v3  ;;  %10497 = vmatpush1.msra.mxu0 %v14928_v0 }
0x19a6   :  { %10645 = vmatpush1.msra.mxu1 %v16625_v47  ;;  %10499 = vmatprep.subr.mxu0 %v14931_v8  ;;  %v16631_v47 = vld [vmem:[#allocation54_spill] sm:$0xff] }
0x19a7   :  { %10651 = vmatprep.subr.mxu1 %v16626_v54  ;;  %10501 = vmatpush1.msra.mxu0 %v14933_v55 }
0x19a8   :  { %10657 = vmatpush1.msra.mxu1 %v16627_v43  ;;  %10503 = vmatprep.subr.mxu0 %v14940_v30 }
0x19a9   :  { %10663 = vmatprep.subr.mxu1 %v16628_v58  ;;  %10505 = vmatpush1.msra.mxu0 %v14959_v62 }
0x19aa   :  { %10669 = vmatpush1.msra.mxu1 %v16629_v32  ;;  %10507 = vmatprep.subr.mxu0 %v14967_v13 }
0x19ab   :  { %10675 = vmatprep.subr.mxu1 %v16630_v23  ;;  %10509 = vmatpush1.msra.mxu0 %v14984_v40 }
0x19ac   :  { %10681 = vmatpush1.msra.mxu1 %v16631_v47  ;;  %10511 = vmatprep.subr.mxu0 %v14993_v2  ;;  %v16632_v47 = vld [vmem:[#allocation42_spill] sm:$0xff] }
0x19ad   :  { %10714 = vmatprep.mubr.f32.mxu1 %v16326_v41  ;;  %10844 = vmatprep.subr.mxu1 %v14923_v35 }
0x19ae   :  { %10513 = vmatpush1.msra.mxu0 %v15004_v34  ;;  %10558 = vmatprep.mubr.f32.mxu0 %v16326_v41 }
0x19af   :  { %10515 = vmatprep.subr.mxu0 %v15010_v5 }
0x19b0   :  { %10517 = vmatpush1.msra.mxu0 %v15022_v48 }
0x19b1   :  { %10519 = vmatprep.subr.mxu0 %v15035_v53 }
0x19b2   :  { %10521 = vmatpush1.msra.mxu0 %v15048_v19 }
0x19b3   :  { %10523 = vmatprep.subr.mxu0 %v15058_v57 }
0x19b4   :  { %10525 = vmatpush1.msra.mxu0 %v15084_v45 }
0x19b5   :  { %10740 = vmatprep.subr.mxu0 %v16632_v47 }
0x1a39   :  { %v10043_v32 = vpop.f32.mrf.mxu1 }
0x1a3b   :  { %v10045_v3 = vpop.f32.mrf.mxu1 }
0x1a41   :  { %v9891_v23 = vpop.f32.mrf.mxu0 }
0x1a42   :  { %v10044_v54 = vadd.f32 %v10043_v32, %v9891_v23 }
0x1a43   :  { %v9893_v58 = vpop.f32.mrf.mxu0 }
0x1a44   :  { %v10046_v47 = vadd.f32 %v10045_v3, %v9893_v58 }
0x1a49   :  { %v10238_v9 = vpop.f32.mrf.mxu1 }
0x1a4b   :  { %v10240_v60 = vpop.f32.mrf.mxu1 }
0x1a52   :  { %v10148_v43 = vpop.f32.mrf.mxu0 }
0x1a53   :  { %v10149_v37 = vadd.f32 %v10148_v43, %v10044_v54 }
0x1a54   :  { %v10150_v50 = vpop.f32.mrf.mxu0 }
0x1a55   :  { %v10239_v15 = vadd.f32 %v10238_v9, %v10149_v37  ;;  %v10151_v24 = vadd.f32 %v10150_v50, %v10046_v47 }
0x1a57   :  { %v10241_v32 = vadd.f32 %v10240_v60, %v10151_v24 }
0x1a5b   :  { %v10446_v42 = vpop.f32.mrf.mxu1 }
0x1a5d   :  { %v10448_v43 = vpop.f32.mrf.mxu1 }
0x1a63   :  { %v10358_v33 = vpop.f32.mrf.mxu0 }
0x1a64   :  { %v10359_v31 = vadd.f32 %v10358_v33, %v10239_v15  ;;  %v15799_v33 = vld [vmem:[%s16130_s8] ss:$0 sm:$0xff]  ;;  %s12811_s8 = smov [#allocation13]  }
0x1a65   :  { %v10360_v23 = vpop.f32.mrf.mxu0  ;;  %s12527_s23 = sshll.u32 %s12811_s8, 4  ;;  %s12528_s23 = int_to_ptr.vmem [resolvable:$true] %s12527_s23 }
0x1a66   :  { %v10447_v51 = vadd.f32 %v10446_v42, %v10359_v31  ;;  %v10361_v54 = vadd.f32 %v10360_v23, %v10241_v32  ;;  %v16634_v23 = vld [vmem:[#allocation34_spill] sm:$0xff]  ;;  %v16635_v32 = vld [vmem:[#allocation35_spill] sm:$0xff]  ;;  %s12772_s24 = scalar_lea.vmem %s12528_s23, 32  ;;  %p12777_p12 = scmp.lt.s32.totalorder %s12528_s23, %s12528_s23 }
0x1a67   :  { %p12773_p11 = scmp.ne.s32.totalorder %s12528_s23, %s12772_s24  ;;  %p12778_p13 = scmp.lt.s32.totalorder %s12772_s24, %s12772_s24 }
0x1a68   :  { %v10451_v17 = vadd.f32 %v10447_v51, %v9796_v1  ;;  %v10449_v11 = vadd.f32 %v10448_v43, %v10361_v54  ;;  %v16636_v54 = vld [vmem:[#allocation25_spill] sm:$0xff] }
0x1a69   :  { %v16637_v43 = vld [vmem:[#allocation41_spill] sm:$0xff]  ;;  %p12779_p0 = por %p12778_p13, %p12777_p12 }
0x1a6a   :  { %v12559_v12 = vmul.f32 -1.442695, %v10451_v17  ;;  %v10458_v42 = vadd.f32 %v15799_v33, %v10449_v11 }
0x1a6b   :  { %p12780_p1 = pnand %p12779_p0, %p12773_p11 }
0x1a6c   :  { %12647 = vpow2.f32 %v12559_v12  ;;  %v9797_v12 = vld [vmem:[#allocation2 + $0x18] sm:$0x3] }
0x1a79   :  { %v12648_v63 = vpop.eup %12647 }
0x1a7a   :  { %v10455_v38 = vadd.f32 1.0, %v12648_v63  ;;  %v16633_v63 = vrot.slane %v15681_v26, 6 }
0x1a7c   :  { %12649 = vrcp.f32 %v10455_v38 }
0x1a89   :  { %v12650_v1 = vpop.eup %12649 }
0x1a8a   :  { %v10459_v17 = vmul.f32 %v12650_v1, %v10458_v42  ;;  %v10462_v38 = vsub.f32 1.0, %v12650_v1  ;;  %v10469_v60 = vmul.f32 %v12650_v1, %v16633_v63  ;;  %v16638_v42 = vld [vmem:[#allocation37_spill] sm:$0xff]  ;;  %v16646_v63 = vld [vmem:[#allocation47_spill] sm:$0xff] }
0x1a8b   :  { %v16639_v1 = vld [vmem:[#allocation33_spill] sm:$0xff] }
0x1a8c   :  { %v10460_v51 = vadd.f32 %v10459_v17, %v9797_v12  ;;  %v16640_v17 = vld [vmem:[#allocation39_spill] sm:$0xff]  ;;  %v16641_v12 = vld [vmem:[#allocation26_spill] sm:$0xff] }
0x1a8e   :  { %12651 = vtanh.f32 %v10460_v51  ;;  %v16642_v51 = vld [vmem:[#allocation30_spill] sm:$0xff] }
0x1a9b   :  { %v12652_v31 = vpop.eup %12651 }
0x1a9c   :  { %10464 = vrot.lane.b32.xlu1 %v12652_v31, %s12810_s13  ;;  %v16643_v31 = vld [vmem:[#allocation28_spill] sm:$0xff] }
0x1b0e   :  { %v10465_v24 = vpop.permute.xlu1 %10464 }
0x1b0f   :  { %v10467_v15 = vmul.f32 %v10465_v24, %v10462_v38  ;;  %v16644_v38 = vld [vmem:[#allocation46_spill] sm:$0xff]  ;;  %v16645_v24 = vld [vmem:[#allocation19_spill] sm:$0xff] }
0x1b11   :  { %v15805_v50 = vadd.f32 %v10469_v60, %v10467_v15  ;;  %v16647_v60 = vld [vmem:[#allocation38_spill] sm:$0xff]  ;;  %v16648_v15 = vld [vmem:[#allocation29_spill] sm:$0xff] }
0x1b13   :  { %10474 = vrot.lane.b32.xlu0 %v15805_v50, %s12810_s13 }
0x1b85   :  { %v10475_v11 = vpop.permute.xlu0 %10474 }
0x1b86   :  { %v10476_v9 = vsel %vm667_vm1, %v10475_v11, 0  ;;  %v16649_v11 = vld [vmem:[#allocation18_spill] sm:$0xff] }
0x1b87   :  { %v15810_v37 = vand.u32 4294901760, %v10476_v9 }
0x1b89   :  { %v10560_v3 = vsub.f32 %v10476_v9, %v15810_v37  ;;  %10716 = vmatmul.mubr.f32.vlgmr.msra.gmra.mxu1 %v15810_v37  ;;  %v16650_v9 = vld [vmem:[#allocation31_spill] sm:$0xff] }
0x1b8a   :  { %10846 = vmatpush1.msra.mxu1 %v14928_v0  ;;  %10907 = vmatprep.mubr.f32.mxu1 %v16326_v41 }
0x1b8b   :  { %v10561_v26 = vand.u32 4294901760, %v10560_v3  ;;  %10848 = vmatprep.subr.mxu1 %v14931_v8 }
0x1b8c   :  { %10850 = vmatpush1.msra.mxu1 %v14933_v55 }
0x1b8d   :  { %v10562_v47 = vsub.f32 %v10560_v3, %v10561_v26  ;;  %10852 = vmatprep.subr.mxu1 %v14940_v30 }
0x1b8e   :  { %10854 = vmatpush1.msra.mxu1 %v14959_v62 }
0x1b8f   :  { %v10563_v58 = vand.u32 4294901760, %v10562_v47  ;;  %10856 = vmatprep.subr.mxu1 %v14967_v13  ;;  %v16653_v47 = vld [vmem:[#allocation50_spill] sm:$0xff] }
0x1b90   :  { %10858 = vmatpush1.msra.mxu1 %v14984_v40 }
0x1b91   :  { %10860 = vmatprep.subr.mxu1 %v14993_v2  ;;  %10564 = vmatmul.mubr.f32.vlgmr.msra.gmra.mxu0 %v10563_v58  ;;  %v16655_v58 = vld [vmem:[#allocation52_spill] sm:$0xff] }
0x1b92   :  { %10743 = vmatpush1.msra.mxu0 %v14945_v52  ;;  %10862 = vmatpush1.msra.mxu1 %v15004_v34 }
0x1b93   :  { %10746 = vmatprep.subr.mxu0 %v14949_v27  ;;  %10864 = vmatprep.subr.mxu1 %v15010_v5 }
0x1b94   :  { %10749 = vmatpush1.msra.mxu0 %v14952_v16  ;;  %10866 = vmatpush1.msra.mxu1 %v15022_v48 }
0x1b95   :  { %10752 = vmatprep.subr.mxu0 %v14965_v4  ;;  %10868 = vmatprep.subr.mxu1 %v15035_v53 }
0x1b96   :  { %10755 = vmatpush1.msra.mxu0 %v14991_v44  ;;  %10870 = vmatpush1.msra.mxu1 %v15048_v19 }
0x1b97   :  { %10758 = vmatprep.subr.mxu0 %v15002_v61  ;;  %10872 = vmatprep.subr.mxu1 %v15058_v57 }
0x1b98   :  { %10761 = vmatpush1.msra.mxu0 %v15020_v21  ;;  %10874 = vmatpush1.msra.mxu1 %v15084_v45 }
0x1b99   :  { %10764 = vmatprep.subr.mxu0 %v15033_v39  ;;  %10911 = vmatmul.mubr.f32.vlgmr.msra.gmra.mxu1 %v10561_v26  ;;  %v16652_v26 = vld [vmem:[#allocation49_spill] sm:$0xff] }
0x1b9a   :  { %11054 = vmatprep.subr.mxu1 %v14923_v35  ;;  %10767 = vmatpush1.msra.mxu0 %v15046_v49 }
0x1b9b   :  { %11056 = vmatpush1.msra.mxu1 %v14928_v0  ;;  %10770 = vmatprep.subr.mxu0 %v15056_v56 }
0x1b9c   :  { %11058 = vmatprep.subr.mxu1 %v14931_v8  ;;  %10773 = vmatpush1.msra.mxu0 %v15071_v46 }
0x1b9d   :  { %11060 = vmatpush1.msra.mxu1 %v14933_v55  ;;  %10776 = vmatprep.subr.mxu0 %v15082_v29 }
0x1b9e   :  { %11062 = vmatprep.subr.mxu1 %v14940_v30  ;;  %10779 = vmatpush1.msra.mxu0 %v16519_v20 }
0x1b9f   :  { %11064 = vmatpush1.msra.mxu1 %v14959_v62  ;;  %10782 = vmatprep.subr.mxu0 %v16520_v36 }
0x1ba0   :  { %11066 = vmatprep.subr.mxu1 %v14967_v13  ;;  %10785 = vmatpush1.msra.mxu0 %v16521_v18 }
0x1ba1   :  { %10818 = vmatprep.mubr.f32.mxu0 %v16326_v41  ;;  %11068 = vmatpush1.msra.mxu1 %v14984_v40 }
0x1ba2   :  { %10821 = vmatmul.mubr.f32.vlgmr.msra.gmra.mxu0 %v10560_v3  ;;  %10936 = vmatprep.subr.mxu0 %v16522_v7  ;;  %v16651_v3 = vld [vmem:[#allocation48_spill] sm:$0xff] }
0x1ba3   :  { %11070 = vmatprep.subr.mxu1 %v14993_v2  ;;  %10940 = vmatpush1.msra.mxu0 %v16523_v10 }
0x1ba4   :  { %11072 = vmatpush1.msra.mxu1 %v15004_v34  ;;  %10944 = vmatprep.subr.mxu0 %v16524_v25 }
0x1ba5   :  { %11074 = vmatprep.subr.mxu1 %v15010_v5  ;;  %10948 = vmatpush1.msra.mxu0 %v16525_v14 }
0x1ba6   :  { %11076 = vmatpush1.msra.mxu1 %v15022_v48  ;;  %10952 = vmatprep.subr.mxu0 %v16526_v28 }
0x1ba7   :  { %11078 = vmatprep.subr.mxu1 %v15035_v53  ;;  %10956 = vmatpush1.msra.mxu0 %v16527_v59 }
0x1ba8   :  { %11080 = vmatpush1.msra.mxu1 %v15048_v19  ;;  %10960 = vmatprep.subr.mxu0 %v16528_v22 }
0x1ba9   :  { %11082 = vmatprep.subr.mxu1 %v15058_v57  ;;  %10964 = vmatpush1.msra.mxu0 %v16607_v6 }
0x1baa   :  { %11084 = vmatpush1.msra.mxu1 %v15084_v45  ;;  %11117 = vmatprep.mubr.f32.mxu1 %v16326_v41 }
0x1bab   :  { %10968 = vmatprep.subr.mxu0 %v16634_v23  ;;  %11119 = vmatmul.mubr.f32.vlgmr.msra.gmra.mxu1 %v15810_v37 }
0x1bac   :  { %10972 = vmatpush1.msra.mxu0 %v16635_v32  ;;  %11029 = vmatprep.mubr.f32.mxu0 %v16326_v41 }
0x1bad   :  { %10976 = vmatprep.subr.mxu0 %v16636_v54  ;;  %11273 = vmatprep.subr.mxu1 %v16637_v43 }
0x1bae   :  { %10980 = vmatpush1.msra.mxu0 %v16638_v42  ;;  %11279 = vmatpush1.msra.mxu1 %v16639_v1  ;;  %v10471_v42 = vld [vmem:[#allocation2 + $0x10] sm:$0xc] }
0x1baf   :  { %10984 = vmatprep.subr.mxu0 %v16640_v17  ;;  %11285 = vmatprep.subr.mxu1 %v16641_v12 }
0x1bb0   :  { %10988 = vmatpush1.msra.mxu0 %v16642_v51  ;;  %11291 = vmatpush1.msra.mxu1 %v16643_v31 }
0x1bb1   :  { %10992 = vmatprep.subr.mxu0 %v16644_v38  ;;  %11297 = vmatprep.subr.mxu1 %v16645_v24 }
0x1bb2   :  { %10996 = vmatpush1.msra.mxu0 %v16646_v63  ;;  %11303 = vmatpush1.msra.mxu1 %v16647_v60 }
0x1bb3   :  { %11031 = vmatmul.mubr.f32.vlgmr.msra.gmra.mxu0 %v15810_v37  ;;  %11309 = vmatprep.subr.mxu1 %v16648_v15  ;;  %v16654_v37 = vld [vmem:[#allocation51_spill] sm:$0xff] }
0x1bb4   :  { %11315 = vmatpush1.msra.mxu1 %v16649_v11  ;;  %11177 = vmatprep.subr.mxu0 %v14923_v35 }
0x1bb5   :  { %11321 = vmatprep.subr.mxu1 %v16650_v9  ;;  %11179 = vmatpush1.msra.mxu0 %v14928_v0  ;;  %v16656_v9 = vld [vmem:[#allocation53_spill] sm:$0xff] }
0x1bb6   :  { %11327 = vmatpush1.msra.mxu1 %v16651_v3  ;;  %11181 = vmatprep.subr.mxu0 %v14931_v8  ;;  %v16657_v3 = vld [vmem:[#allocation54_spill] sm:$0xff] }
0x1bb7   :  { %11333 = vmatprep.subr.mxu1 %v16652_v26  ;;  %11183 = vmatpush1.msra.mxu0 %v14933_v55 }
0x1bb8   :  { %11339 = vmatpush1.msra.mxu1 %v16653_v47  ;;  %11185 = vmatprep.subr.mxu0 %v14940_v30 }
0x1bb9   :  { %11345 = vmatprep.subr.mxu1 %v16654_v37  ;;  %11187 = vmatpush1.msra.mxu0 %v14959_v62 }
0x1bba   :  { %11351 = vmatpush1.msra.mxu1 %v16655_v58  ;;  %11189 = vmatprep.subr.mxu0 %v14967_v13 }
0x1bbb   :  { %11357 = vmatprep.subr.mxu1 %v16656_v9  ;;  %11191 = vmatpush1.msra.mxu0 %v14984_v40 }
0x1bbc   :  { %11363 = vmatpush1.msra.mxu1 %v16657_v3  ;;  %11193 = vmatprep.subr.mxu0 %v14993_v2  ;;  %v16658_v3 = vld [vmem:[#allocation42_spill] sm:$0xff] }
0x1bbd   :  { %11396 = vmatprep.mubr.f32.mxu1 %v16326_v41  ;;  %11526 = vmatprep.subr.mxu1 %v14923_v35 }
0x1bbe   :  { %11195 = vmatpush1.msra.mxu0 %v15004_v34  ;;  %11240 = vmatprep.mubr.f32.mxu0 %v16326_v41 }
0x1bbf   :  { %11197 = vmatprep.subr.mxu0 %v15010_v5 }
0x1bc0   :  { %11199 = vmatpush1.msra.mxu0 %v15022_v48 }
0x1bc1   :  { %11201 = vmatprep.subr.mxu0 %v15035_v53 }
0x1bc2   :  { %11203 = vmatpush1.msra.mxu0 %v15048_v19 }
0x1bc3   :  { %11205 = vmatprep.subr.mxu0 %v15058_v57 }
0x1bc4   :  { %11207 = vmatpush1.msra.mxu0 %v15084_v45 }
0x1bc5   :  { %11422 = vmatprep.subr.mxu0 %v16658_v3 }
0x1c49   :  { %v10717_v58 = vpop.f32.mrf.mxu1 }
0x1c4b   :  { %v10719_v11 = vpop.f32.mrf.mxu1 }
0x1c51   :  { %v10565_v9 = vpop.f32.mrf.mxu0 }
0x1c52   :  { %v10718_v26 = vadd.f32 %v10717_v58, %v10565_v9 }
0x1c53   :  { %v10567_v37 = vpop.f32.mrf.mxu0 }
0x1c54   :  { %v10720_v3 = vadd.f32 %v10719_v11, %v10567_v37 }
0x1c59   :  { %v10912_v60 = vpop.f32.mrf.mxu1 }
0x1c5b   :  { %v10914_v38 = vpop.f32.mrf.mxu1 }
0x1c62   :  { %v10822_v47 = vpop.f32.mrf.mxu0 }
0x1c63   :  { %v10823_v15 = vadd.f32 %v10822_v47, %v10718_v26 }
0x1c64   :  { %v10824_v63 = vpop.f32.mrf.mxu0 }
0x1c65   :  { %v10913_v24 = vadd.f32 %v10912_v60, %v10823_v15  ;;  %v10825_v32 = vadd.f32 %v10824_v63, %v10720_v3 }
0x1c67   :  { %v10915_v58 = vadd.f32 %v10914_v38, %v10825_v32 }
0x1c6b   :  { %v11120_v12 = vpop.f32.mrf.mxu1 }
0x1c6d   :  { %v11122_v47 = vpop.f32.mrf.mxu1 }
0x1c73   :  { %v11032_v31 = vpop.f32.mrf.mxu0 }
0x1c74   :  { %v11033_v51 = vadd.f32 %v11032_v31, %v10913_v24  ;;  %v11148_v31 = vrot.slane %v15805_v50, 6 }
0x1c75   :  { %v11034_v6 = vpop.f32.mrf.mxu0 }
0x1c76   :  { %v11121_v17 = vadd.f32 %v11120_v12, %v11033_v51  ;;  %v11035_v26 = vadd.f32 %v11034_v6, %v10915_v58 }
0x1c78   :  { %v11126_v1 = vrot.slane %v11121_v17, 6  ;;  %v11123_v60 = vadd.f32 %v11122_v47, %v11035_v26  ;;  %v16659_v26 = vld [vmem:[#allocation32_spill] sm:$0xff]  ;;  %v16660_v47 = vld [vmem:[#allocation34_spill] sm:$0xff] }
0x1c7a   :  { %v11128_v43 = vadd.f32 %v11126_v1, %v10471_v42  ;;  %v11135_v15 = vadd.f32 %v15799_v33, %v11123_v60  ;;  %v16661_v60 = vld [vmem:[#allocation35_spill] sm:$0xff] }
0x1c7c   :  { %v12560_v54 = vmul.f32 -1.442695, %v11128_v43  ;;  %v11137_v12 = vrot.slane %v11135_v15, 6  ;;  %v10472_v43 = vld [vmem:[#allocation2 + $0x18] sm:$0xc] }
0x1c7d   :  { %v16662_v15 = vld [vmem:[#allocation25_spill] sm:$0xff] }
0x1c7e   :  { %12653 = vpow2.f32 %v12560_v54 }
0x1c8b   :  { %v12654_v23 = vpop.eup %12653 }
0x1c8c   :  { %v11132_v9 = vadd.f32 1.0, %v12654_v23 }
0x1c8e   :  { %12655 = vrcp.f32 %v11132_v9 }
0x1c9b   :  { %v12656_v17 = vpop.eup %12655 }
0x1c9c   :  { %v11139_v51 = vmul.f32 %v12656_v17, %v11137_v12  ;;  %v11150_v42 = vmul.f32 %v12656_v17, %v11148_v31  ;;  %v11142_v23 = vsub.f32 1.0, %v12656_v17  ;;  %v16663_v31 = vld [vmem:[#allocation41_spill] sm:$0xff] }
0x1c9d   :  { %v16664_v12 = vld [vmem:[#allocation37_spill] sm:$0xff] }
0x1c9e   :  { %v11140_v54 = vadd.f32 %v11139_v51, %v10472_v43  ;;  %v16665_v17 = vld [vmem:[#allocation33_spill] sm:$0xff]  ;;  %v16666_v51 = vld [vmem:[#allocation39_spill] sm:$0xff]  ;;  %v16668_v43 = vld [vmem:[#allocation30_spill] sm:$0xff] }
0x1ca0   :  { %12657 = vtanh.f32 %v11140_v54  ;;  %v16669_v54 = vld [vmem:[#allocation28_spill] sm:$0xff] }
0x1cad   :  { %v12658_v1 = vpop.eup %12657 }
0x1cae   :  { %11144 = vrot.lane.b32.xlu1 %v12658_v1, %s12810_s13  ;;  %v16670_v1 = vld [vmem:[#allocation46_spill] sm:$0xff] }
0x1d20   :  { %v11145_v32 = vpop.permute.xlu1 %11144 }
0x1d21   :  { %v11147_v38 = vmul.f32 %v11145_v32, %v11142_v23  ;;  %v16671_v23 = vld [vmem:[#allocation19_spill] sm:$0xff] }
0x1d22   :  { %v16672_v32 = vld [vmem:[#allocation47_spill] sm:$0xff] }
0x1d23   :  { %v15921_v6 = vadd.f32 %v11150_v42, %v11147_v38  ;;  %v16667_v42 = vld [vmem:[#allocation26_spill] sm:$0xff] }
0x1d24   :  { %v16673_v38 = vld [vmem:[#allocation38_spill] sm:$0xff] }
0x1d25   :  { %v11155_v24 = vrot.slane %v15921_v6, 2 }
0x1d27   :  { %11156 = vrot.lane.b32.xlu0 %v11155_v24, %s12810_s13  ;;  %v16674_v24 = vld [vmem:[#allocation29_spill] sm:$0xff] }
0x1d99   :  { %v11157_v50 = vpop.permute.xlu0 %11156 }
0x1d9a   :  { %v11158_v63 = vsel %vm667_vm1, %v11157_v50, 0  ;;  %v16675_v50 = vld [vmem:[#allocation18_spill] sm:$0xff] }
0x1d9b   :  { %v15926_v11 = vand.u32 4294901760, %v11158_v63 }
0x1d9d   :  { %v11242_v3 = vsub.f32 %v11158_v63, %v15926_v11  ;;  %11398 = vmatmul.mubr.f32.vlgmr.msra.gmra.mxu1 %v15926_v11  ;;  %v16676_v63 = vld [vmem:[#allocation31_spill] sm:$0xff] }
0x1d9e   :  { %11528 = vmatpush1.msra.mxu1 %v14928_v0  ;;  %11589 = vmatprep.mubr.f32.mxu1 %v16326_v41 }
0x1d9f   :  { %v11243_v37 = vand.u32 4294901760, %v11242_v3  ;;  %11530 = vmatprep.subr.mxu1 %v14931_v8 }
0x1da0   :  { %11532 = vmatpush1.msra.mxu1 %v14933_v55 }
0x1da1   :  { %v11244_v9 = vsub.f32 %v11242_v3, %v11243_v37  ;;  %11534 = vmatprep.subr.mxu1 %v14940_v30 }
0x1da2   :  { %11536 = vmatpush1.msra.mxu1 %v14959_v62 }
0x1da3   :  { %v11245_v58 = vand.u32 4294901760, %v11244_v9  ;;  %11538 = vmatprep.subr.mxu1 %v14967_v13  ;;  %v16679_v9 = vld [vmem:[#allocation50_spill] sm:$0xff] }
0x1da4   :  { %11540 = vmatpush1.msra.mxu1 %v14984_v40 }
0x1da5   :  { %11542 = vmatprep.subr.mxu1 %v14993_v2  ;;  %11246 = vmatmul.mubr.f32.vlgmr.msra.gmra.mxu0 %v11245_v58  ;;  %v16681_v58 = vld [vmem:[#allocation52_spill] sm:$0xff] }
0x1da6   :  { %11425 = vmatpush1.msra.mxu0 %v14945_v52  ;;  %11544 = vmatpush1.msra.mxu1 %v15004_v34 }
0x1da7   :  { %11428 = vmatprep.subr.mxu0 %v14949_v27  ;;  %11546 = vmatprep.subr.mxu1 %v15010_v5 }
0x1da8   :  { %11431 = vmatpush1.msra.mxu0 %v14952_v16  ;;  %11548 = vmatpush1.msra.mxu1 %v15022_v48 }
0x1da9   :  { %11434 = vmatprep.subr.mxu0 %v14965_v4  ;;  %11550 = vmatprep.subr.mxu1 %v15035_v53 }
0x1daa   :  { %11437 = vmatpush1.msra.mxu0 %v14991_v44  ;;  %11552 = vmatpush1.msra.mxu1 %v15048_v19 }
0x1dab   :  { %11440 = vmatprep.subr.mxu0 %v15002_v61  ;;  %11554 = vmatprep.subr.mxu1 %v15058_v57 }
0x1dac   :  { %11443 = vmatpush1.msra.mxu0 %v15020_v21  ;;  %11556 = vmatpush1.msra.mxu1 %v15084_v45 }
0x1dad   :  { %11446 = vmatprep.subr.mxu0 %v15033_v39  ;;  %11593 = vmatmul.mubr.f32.vlgmr.msra.gmra.mxu1 %v11243_v37  ;;  %v16678_v37 = vld [vmem:[#allocation49_spill] sm:$0xff] }
0x1dae   :  { %11736 = vmatprep.subr.mxu1 %v14923_v35  ;;  %11449 = vmatpush1.msra.mxu0 %v15046_v49 }
0x1daf   :  { %11738 = vmatpush1.msra.mxu1 %v14928_v0  ;;  %11452 = vmatprep.subr.mxu0 %v15056_v56 }
0x1db0   :  { %11740 = vmatprep.subr.mxu1 %v14931_v8  ;;  %11455 = vmatpush1.msra.mxu0 %v15071_v46 }
0x1db1   :  { %11742 = vmatpush1.msra.mxu1 %v14933_v55  ;;  %11458 = vmatprep.subr.mxu0 %v15082_v29 }
0x1db2   :  { %11744 = vmatprep.subr.mxu1 %v14940_v30  ;;  %11461 = vmatpush1.msra.mxu0 %v16519_v20 }
0x1db3   :  { %11746 = vmatpush1.msra.mxu1 %v14959_v62  ;;  %11464 = vmatprep.subr.mxu0 %v16520_v36 }
0x1db4   :  { %11748 = vmatprep.subr.mxu1 %v14967_v13  ;;  %11467 = vmatpush1.msra.mxu0 %v16521_v18 }
0x1db5   :  { %11500 = vmatprep.mubr.f32.mxu0 %v16326_v41  ;;  %11750 = vmatpush1.msra.mxu1 %v14984_v40 }
0x1db6   :  { %11503 = vmatmul.mubr.f32.vlgmr.msra.gmra.mxu0 %v11242_v3  ;;  %11618 = vmatprep.subr.mxu0 %v16522_v7  ;;  %v16677_v3 = vld [vmem:[#allocation48_spill] sm:$0xff] }
0x1db7   :  { %11752 = vmatprep.subr.mxu1 %v14993_v2  ;;  %11622 = vmatpush1.msra.mxu0 %v16523_v10 }
0x1db8   :  { %11754 = vmatpush1.msra.mxu1 %v15004_v34  ;;  %11626 = vmatprep.subr.mxu0 %v16524_v25 }
0x1db9   :  { %11756 = vmatprep.subr.mxu1 %v15010_v5  ;;  %11630 = vmatpush1.msra.mxu0 %v16525_v14 }
0x1dba   :  { %11758 = vmatpush1.msra.mxu1 %v15022_v48  ;;  %11634 = vmatprep.subr.mxu0 %v16526_v28 }
0x1dbb   :  { %11760 = vmatprep.subr.mxu1 %v15035_v53  ;;  %11638 = vmatpush1.msra.mxu0 %v16527_v59 }
0x1dbc   :  { %11762 = vmatpush1.msra.mxu1 %v15048_v19  ;;  %11642 = vmatprep.subr.mxu0 %v16528_v22 }
0x1dbd   :  { %11764 = vmatprep.subr.mxu1 %v15058_v57  ;;  %11646 = vmatpush1.msra.mxu0 %v16659_v26 }
0x1dbe   :  { %11766 = vmatpush1.msra.mxu1 %v15084_v45  ;;  %11799 = vmatprep.mubr.f32.mxu1 %v16326_v41 }
0x1dbf   :  { %11650 = vmatprep.subr.mxu0 %v16660_v47  ;;  %11801 = vmatmul.mubr.f32.vlgmr.msra.gmra.mxu1 %v15926_v11 }
0x1dc0   :  { %11654 = vmatpush1.msra.mxu0 %v16661_v60  ;;  %11711 = vmatprep.mubr.f32.mxu0 %v16326_v41 }
0x1dc1   :  { %11658 = vmatprep.subr.mxu0 %v16662_v15  ;;  %11955 = vmatprep.subr.mxu1 %v16663_v31  ;;  %v16682_v31 = vld [vmem:[#allocation53_spill] sm:$0xff] }
0x1dc2   :  { %11662 = vmatpush1.msra.mxu0 %v16664_v12  ;;  %11961 = vmatpush1.msra.mxu1 %v16665_v17  ;;  %v16683_v17 = vld [vmem:[#allocation54_spill] sm:$0xff] }
0x1dc3   :  { %11666 = vmatprep.subr.mxu0 %v16666_v51  ;;  %11967 = vmatprep.subr.mxu1 %v16667_v42  ;;  %v16684_v42 = vld [vmem:[#allocation42_spill] sm:$0xff]  ;;  %v11152_v51 = vld [vmem:[#allocation2 + $0x10] sm:$0x30] }
0x1dc4   :  { %11670 = vmatpush1.msra.mxu0 %v16668_v43  ;;  %11973 = vmatpush1.msra.mxu1 %v16669_v54 }
0x1dc5   :  { %11674 = vmatprep.subr.mxu0 %v16670_v1  ;;  %11979 = vmatprep.subr.mxu1 %v16671_v23 }
0x1dc6   :  { %11678 = vmatpush1.msra.mxu0 %v16672_v32  ;;  %11985 = vmatpush1.msra.mxu1 %v16673_v38 }
0x1dc7   :  { %11713 = vmatmul.mubr.f32.vlgmr.msra.gmra.mxu0 %v15926_v11  ;;  %11991 = vmatprep.subr.mxu1 %v16674_v24  ;;  %v16680_v11 = vld [vmem:[#allocation51_spill] sm:$0xff] }
0x1dc8   :  { %11997 = vmatpush1.msra.mxu1 %v16675_v50  ;;  %11859 = vmatprep.subr.mxu0 %v14923_v35 }
0x1dc9   :  { %12003 = vmatprep.subr.mxu1 %v16676_v63  ;;  %11861 = vmatpush1.msra.mxu0 %v14928_v0 }
0x1dca   :  { %12009 = vmatpush1.msra.mxu1 %v16677_v3  ;;  %11863 = vmatprep.subr.mxu0 %v14931_v8 }
0x1dcb   :  { %12015 = vmatprep.subr.mxu1 %v16678_v37  ;;  %11865 = vmatpush1.msra.mxu0 %v14933_v55 }
0x1dcc   :  { %12021 = vmatpush1.msra.mxu1 %v16679_v9  ;;  %11867 = vmatprep.subr.mxu0 %v14940_v30 }
0x1dcd   :  { %12027 = vmatprep.subr.mxu1 %v16680_v11  ;;  %11869 = vmatpush1.msra.mxu0 %v14959_v62 }
0x1dce   :  { %12033 = vmatpush1.msra.mxu1 %v16681_v58  ;;  %11871 = vmatprep.subr.mxu0 %v14967_v13 }
0x1dcf   :  { %12039 = vmatprep.subr.mxu1 %v16682_v31  ;;  %11873 = vmatpush1.msra.mxu0 %v14984_v40 }
0x1dd0   :  { %12045 = vmatpush1.msra.mxu1 %v16683_v17  ;;  %11875 = vmatprep.subr.mxu0 %v14993_v2 }
0x1dd1   :  { %12078 = vmatprep.mubr.f32.mxu1 %v16326_v41  ;;  %12208 = vmatprep.subr.mxu1 %v14923_v35 }
0x1dd2   :  { %11877 = vmatpush1.msra.mxu0 %v15004_v34  ;;  %11922 = vmatprep.mubr.f32.mxu0 %v16326_v41 }
0x1dd3   :  { %11879 = vmatprep.subr.mxu0 %v15010_v5 }
0x1dd4   :  { %11881 = vmatpush1.msra.mxu0 %v15022_v48 }
0x1dd5   :  { %11883 = vmatprep.subr.mxu0 %v15035_v53 }
0x1dd6   :  { %11885 = vmatpush1.msra.mxu0 %v15048_v19 }
0x1dd7   :  { %11887 = vmatprep.subr.mxu0 %v15058_v57 }
0x1dd8   :  { %11889 = vmatpush1.msra.mxu0 %v15084_v45 }
0x1dd9   :  { %12104 = vmatprep.subr.mxu0 %v16684_v42 }
0x1e5d   :  { %v11399_v23 = vpop.f32.mrf.mxu1 }
0x1e5f   :  { %v11401_v63 = vpop.f32.mrf.mxu1 }
0x1e65   :  { %v11247_v54 = vpop.f32.mrf.mxu0 }
0x1e66   :  { %v11400_v50 = vadd.f32 %v11399_v23, %v11247_v54 }
0x1e67   :  { %v11249_v38 = vpop.f32.mrf.mxu0 }
0x1e68   :  { %v11402_v42 = vadd.f32 %v11401_v63, %v11249_v38 }
0x1e6d   :  { %v11594_v37 = vpop.f32.mrf.mxu1 }
0x1e6f   :  { %v11596_v58 = vpop.f32.mrf.mxu1 }
0x1e76   :  { %v11504_v24 = vpop.f32.mrf.mxu0 }
0x1e77   :  { %v11505_v3 = vadd.f32 %v11504_v24, %v11400_v50 }
0x1e78   :  { %v11506_v9 = vpop.f32.mrf.mxu0 }
0x1e79   :  { %v11595_v11 = vadd.f32 %v11594_v37, %v11505_v3  ;;  %v11507_v60 = vadd.f32 %v11506_v9, %v11402_v42 }
0x1e7b   :  { %v11597_v23 = vadd.f32 %v11596_v58, %v11507_v60 }
0x1e7f   :  { %v11802_v32 = vpop.f32.mrf.mxu1 }
0x1e81   :  { %v11804_v50 = vpop.f32.mrf.mxu1 }
0x1e87   :  { %v11714_v31 = vpop.f32.mrf.mxu0 }
0x1e88   :  { %v11715_v17 = vadd.f32 %v11714_v31, %v11595_v11  ;;  %v11830_v11 = vrot.slane %v15921_v6, 6 }
0x1e89   :  { %v11716_v26 = vpop.f32.mrf.mxu0 }
0x1e8a   :  { %v11803_v1 = vadd.f32 %v11802_v32, %v11715_v17  ;;  %v11717_v24 = vadd.f32 %v11716_v26, %v11597_v23 }
0x1e8c   :  { %v11808_v43 = vrot.slane %v11803_v1, 4  ;;  %v11805_v3 = vadd.f32 %v11804_v50, %v11717_v24 }
0x1e8e   :  { %v11810_v12 = vadd.f32 %v11808_v43, %v11152_v51  ;;  %v11817_v37 = vadd.f32 %v15799_v33, %v11805_v3 }
0x1e90   :  { %v12561_v15 = vmul.f32 -1.442695, %v11810_v12  ;;  %v11819_v32 = vrot.slane %v11817_v37, 4  ;;  %v11153_v12 = vld [vmem:[#allocation2 + $0x18] sm:$0x30] }
0x1e92   :  { %12659 = vpow2.f32 %v12561_v15 }
0x1e9f   :  { %v12660_v47 = vpop.eup %12659 }
0x1ea0   :  { %v11814_v54 = vadd.f32 1.0, %v12660_v47 }
0x1ea2   :  { %12661 = vrcp.f32 %v11814_v54 }
0x1eaf   :  { %v12662_v1 = vpop.eup %12661 }
0x1eb0   :  { %v11821_v31 = vmul.f32 %v12662_v1, %v11819_v32  ;;  %v11832_v51 = vmul.f32 %v12662_v1, %v11830_v11  ;;  %v11824_v47 = vsub.f32 1.0, %v12662_v1  ;;  %v11835_v11 = vld [vmem:[#allocation2 + $0x18] sm:$0xc0] }
0x1eb2   :  { %v11822_v15 = vadd.f32 %v11821_v31, %v11153_v12 }
0x1eb4   :  { %12663 = vtanh.f32 %v11822_v15 }
0x1ec1   :  { %v12664_v43 = vpop.eup %12663 }
0x1ec2   :  { %11826 = vrot.lane.b32.xlu1 %v12664_v43, %s12810_s13 }
0x1f34   :  { %v11827_v60 = vpop.permute.xlu1 %11826 }
0x1f35   :  { %v11829_v38 = vmul.f32 %v11827_v60, %v11824_v47 }
0x1f37   :  { %v16037_v26 = vadd.f32 %v11832_v51, %v11829_v38 }
0x1f39   :  { %v11837_v63 = vrot.slane %v16037_v26, 4 }
0x1f3b   :  { %11838 = vrot.lane.b32.xlu0 %v11837_v63, %s12810_s13 }
0x1fad   :  { %v11839_v6 = vpop.permute.xlu0 %11838 }
0x1fae   :  { %v11840_v9 = vsel %vm667_vm1, %v11839_v6, 0 }
0x1faf   :  { %v16042_v58 = vand.u32 4294901760, %v11840_v9 }
0x1fb1   :  { %v11924_v17 = vsub.f32 %v11840_v9, %v16042_v58  ;;  %12080 = vmatmul.mubr.f32.vlgmr.msra.gmra.mxu1 %v16042_v58 }
0x1fb2   :  { %12210 = vmatpush1.msra.mxu1 %v14928_v0  ;;  %12271 = vmatprep.mubr.f32.mxu1 %v16326_v41 }
0x1fb3   :  { %v11925_v42 = vand.u32 4294901760, %v11924_v17  ;;  %12212 = vmatprep.subr.mxu1 %v14931_v8 }
0x1fb4   :  { %12214 = vmatpush1.msra.mxu1 %v14933_v55 }
0x1fb5   :  { %v11926_v54 = vsub.f32 %v11924_v17, %v11925_v42  ;;  %12216 = vmatprep.subr.mxu1 %v14940_v30 }
0x1fb6   :  { %12218 = vmatpush1.msra.mxu1 %v14959_v62 }
0x1fb7   :  { %v11927_v23 = vand.u32 4294901760, %v11926_v54  ;;  %12220 = vmatprep.subr.mxu1 %v14967_v13 }
0x1fb8   :  { %12222 = vmatpush1.msra.mxu1 %v14984_v40 }
0x1fb9   :  { %12224 = vmatprep.subr.mxu1 %v14993_v2  ;;  %11928 = vmatmul.mubr.f32.vlgmr.msra.gmra.mxu0 %v11927_v23 }
0x1fba   :  { %12107 = vmatpush1.msra.mxu0 %v14945_v52  ;;  %12226 = vmatpush1.msra.mxu1 %v15004_v34  ;;  %v16691_v52 = vld [vmem:[#allocation30_spill] sm:$0xff] }
0x1fbb   :  { %12110 = vmatprep.subr.mxu0 %v14949_v27  ;;  %12228 = vmatprep.subr.mxu1 %v15010_v5  ;;  %v16692_v27 = vld [vmem:[#allocation46_spill] sm:$0xff] }
0x1fbc   :  { %12113 = vmatpush1.msra.mxu0 %v14952_v16  ;;  %12230 = vmatpush1.msra.mxu1 %v15022_v48  ;;  %v16693_v16 = vld [vmem:[#allocation47_spill] sm:$0xff] }
0x1fbd   :  { %12116 = vmatprep.subr.mxu0 %v14965_v4  ;;  %12232 = vmatprep.subr.mxu1 %v15035_v53 }
0x1fbe   :  { %12119 = vmatpush1.msra.mxu0 %v14991_v44  ;;  %12234 = vmatpush1.msra.mxu1 %v15048_v19 }
0x1fbf   :  { %12122 = vmatprep.subr.mxu0 %v15002_v61  ;;  %12236 = vmatprep.subr.mxu1 %v15058_v57 }
0x1fc0   :  { %12125 = vmatpush1.msra.mxu0 %v15020_v21  ;;  %12238 = vmatpush1.msra.mxu1 %v15084_v45 }
0x1fc1   :  { %12128 = vmatprep.subr.mxu0 %v15033_v39  ;;  %12275 = vmatmul.mubr.f32.vlgmr.msra.gmra.mxu1 %v11925_v42 }
0x1fc2   :  { %12418 = vmatprep.subr.mxu1 %v14923_v35  ;;  %12131 = vmatpush1.msra.mxu0 %v15046_v49  ;;  %v16685_v35 = vld [vmem:[#allocation32_spill] sm:$0xff] }
0x1fc3   :  { %12420 = vmatpush1.msra.mxu1 %v14928_v0  ;;  %12134 = vmatprep.subr.mxu0 %v15056_v56  ;;  %v16686_v0 = vld [vmem:[#allocation34_spill] sm:$0xff] }
0x1fc4   :  { %12422 = vmatprep.subr.mxu1 %v14931_v8  ;;  %12137 = vmatpush1.msra.mxu0 %v15071_v46  ;;  %v16687_v8 = vld [vmem:[#allocation35_spill] sm:$0xff] }
0x1fc5   :  { %12424 = vmatpush1.msra.mxu1 %v14933_v55  ;;  %12140 = vmatprep.subr.mxu0 %v15082_v29  ;;  %v16689_v55 = vld [vmem:[#allocation37_spill] sm:$0xff] }
0x1fc6   :  { %12426 = vmatprep.subr.mxu1 %v14940_v30  ;;  %12143 = vmatpush1.msra.mxu0 %v16519_v20  ;;  %v16690_v30 = vld [vmem:[#allocation39_spill] sm:$0xff] }
0x1fc7   :  { %12428 = vmatpush1.msra.mxu1 %v14959_v62  ;;  %12146 = vmatprep.subr.mxu0 %v16520_v36 }
0x1fc8   :  { %12430 = vmatprep.subr.mxu1 %v14967_v13  ;;  %12149 = vmatpush1.msra.mxu0 %v16521_v18 }
0x1fc9   :  { %12182 = vmatprep.mubr.f32.mxu0 %v16326_v41  ;;  %12432 = vmatpush1.msra.mxu1 %v14984_v40 }
0x1fca   :  { %12185 = vmatmul.mubr.f32.vlgmr.msra.gmra.mxu0 %v11924_v17  ;;  %12300 = vmatprep.subr.mxu0 %v16522_v7 }
0x1fcb   :  { %12434 = vmatprep.subr.mxu1 %v14993_v2  ;;  %12304 = vmatpush1.msra.mxu0 %v16523_v10 }
0x1fcc   :  { %12436 = vmatpush1.msra.mxu1 %v15004_v34  ;;  %12308 = vmatprep.subr.mxu0 %v16524_v25 }
0x1fcd   :  { %12438 = vmatprep.subr.mxu1 %v15010_v5  ;;  %12312 = vmatpush1.msra.mxu0 %v16525_v14 }
0x1fce   :  { %12440 = vmatpush1.msra.mxu1 %v15022_v48  ;;  %12316 = vmatprep.subr.mxu0 %v16526_v28 }
0x1fcf   :  { %12442 = vmatprep.subr.mxu1 %v15035_v53  ;;  %12320 = vmatpush1.msra.mxu0 %v16527_v59  ;;  %v16688_v53 = vld [vmem:[#allocation25_spill] sm:$0xff] }
0x1fd0   :  { %12444 = vmatpush1.msra.mxu1 %v15048_v19  ;;  %12324 = vmatprep.subr.mxu0 %v16528_v22  ;;  %v12512_v22 = vrot.slane %v16037_v26, 6 }
0x1fd1   :  { %12446 = vmatprep.subr.mxu1 %v15058_v57  ;;  %12328 = vmatpush1.msra.mxu0 %v16685_v35  ;;  %v11834_v57 = vld [vmem:[#allocation2 + $0x10] sm:$0xc0] }
0x1fd2   :  { %12448 = vmatpush1.msra.mxu1 %v15084_v45  ;;  %12481 = vmatprep.mubr.f32.mxu1 %v16326_v41 }
0x1fd3   :  { %12332 = vmatprep.subr.mxu0 %v16686_v0  ;;  %12483 = vmatmul.mubr.f32.vlgmr.msra.gmra.mxu1 %v16042_v58 }
0x1fd4   :  { %12336 = vmatpush1.msra.mxu0 %v16687_v8  ;;  %12393 = vmatprep.mubr.f32.mxu0 %v16326_v41 }
0x1fd5   :  { %12340 = vmatprep.subr.mxu0 %v16688_v53 }
0x1fd6   :  { %12344 = vmatpush1.msra.mxu0 %v16689_v55 }
0x1fd7   :  { %12348 = vmatprep.subr.mxu0 %v16690_v30 }
0x1fd8   :  { %12352 = vmatpush1.msra.mxu0 %v16691_v52 }
0x1fd9   :  { %12356 = vmatprep.subr.mxu0 %v16692_v27 }
0x1fda   :  { %12360 = vmatpush1.msra.mxu0 %v16693_v16 }
0x1fdb   :  { %12395 = vmatmul.mubr.f32.vlgmr.msra.gmra.mxu0 %v16042_v58 }
0x2071   :  { %v12081_v4 = vpop.f32.mrf.mxu1 }
0x2073   :  { %v12083_v41 = vpop.f32.mrf.mxu1 }
0x2079   :  { %v11929_v62 = vpop.f32.mrf.mxu0 }
0x207a   :  { %v12082_v44 = vadd.f32 %v12081_v4, %v11929_v62 }
0x207b   :  { %v11931_v13 = vpop.f32.mrf.mxu0 }
0x207c   :  { %v12084_v45 = vadd.f32 %v12083_v41, %v11931_v13 }
0x2081   :  { %v12276_v61 = vpop.f32.mrf.mxu1 }
0x2083   :  { %v12278_v21 = vpop.f32.mrf.mxu1 }
0x208a   :  { %v12186_v40 = vpop.f32.mrf.mxu0 }
0x208b   :  { %v12187_v2 = vadd.f32 %v12186_v40, %v12082_v44 }
0x208c   :  { %v12188_v34 = vpop.f32.mrf.mxu0 }
0x208d   :  { %v12277_v5 = vadd.f32 %v12276_v61, %v12187_v2  ;;  %v12189_v20 = vadd.f32 %v12188_v34, %v12084_v45 }
0x208f   :  { %v12279_v10 = vadd.f32 %v12278_v21, %v12189_v20 }
0x2093   :  { %v12484_v49 = vpop.f32.mrf.mxu1 }
0x2095   :  { %v12486_v14 = vpop.f32.mrf.mxu1 }
0x209b   :  { %v12396_v48 = vpop.f32.mrf.mxu0 }
0x209c   :  { %v12397_v39 = vadd.f32 %v12396_v48, %v12277_v5 }
0x209d   :  { %v12398_v18 = vpop.f32.mrf.mxu0 }
0x209e   :  { %v12485_v19 = vadd.f32 %v12484_v49, %v12397_v39  ;;  %v12399_v25 = vadd.f32 %v12398_v18, %v12279_v10 }
0x20a0   :  { %v12490_v56 = vrot.slane %v12485_v19, 2  ;;  %v12487_v28 = vadd.f32 %v12486_v14, %v12399_v25 }
0x20a2   :  { %v12492_v46 = vadd.f32 %v12490_v56, %v11834_v57  ;;  %v12499_v59 = vadd.f32 %v15799_v33, %v12487_v28 }
0x20a4   :  { %v12562_v29 = vmul.f32 -1.442695, %v12492_v46  ;;  %v12501_v24 = vrot.slane %v12499_v59, 2 }
0x20a6   :  { %12665 = vpow2.f32 %v12562_v29 }
0x20b3   :  { %v12666_v36 = vpop.eup %12665 }
0x20b4   :  { %v12496_v7 = vadd.f32 1.0, %v12666_v36 }
0x20b6   :  { %12667 = vrcp.f32 %v12496_v7 }
0x20c3   :  { %v12668_v50 = vpop.eup %12667 }
0x20c4   :  { %v12503_v3 = vmul.f32 %v12668_v50, %v12501_v24  ;;  %v12514_v37 = vmul.f32 %v12668_v50, %v12512_v22  ;;  %v12506_v31 = vsub.f32 1.0, %v12668_v50 }
0x20c6   :  { %v12504_v32 = vadd.f32 %v12503_v3, %v11835_v11 }
0x20c8   :  { %12669 = vtanh.f32 %v12504_v32 }
0x20d5   :  { %v12670_v1 = vpop.eup %12669 }
0x20d6   :  { %12508 = vrot.lane.b32.xlu1 %v12670_v1, %s12810_s13 }
0x2148   :  { %v12509_v51 = vpop.permute.xlu1 %12508 }
0x2149   :  { %v12511_v12 = vmul.f32 %v12509_v51, %v12506_v31 }
0x214b   :  { %v12515_v15 = vadd.f32 %v12514_v37, %v12511_v12 }
0x214d   :  { %12517 = vrot.lane.b32.xlu0 %v12515_v15, %s12810_s13 }
0x21bf   :  { %v12518_v33 = vpop.permute.xlu0 %12517 }
0x21c0   :  { %12520 = vst.msk [vmem:[#allocation13 - $0x6] sm:$0xc0] %vm3496_vm4, %v12518_v33 }
0x21c1   :  { %12783 = shalt.err (!%p12780_p1)
}
0x21c2   :  { %12530 = dma.vmem_to_hbm [thread:$0]  %s12528_s23, 32, %s16131_s9, [#allocation6]  }
0x21c3   :  { %12798 = dma.done.wait [#allocation6], 32  }
0x21c4   :  { %12799 = vsyncadd [#allocation6], 4294967264 }
0x21c5   :  { %12534 = vsyncpa [#allocation5], 1 }
0x21c6   :  { %12535 = vsyncpa [#allocation8], 1 }
0x21c7   :  { %12536 = vsyncpa [#allocation11], 1 }
0x21c8   :  { %12537 = vsyncpa [#allocation6], 1 }

</bundles_post_ra>
